<compile_context>
chip_gen: v7x
topology: tpu7x:2x2x1
jax: 0.10.0
libtpu: 0.0.40
codegen_flags: <defaults>
</compile_context>

<pallas_src>
import functools

import jax
import jax.numpy as jnp
import numpy as np
from jax.experimental import pallas as pl
from jax.experimental.pallas import tpu as pltpu


# Rows of the fused per-class statistics block (one (NUM_STATS, C) per slab):
#   0: pred_counts   1: label_counts   2: norm_sums (sum ||x_n|| over class rows)
#   3: col_sums      4: col_sumsq      5: ce_sums (per-class sum of lse - true logit)
_NUM_STATS = 6


def _stats_kernel(x_ref, lab_ref, acc_ref, *, n_total, tiles_per_split):
    split = pl.program_id(0)   # "parallel" row slab (v7x: one per TensorCore)
    tile = pl.program_id(1)    # "arbitrary" accumulation axis within the slab

    @pl.when(tile == 0)
    def _init():
        acc_ref[...] = jnp.zeros_like(acc_ref)

    # Note: torch's F.cross_entropy sees raw logits; here nan_to_num is applied
    # first (identical for finite inputs).
    x = jnp.nan_to_num(x_ref[...].astype(jnp.float32))            # (TN, C)
    labels = lab_ref[...]                                         # (TN, 1) int32
    tn, c = x.shape

    # Ragged-tail validity lives on the LANE axis and is used as the LHS of all
    # column-sum matmuls: masking rides the MXU contraction for free.
    row0 = (split * tiles_per_split + tile) * tn
    lane_ids = jax.lax.broadcasted_iota(jnp.int32, (1, tn), 1)
    valid_row = ((row0 + lane_ids) < n_total).astype(jnp.float32)  # (1, TN)

    class_ids = jax.lax.broadcasted_iota(jnp.int32, (tn, c), 1)    # (TN, C)

    # --- fused row-max + first-occurrence argmax: a single XLU lane reduce ---
    if c <= 256:
        bits = pltpu.bitcast(x, jnp.int32)
        # order-preserving int32 key for IEEE-754 f32 (monotone in x)
        key = jnp.where(bits < 0, bits ^ 0x7FFFFFFF, bits)
        idx_bits = max(1, (c - 1).bit_length())
        low_mask = (1 << idx_bits) - 1
        packed = (key & (~low_mask)) | ((c - 1) - class_ids)
        pmax = jnp.max(packed, axis=-1, keepdims=True)             # (TN, 1)
        preds = (c - 1) - (pmax & low_mask)                        # argmax (first occ.)
        kmax = pmax & (~low_mask)
        mbits = jnp.where(kmax < 0, kmax ^ 0x7FFFFFFF, kmax)
        # row max rounded down by <= idx_bits key-ulps; the log-sum-exp identity
        # below is exact for any finite shift, so CE is unaffected.
        row_max = pltpu.bitcast(mbits, jnp.float32)                # (TN, 1)
    else:
        # large-C fallback: exact two-reduce argmax (kernel is HBM-bound there)
        row_max = jnp.max(x, axis=-1, keepdims=True)
        cand = jnp.where(x == row_max, class_ids, c)
        preds = jnp.min(cand, axis=-1, keepdims=True)

    pred_onehot = (class_ids == preds).astype(jnp.float32)         # (TN, C)
    label_onehot = (class_ids == labels).astype(jnp.float32)       # (TN, C)

    xsq = x * x
    # Per-row sum of squares on the MXU instead of a cross-lane XLU reduce.
    ones_col = jnp.ones((c, 1), jnp.float32)
    row_sq = jnp.dot(xsq, ones_col, preferred_element_type=jnp.float32,
                     precision=jax.lax.Precision.HIGHEST)          # (TN, 1)
    norms = jnp.sqrt(row_sq)

    # log-sum-exp per row; exp/log on the EUP, exact-f32 lane sum on the XLU
    # (keeps the cross-entropy 1e-4 tolerance).
    sum_e = jnp.sum(jnp.exp(x - row_max), axis=-1, keepdims=True)
    lse = row_max + jnp.log(sum_e)                                 # (TN, 1)

    # Per-class CE numerator folded into a single matmul RHS:
    # label_onehot * (lse - x) is nonzero only at (n, label_n) where it equals
    # lse_n - x[n, label_n] >= 0 (no cancellation in the accumulation).
    ce_rhs = label_onehot * (lse - x)
    norm_rhs = label_onehot * norms

    hi = jax.lax.Precision.HIGHEST

    def colsum(rhs, precision=None):   # (1, TN) @ (TN, C) on the MXU
        return jnp.dot(valid_row, rhs, preferred_element_type=jnp.float32,
                       precision=precision)

    update = jnp.concatenate([
        colsum(pred_onehot),           # exact 0/1 values -> DEFAULT precision
        colsum(label_onehot),          # exact 0/1 values -> DEFAULT precision
        colsum(norm_rhs, hi),
        colsum(x, hi),
        colsum(xsq, hi),
        colsum(ce_rhs, hi),
    ], axis=0)                          # (_NUM_STATS, C)

    acc_ref[...] += update[None]


def _round_up(v, m):
    return ((int(v) + m - 1) // m) * m


def _vmem_capacity_bytes():
    try:
        info = pltpu.get_tpu_info()
        cap = int(getattr(info, "vmem_capacity_bytes", 0) or 0)
        if cap > 0:
            return cap
    except Exception:
        pass
    return 64 * 1024 * 1024   # conservative: v7x per-TensorCore VMEM


def _compute_stats(y_pred, y_true, *, tile_n=None):
    """Single streaming pass over the logits; returns six (C,) statistics."""
    n, c = y_pred.shape
    itemsize = jnp.dtype(y_pred.dtype).itemsize
    # dtype-aware sublane packing for the streamed (tile_n, C) input block
    sub = max(8, 32 // max(1, itemsize))          # f32->8, bf16->16, int8/fp8->32
    c_pad = _round_up(c, 128)

    vmem_cap = _vmem_capacity_bytes()
    # Leave headroom: ~3/4 of physical VMEM, capped at 96 MiB (v5e/v6e).
    vmem_limit = min((vmem_cap * 3) // 4, 96 * 1024 * 1024)

    if tile_n is None:
        # Padded-VMEM-byte accounting: 2x double-buffered lane-padded logits
        # block + 2x lane-padded int32 labels block + ~10 live f32 (TN, c_pad)
        # intermediates inside the kernel.
        per_row = 2 * (c_pad * itemsize + 128 * 4) + 10 * c_pad * 4
        budget = max(vmem_limit - 6 * 1024 * 1024, 4 * 1024 * 1024)
        tile_n = min(8192, max(sub, budget // per_row))
    tile_n = max(sub, (int(tile_n) // sub) * sub)
    tile_n = min(tile_n, _round_up(n, sub))

    tiles_total = pl.cdiv(n, tile_n)
    # Two independent row slabs so both TensorCores stream on v7x; on
    # single-TC chips this is just a benign loop split.
    n_splits = 2 if tiles_total >= 2 else 1
    tiles_per_split = pl.cdiv(tiles_total, n_splits)
    if n_splits > 1:
        # Balance the slabs: shrink tile_n so neither core runs a phantom
        # clamped tile when the tile count is odd.
        tile_n = max(sub, _round_up(pl.cdiv(n, n_splits * tiles_per_split), sub))

    labels2d = y_true.reshape(n, 1).astype(jnp.int32)

    kernel = functools.partial(_stats_kernel, n_total=n,
                               tiles_per_split=tiles_per_split)

    cost = pl.CostEstimate(
        flops=int(30 * n * c),
        transcendentals=int(n * (c + 2)),
        bytes_accessed=int(n * c * itemsize + n * 4
                           + _NUM_STATS * n_splits * c * 4))

    out = pl.pallas_call(
        kernel,
        out_shape=jax.ShapeDtypeStruct((n_splits, _NUM_STATS, c), jnp.float32),
        grid_spec=pltpu.PrefetchScalarGridSpec(
            num_scalar_prefetch=0,
            grid=(n_splits, tiles_per_split),
            in_specs=[
                pl.BlockSpec((tile_n, c),
                             lambda s, i: (s * tiles_per_split + i, 0)),
                pl.BlockSpec((tile_n, 1),
                             lambda s, i: (s * tiles_per_split + i, 0)),
            ],
            out_specs=pl.BlockSpec((1, _NUM_STATS, c), lambda s, i: (s, 0, 0)),
        ),
        compiler_params=pltpu.CompilerParams(
            dimension_semantics=("parallel", "arbitrary"),
            vmem_limit_bytes=int(vmem_limit)),
        cost_estimate=cost,
    )(y_pred, labels2d)

    stats = jnp.sum(out, axis=0)       # (_NUM_STATS, C): reduce per-slab partials
    return tuple(stats[i] for i in range(_NUM_STATS))


def additional_term_and_ce(y_pred, y_true, target_class_index, num_classes,
                           previous_epoch_class_predictions=None, tile_n=None):
    n = y_pred.shape[0]
    (pred_counts, label_counts, norm_sums, col_sums, col_sumsq,
     ce_sums) = _compute_stats(y_pred, y_true, tile_n=tile_n)

    # ---- AdditionalTermLayer (first-call feature_storage semantics) ----
    avg_mag = jnp.where(label_counts > 0,
                        norm_sums / jnp.maximum(label_counts, 1.0), 0.0)
    semantic_scales = avg_mag ** 2

    inv_n = 1.0 / n
    class_entropies = -pred_counts * inv_n * jnp.log(inv_n + 1e-6)

    max_semantic_scale = jnp.max(semantic_scales) + 1e-6
    dynamic_gammas = semantic_scales / (1e-6 + max_semantic_scale * class_entropies)

    current_preds = pred_counts
    if previous_epoch_class_predictions is None:
        reinforcement = jnp.zeros((num_classes,), jnp.float32)
    else:
        target_mask = jnp.zeros((num_classes,), jnp.float32).at[
            jnp.asarray(target_class_index)].set(1.0)
        reinforcement = target_mask * 2.0 * jnp.sign(
            jnp.asarray(previous_epoch_class_predictions, jnp.float32)
            - current_preds)

    term = (dynamic_gammas * current_preds + reinforcement) ** 2
    total_sq = jnp.sum(col_sumsq)
    # sum_{n,c} (x[n,c] - onehot_i[c])^2 = sum x^2 - 2*sum_n x[n,i] + N
    denom = total_sq - 2.0 * col_sums + float(n) + 1e-6
    additional_term = jnp.sum(term / denom) / num_classes

    # ---- cross entropy (mean reduction), from the same single pass ----
    cross_entropy = jnp.sum(ce_sums) / n

    return additional_term, cross_entropy, current_preds


def csl_loss(y_pred, y_true, target_class_index, num_classes, epoch=0,
             previous_epoch_class_predictions=None, tile_n=None):
    """JAX/Pallas port of CSLLossFunc.forward."""
    del epoch  # unused by the math, matching the reference module
    add_term, ce, current_preds = additional_term_and_ce(
        y_pred, y_true, target_class_index, num_classes,
        previous_epoch_class_predictions=previous_epoch_class_predictions,
        tile_n=tile_n)
    return ce + add_term, current_preds


# ----------------------------- numpy reference ------------------------------
def _reference(inputs, labels, target_class_index, num_classes, prev=None):
    x_raw = np.asarray(inputs, np.float64)
    labels = np.asarray(labels)
    n = len(labels)

    # cross entropy (mean reduction)
    m = x_raw.max(axis=-1, keepdims=True)
    lse = m[:, 0] + np.log(np.sum(np.exp(x_raw - m), axis=-1))
    ce = float(np.mean(lse - x_raw[np.arange(n), labels]))

    x = np.nan_to_num(x_raw)
    preds = np.argmax(x, axis=-1)
    semantic_scales = []
    for i in range(num_classes):
        feats = x[labels == i]
        if feats.shape[0] > 0:
            semantic_scales.append(float(np.mean(np.linalg.norm(feats, axis=1)) ** 2))
        else:
            semantic_scales.append(0.0)
    class_entropies = []
    for i in range(num_classes):
        probs = (preds == i).astype(np.float64) / n
        nz = probs[probs > 0]
        class_entropies.append(float(-np.sum(nz * np.log(nz + 1e-6))))
    max_scale = max(semantic_scales) + 1e-6
    gammas = [s / (1e-6 + max_scale * e)
              for s, e in zip(semantic_scales, class_entropies)]
    cur = np.array([float(np.sum(preds == i)) for i in range(num_classes)])
    add = 0.0
    for i, g in enumerate(gammas):
        if i in target_class_index and prev is not None:
            r = -2.0 if cur[i] > prev[i] else (2.0 if cur[i] < prev[i] else 0.0)
        else:
            r = 0.0
        term = (g * cur[i] + r) ** 2
        onehot = np.zeros(num_classes, np.float64)
        onehot[i] = 1.0
        denom = np.sum((x - onehot) ** 2) + 1e-6
        add += term / denom
    add /= num_classes
    return add, ce, cur


if __name__ == "__main__":
    N, NUM_CLASSES = 300, 8
    TARGET_CLASS_INDEX = [1, 3]

    key = jax.random.PRNGKey(0)
    kx, kl = jax.random.split(key)
    y_pred = jax.random.normal(kx, (N, NUM_CLASSES), dtype=jnp.float32)
    y_true = jax.random.randint(kl, (N,), 0, NUM_CLASSES, dtype=jnp.int32)

    ref_add, ref_ce, ref_cur = _reference(np.array(y_pred), np.array(y_true),
                                          TARGET_CLASS_INDEX, NUM_CLASSES)

    # 1) Default (large auto) row tile — a single tile covers all 300 rows.
    add1, ce1, cur1 = additional_term_and_ce(
        y_pred, y_true, TARGET_CLASS_INDEX, NUM_CLASSES)
    total1, _ = csl_loss(y_pred, y_true, TARGET_CLASS_INDEX, NUM_CLASSES, epoch=0)
    total1 = jax.block_until_ready(total1)
    assert np.allclose(np.array(cur1), ref_cur), (np.array(cur1), ref_cur)
    assert np.allclose(float(ce1), ref_ce, rtol=1e-4, atol=1e-5), (float(ce1), ref_ce)
    assert np.allclose(float(add1), ref_add, rtol=5e-3, atol=1e-6), (float(add1), ref_add)
    assert np.allclose(float(total1), ref_ce + ref_add, rtol=5e-3, atol=1e-5), (
        float(total1), ref_ce + ref_add)

    # 2) Small explicit tile -> exercises the balanced 2-way core split,
    #    multi-tile accumulation, and the masked ragged tail, plus the
    #    reinforcement branch (second-epoch semantics).
    prev = np.array(ref_cur, np.float32)
    prev[1] += 5.0   # prev > cur on a target class -> reinforcement +2
    prev[3] -= 5.0   # prev < cur on a target class -> reinforcement -2
    ref_add2, ref_ce2, _ = _reference(np.array(y_pred), np.array(y_true),
                                      TARGET_CLASS_INDEX, NUM_CLASSES, prev=prev)
    total2, cur2 = csl_loss(y_pred, y_true, TARGET_CLASS_INDEX, NUM_CLASSES,
                            epoch=1, previous_epoch_class_predictions=prev,
                            tile_n=128)
    total2 = jax.block_until_ready(total2)
    assert np.allclose(np.array(cur2), ref_cur), (np.array(cur2), ref_cur)
    assert np.allclose(float(total2), ref_ce2 + ref_add2, rtol=5e-3, atol=1e-5), (
        float(total2), ref_ce2 + ref_add2)

    print("KERNEL_OK")
</pallas_src>

<mosaic_0001>
module attributes {stable_mosaic.version = 11 : i64} {
  func.func @_stats_kernel(%arg0: i32, %arg1: i32, %arg2: memref<304x8xf32, #tpu.memory_space<vmem>>, %arg3: memref<304x1xi32, #tpu.memory_space<vmem>>, %arg4: memref<1x6x8xf32, #tpu.memory_space<vmem>>) attributes {dimension_semantics = [#tpu.dimension_semantics<parallel>, #tpu.dimension_semantics<arbitrary>], iteration_bounds = array<i64: 1, 1>, scalar_prefetch = 0 : i64, scratch_operands = 0 : i64, tpu.core_type = #tpu.core_type<tc>, window_params = [{transform_indices = @transform_0, window_bounds = array<i64: 304, 8>}, {transform_indices = @transform_1, window_bounds = array<i64: 304, 1>}, {transform_indices = @transform_2, window_bounds = array<i64: 1, 6, 8>}]} {
    %c0_i32 = arith.constant 0 : i32
    %0 = arith.cmpi eq, %arg1, %c0_i32 : i32
    %1 = arith.extui %0 : i1 to i32
    %c0_i32_0 = arith.constant 0 : i32
    %2 = arith.cmpi ne, %1, %c0_i32_0 : i32
    scf.if %2 {
      %cst_30 = arith.constant 0.000000e+00 : f32
      %87 = vector.broadcast %cst_30 : f32 to vector<1x6x8xf32>
      %c0_31 = arith.constant 0 : index
      %c0_32 = arith.constant 0 : index
      %c0_33 = arith.constant 0 : index
      %88 = vector.load %arg4[%c0_31, %c0_32, %c0_33] : memref<1x6x8xf32, #tpu.memory_space<vmem>>, vector<1x6x8xf32>
      tpu.vector_store %arg4[%c0_31, %c0_32, %c0_33], %87 {strides = array<i32>} : memref<1x6x8xf32, #tpu.memory_space<vmem>>, vector<1x6x8xf32>,
    } else {
    }
    %c0 = arith.constant 0 : index
    %c0_1 = arith.constant 0 : index
    %3 = vector.load %arg2[%c0, %c0_1] : memref<304x8xf32, #tpu.memory_space<vmem>>, vector<304x8xf32>
    %4 = arith.cmpf one, %3, %3 : vector<304x8xf32>
    %cst = arith.constant 0.000000e+00 : f32
    %5 = vector.broadcast %cst : f32 to vector<304x8xf32>
    %6 = arith.select %4, %5, %3 : vector<304x8xi1>, vector<304x8xf32>
    %cst_2 = arith.constant 0x7F800000 : f32
    %7 = vector.broadcast %cst_2 : f32 to vector<304x8xf32>
    %8 = arith.cmpf oeq, %6, %7 : vector<304x8xf32>
    %cst_3 = arith.constant 3.40282347E+38 : f32
    %9 = vector.broadcast %cst_3 : f32 to vector<304x8xf32>
    %10 = arith.select %8, %9, %6 : vector<304x8xi1>, vector<304x8xf32>
    %cst_4 = arith.constant 0xFF800000 : f32
    %11 = vector.broadcast %cst_4 : f32 to vector<304x8xf32>
    %12 = arith.cmpf oeq, %10, %11 : vector<304x8xf32>
    %cst_5 = arith.constant -3.40282347E+38 : f32
    %13 = vector.broadcast %cst_5 : f32 to vector<304x8xf32>
    %14 = arith.select %12, %13, %10 : vector<304x8xi1>, vector<304x8xf32>
    %c0_6 = arith.constant 0 : index
    %c0_7 = arith.constant 0 : index
    %15 = vector.load %arg3[%c0_6, %c0_7] : memref<304x1xi32, #tpu.memory_space<vmem>>, vector<304x1xi32>
    %c1_i32 = arith.constant 1 : i32
    %16 = arith.muli %arg0, %c1_i32 : i32
    %17 = arith.addi %16, %arg1 : i32
    %c304_i32 = arith.constant 304 : i32
    %18 = arith.muli %17, %c304_i32 : i32
    %19 = tpu.iota {dimensions = array<i32: 1>} : vector<1x304xi32>
    %20 = vector.broadcast %18 : i32 to vector<1x304xi32>
    %21 = arith.addi %20, %19 : vector<1x304xi32>
    %c300_i32 = arith.constant 300 : i32
    %22 = vector.broadcast %c300_i32 : i32 to vector<1x304xi32>
    %23 = arith.cmpi slt, %21, %22 : vector<1x304xi32>
    %24 = arith.extui %23 : vector<1x304xi1> to vector<1x304xi32>
    %25 = arith.sitofp %24 : vector<1x304xi32> to vector<1x304xf32>
    %26 = tpu.iota {dimensions = array<i32: 1>} : vector<304x8xi32>
    %27 = tpu.bitcast %14 : vector<304x8xf32> -> vector<304x8xi32>
    %c0_i32_8 = arith.constant 0 : i32
    %28 = vector.broadcast %c0_i32_8 : i32 to vector<304x8xi32>
    %29 = arith.cmpi slt, %27, %28 : vector<304x8xi32>
    %c2147483647_i32 = arith.constant 2147483647 : i32
    %30 = vector.broadcast %c2147483647_i32 : i32 to vector<304x8xi32>
    %31 = arith.xori %27, %30 : vector<304x8xi32>
    %32 = arith.select %29, %31, %27 : vector<304x8xi1>, vector<304x8xi32>
    %c-8_i32 = arith.constant -8 : i32
    %33 = vector.broadcast %c-8_i32 : i32 to vector<304x8xi32>
    %34 = arith.andi %32, %33 : vector<304x8xi32>
    %c7_i32 = arith.constant 7 : i32
    %35 = vector.broadcast %c7_i32 : i32 to vector<304x8xi32>
    %36 = arith.subi %35, %26 : vector<304x8xi32>
    %37 = arith.ori %34, %36 : vector<304x8xi32>
    %cst_9 = arith.constant dense<-2147483648> : vector<304xi32>
    %38 = vector.multi_reduction <maxsi>, %37, %cst_9 [1] : vector<304x8xi32> to vector<304xi32>
    %39 = vector.shape_cast %38 : vector<304xi32> to vector<304x1xi32>
    %c7_i32_10 = arith.constant 7 : i32
    %40 = vector.broadcast %c7_i32_10 : i32 to vector<304x1xi32>
    %41 = arith.andi %39, %40 : vector<304x1xi32>
    %c7_i32_11 = arith.constant 7 : i32
    %42 = vector.broadcast %c7_i32_11 : i32 to vector<304x1xi32>
    %43 = arith.subi %42, %41 : vector<304x1xi32>
    %c-8_i32_12 = arith.constant -8 : i32
    %44 = vector.broadcast %c-8_i32_12 : i32 to vector<304x1xi32>
    %45 = arith.andi %39, %44 : vector<304x1xi32>
    %c0_i32_13 = arith.constant 0 : i32
    %46 = vector.broadcast %c0_i32_13 : i32 to vector<304x1xi32>
    %47 = arith.cmpi slt, %45, %46 : vector<304x1xi32>
    %c2147483647_i32_14 = arith.constant 2147483647 : i32
    %48 = vector.broadcast %c2147483647_i32_14 : i32 to vector<304x1xi32>
    %49 = arith.xori %45, %48 : vector<304x1xi32>
    %50 = arith.select %47, %49, %45 : vector<304x1xi1>, vector<304x1xi32>
    %51 = tpu.bitcast %50 : vector<304x1xi32> -> vector<304x1xf32>
    %52 = vector.broadcast %43 : vector<304x1xi32> to vector<304x8xi32>
    %53 = arith.cmpi eq, %26, %52 : vector<304x8xi32>
    %54 = arith.extui %53 : vector<304x8xi1> to vector<304x8xi32>
    %55 = arith.sitofp %54 : vector<304x8xi32> to vector<304x8xf32>
    %56 = vector.broadcast %15 : vector<304x1xi32> to vector<304x8xi32>
    %57 = arith.cmpi eq, %26, %56 : vector<304x8xi32>
    %58 = arith.extui %57 : vector<304x8xi1> to vector<304x8xi32>
    %59 = arith.sitofp %58 : vector<304x8xi32> to vector<304x8xf32>
    %60 = arith.mulf %14, %14 : vector<304x8xf32>
    %cst_15 = arith.constant 1.000000e+00 : f32
    %61 = vector.broadcast %cst_15 : f32 to vector<8x1xf32>
    %cst_16 = arith.constant dense<0.000000e+00> : vector<304x1xf32>
    %62 = tpu.matmul %60, %61, %cst_16 {dimension_numbers = #tpu.dot_dimension_numbers<[1], [0], [0], [1], [0, 0, 1, 1], [], []>, precision = #tpu.contract_precision<fp32>} : vector<304x8xf32>, vector<8x1xf32>, vector<304x1xf32> -> vector<304x1xf32>
    %63 = math.sqrt %62 : vector<304x1xf32>
    %64 = vector.broadcast %51 : vector<304x1xf32> to vector<304x8xf32>
    %65 = arith.subf %14, %64 : vector<304x8xf32>
    %66 = math.exp %65 : vector<304x8xf32>
    %cst_17 = arith.constant dense<0.000000e+00> : vector<304xf32>
    %67 = vector.multi_reduction <add>, %66, %cst_17 [1] : vector<304x8xf32> to vector<304xf32>
    %68 = vector.shape_cast %67 : vector<304xf32> to vector<304x1xf32>
    %69 = math.log %68 : vector<304x1xf32>
    %70 = arith.addf %51, %69 : vector<304x1xf32>
    %71 = vector.broadcast %70 : vector<304x1xf32> to vector<304x8xf32>
    %72 = arith.subf %71, %14 : vector<304x8xf32>
    %73 = arith.mulf %59, %72 : vector<304x8xf32>
    %74 = vector.broadcast %63 : vector<304x1xf32> to vector<304x8xf32>
    %75 = arith.mulf %59, %74 : vector<304x8xf32>
    %cst_18 = arith.constant dense<0.000000e+00> : vector<1x8xf32>
    %76 = tpu.matmul %25, %55, %cst_18 {dimension_numbers = #tpu.dot_dimension_numbers<[1], [0], [0], [1], [0, 0, 1, 1], [], []>} : vector<1x304xf32>, vector<304x8xf32>, vector<1x8xf32> -> vector<1x8xf32>
    %cst_19 = arith.constant dense<0.000000e+00> : vector<1x8xf32>
    %77 = tpu.matmul %25, %59, %cst_19 {dimension_numbers = #tpu.dot_dimension_numbers<[1], [0], [0], [1], [0, 0, 1, 1], [], []>} : vector<1x304xf32>, vector<304x8xf32>, vector<1x8xf32> -> vector<1x8xf32>
    %cst_20 = arith.constant dense<0.000000e+00> : vector<1x8xf32>
    %78 = tpu.matmul %25, %75, %cst_20 {dimension_numbers = #tpu.dot_dimension_numbers<[1], [0], [0], [1], [0, 0, 1, 1], [], []>, precision = #tpu.contract_precision<fp32>} : vector<1x304xf32>, vector<304x8xf32>, vector<1x8xf32> -> vector<1x8xf32>
    %cst_21 = arith.constant dense<0.000000e+00> : vector<1x8xf32>
    %79 = tpu.matmul %25, %14, %cst_21 {dimension_numbers = #tpu.dot_dimension_numbers<[1], [0], [0], [1], [0, 0, 1, 1], [], []>, precision = #tpu.contract_precision<fp32>} : vector<1x304xf32>, vector<304x8xf32>, vector<1x8xf32> -> vector<1x8xf32>
    %cst_22 = arith.constant dense<0.000000e+00> : vector<1x8xf32>
    %80 = tpu.matmul %25, %60, %cst_22 {dimension_numbers = #tpu.dot_dimension_numbers<[1], [0], [0], [1], [0, 0, 1, 1], [], []>, precision = #tpu.contract_precision<fp32>} : vector<1x304xf32>, vector<304x8xf32>, vector<1x8xf32> -> vector<1x8xf32>
    %cst_23 = arith.constant dense<0.000000e+00> : vector<1x8xf32>
    %81 = tpu.matmul %25, %73, %cst_23 {dimension_numbers = #tpu.dot_dimension_numbers<[1], [0], [0], [1], [0, 0, 1, 1], [], []>, precision = #tpu.contract_precision<fp32>} : vector<1x304xf32>, vector<304x8xf32>, vector<1x8xf32> -> vector<1x8xf32>
    %82 = tpu.concatenate %76, %77, %78, %79, %80, %81 in 0 : vector<1x8xf32>, vector<1x8xf32>, vector<1x8xf32>, vector<1x8xf32>, vector<1x8xf32>, vector<1x8xf32> -> vector<6x8xf32>
    %c0_24 = arith.constant 0 : index
    %c0_25 = arith.constant 0 : index
    %c0_26 = arith.constant 0 : index
    %83 = vector.load %arg4[%c0_24, %c0_25, %c0_26] : memref<1x6x8xf32, #tpu.memory_space<vmem>>, vector<1x6x8xf32>
    %84 = vector.shape_cast %82 : vector<6x8xf32> to vector<1x6x8xf32>
    %85 = arith.addf %83, %84 : vector<1x6x8xf32>
    %c0_27 = arith.constant 0 : index
    %c0_28 = arith.constant 0 : index
    %c0_29 = arith.constant 0 : index
    %86 = vector.load %arg4[%c0_27, %c0_28, %c0_29] : memref<1x6x8xf32, #tpu.memory_space<vmem>>, vector<1x6x8xf32>
    tpu.vector_store %arg4[%c0_27, %c0_28, %c0_29], %85 {strides = array<i32>} : memref<1x6x8xf32, #tpu.memory_space<vmem>>, vector<1x6x8xf32>,
    return
  }
  func.func @transform_0(%arg0: i32, %arg1: i32) -> (i32, i32) {
    %c1_i32 = arith.constant 1 : i32
    %0 = arith.muli %arg0, %c1_i32 : i32
    %1 = arith.addi %0, %arg1 : i32
    %c0_i32 = arith.constant 0 : i32
    %c0_i32_0 = arith.constant 0 : i32
    return %1, %c0_i32 : i32, i32
  }
  func.func @transform_1(%arg0: i32, %arg1: i32) -> (i32, i32) {
    %c1_i32 = arith.constant 1 : i32
    %0 = arith.muli %arg0, %c1_i32 : i32
    %1 = arith.addi %0, %arg1 : i32
    %c0_i32 = arith.constant 0 : i32
    %c0_i32_0 = arith.constant 0 : i32
    return %1, %c0_i32 : i32, i32
  }
  func.func @transform_2(%arg0: i32, %arg1: i32) -> (i32, i32, i32) {
    %c0_i32 = arith.constant 0 : i32
    %c0_i32_0 = arith.constant 0 : i32
    %c0_i32_1 = arith.constant 0 : i32
    return %arg0, %c0_i32, %c0_i32_0 : i32, i32, i32
  }
}

</mosaic_0001>

<bundles_post_ra>
// kernel: tpu_custom_call.1
= control target key start
LH: loop header
LB: loop body
LE: loop exit
PB: predicated region body
PF: predicated region fallthrough
CT: control target
= control target key end

     0   :  { %v367_v0 = vlaneseq  ;;  %v21261_v1 = vmov 1.0   ;;  %vm613_vm0 = vcmask 64512   ;;  %v21263_v9 = vmov 0.0   ;;  %s21248_s0 = inlined_call_operand.vmem [shape: f32[300,8], index: 0, kind: input, shape index: {}]   ;;  %s21249_s1 = inlined_call_operand.vmem [shape: s32[300,1], index: 1, kind: input, shape index: {}]   ;;  %s21250_s2 = inlined_call_operand.vmem [shape: f32[1,6,8], index: 2, kind: output, shape index: {}]  }
   0x1   :  { %12194 = vmatprep.subr.mxu0 %v21261_v1  ;;  %v61_v2 = vld [vmem:[%s21248_s0] sm:$0xff]  ;;  %v62_v3 = vld [vmem:[%s21248_s0 + $0x8] sm:$0xff]  ;;  %v63_v4 = vld [vmem:[%s21248_s0 + $0x10] sm:$0xff]  ;;  %14004 = vmatprep.subr.mxu1 %v21261_v1 }
   0x2   :  { %12195 = vmatpush3.msra.mxu0 %v21261_v1  ;;  %vm99_vm1 = vcmp.ne.f32.partialorder %v61_v2, %v61_v2  ;;  %vm100_vm2 = vcmp.ne.f32.partialorder %v62_v3, %v62_v3  ;;  %vm101_vm3 = vcmp.ne.f32.partialorder %v63_v4, %v63_v4  ;;  %v64_v5 = vld [vmem:[%s21248_s0 + $0x18] sm:$0xff]  ;;  %v65_v6 = vld [vmem:[%s21248_s0 + $0x20] sm:$0xff]  ;;  %v14515_v7 = vand.u32 127, %v367_v0  ;;  %14005 = vmatpush3.msra.mxu1 %v21261_v1  ;;  %v66_v13 = vld [vmem:[%s21248_s0 + $0x28] sm:$0xff] }
   0x3   :  { %v137_v8 = vsel %vm99_vm1, 0.0, %v61_v2  ;;  %12253 = vmatprep.subr.mxu0 %v21263_v9  ;;  %v138_v10 = vsel %vm100_vm2, 0.0, %v62_v3  ;;  %v139_v11 = vsel %vm101_vm3, 0.0, %v63_v4  ;;  %vm102_vm4 = vcmp.ne.f32.partialorder %v64_v5, %v64_v5  ;;  %v67_v17 = vld [vmem:[%s21248_s0 + $0x30] sm:$0xff]  ;;  %v68_v27 = vld [vmem:[%s21248_s0 + $0x38] sm:$0xff]  ;;  %v69_v54 = vld [vmem:[%s21248_s0 + $0x40] sm:$0xff] }
   0x4   :  { %22194 = vst [vmem:[#allocation2_spill] sm:$0xff] %v14515_v7  ;;  %vm175_vm5 = vcmp.eq.f32.partialorder %v137_v8, inf  ;;  %vm176_vm6 = vcmp.eq.f32.partialorder %v138_v10, inf  ;;  %vm177_vm7 = vcmp.eq.f32.partialorder %v139_v11, inf  ;;  %v140_v12 = vsel %vm102_vm4, 0.0, %v64_v5  ;;  %v70_v58 = vld [vmem:[%s21248_s0 + $0x48] sm:$0xff] }
   0x5   :  { %v213_v14 = vsel %vm175_vm5, 3.4028235e+38, %v137_v8  ;;  %v214_v15 = vsel %vm176_vm6, 3.4028235e+38, %v138_v10  ;;  %v215_v16 = vsel %vm177_vm7, 3.4028235e+38, %v139_v11  ;;  %vm103_vm8 = vcmp.ne.f32.partialorder %v65_v6, %v65_v6 }
   0x6   :  { %vm251_vm9 = vcmp.eq.f32.partialorder %v213_v14, -inf  ;;  %vm252_vm10 = vcmp.eq.f32.partialorder %v214_v15, -inf  ;;  %vm253_vm11 = vcmp.eq.f32.partialorder %v215_v16, -inf  ;;  %vm178_vm12 = vcmp.eq.f32.partialorder %v140_v12, inf }
   0x7   :  { %v14525_v18 = vsel %vm251_vm9, -3.4028235e+38, %v213_v14  ;;  %v14527_v19 = vsel %vm252_vm10, -3.4028235e+38, %v214_v15  ;;  %v14529_v20 = vsel %vm253_vm11, -3.4028235e+38, %v215_v16  ;;  %vm104_vm13 = vcmp.ne.f32.partialorder %v66_v13, %v66_v13 }
   0x8   :  { %22195 = vst [vmem:[#allocation3_spill] sm:$0xff] %v14525_v18  ;;  %22196 = vst [vmem:[#allocation4_spill] sm:$0xff] %v14527_v19  ;;  %v14533_v21 = vmul.f32 %v14525_v18, %v14525_v18  ;;  %v14537_v22 = vmul.f32 %v14527_v19, %v14527_v19  ;;  %v14541_v23 = vmul.f32 %v14529_v20, %v14529_v20  ;;  %v216_v24 = vsel %vm178_vm12, 3.4028235e+38, %v140_v12 }
   0x9   :  { %22197 = vst [vmem:[#allocation5_spill] sm:$0xff] %v14529_v20  ;;  %vm254_vm14 = vcmp.eq.f32.partialorder %v216_v24, -inf  ;;  %v141_v25 = vsel %vm103_vm8, 0.0, %v65_v6  ;;  %v142_v26 = vsel %vm104_vm13, 0.0, %v66_v13  ;;  %vm105_vm15 = vcmp.ne.f32.partialorder %v67_v17, %v67_v17 }
   0xa   :  { %22198 = vst [vmem:[#allocation6_spill] sm:$0xff] %v14533_v21  ;;  %22199 = vst [vmem:[#allocation7_spill] sm:$0xff] %v14537_v22  ;;  %v1831_v28 = vsel %vm613_vm0, %v14533_v21, 0  ;;  %v1834_v29 = vsel %vm613_vm0, %v14537_v22, 0  ;;  %v1837_v30 = vsel %vm613_vm0, %v14541_v23, 0  ;;  %vm179_vm1 = vcmp.eq.f32.partialorder %v141_v25, inf }
   0xb   :  { %22200 = vst [vmem:[#allocation8_spill] sm:$0xff] %v14541_v23  ;;  %v14552_v31 = vsel %vm254_vm14, -3.4028235e+38, %v216_v24  ;;  %v14554_v32 = vand.u32 4294901760, %v1831_v28  ;;  %v14556_v33 = vand.u32 4294901760, %v1834_v29  ;;  %v14558_v34 = vand.u32 4294901760, %v1837_v30 }
   0xc   :  { %22201 = vst [vmem:[#allocation9_spill] sm:$0xff] %v14552_v31  ;;  %v14562_v35 = vmul.f32 %v14552_v31, %v14552_v31  ;;  %vm180_vm2 = vcmp.eq.f32.partialorder %v142_v26, inf  ;;  %v143_v36 = vsel %vm105_vm15, 0.0, %v67_v17  ;;  %vm106_vm3 = vcmp.ne.f32.partialorder %v68_v27, %v68_v27  ;;  %v83_v21 = vld [vmem:[%s21248_s0 + $0xb0] sm:$0xff] }
   0xd   :  { %22202 = vst [vmem:[#allocation10_spill] sm:$0xff] %v14554_v32  ;;  %22203 = vst [vmem:[#allocation11_spill] sm:$0xff] %v14556_v33  ;;  %v14565_v37 = vsub.f32 %v1831_v28, %v14554_v32  ;;  %v14568_v38 = vsub.f32 %v1834_v29, %v14556_v33  ;;  %v14571_v39 = vsub.f32 %v1837_v30, %v14558_v34  ;;  %v217_v42 = vsel %vm179_vm1, 3.4028235e+38, %v141_v25  ;;  %v71_v29 = vld [vmem:[%s21248_s0 + $0x50] sm:$0xff]  ;;  %v72_v30 = vld [vmem:[%s21248_s0 + $0x58] sm:$0xff] }
   0xe   :  { %22204 = vst [vmem:[#allocation12_spill] sm:$0xff] %v14558_v34  ;;  %22205 = vst [vmem:[#allocation13_spill] sm:$0xff] %v14562_v35  ;;  %v1840_v40 = vsel %vm613_vm0, %v14562_v35, 0  ;;  %v218_v43 = vsel %vm180_vm2, 3.4028235e+38, %v142_v26  ;;  %vm181_vm4 = vcmp.eq.f32.partialorder %v143_v36, inf  ;;  %vm107_vm9 = vcmp.ne.f32.partialorder %v69_v54, %v69_v54 }
   0xf   :  { %v14575_v41 = vand.u32 4294901760, %v1840_v40  ;;  %v21260_v44 = vand.u32 4294901760, %v14565_v37  ;;  %v21258_v45 = vand.u32 4294901760, %v14568_v38  ;;  %v21257_v46 = vand.u32 4294901760, %v14571_v39 }
  0x10   :  { %vm255_vm5 = vcmp.eq.f32.partialorder %v217_v42, -inf  ;;  %vm256_vm6 = vcmp.eq.f32.partialorder %v218_v43, -inf  ;;  %v219_v49 = vsel %vm181_vm4, 3.4028235e+38, %v143_v36  ;;  %v144_v57 = vsel %vm106_vm3, 0.0, %v68_v27 }
  0x11   :  { %22206 = vst [vmem:[#allocation14_spill] sm:$0xff] %v14575_v41  ;;  %v14581_v47 = vsub.f32 %v1840_v40, %v14575_v41  ;;  %v14583_v48 = vsel %vm255_vm5, -3.4028235e+38, %v217_v42  ;;  %v2012_v50 = vsub.f32 %v14565_v37, %v21260_v44  ;;  %v2022_v51 = vsub.f32 %v14568_v38, %v21258_v45 }
  0x12   :  { %22207 = vst [vmem:[#allocation15_spill] sm:$0xff] %v14583_v48  ;;  %v2032_v52 = vsub.f32 %v14571_v39, %v21257_v46  ;;  %v14596_v53 = vmul.f32 %v14583_v48, %v14583_v48  ;;  %v14602_v56 = vsel %vm256_vm6, -3.4028235e+38, %v218_v43  ;;  %vm257_vm7 = vcmp.eq.f32.partialorder %v219_v49, -inf }
  0x13   :  { %v21256_v55 = vand.u32 4294901760, %v14581_v47  ;;  %22209 = vst [vmem:[#allocation17_spill] sm:$0xff] %v14602_v56  ;;  %v2013_v59 = vand.u32 4294901760, %v2012_v50  ;;  %v2023_v60 = vand.u32 4294901760, %v2022_v51  ;;  %v14617_v2 = vmul.f32 %v14602_v56, %v14602_v56 }
  0x14   :  { %22208 = vst [vmem:[#allocation16_spill] sm:$0xff] %v14596_v53  ;;  %v2033_v61 = vand.u32 4294901760, %v2032_v52  ;;  %v1843_v62 = vsel %vm613_vm0, %v14596_v53, 0  ;;  %v14619_v3 = vsel %vm257_vm7, -3.4028235e+38, %v219_v49  ;;  %vm182_vm8 = vcmp.eq.f32.partialorder %v144_v57, inf }
  0x15   :  { %v2042_v63 = vsub.f32 %v14581_v47, %v21256_v55  ;;  %v14613_v0 = vand.u32 4294901760, %v1843_v62  ;;  %22211 = vst [vmem:[#allocation19_spill] sm:$0xff] %v14617_v2  ;;  %22212 = vst [vmem:[#allocation20_spill] sm:$0xff] %v14619_v3  ;;  %12196 = vmatprep.mubr.f32.mxu0 %v2013_v59  ;;  %v14623_v4 = vmul.f32 %v14619_v3, %v14619_v3  ;;  %v1846_v8 = vsel %vm613_vm0, %v14617_v2, 0  ;;  %v81_v53 = vld [vmem:[%s21248_s0 + $0xa0] sm:$0xff] }
  0x16   :  { %vm108_vm10 = vcmp.ne.f32.partialorder %v70_v58, %v70_v58  ;;  %12197 = vmatmul.mubr.f32.vlgmr.msra.gmra.mrb[0].mxu0 %v2023_v60  ;;  %v220_v10 = vsel %vm182_vm8, 3.4028235e+38, %v144_v57  ;;  %v14631_v11 = vand.u32 4294901760, %v1846_v8  ;;  %v145_v13 = vsel %vm107_vm9, 0.0, %v69_v54 }
  0x17   :  { %22210 = vst [vmem:[#allocation18_spill] sm:$0xff] %v14613_v0  ;;  %22213 = vst [vmem:[#allocation21_spill] sm:$0xff] %v14623_v4  ;;  %v2043_v5 = vand.u32 4294901760, %v2042_v63  ;;  %v14626_v6 = vsub.f32 %v1843_v62, %v14613_v0  ;;  %12254 = vmatpush3.msra.mxu0 %v21263_v9  ;;  %12199 = vmatprep.mubr.f32.mxu0 %v2033_v61  ;;  %v1849_v12 = vsel %vm613_vm0, %v14623_v4, 0  ;;  %vm258_vm11 = vcmp.eq.f32.partialorder %v220_v10, -inf }
  0x18   :  { %22214 = vst [vmem:[#allocation22_spill] sm:$0xff] %v14631_v11  ;;  %v14636_v15 = vand.u32 4294901760, %v1849_v12  ;;  %v14638_v16 = vsel %vm258_vm11, -3.4028235e+38, %v220_v10  ;;  %vm183_vm12 = vcmp.eq.f32.partialorder %v145_v13, inf  ;;  %12312 = vmatprep.subr.mxu0 %v21263_v9  ;;  %v14642_v17 = vsub.f32 %v1846_v8, %v14631_v11 }
  0x19   :  { %v21255_v14 = vand.u32 4294901760, %v14626_v6  ;;  %22216 = vst [vmem:[#allocation24_spill] sm:$0xff] %v14638_v16  ;;  %v14646_v24 = vmul.f32 %v14638_v16, %v14638_v16  ;;  %v221_v25 = vsel %vm183_vm12, 3.4028235e+38, %v145_v13  ;;  %v146_v26 = vsel %vm108_vm10, 0.0, %v70_v58  ;;  %v73_v13 = vld [vmem:[%s21248_s0 + $0x60] sm:$0xff] }
  0x1a   :  { %22215 = vst [vmem:[#allocation23_spill] sm:$0xff] %v14636_v15  ;;  %12200 = vmatmul.mubr.f32.gmra.mrb[2].mxu0 %v2043_v5  ;;  %v14653_v28 = vsub.f32 %v1849_v12, %v14636_v15  ;;  %vm259_vm13 = vcmp.eq.f32.partialorder %v221_v25, -inf  ;;  %vm184_vm14 = vcmp.eq.f32.partialorder %v146_v26, inf  ;;  %v21254_v36 = vand.u32 4294901760, %v14642_v17 }
  0x1b   :  { %22217 = vst [vmem:[#allocation25_spill] sm:$0xff] %v14646_v24  ;;  %v2052_v27 = vsub.f32 %v14626_v6, %v21255_v14  ;;  %v1852_v40 = vsel %vm613_vm0, %v14646_v24, 0  ;;  %v14664_v42 = vsel %vm259_vm13, -3.4028235e+38, %v221_v25  ;;  %v222_v43 = vsel %vm184_vm14, 3.4028235e+38, %v146_v26 }
  0x1c   :  { %22218 = vst [vmem:[#allocation26_spill] sm:$0xff] %v14664_v42  ;;  %v21252_v50 = vand.u32 4294901760, %v14653_v28  ;;  %v14667_v51 = vand.u32 4294901760, %v1852_v40  ;;  %v14671_v52 = vmul.f32 %v14664_v42, %v14664_v42  ;;  %v2062_v54 = vsub.f32 %v14642_v17, %v21254_v36 }
  0x1d   :  { %v2053_v49 = vand.u32 4294901760, %v2052_v27  ;;  %vm260_vm15 = vcmp.eq.f32.partialorder %v222_v43, -inf  ;;  %vm109_vm1 = vcmp.ne.f32.partialorder %v71_v29, %v71_v29  ;;  %vm110_vm2 = vcmp.ne.f32.partialorder %v72_v30, %v72_v30 }
  0x1e   :  { %22219 = vst [vmem:[#allocation27_spill] sm:$0xff] %v14667_v51  ;;  %22220 = vst [vmem:[#allocation28_spill] sm:$0xff] %v14671_v52  ;;  %v2072_v57 = vsub.f32 %v14653_v28, %v21252_v50  ;;  %v14680_v58 = vsub.f32 %v1852_v40, %v14667_v51  ;;  %v1855_v59 = vsel %vm613_vm0, %v14671_v52, 0  ;;  %v14684_v60 = vsel %vm260_vm15, -3.4028235e+38, %v222_v43  ;;  %v74_v43 = vld [vmem:[%s21248_s0 + $0x68] sm:$0xff] }
  0x1f   :  { %12202 = vmatprep.mubr.f32.mxu0 %v2053_v49  ;;  %22221 = vst [vmem:[#allocation29_spill] sm:$0xff] %v14684_v60  ;;  %v2063_v61 = vand.u32 4294901760, %v2062_v54  ;;  %v14686_v62 = vand.u32 4294901760, %v1855_v59  ;;  %v14690_v63 = vmul.f32 %v14684_v60, %v14684_v60  ;;  %v147_v5 = vsel %vm109_vm1, 0.0, %v71_v29  ;;  %v79_v52 = vld [vmem:[%s21248_s0 + $0x90] sm:$0xff] }
  0x20   :  { %v2073_v8 = vand.u32 4294901760, %v2072_v57  ;;  %v21251_v10 = vand.u32 4294901760, %v14680_v58  ;;  %vm185_vm3 = vcmp.eq.f32.partialorder %v147_v5, inf  ;;  %v148_v12 = vsel %vm110_vm2, 0.0, %v72_v30 }
  0x21   :  { %22222 = vst [vmem:[#allocation30_spill] sm:$0xff] %v14686_v62  ;;  %22223 = vst [vmem:[#allocation31_spill] sm:$0xff] %v14690_v63  ;;  %12203 = vmatmul.mubr.f32.gmra.mrb[4].mxu0 %v2063_v61  ;;  %v14697_v25 = vsub.f32 %v1855_v59, %v14686_v62  ;;  %v1858_v26 = vsel %vm613_vm0, %v14690_v63, 0  ;;  %v223_v27 = vsel %vm185_vm3, 3.4028235e+38, %v147_v5  ;;  %vm186_vm4 = vcmp.eq.f32.partialorder %v148_v12, inf }
  0x22   :  { %12205 = vmatprep.mubr.f32.mxu0 %v2073_v8  ;;  %v2082_v29 = vsub.f32 %v14680_v58, %v21251_v10  ;;  %v14704_v40 = vand.u32 4294901760, %v1858_v26  ;;  %vm261_vm5 = vcmp.eq.f32.partialorder %v223_v27, -inf  ;;  %v224_v30 = vsel %vm186_vm4, 3.4028235e+38, %v148_v12 }
  0x23   :  { %v21253_v49 = vand.u32 4294901760, %v14697_v25  ;;  %v14710_v54 = vsel %vm261_vm5, -3.4028235e+38, %v223_v27  ;;  %vm262_vm6 = vcmp.eq.f32.partialorder %v224_v30, -inf  ;;  %vm111_vm7 = vcmp.ne.f32.partialorder %v73_v13, %v73_v13 }
  0x24   :  { %22224 = vst [vmem:[#allocation32_spill] sm:$0xff] %v14704_v40  ;;  %22225 = vst [vmem:[#allocation33_spill] sm:$0xff] %v14710_v54  ;;  %v2083_v57 = vand.u32 4294901760, %v2082_v29  ;;  %v14713_v59 = vsub.f32 %v1858_v26, %v14704_v40  ;;  %v14717_v61 = vmul.f32 %v14710_v54, %v14710_v54  ;;  %v14719_v5 = vsel %vm262_vm6, -3.4028235e+38, %v224_v30  ;;  %v75_v30 = vld [vmem:[%s21248_s0 + $0x70] sm:$0xff] }
  0x25   :  { %22228 = vst [vmem:[#allocation36_spill] sm:$0xff] %v14719_v5  ;;  %v2092_v8 = vsub.f32 %v14697_v25, %v21253_v49  ;;  %v14726_v12 = vmul.f32 %v14719_v5, %v14719_v5  ;;  %v149_v27 = vsel %vm111_vm7, 0.0, %v73_v13  ;;  %vm112_vm8 = vcmp.ne.f32.partialorder %v74_v43, %v74_v43 }
  0x26   :  { %22226 = vst [vmem:[#allocation34_spill] sm:$0xff] %v14713_v59  ;;  %22227 = vst [vmem:[#allocation35_spill] sm:$0xff] %v14717_v61  ;;  %12206 = vmatmul.mubr.f32.gmra.mrb[6].mxu0 %v2083_v57  ;;  %v21259_v26 = vand.u32 4294901760, %v14713_v59  ;;  %v1861_v29 = vsel %vm613_vm0, %v14717_v61, 0  ;;  %vm187_vm9 = vcmp.eq.f32.partialorder %v149_v27, inf  ;;  %v150_v10 = vsel %vm112_vm8, 0.0, %v74_v43 }
  0x27   :  { %22229 = vst [vmem:[#allocation37_spill] sm:$0xff] %v14726_v12  ;;  %v2093_v50 = vand.u32 4294901760, %v2092_v8  ;;  %v14734_v49 = vand.u32 4294901760, %v1861_v29  ;;  %v1864_v36 = vsel %vm613_vm0, %v14726_v12, 0  ;;  %v225_v13 = vsel %vm187_vm9, 3.4028235e+38, %v149_v27 }
  0x28   :  { %v2102_v57 = vsub.f32 %v14713_v59, %v21259_v26  ;;  %v14741_v14 = vand.u32 4294901760, %v1864_v36  ;;  %vm263_vm10 = vcmp.eq.f32.partialorder %v225_v13, -inf  ;;  %vm188_vm11 = vcmp.eq.f32.partialorder %v150_v10, inf  ;;  %v76_v43 = vld [vmem:[%s21248_s0 + $0x78] sm:$0xff] }
  0x29   :  { %22230 = vst [vmem:[#allocation38_spill] sm:$0xff] %v14734_v49  ;;  %12208 = vmatprep.mubr.f32.mxu0 %v2093_v50  ;;  %v14747_v8 = vsub.f32 %v1861_v29, %v14734_v49  ;;  %v14749_v55 = vsel %vm263_vm10, -3.4028235e+38, %v225_v13  ;;  %v226_v46 = vsel %vm188_vm11, 3.4028235e+38, %v150_v10  ;;  %vm113_vm12 = vcmp.ne.f32.partialorder %v75_v30, %v75_v30 }
  0x2a   :  { %22231 = vst [vmem:[#allocation39_spill] sm:$0xff] %v14741_v14  ;;  %22233 = vst [vmem:[#allocation41_spill] sm:$0xff] %v14749_v55  ;;  %v2103_v27 = vand.u32 4294901760, %v2102_v57  ;;  %v14752_v45 = vsub.f32 %v1864_v36, %v14741_v14  ;;  %v14756_v26 = vmul.f32 %v14749_v55, %v14749_v55  ;;  %vm264_vm13 = vcmp.eq.f32.partialorder %v226_v46, -inf }
  0x2b   :  { %22232 = vst [vmem:[#allocation40_spill] sm:$0xff] %v14747_v8  ;;  %v21269_v44 = vand.u32 4294901760, %v14747_v8  ;;  %v14759_v1 = vsel %vm264_vm13, -3.4028235e+38, %v226_v46  ;;  %v151_v50 = vsel %vm113_vm12, 0.0, %v75_v30  ;;  %vm114_vm14 = vcmp.ne.f32.partialorder %v76_v43, %v76_v43 }
  0x2c   :  { %22234 = vst [vmem:[#allocation42_spill] sm:$0xff] %v14752_v45  ;;  %22235 = vst [vmem:[#allocation43_spill] sm:$0xff] %v14756_v26  ;;  %12209 = vmatmul.mubr.f32.gmra.mrb[8].mxu0 %v2103_v27  ;;  %v21274_v29 = vand.u32 4294901760, %v14752_v45  ;;  %v1867_v10 = vsel %vm613_vm0, %v14756_v26, 0  ;;  %v14766_v36 = vmul.f32 %v14759_v1, %v14759_v1  ;;  %vm189_vm15 = vcmp.eq.f32.partialorder %v151_v50, inf  ;;  %v77_v27 = vld [vmem:[%s21248_s0 + $0x80] sm:$0xff] }
  0x2d   :  { %22236 = vst [vmem:[#allocation44_spill] sm:$0xff] %v14759_v1  ;;  %v2112_v13 = vsub.f32 %v14747_v8, %v21269_v44  ;;  %v14771_v57 = vand.u32 4294901760, %v1867_v10  ;;  %v227_v46 = vsel %vm189_vm15, 3.4028235e+38, %v151_v50  ;;  %v152_v30 = vsel %vm114_vm14, 0.0, %v76_v43  ;;  %v78_v50 = vld [vmem:[%s21248_s0 + $0x88] sm:$0xff] }
  0x2e   :  { %22237 = vst [vmem:[#allocation45_spill] sm:$0xff] %v14766_v36  ;;  %v2122_v9 = vsub.f32 %v14752_v45, %v21274_v29  ;;  %v1870_v26 = vsel %vm613_vm0, %v14766_v36, 0  ;;  %vm265_vm1 = vcmp.eq.f32.partialorder %v227_v46, -inf  ;;  %vm190_vm2 = vcmp.eq.f32.partialorder %v152_v30, inf }
  0x2f   :  { %22238 = vst [vmem:[#allocation46_spill] sm:$0xff] %v14771_v57  ;;  %v2113_v12 = vand.u32 4294901760, %v2112_v13  ;;  %v14782_v44 = vsub.f32 %v1867_v10, %v14771_v57  ;;  %v14784_v61 = vand.u32 4294901760, %v1870_v26  ;;  %v14786_v43 = vsel %vm265_vm1, -3.4028235e+38, %v227_v46 }
  0x30   :  { %22241 = vst [vmem:[#allocation49_spill] sm:$0xff] %v14786_v43  ;;  %v2123_v63 = vand.u32 4294901760, %v2122_v9  ;;  %v14793_v29 = vmul.f32 %v14786_v43, %v14786_v43  ;;  %v228_v36 = vsel %vm190_vm2, 3.4028235e+38, %v152_v30  ;;  %vm115_vm3 = vcmp.ne.f32.partialorder %v77_v27, %v77_v27  ;;  %v80_v9 = vld [vmem:[%s21248_s0 + $0x98] sm:$0xff] }
  0x31   :  { %22239 = vst [vmem:[#allocation47_spill] sm:$0xff] %v14782_v44  ;;  %22240 = vst [vmem:[#allocation48_spill] sm:$0xff] %v14784_v61  ;;  %12211 = vmatprep.mubr.f32.mxu0 %v2113_v12  ;;  %v21287_v13 = vand.u32 4294901760, %v14782_v44  ;;  %v14797_v10 = vsub.f32 %v1870_v26, %v14784_v61  ;;  %vm266_vm4 = vcmp.eq.f32.partialorder %v228_v36, -inf  ;;  %v153_v46 = vsel %vm115_vm3, 0.0, %v77_v27 }
  0x32   :  { %22242 = vst [vmem:[#allocation50_spill] sm:$0xff] %v14793_v29  ;;  %12212 = vmatmul.mubr.f32.gmra.mrb[10].mxu0 %v2123_v63  ;;  %v14807_v30 = vsel %vm613_vm0, %v14793_v29, 0  ;;  %v14809_v12 = vsel %vm266_vm4, -3.4028235e+38, %v228_v36  ;;  %vm191_vm5 = vcmp.eq.f32.partialorder %v153_v46, inf  ;;  %vm116_vm6 = vcmp.ne.f32.partialorder %v78_v50, %v78_v50 }
  0x33   :  { %22243 = vst [vmem:[#allocation51_spill] sm:$0xff] %v14797_v10  ;;  %22244 = vst [vmem:[#allocation52_spill] sm:$0xff] %v14807_v30  ;;  %v2132_v26 = vsub.f32 %v14782_v44, %v21287_v13  ;;  %v21292_v27 = vand.u32 4294901760, %v14797_v10  ;;  %v14816_v24 = vand.u32 4294901760, %v14807_v30  ;;  %v14820_v63 = vmul.f32 %v14809_v12, %v14809_v12  ;;  %v90_v30 = vld [vmem:[%s21248_s0 + $0xe8] sm:$0xff] }
  0x34   :  { %22245 = vst [vmem:[#allocation53_spill] sm:$0xff] %v14809_v12  ;;  %v229_v4 = vsel %vm191_vm5, 3.4028235e+38, %v153_v46  ;;  %v154_v29 = vsel %vm116_vm6, 0.0, %v78_v50  ;;  %vm117_vm7 = vcmp.ne.f32.partialorder %v79_v52, %v79_v52  ;;  %vm118_vm8 = vcmp.ne.f32.partialorder %v80_v9, %v80_v9 }
  0x35   :  { %22246 = vst [vmem:[#allocation54_spill] sm:$0xff] %v14816_v24  ;;  %22247 = vst [vmem:[#allocation55_spill] sm:$0xff] %v14820_v63  ;;  %v2133_v36 = vand.u32 4294901760, %v2132_v26  ;;  %v2142_v2 = vsub.f32 %v14797_v10, %v21292_v27  ;;  %v14827_v13 = vsel %vm613_vm0, %v14820_v63, 0  ;;  %vm267_vm9 = vcmp.eq.f32.partialorder %v229_v4, -inf }
  0x36   :  { %22248 = vst [vmem:[#allocation56_spill] sm:$0xff] %v14827_v13  ;;  %v14833_v35 = vand.u32 4294901760, %v14827_v13  ;;  %v14835_v50 = vsel %vm267_vm9, -3.4028235e+38, %v229_v4  ;;  %vm192_vm10 = vcmp.eq.f32.partialorder %v154_v29, inf  ;;  %v155_v46 = vsel %vm117_vm7, 0.0, %v79_v52 }
  0x37   :  { %22250 = vst [vmem:[#allocation58_spill] sm:$0xff] %v14835_v50  ;;  %12214 = vmatprep.mubr.f32.mxu0 %v2133_v36  ;;  %v2143_v26 = vand.u32 4294901760, %v2142_v2  ;;  %v14839_v27 = vmul.f32 %v14835_v50, %v14835_v50  ;;  %v230_v63 = vsel %vm192_vm10, 3.4028235e+38, %v154_v29  ;;  %vm193_vm11 = vcmp.eq.f32.partialorder %v155_v46, inf  ;;  %v82_v4 = vld [vmem:[%s21248_s0 + $0xa8] sm:$0xff] }
  0x38   :  { %22249 = vst [vmem:[#allocation57_spill] sm:$0xff] %v14833_v35  ;;  %vm268_vm12 = vcmp.eq.f32.partialorder %v230_v63, -inf  ;;  %v231_v23 = vsel %vm193_vm11, 3.4028235e+38, %v155_v46  ;;  %v156_v22 = vsel %vm118_vm8, 0.0, %v80_v9  ;;  %vm119_vm13 = vcmp.ne.f32.partialorder %v81_v53, %v81_v53 }
  0x39   :  { %22251 = vst [vmem:[#allocation59_spill] sm:$0xff] %v14839_v27  ;;  %12215 = vmatmul.mubr.f32.gmra.mrb[12].mxu0 %v2143_v26  ;;  %v14847_v52 = vsel %vm613_vm0, %v14839_v27, 0  ;;  %v14849_v2 = vsel %vm268_vm12, -3.4028235e+38, %v230_v63  ;;  %vm269_vm14 = vcmp.eq.f32.partialorder %v231_v23, -inf  ;;  %vm194_vm15 = vcmp.eq.f32.partialorder %v156_v22, inf }
  0x3a   :  { %22252 = vst [vmem:[#allocation60_spill] sm:$0xff] %v14847_v52  ;;  %22253 = vst [vmem:[#allocation61_spill] sm:$0xff] %v14849_v2  ;;  %12255 = vmatprep.mubr.f32.mxu0 %v14554_v32  ;;  %v14853_v29 = vand.u32 4294901760, %v14847_v52  ;;  %v14857_v9 = vmul.f32 %v14849_v2, %v14849_v2  ;;  %v14859_v36 = vsel %vm269_vm14, -3.4028235e+38, %v231_v23  ;;  %v157_v63 = vsel %vm119_vm13, 0.0, %v81_v53 }
  0x3b   :  { %22256 = vst [vmem:[#allocation64_spill] sm:$0xff] %v14859_v36  ;;  %v232_v46 = vsel %vm194_vm15, 3.4028235e+38, %v156_v22  ;;  %v14863_v26 = vmul.f32 %v14859_v36, %v14859_v36  ;;  %vm120_vm2 = vcmp.ne.f32.partialorder %v82_v4, %v82_v4  ;;  %vm195_vm3 = vcmp.eq.f32.partialorder %v157_v63, inf }
  0x3c   :  { %22254 = vst [vmem:[#allocation62_spill] sm:$0xff] %v14853_v29  ;;  %22255 = vst [vmem:[#allocation63_spill] sm:$0xff] %v14857_v9  ;;  %vm270_vm1 = vcmp.eq.f32.partialorder %v232_v46, -inf  ;;  %v14870_v27 = vsel %vm613_vm0, %v14857_v9, 0  ;;  %v158_v23 = vsel %vm120_vm2, 0.0, %v82_v4  ;;  %v22263_v9 = vmov 0.0  }
  0x3d   :  { %22257 = vst [vmem:[#allocation65_spill] sm:$0xff] %v14863_v26  ;;  %22258 = vst [vmem:[#allocation66_spill] sm:$0xff] %v14870_v27  ;;  %v14872_v32 = vsel %vm270_vm1, -3.4028235e+38, %v232_v46  ;;  %12256 = vmatmul.mubr.f32.vlgmr.msra.gmra.mrb[0].mxu0 %v14556_v33  ;;  %v14876_v22 = vand.u32 4294901760, %v14870_v27  ;;  %v14880_v53 = vsel %vm613_vm0, %v14863_v26, 0  ;;  %vm121_vm6 = vcmp.ne.f32.partialorder %v83_v21, %v83_v21 }
  0x3e   :  { %22259 = vst [vmem:[#allocation67_spill] sm:$0xff] %v14872_v32  ;;  %22261 = vst [vmem:[#allocation69_spill] sm:$0xff] %v14880_v53  ;;  %v14884_v43 = vmul.f32 %v14872_v32, %v14872_v32  ;;  %v233_v12 = vsel %vm195_vm3, 3.4028235e+38, %v157_v63  ;;  %12313 = vmatpush3.msra.mxu0 %v22263_v9  ;;  %12258 = vmatprep.mubr.f32.mxu0 %v14558_v34  ;;  %v14889_v4 = vand.u32 4294901760, %v14880_v53  ;;  %vm196_vm5 = vcmp.eq.f32.partialorder %v158_v23, inf }
  0x3f   :  { %22260 = vst [vmem:[#allocation68_spill] sm:$0xff] %v14876_v22  ;;  %vm271_vm4 = vcmp.eq.f32.partialorder %v233_v12, -inf  ;;  %v84_v46 = vld [vmem:[%s21248_s0 + $0xb8] sm:$0xff]  ;;  %v85_v26 = vld [vmem:[%s21248_s0 + $0xc0] sm:$0xff]  ;;  %v234_v34 = vsel %vm196_vm5, 3.4028235e+38, %v158_v23 }
  0x40   :  { %22262 = vst [vmem:[#allocation70_spill] sm:$0xff] %v14884_v43  ;;  %22264 = vst [vmem:[#allocation71_spill] sm:$0xff] %v14889_v4  ;;  %v14899_v63 = vsel %vm613_vm0, %v14884_v43, 0  ;;  %v14901_v33 = vsel %vm271_vm4, -3.4028235e+38, %v233_v12  ;;  %v159_v53 = vsel %vm121_vm6, 0.0, %v83_v21  ;;  %vm122_vm9 = vcmp.ne.f32.partialorder %v84_v46, %v84_v46 }
  0x41   :  { %22265 = vst [vmem:[#allocation72_spill] sm:$0xff] %v14899_v63  ;;  %22266 = vst [vmem:[#allocation73_spill] sm:$0xff] %v14901_v33  ;;  %v22267_v27 = vmov 1.0   ;;  %v14905_v10 = vand.u32 4294901760, %v14899_v63  ;;  %v14909_v52 = vmul.f32 %v14901_v33, %v14901_v33  ;;  %vm272_vm7 = vcmp.eq.f32.partialorder %v234_v34, -inf  ;;  %12259 = vmatmul.mubr.f32.gmra.mrb[2].mxu0 %v14575_v41 }
  0x42   :  { %12371 = vmatprep.subr.mxu0 %v22267_v27  ;;  %vm197_vm8 = vcmp.eq.f32.partialorder %v159_v53, inf  ;;  %v14912_v44 = vsel %vm272_vm7, -3.4028235e+38, %v234_v34  ;;  %vm123_vm10 = vcmp.ne.f32.partialorder %v85_v26, %v85_v26  ;;  %12261 = vmatprep.mubr.f32.mxu0 %v14613_v0  ;;  %v160_v23 = vsel %vm122_vm9, 0.0, %v84_v46  ;;  %v86_v34 = vld [vmem:[%s21248_s0 + $0xc8] sm:$0xff] }
  0x43   :  { %22268 = vst [vmem:[#allocation74_spill] sm:$0xff] %v14905_v10  ;;  %22269 = vst [vmem:[#allocation75_spill] sm:$0xff] %v14909_v52  ;;  %v235_v43 = vsel %vm197_vm8, 3.4028235e+38, %v159_v53  ;;  %v14917_v21 = vsel %vm613_vm0, %v14909_v52, 0  ;;  %v14921_v12 = vmul.f32 %v14912_v44, %v14912_v44  ;;  %vm198_vm12 = vcmp.eq.f32.partialorder %v160_v23, inf }
  0x44   :  { %22270 = vst [vmem:[#allocation76_spill] sm:$0xff] %v14912_v44  ;;  %22271 = vst [vmem:[#allocation77_spill] sm:$0xff] %v14917_v21  ;;  %vm273_vm11 = vcmp.eq.f32.partialorder %v235_v43, -inf  ;;  %v14927_v53 = vand.u32 4294901760, %v14917_v21  ;;  %v161_v0 = vsel %vm123_vm10, 0.0, %v85_v26  ;;  %vm124_vm15 = vcmp.ne.f32.partialorder %v86_v34, %v86_v34  ;;  %v87_v26 = vld [vmem:[%s21248_s0 + $0xd0] sm:$0xff] }
  0x45   :  { %22272 = vst [vmem:[#allocation78_spill] sm:$0xff] %v14921_v12  ;;  %v14929_v41 = vsel %vm273_vm11, -3.4028235e+38, %v235_v43  ;;  %v14933_v52 = vsel %vm613_vm0, %v14921_v12, 0  ;;  %v236_v46 = vsel %vm198_vm12, 3.4028235e+38, %v160_v23  ;;  %12262 = vmatmul.mubr.f32.gmra.mrb[4].mxu0 %v14631_v11  ;;  %vm125_vm3 = vcmp.ne.f32.partialorder %v87_v26, %v87_v26 }
  0x46   :  { %22273 = vst [vmem:[#allocation79_spill] sm:$0xff] %v14927_v53  ;;  %22274 = vst [vmem:[#allocation80_spill] sm:$0xff] %v14929_v41  ;;  %v14937_v63 = vmul.f32 %v14929_v41, %v14929_v41  ;;  %vm199_vm13 = vcmp.eq.f32.partialorder %v161_v0, inf  ;;  %v14941_v13 = vand.u32 4294901760, %v14933_v52  ;;  %vm274_vm14 = vcmp.eq.f32.partialorder %v236_v46, -inf  ;;  %v88_v12 = vld [vmem:[%s21248_s0 + $0xd8] sm:$0xff]  ;;  %12264 = vmatprep.mubr.f32.mxu0 %v14636_v15 }
  0x47   :  { %22275 = vst [vmem:[#allocation81_spill] sm:$0xff] %v14933_v52  ;;  %v237_v43 = vsel %vm199_vm13, 3.4028235e+38, %v161_v0  ;;  %v14954_v11 = vsel %vm274_vm14, -3.4028235e+38, %v236_v46  ;;  %v162_v52 = vsel %vm124_vm15, 0.0, %v86_v34  ;;  %vm126_vm4 = vcmp.ne.f32.partialorder %v88_v12, %v88_v12 }
  0x48   :  { %22276 = vst [vmem:[#allocation82_spill] sm:$0xff] %v14937_v63  ;;  %22277 = vst [vmem:[#allocation83_spill] sm:$0xff] %v14941_v13  ;;  %v14952_v23 = vsel %vm613_vm0, %v14937_v63, 0  ;;  %vm275_vm1 = vcmp.eq.f32.partialorder %v237_v43, -inf  ;;  %v14961_v21 = vmul.f32 %v14954_v11, %v14954_v11  ;;  %vm200_vm2 = vcmp.eq.f32.partialorder %v162_v52, inf }
  0x49   :  { %22278 = vst [vmem:[#allocation84_spill] sm:$0xff] %v14952_v23  ;;  %22279 = vst [vmem:[#allocation85_spill] sm:$0xff] %v14954_v11  ;;  %v14957_v0 = vand.u32 4294901760, %v14952_v23  ;;  %v14963_v45 = vsel %vm275_vm1, -3.4028235e+38, %v237_v43  ;;  %12265 = vmatmul.mubr.f32.gmra.mrb[6].mxu0 %v14667_v51  ;;  %v163_v46 = vsel %vm125_vm3, 0.0, %v87_v26  ;;  %vm128_vm10 = vcmp.ne.f32.partialorder %v90_v30, %v90_v30 }
  0x4a   :  { %22281 = vst [vmem:[#allocation87_spill] sm:$0xff] %v14961_v21  ;;  %22282 = vst [vmem:[#allocation88_spill] sm:$0xff] %v14963_v45  ;;  %v14967_v15 = vmul.f32 %v14963_v45, %v14963_v45  ;;  %v238_v63 = vsel %vm200_vm2, 3.4028235e+38, %v162_v52  ;;  %v14972_v34 = vsel %vm613_vm0, %v14961_v21, 0  ;;  %v164_v23 = vsel %vm126_vm4, 0.0, %v88_v12  ;;  %12267 = vmatprep.mubr.f32.mxu0 %v14686_v62 }
  0x4b   :  { %22280 = vst [vmem:[#allocation86_spill] sm:$0xff] %v14957_v0  ;;  %22284 = vst [vmem:[#allocation90_spill] sm:$0xff] %v14972_v34  ;;  %vm276_vm5 = vcmp.eq.f32.partialorder %v238_v63, -inf  ;;  %v89_v43 = vld [vmem:[%s21248_s0 + $0xe0] sm:$0xff]  ;;  %v14982_v52 = vand.u32 4294901760, %v14972_v34  ;;  %vm201_vm6 = vcmp.eq.f32.partialorder %v163_v46, inf }
  0x4c   :  { %22283 = vst [vmem:[#allocation89_spill] sm:$0xff] %v14967_v15  ;;  %v14986_v21 = vsel %vm613_vm0, %v14967_v15, 0  ;;  %v14988_v51 = vsel %vm276_vm5, -3.4028235e+38, %v238_v63  ;;  %v239_v55 = vsel %vm201_vm6, 3.4028235e+38, %v163_v46  ;;  %vm127_vm9 = vcmp.ne.f32.partialorder %v89_v43, %v89_v43 }
  0x4d   :  { %22285 = vst [vmem:[#allocation91_spill] sm:$0xff] %v14982_v52  ;;  %22286 = vst [vmem:[#allocation92_spill] sm:$0xff] %v14986_v21  ;;  %v14991_v12 = vand.u32 4294901760, %v14986_v21  ;;  %v14995_v26 = vmul.f32 %v14988_v51, %v14988_v51  ;;  %vm202_vm7 = vcmp.eq.f32.partialorder %v164_v23, inf  ;;  %vm277_vm8 = vcmp.eq.f32.partialorder %v239_v55, -inf  ;;  %v91_v15 = vld [vmem:[%s21248_s0 + $0xf0] sm:$0xff]  ;;  %12268 = vmatmul.mubr.f32.gmra.mrb[8].mxu0 %v14704_v40 }
  0x4e   :  { %22287 = vst [vmem:[#allocation93_spill] sm:$0xff] %v14988_v51  ;;  %v240_v62 = vsel %vm202_vm7, 3.4028235e+38, %v164_v23  ;;  %v15005_v21 = vsel %vm277_vm8, -3.4028235e+38, %v239_v55  ;;  %v165_v34 = vsel %vm127_vm9, 0.0, %v89_v43  ;;  %12270 = vmatprep.mubr.f32.mxu0 %v14734_v49  ;;  %vm129_vm13 = vcmp.ne.f32.partialorder %v91_v15, %v91_v15 }
  0x4f   :  { %22288 = vst [vmem:[#allocation94_spill] sm:$0xff] %v14991_v12  ;;  %22289 = vst [vmem:[#allocation95_spill] sm:$0xff] %v14995_v26  ;;  %v15003_v63 = vsel %vm613_vm0, %v14995_v26, 0  ;;  %vm278_vm11 = vcmp.eq.f32.partialorder %v240_v62, -inf  ;;  %v15013_v46 = vmul.f32 %v15005_v21, %v15005_v21  ;;  %vm203_vm12 = vcmp.eq.f32.partialorder %v165_v34, inf }
  0x50   :  { %22290 = vst [vmem:[#allocation96_spill] sm:$0xff] %v15003_v63  ;;  %22291 = vst [vmem:[#allocation97_spill] sm:$0xff] %v15005_v21  ;;  %v15009_v23 = vand.u32 4294901760, %v15003_v63  ;;  %v15015_v1 = vsel %vm278_vm11, -3.4028235e+38, %v240_v62  ;;  %v166_v40 = vsel %vm128_vm10, 0.0, %v90_v30 }
  0x51   :  { %22293 = vst [vmem:[#allocation99_spill] sm:$0xff] %v15013_v46  ;;  %22294 = vst [vmem:[#allocation100_spill] sm:$0xff] %v15015_v1  ;;  %v15019_v26 = vmul.f32 %v15015_v1, %v15015_v1  ;;  %v241_v55 = vsel %vm203_vm12, 3.4028235e+38, %v165_v34  ;;  %v15023_v43 = vsel %vm613_vm0, %v15013_v46, 0  ;;  %vm204_vm15 = vcmp.eq.f32.partialorder %v166_v40, inf  ;;  %12271 = vmatmul.mubr.f32.gmra.mrb[10].mxu0 %v14741_v14 }
  0x52   :  { %22292 = vst [vmem:[#allocation98_spill] sm:$0xff] %v15009_v23  ;;  %22296 = vst [vmem:[#allocation102_spill] sm:$0xff] %v15023_v43  ;;  %vm279_vm14 = vcmp.eq.f32.partialorder %v241_v55, -inf  ;;  %v167_v49 = vsel %vm129_vm13, 0.0, %v91_v15  ;;  %v92_v62 = vld [vmem:[%s21248_s0 + $0xf8] sm:$0xff]  ;;  %v93_v63 = vld [vmem:[%s21248_s0 + $0x100] sm:$0xff]  ;;  %12273 = vmatprep.mubr.f32.mxu0 %v14771_v57 }
  0x53   :  { %22295 = vst [vmem:[#allocation101_spill] sm:$0xff] %v15019_v26  ;;  %v15033_v30 = vand.u32 4294901760, %v15023_v43  ;;  %v15037_v34 = vsel %vm613_vm0, %v15019_v26, 0  ;;  %v15039_v46 = vsel %vm279_vm14, -3.4028235e+38, %v241_v55  ;;  %vm205_vm2 = vcmp.eq.f32.partialorder %v167_v49, inf }
  0x54   :  { %22298 = vst [vmem:[#allocation104_spill] sm:$0xff] %v15037_v34  ;;  %22299 = vst [vmem:[#allocation105_spill] sm:$0xff] %v15039_v46  ;;  %v242_v15 = vsel %vm204_vm15, 3.4028235e+38, %v166_v40  ;;  %v15043_v8 = vand.u32 4294901760, %v15037_v34  ;;  %v15047_v59 = vmul.f32 %v15039_v46, %v15039_v46  ;;  %vm130_vm3 = vcmp.ne.f32.partialorder %v92_v62, %v92_v62  ;;  %v94_v57 = vld [vmem:[%s21248_s0 + $0x108] sm:$0xff] }
  0x55   :  { %22297 = vst [vmem:[#allocation103_spill] sm:$0xff] %v15033_v30  ;;  %vm280_vm1 = vcmp.eq.f32.partialorder %v242_v15, -inf  ;;  %v243_v43 = vsel %vm205_vm2, 3.4028235e+38, %v167_v49  ;;  %vm131_vm4 = vcmp.ne.f32.partialorder %v93_v63, %v93_v63  ;;  %v168_v26 = vsel %vm130_vm3, 0.0, %v92_v62  ;;  %12274 = vmatmul.mubr.f32.gmra.mrb[12].mxu0 %v14784_v61 }
  0x56   :  { %22300 = vst [vmem:[#allocation106_spill] sm:$0xff] %v15043_v8  ;;  %22301 = vst [vmem:[#allocation107_spill] sm:$0xff] %v15047_v59  ;;  %v15049_v14 = vsel %vm280_vm1, -3.4028235e+38, %v242_v15  ;;  %v15053_v55 = vsel %vm613_vm0, %v15047_v59, 0  ;;  %vm281_vm5 = vcmp.eq.f32.partialorder %v243_v43, -inf  ;;  %12276 = vmatprep.mubr.f32.mxu0 %v14816_v24  ;;  %vm132_vm9 = vcmp.ne.f32.partialorder %v94_v57, %v94_v57 }
  0x57   :  { %22302 = vst [vmem:[#allocation108_spill] sm:$0xff] %v15049_v14  ;;  %22303 = vst [vmem:[#allocation109_spill] sm:$0xff] %v15053_v55  ;;  %v15057_v40 = vmul.f32 %v15049_v14, %v15049_v14  ;;  %v15064_v49 = vand.u32 4294901760, %v15053_v55  ;;  %v15066_v15 = vsel %vm281_vm5, -3.4028235e+38, %v243_v43  ;;  %vm206_vm6 = vcmp.eq.f32.partialorder %v168_v26, inf }
  0x58   :  { %22306 = vst [vmem:[#allocation112_spill] sm:$0xff] %v15066_v15  ;;  %v169_v59 = vsel %vm131_vm4, 0.0, %v93_v63  ;;  %v15075_v62 = vmul.f32 %v15066_v15, %v15066_v15  ;;  %v244_v46 = vsel %vm206_vm6, 3.4028235e+38, %v168_v26  ;;  %v95_v15 = vld [vmem:[%s21248_s0 + $0x110] sm:$0xff]  ;;  %vm438_vm12 = vcmp.lt.s32.totalorder %v14835_v50, 0 }
  0x59   :  { %22304 = vst [vmem:[#allocation110_spill] sm:$0xff] %v15057_v40  ;;  %22305 = vst [vmem:[#allocation111_spill] sm:$0xff] %v15064_v49  ;;  %v15071_v34 = vsel %vm613_vm0, %v15057_v40, 0  ;;  %vm207_vm7 = vcmp.eq.f32.partialorder %v169_v59, inf  ;;  %vm282_vm8 = vcmp.eq.f32.partialorder %v244_v46, -inf  ;;  %v170_v40 = vsel %vm132_vm9, 0.0, %v94_v57  ;;  %12277 = vmatmul.mubr.f32.gmra.mrb[14].mxu0 %v14833_v35 }
  0x5a   :  { %22307 = vst [vmem:[#allocation113_spill] sm:$0xff] %v15071_v34  ;;  %22308 = vst [vmem:[#allocation114_spill] sm:$0xff] %v15075_v62  ;;  %v15078_v61 = vand.u32 4294901760, %v15071_v34  ;;  %v245_v43 = vsel %vm207_vm7, 3.4028235e+38, %v169_v59  ;;  %v15082_v63 = vsel %vm613_vm0, %v15075_v62, 0  ;;  %12279 = vmatprep.mubr.f32.mxu0 %v14853_v29  ;;  %vm133_vm14 = vcmp.ne.f32.partialorder %v95_v15, %v95_v15 }
  0x5b   :  { %22310 = vst [vmem:[#allocation116_spill] sm:$0xff] %v15082_v63  ;;  %v15084_v55 = vsel %vm282_vm8, -3.4028235e+38, %v244_v46  ;;  %vm283_vm10 = vcmp.eq.f32.partialorder %v245_v43, -inf  ;;  %v15091_v26 = vand.u32 4294901760, %v15082_v63  ;;  %vm208_vm11 = vcmp.eq.f32.partialorder %v170_v40, inf }
  0x5c   :  { %22309 = vst [vmem:[#allocation115_spill] sm:$0xff] %v15078_v61  ;;  %22311 = vst [vmem:[#allocation117_spill] sm:$0xff] %v15084_v55  ;;  %v15095_v59 = vmul.f32 %v15084_v55, %v15084_v55  ;;  %v15097_v34 = vsel %vm283_vm10, -3.4028235e+38, %v245_v43  ;;  %v246_v46 = vsel %vm208_vm11, 3.4028235e+38, %v170_v40 }
  0x5d   :  { %22312 = vst [vmem:[#allocation118_spill] sm:$0xff] %v15091_v26  ;;  %22314 = vst [vmem:[#allocation120_spill] sm:$0xff] %v15097_v34  ;;  %v15102_v57 = vmul.f32 %v15097_v34, %v15097_v34  ;;  %v476_v62 = vxor.u32 2147483647, %v14835_v50  ;;  %vm284_vm13 = vcmp.eq.f32.partialorder %v246_v46, -inf  ;;  %v15111_v43 = vsub.s32 7, %v14515_v7  ;;  %12280 = vmatmul.mubr.f32.gmra.mrb[16].mxu0 %v14876_v22 }
  0x5e   :  { %22313 = vst [vmem:[#allocation119_spill] sm:$0xff] %v15095_v59  ;;  %v15108_v63 = vsel %vm613_vm0, %v15095_v59, 0  ;;  %v96_v29 = vld [vmem:[%s21248_s0 + $0x118] sm:$0xff]  ;;  %v15123_v55 = vsel %vm284_vm13, -3.4028235e+38, %v246_v46  ;;  %12282 = vmatprep.mubr.f32.mxu0 %v14889_v4  ;;  %vm439_vm2 = vcmp.lt.s32.totalorder %v14849_v2, 0 }
  0x5f   :  { %22315 = vst [vmem:[#allocation121_spill] sm:$0xff] %v15102_v57  ;;  %22316 = vst [vmem:[#allocation122_spill] sm:$0xff] %v15108_v63  ;;  %v15117_v34 = vand.u32 4294901760, %v15108_v63  ;;  %v15121_v40 = vsel %vm613_vm0, %v15102_v57, 0  ;;  %v514_v59 = vsel %vm438_vm12, %v476_v62, %v14835_v50  ;;  %v15132_v35 = vmul.f32 %v15123_v55, %v15123_v55 }
  0x60   :  { %22318 = vst [vmem:[#allocation124_spill] sm:$0xff] %v15121_v40  ;;  %22319 = vst [vmem:[#allocation125_spill] sm:$0xff] %v15123_v55  ;;  %v15128_v7 = vand.u32 4294901760, %v15121_v40  ;;  %v552_v24 = vand.u32 4294967288, %v514_v59  ;;  %v171_v63 = vsel %vm133_vm14, 0.0, %v95_v15  ;;  %vm134_vm1 = vcmp.ne.f32.partialorder %v96_v29, %v96_v29  ;;  %v97_v59 = vld [vmem:[%s21248_s0 + $0x120] sm:$0xff] }
  0x61   :  { %22317 = vst [vmem:[#allocation123_spill] sm:$0xff] %v15117_v34  ;;  %22321 = vst [vmem:[#allocation127_spill] sm:$0xff] %v15132_v35  ;;  %vm209_vm15 = vcmp.eq.f32.partialorder %v171_v63, inf  ;;  %v477_v46 = vxor.u32 2147483647, %v14849_v2  ;;  %v15139_v62 = vsel %vm613_vm0, %v15132_v35, 0  ;;  %12283 = vmatmul.mubr.f32.gmra.mrb[18].mxu0 %v14905_v10  ;;  %vm135_vm7 = vcmp.ne.f32.partialorder %v97_v59, %v97_v59 }
  0x62   :  { %22320 = vst [vmem:[#allocation126_spill] sm:$0xff] %v15128_v7  ;;  %22322 = vst [vmem:[#allocation128_spill] sm:$0xff] %v15139_v62  ;;  %v591_v57 = vor.u32 %v15111_v43, %v552_v24  ;;  %v247_v50 = vsel %vm209_vm15, 3.4028235e+38, %v171_v63  ;;  %v172_v40 = vsel %vm134_vm1, 0.0, %v96_v29  ;;  %v15143_v55 = vand.u32 4294901760, %v15139_v62  ;;  %12285 = vmatprep.mubr.f32.mxu0 %v14927_v53 }
  0x63   :  { %vm285_vm3 = vcmp.eq.f32.partialorder %v247_v50, -inf  ;;  %vm210_vm4 = vcmp.eq.f32.partialorder %v172_v40, inf  ;;  %v515_v15 = vsel %vm439_vm2, %v477_v46, %v14849_v2  ;;  %vm422_vm6 = vcmp.lt.s32.totalorder %v14525_v18, 0 }
  0x64   :  { %22323 = vst [vmem:[#allocation129_spill] sm:$0xff] %v15143_v55  ;;  %v15151_v35 = vsel %vm613_vm0, %v591_v57, 2147483648  ;;  %v15153_v4 = vsel %vm285_vm3, -3.4028235e+38, %v247_v50  ;;  %v248_v24 = vsel %vm210_vm4, 3.4028235e+38, %v172_v40 }
  0x65   :  { %22324 = vst [vmem:[#allocation130_spill] sm:$0xff] %v15151_v35  ;;  %22325 = vst [vmem:[#allocation131_spill] sm:$0xff] %v15153_v4  ;;  %v553_v29 = vand.u32 4294967288, %v515_v15  ;;  %v856_v63 = vshra.s32 %v15151_v35, 16  ;;  %v15159_v46 = vmul.f32 %v15153_v4, %v15153_v4  ;;  %vm286_vm5 = vcmp.eq.f32.partialorder %v248_v24, -inf  ;;  %12286 = vmatmul.mubr.f32.gmra.mrb[20].mxu0 %v14941_v13 }
  0x66   :  { %v15162_v2 = vsel %vm286_vm5, -3.4028235e+38, %v248_v24  ;;  %v460_v50 = vxor.u32 2147483647, %v14525_v18  ;;  %v173_v62 = vsel %vm135_vm7, 0.0, %v97_v59  ;;  %v98_v24 = vld [vmem:[%s21248_s0 + $0x128] sm:$0xff]  ;;  %12288 = vmatprep.mubr.f32.mxu0 %v14957_v0 }
  0x67   :  { %22326 = vst [vmem:[#allocation132_spill] sm:$0xff] %v15159_v46  ;;  %22327 = vst [vmem:[#allocation133_spill] sm:$0xff] %v15162_v2  ;;  %v592_v57 = vor.u32 %v15111_v43, %v553_v29  ;;  %v15166_v40 = vcvt.s32.f32 %v856_v63  ;;  %v15170_v15 = vsel %vm613_vm0, %v15159_v46, 0  ;;  %v15174_v35 = vmul.f32 %v15162_v2, %v15162_v2 }
  0x68   :  { %22329 = vst [vmem:[#allocation135_spill] sm:$0xff] %v15170_v15  ;;  %v15181_v29 = vand.u32 4294901760, %v15170_v15  ;;  %v498_v46 = vsel %vm422_vm6, %v460_v50, %v14525_v18  ;;  %vm211_vm8 = vcmp.eq.f32.partialorder %v173_v62, inf  ;;  %vm136_vm10 = vcmp.ne.f32.partialorder %v98_v24, %v98_v24 }
  0x69   :  { %22328 = vst [vmem:[#allocation134_spill] sm:$0xff] %v15166_v40  ;;  %22330 = vst [vmem:[#allocation136_spill] sm:$0xff] %v15174_v35  ;;  %v15184_v63 = vsel %vm613_vm0, %v592_v57, 2147483648  ;;  %859 = vmax.xlane.f32.xlu0 %v15166_v40  ;;  %v15191_v59 = vsel %vm613_vm0, %v15174_v35, 0  ;;  %v536_v2 = vand.u32 4294967288, %v498_v46  ;;  %vm423_vm11 = vcmp.lt.s32.totalorder %v14527_v19, 0  ;;  %12289 = vmatmul.mubr.f32.gmra.mrb[22].mxu0 %v14982_v52 }
  0x6a   :  { %22331 = vst [vmem:[#allocation137_spill] sm:$0xff] %v15184_v63  ;;  %22332 = vst [vmem:[#allocation138_spill] sm:$0xff] %v15191_v59  ;;  %v871_v4 = vshra.s32 %v15184_v63, 16  ;;  %v249_v13 = vsel %vm211_vm8, 3.4028235e+38, %v173_v62  ;;  %v15195_v15 = vand.u32 4294901760, %v15191_v59  ;;  %12291 = vmatprep.mubr.f32.mxu0 %v14991_v12 }
  0x6b   :  { %vm287_vm9 = vcmp.eq.f32.partialorder %v249_v13, -inf  ;;  %v575_v50 = vor.u32 %v15111_v43, %v536_v2  ;;  %v174_v40 = vsel %vm136_vm10, 0.0, %v98_v24  ;;  %v461_v62 = vxor.u32 2147483647, %v14527_v19 }
  0x6c   :  { %v15198_v57 = vcvt.s32.f32 %v871_v4  ;;  %v15201_v18 = vsel %vm287_vm9, -3.4028235e+38, %v249_v13  ;;  %vm212_vm12 = vcmp.eq.f32.partialorder %v174_v40, inf  ;;  %vm441_vm13 = vcmp.lt.s32.totalorder %v14872_v32, 0 }
  0x6d   :  { %22334 = vst [vmem:[#allocation140_spill] sm:$0xff] %v15201_v18  ;;  %v15206_v46 = vmul.f32 %v15201_v18, %v15201_v18  ;;  %v15213_v2 = vsel %vm613_vm0, %v575_v50, 2147483648  ;;  %v250_v13 = vsel %vm212_vm12, 3.4028235e+38, %v174_v40  ;;  %v479_v4 = vxor.u32 2147483647, %v14872_v32  ;;  %12292 = vmatmul.mubr.f32.gmra.mrb[24].mxu0 %v15009_v23 }
  0x6e   :  { %22333 = vst [vmem:[#allocation139_spill] sm:$0xff] %v15198_v57  ;;  %874 = vmax.xlane.f32.xlu0 %v15198_v57  ;;  %22336 = vst [vmem:[#allocation142_spill] sm:$0xff] %v15213_v2  ;;  %vm440_vm14 = vcmp.lt.s32.totalorder %v14859_v36, 0  ;;  %v616_v24 = vshra.s32 %v15213_v2, 16  ;;  %vm288_vm15 = vcmp.eq.f32.partialorder %v250_v13, -inf  ;;  %v499_v63 = vsel %vm423_vm11, %v461_v62, %v14527_v19  ;;  %12294 = vmatprep.mubr.f32.mxu0 %v15033_v30 }
  0x6f   :  { %22335 = vst [vmem:[#allocation141_spill] sm:$0xff] %v15206_v46  ;;  %v15220_v35 = vsel %vm613_vm0, %v15206_v46, 0  ;;  %v15228_v50 = vsel %vm288_vm15, -3.4028235e+38, %v250_v13  ;;  %v537_v40 = vand.u32 4294967288, %v499_v63  ;;  %v517_v59 = vsel %vm441_vm13, %v479_v4, %v14872_v32 }
  0x70   :  { %22337 = vst [vmem:[#allocation143_spill] sm:$0xff] %v15220_v35  ;;  %v15226_v57 = vand.u32 4294901760, %v15220_v35  ;;  %22339 = vst [vmem:[#allocation145_spill] sm:$0xff] %v15228_v50  ;;  %v15232_v2 = vcvt.s32.f32 %v616_v24  ;;  %v15236_v46 = vmul.f32 %v15228_v50, %v15228_v50  ;;  %v555_v12 = vand.u32 4294967288, %v517_v59 }
  0x71   :  { %v478_v18 = vxor.u32 2147483647, %v14859_v36  ;;  %v576_v62 = vor.u32 %v15111_v43, %v537_v40  ;;  %vm425_vm1 = vcmp.lt.s32.totalorder %v14552_v31, 0  ;;  %v463_v63 = vxor.u32 2147483647, %v14552_v31  ;;  %12295 = vmatmul.mubr.f32.gmra.mrb[26].mxu0 %v15043_v8 }
  0x72   :  { %22338 = vst [vmem:[#allocation144_spill] sm:$0xff] %v15226_v57  ;;  %22340 = vst [vmem:[#allocation146_spill] sm:$0xff] %v15232_v2  ;;  %vm424_vm2 = vcmp.lt.s32.totalorder %v14529_v20, 0  ;;  %619 = vmax.xlane.f32.xlu1 %v15232_v2  ;;  %v15247_v13 = vsel %vm613_vm0, %v15236_v46, 0  ;;  %v594_v59 = vor.u32 %v15111_v43, %v555_v12  ;;  %v462_v24 = vxor.u32 2147483647, %v14529_v20  ;;  %12297 = vmatprep.mubr.f32.mxu0 %v15064_v49 }
  0x73   :  { %22341 = vst [vmem:[#allocation147_spill] sm:$0xff] %v15236_v46  ;;  %22342 = vst [vmem:[#allocation148_spill] sm:$0xff] %v15247_v13  ;;  %v516_v4 = vsel %vm440_vm14, %v478_v18, %v14859_v36  ;;  %v15255_v40 = vand.u32 4294901760, %v15247_v13  ;;  %v15258_v32 = vsel %vm613_vm0, %v576_v62, 2147483648  ;;  %v501_v2 = vsel %vm425_vm1, %v463_v63, %v14552_v31 }
  0x74   :  { %v554_v19 = vand.u32 4294967288, %v516_v4  ;;  %v631_v46 = vshra.s32 %v15258_v32, 16  ;;  %v15264_v12 = vsel %vm613_vm0, %v594_v59, 2147483648  ;;  %v539_v35 = vand.u32 4294967288, %v501_v2 }
  0x75   :  { %22343 = vst [vmem:[#allocation149_spill] sm:$0xff] %v15255_v40  ;;  %22344 = vst [vmem:[#allocation150_spill] sm:$0xff] %v15264_v12  ;;  %v500_v18 = vsel %vm424_vm2, %v462_v24, %v14529_v20  ;;  %v901_v36 = vshra.s32 %v15264_v12, 16  ;;  %vm443_vm3 = vcmp.lt.s32.totalorder %v14912_v44, 0  ;;  %v481_v31 = vxor.u32 2147483647, %v14912_v44  ;;  %12298 = vmatmul.mubr.f32.gmra.mrb[28].mxu0 %v15078_v61 }
  0x76   :  { %v593_v62 = vor.u32 %v15111_v43, %v554_v19  ;;  %v538_v13 = vand.u32 4294967288, %v500_v18  ;;  %v15271_v63 = vcvt.s32.f32 %v631_v46  ;;  %v578_v4 = vor.u32 %v15111_v43, %v539_v35  ;;  %12300 = vmatprep.mubr.f32.mxu0 %v15091_v26 }
  0x77   :  { %vm442_vm4 = vcmp.lt.s32.totalorder %v14901_v33, 0  ;;  %v15276_v2 = vcvt.s32.f32 %v901_v36  ;;  %v480_v19 = vxor.u32 2147483647, %v14901_v33  ;;  %v519_v18 = vsel %vm443_vm3, %v481_v31, %v14912_v44 }
  0x78   :  { %22345 = vst [vmem:[#allocation151_spill] sm:$0xff] %v15271_v63  ;;  %v15279_v59 = vsel %vm613_vm0, %v593_v62, 2147483648  ;;  %v577_v24 = vor.u32 %v15111_v43, %v538_v13  ;;  %634 = vmax.xlane.f32.xlu1 %v15271_v63  ;;  %v15287_v35 = vsel %vm613_vm0, %v578_v4, 2147483648  ;;  %vm427_vm5 = vcmp.lt.s32.totalorder %v14602_v56, 0 }
  0x79   :  { %22346 = vst [vmem:[#allocation152_spill] sm:$0xff] %v15279_v59  ;;  %v886_v46 = vshra.s32 %v15279_v59, 16  ;;  %22347 = vst [vmem:[#allocation153_spill] sm:$0xff] %v15287_v35  ;;  %v661_v36 = vshra.s32 %v15287_v35, 16  ;;  %v557_v62 = vand.u32 4294967288, %v519_v18  ;;  %v518_v20 = vsel %vm442_vm4, %v480_v19, %v14901_v33  ;;  %12301 = vmatmul.mubr.f32.gmra.mrb[30].mxu0 %v15117_v34 }
  0x7a   :  { %v15294_v13 = vsel %vm613_vm0, %v577_v24, 2147483648  ;;  %v556_v4 = vand.u32 4294967288, %v518_v20  ;;  %v465_v12 = vxor.u32 2147483647, %v14602_v56  ;;  %vm426_vm6 = vcmp.lt.s32.totalorder %v14583_v48, 0  ;;  %12303 = vmatprep.mubr.f32.mxu0 %v15128_v7 }
  0x7b   :  { %v15297_v63 = vcvt.s32.f32 %v886_v46  ;;  %v646_v59 = vshra.s32 %v15294_v13, 16  ;;  %v15301_v31 = vcvt.s32.f32 %v661_v36  ;;  %v596_v44 = vor.u32 %v15111_v43, %v557_v62 }
  0x7c   :  { %v464_v35 = vxor.u32 2147483647, %v14583_v48  ;;  %904 = vmax.xlane.f32.xlu1 %v15276_v2  ;;  %v595_v19 = vor.u32 %v15111_v43, %v556_v4  ;;  %v503_v20 = vsel %vm427_vm5, %v465_v12, %v14602_v56  ;;  %vm445_vm7 = vcmp.lt.s32.totalorder %v14954_v11, 0 }
  0x7d   :  { %22348 = vst [vmem:[#allocation154_spill] sm:$0xff] %v15301_v31  ;;  %v15308_v24 = vcvt.s32.f32 %v646_v59  ;;  %889 = vmax.xlane.f32.xlu0 %v15297_v63  ;;  %v15318_v46 = vsel %vm613_vm0, %v596_v44, 2147483648  ;;  %v541_v18 = vand.u32 4294967288, %v503_v20  ;;  %v483_v59 = vxor.u32 2147483647, %v14954_v11  ;;  %12304 = vmatmul.mubr.f32.gmra.mrb[32].mxu0 %v15143_v55 }
  0x7e   :  { %v502_v36 = vsel %vm426_vm6, %v464_v35, %v14583_v48  ;;  %v931_v62 = vshra.s32 %v15318_v46, 16  ;;  %v15324_v4 = vsel %vm613_vm0, %v595_v19, 2147483648  ;;  %vm444_vm8 = vcmp.lt.s32.totalorder %v14929_v41, 0  ;;  %12306 = vmatprep.mubr.f32.mxu0 %v15181_v29 }
  0x7f   :  { %22349 = vst [vmem:[#allocation155_spill] sm:$0xff] %v15308_v24  ;;  %22350 = vst [vmem:[#allocation156_spill] sm:$0xff] %v15324_v4  ;;  %v540_v12 = vand.u32 4294967288, %v502_v36  ;;  %v916_v56 = vshra.s32 %v15324_v4, 16  ;;  %v580_v33 = vor.u32 %v15111_v43, %v541_v18  ;;  %v521_v44 = vsel %vm445_vm7, %v483_v59, %v14954_v11 }
  0x80   :  { %v482_v20 = vxor.u32 2147483647, %v14929_v41  ;;  %664 = vmax.xlane.f32.xlu1 %v15301_v31  ;;  %v15333_v35 = vcvt.s32.f32 %v931_v62  ;;  %v559_v48 = vand.u32 4294967288, %v521_v44  ;;  %vm429_vm9 = vcmp.lt.s32.totalorder %v14638_v16, 0 }
  0x81   :  { %v579_v19 = vor.u32 %v15111_v43, %v540_v12  ;;  %649 = vmax.xlane.f32.xlu0 %v15308_v24  ;;  %v15339_v18 = vcvt.s32.f32 %v916_v56  ;;  %v15342_v36 = vsel %vm613_vm0, %v580_v33, 2147483648  ;;  %v467_v11 = vxor.u32 2147483647, %v14638_v16  ;;  %12307 = vmatmul.mubr.f32.gmra.mrb[34].mxu0 %v15195_v15 }
  0x82   :  { %22351 = vst [vmem:[#allocation157_spill] sm:$0xff] %v15333_v35  ;;  %22353 = vst [vmem:[#allocation159_spill] sm:$0xff] %v15342_v36  ;;  %v520_v59 = vsel %vm444_vm8, %v482_v20, %v14929_v41  ;;  %v691_v62 = vshra.s32 %v15342_v36, 16  ;;  %v598_v44 = vor.u32 %v15111_v43, %v559_v48  ;;  %vm428_vm10 = vcmp.lt.s32.totalorder %v14619_v3, 0  ;;  %12309 = vmatprep.mubr.f32.mxu0 %v15226_v57 }
  0x83   :  { %22352 = vst [vmem:[#allocation158_spill] sm:$0xff] %v15339_v18  ;;  %v15348_v12 = vsel %vm613_vm0, %v579_v19, 2147483648  ;;  %v558_v31 = vand.u32 4294967288, %v520_v59  ;;  %v505_v56 = vsel %vm429_vm9, %v467_v11, %v14638_v16  ;;  %v466_v33 = vxor.u32 2147483647, %v14619_v3 }
  0x84   :  { %22354 = vst [vmem:[#allocation160_spill] sm:$0xff] %v15348_v12  ;;  %v676_v4 = vshra.s32 %v15348_v12, 16  ;;  %934 = vmax.xlane.f32.xlu1 %v15333_v35  ;;  %v15357_v20 = vcvt.s32.f32 %v691_v62  ;;  %v15360_v19 = vsel %vm613_vm0, %v598_v44, 2147483648  ;;  %v543_v59 = vand.u32 4294967288, %v505_v56 }
  0x85   :  { %22356 = vst [vmem:[#allocation162_spill] sm:$0xff] %v15360_v19  ;;  %v597_v48 = vor.u32 %v15111_v43, %v558_v31  ;;  %919 = vmax.xlane.f32.xlu0 %v15339_v18  ;;  %v961_v16 = vshra.s32 %v15360_v19, 16  ;;  %v504_v41 = vsel %vm428_vm10, %v466_v33, %v14619_v3  ;;  %vm447_vm11 = vcmp.lt.s32.totalorder %v14988_v51, 0  ;;  %12310 = vmatmul.mubr.f32.gmra.mrb[36].mxu0 %v15255_v40 }
  0x86   :  { %22355 = vst [vmem:[#allocation161_spill] sm:$0xff] %v15357_v20  ;;  %v15365_v11 = vcvt.s32.f32 %v676_v4  ;;  %v582_v62 = vor.u32 %v15111_v43, %v543_v59  ;;  %v542_v44 = vand.u32 4294967288, %v504_v41  ;;  %v485_v56 = vxor.u32 2147483647, %v14988_v51  ;;  %12314 = vmatprep.mubr.f32.mxu0 %v14565_v37 }
  0x87   :  { %v15370_v35 = vsel %vm613_vm0, %v597_v48, 2147483648  ;;  %v15373_v12 = vcvt.s32.f32 %v961_v16  ;;  %vm446_vm12 = vcmp.lt.s32.totalorder %v14963_v45, 0  ;;  %v484_v41 = vxor.u32 2147483647, %v14963_v45 }
  0x88   :  { %22357 = vst [vmem:[#allocation163_spill] sm:$0xff] %v15365_v11  ;;  %22358 = vst [vmem:[#allocation164_spill] sm:$0xff] %v15370_v35  ;;  %v946_v31 = vshra.s32 %v15370_v35, 16  ;;  %694 = vmax.xlane.f32.xlu1 %v15357_v20  ;;  %v15381_v4 = vsel %vm613_vm0, %v582_v62, 2147483648  ;;  %v581_v33 = vor.u32 %v15111_v43, %v542_v44  ;;  %v523_v48 = vsel %vm447_vm11, %v485_v56, %v14988_v51 }
  0x89   :  { %22359 = vst [vmem:[#allocation165_spill] sm:$0xff] %v15373_v12  ;;  %22360 = vst [vmem:[#allocation166_spill] sm:$0xff] %v15381_v4  ;;  %679 = vmax.xlane.f32.xlu0 %v15365_v11  ;;  %v721_v16 = vshra.s32 %v15381_v4, 16  ;;  %v561_v62 = vand.u32 4294967288, %v523_v48  ;;  %v522_v44 = vsel %vm446_vm12, %v484_v41, %v14963_v45  ;;  %vm431_vm13 = vcmp.lt.s32.totalorder %v14684_v60, 0  ;;  %12315 = vmatmul.mubr.f32.vlgmr.msra.gmra.mrb[0].mxu0 %v14568_v38 }
  0x8a   :  { %v15390_v59 = vcvt.s32.f32 %v946_v31  ;;  %v15393_v3 = vsel %vm613_vm0, %v581_v33, 2147483648  ;;  %v560_v19 = vand.u32 4294967288, %v522_v44  ;;  %v469_v56 = vxor.u32 2147483647, %v14684_v60  ;;  %12372 = vmatpush3.msra.mxu0 %v22267_v27  ;;  %12317 = vmatprep.mubr.f32.mxu0 %v14571_v39 }
  0x8b   :  { %22362 = vst [vmem:[#allocation168_spill] sm:$0xff] %v15393_v3  ;;  %v15396_v20 = vcvt.s32.f32 %v721_v16  ;;  %v706_v35 = vshra.s32 %v15393_v3, 16  ;;  %v600_v31 = vor.u32 %v15111_v43, %v561_v62  ;;  %vm430_vm14 = vcmp.lt.s32.totalorder %v14664_v42, 0  ;;  %12430 = vmatprep.subr.mxu0 %v22263_v9  ;;  %v22399_v3 = vld [vmem:[#allocation51_spill] sm:$0xff] }
  0x8c   :  { %22361 = vst [vmem:[#allocation167_spill] sm:$0xff] %v15390_v59  ;;  %964 = vmax.xlane.f32.xlu1 %v15373_v12  ;;  %v468_v33 = vxor.u32 2147483647, %v14664_v42  ;;  %v599_v16 = vor.u32 %v15111_v43, %v560_v19  ;;  %v507_v62 = vsel %vm431_vm13, %v469_v56, %v14684_v60  ;;  %vm449_vm15 = vcmp.lt.s32.totalorder %v15015_v1, 0 }
  0x8d   :  { %22363 = vst [vmem:[#allocation169_spill] sm:$0xff] %v15396_v20  ;;  %v15408_v41 = vcvt.s32.f32 %v706_v35  ;;  %949 = vmax.xlane.f32.xlu0 %v15390_v59  ;;  %v15413_v48 = vsel %vm613_vm0, %v600_v31, 2147483648  ;;  %v545_v45 = vand.u32 4294967288, %v507_v62  ;;  %12318 = vmatmul.mubr.f32.gmra.mrb[2].mxu0 %v14581_v47  ;;  %v487_v56 = vxor.u32 2147483647, %v15015_v1 }
  0x8e   :  { %22365 = vst [vmem:[#allocation171_spill] sm:$0xff] %v15413_v48  ;;  %v506_v44 = vsel %vm430_vm14, %v468_v33, %v14664_v42  ;;  %v991_v51 = vshra.s32 %v15413_v48, 16  ;;  %v15421_v35 = vsel %vm613_vm0, %v599_v16, 2147483648  ;;  %vm448_vm1 = vcmp.lt.s32.totalorder %v15005_v21, 0  ;;  %12320 = vmatprep.mubr.f32.mxu0 %v14626_v6 }
  0x8f   :  { %22364 = vst [vmem:[#allocation170_spill] sm:$0xff] %v15408_v41  ;;  %22366 = vst [vmem:[#allocation172_spill] sm:$0xff] %v15421_v35  ;;  %v544_v19 = vand.u32 4294967288, %v506_v44  ;;  %v976_v31 = vshra.s32 %v15421_v35, 16  ;;  %v486_v33 = vxor.u32 2147483647, %v15005_v21  ;;  %v584_v16 = vor.u32 %v15111_v43, %v545_v45 }
  0x90   :  { %724 = vmax.xlane.f32.xlu1 %v15396_v20  ;;  %v15430_v60 = vcvt.s32.f32 %v991_v51  ;;  %v525_v42 = vsel %vm449_vm15, %v487_v56, %v15015_v1  ;;  %vm433_vm2 = vcmp.lt.s32.totalorder %v14719_v5, 0  ;;  %v471_v56 = vxor.u32 2147483647, %v14719_v5 }
  0x91   :  { %v583_v62 = vor.u32 %v15111_v43, %v544_v19  ;;  %709 = vmax.xlane.f32.xlu0 %v15408_v41  ;;  %v15435_v44 = vcvt.s32.f32 %v976_v31  ;;  %v524_v20 = vsel %vm448_vm1, %v486_v33, %v15005_v21  ;;  %v15442_v35 = vsel %vm613_vm0, %v584_v16, 2147483648  ;;  %12321 = vmatmul.mubr.f32.gmra.mrb[4].mxu0 %v14642_v17 }
  0x92   :  { %22367 = vst [vmem:[#allocation173_spill] sm:$0xff] %v15430_v60  ;;  %22369 = vst [vmem:[#allocation175_spill] sm:$0xff] %v15442_v35  ;;  %v563_v59 = vand.u32 4294967288, %v525_v42  ;;  %v562_v45 = vand.u32 4294967288, %v524_v20  ;;  %v751_v19 = vshra.s32 %v15442_v35, 16  ;;  %12323 = vmatprep.mubr.f32.mxu0 %v14653_v28  ;;  %vm432_vm3 = vcmp.lt.s32.totalorder %v14710_v54, 0 }
  0x93   :  { %22368 = vst [vmem:[#allocation174_spill] sm:$0xff] %v15435_v44  ;;  %v15445_v51 = vsel %vm613_vm0, %v583_v62, 2147483648  ;;  %v470_v42 = vxor.u32 2147483647, %v14710_v54  ;;  %v509_v21 = vsel %vm433_vm2, %v471_v56, %v14719_v5  ;;  %vm451_vm4 = vcmp.lt.s32.totalorder %v15049_v14, 0  ;;  %v22388_v35 = vld [vmem:[#allocation42_spill] sm:$0xff] }
  0x94   :  { %22370 = vst [vmem:[#allocation176_spill] sm:$0xff] %v15445_v51  ;;  %994 = vmax.xlane.f32.xlu1 %v15430_v60  ;;  %v736_v31 = vshra.s32 %v15445_v51, 16  ;;  %v602_v33 = vor.u32 %v15111_v43, %v563_v59  ;;  %v601_v16 = vor.u32 %v15111_v43, %v562_v45  ;;  %v15459_v20 = vcvt.s32.f32 %v751_v19  ;;  %v22382_v51 = vld [vmem:[#allocation44_spill] sm:$0xff] }
  0x95   :  { %979 = vmax.xlane.f32.xlu0 %v15435_v44  ;;  %v547_v59 = vand.u32 4294967288, %v509_v21  ;;  %v508_v45 = vsel %vm432_vm3, %v470_v42, %v14710_v54  ;;  %12324 = vmatmul.mubr.f32.gmra.mrb[6].mxu0 %v14680_v58  ;;  %v22375_v21 = vld [vmem:[#allocation105_spill] sm:$0xff]  ;;  %vm435_vm6 = vcmp.lt.s32.totalorder %v22382_v51, 0  ;;  %vm459_vm1 = vcmp.lt.s32.totalorder %v15228_v50, 0 }
  0x96   :  { %22371 = vst [vmem:[#allocation177_spill] sm:$0xff] %v15459_v20  ;;  %v15461_v62 = vcvt.s32.f32 %v736_v31  ;;  %v15465_v1 = vsel %vm613_vm0, %v602_v33, 2147483648  ;;  %v15468_v60 = vsel %vm613_vm0, %v601_v16, 2147483648  ;;  %v546_v44 = vand.u32 4294967288, %v508_v45  ;;  %12326 = vmatprep.mubr.f32.mxu0 %v14697_v25 }
  0x97   :  { %22373 = vst [vmem:[#allocation179_spill] sm:$0xff] %v15465_v1  ;;  %22374 = vst [vmem:[#allocation180_spill] sm:$0xff] %v15468_v60  ;;  %v1021_v19 = vshra.s32 %v15465_v1, 16  ;;  %v1006_v31 = vshra.s32 %v15468_v60, 16  ;;  %v586_v56 = vor.u32 %v15111_v43, %v547_v59  ;;  %v489_v33 = vxor.u32 2147483647, %v15049_v14 }
  0x98   :  { %22372 = vst [vmem:[#allocation178_spill] sm:$0xff] %v15461_v62  ;;  %754 = vmax.xlane.f32.xlu1 %v15459_v20  ;;  %vm450_vm5 = vcmp.lt.s32.totalorder %v22375_v21, 0  ;;  %v585_v54 = vor.u32 %v15111_v43, %v546_v44  ;;  %v488_v45 = vxor.u32 2147483647, %v22375_v21  ;;  %v22379_v20 = vld [vmem:[#allocation34_spill] sm:$0xff]  ;;  %v22381_v44 = vld [vmem:[#allocation40_spill] sm:$0xff] }
  0x99   :  { %739 = vmax.xlane.f32.xlu0 %v15461_v62  ;;  %v15481_v16 = vcvt.s32.f32 %v1021_v19  ;;  %v15483_v42 = vcvt.s32.f32 %v1006_v31  ;;  %v15488_v5 = vsel %vm613_vm0, %v586_v56, 2147483648  ;;  %v527_v59 = vsel %vm451_vm4, %v489_v33, %v15049_v14  ;;  %12327 = vmatmul.mubr.f32.gmra.mrb[8].mxu0 %v22379_v20 }
  0x9a   :  { %22378 = vst [vmem:[#allocation183_spill] sm:$0xff] %v15488_v5  ;;  %v781_v60 = vshra.s32 %v15488_v5, 16  ;;  %v15495_v19 = vsel %vm613_vm0, %v585_v54, 2147483648  ;;  %v565_v31 = vand.u32 4294967288, %v527_v59  ;;  %v526_v62 = vsel %vm450_vm5, %v488_v45, %v22375_v21  ;;  %12329 = vmatprep.mubr.f32.mxu0 %v22381_v44  ;;  %v22384_v54 = vld [vmem:[#allocation41_spill] sm:$0xff]  ;;  %v22385_v45 = vld [vmem:[#allocation54_spill] sm:$0xff] }
  0x9b   :  { %22376 = vst [vmem:[#allocation181_spill] sm:$0xff] %v15481_v16  ;;  %22377 = vst [vmem:[#allocation182_spill] sm:$0xff] %v15483_v42  ;;  %v766_v1 = vshra.s32 %v15495_v19, 16  ;;  %v564_v56 = vand.u32 4294967288, %v526_v62  ;;  %v473_v33 = vxor.u32 2147483647, %v22382_v51 }
  0x9c   :  { %1024 = vmax.xlane.f32.xlu1 %v15481_v16  ;;  %22380 = vst [vmem:[#allocation34_spill] sm:$0xff] %v15495_v19  ;;  %v15503_v14 = vcvt.s32.f32 %v781_v60  ;;  %v604_v16 = vor.u32 %v15111_v43, %v565_v31  ;;  %vm434_vm7 = vcmp.lt.s32.totalorder %v22384_v54, 0  ;;  %v472_v59 = vxor.u32 2147483647, %v22384_v54  ;;  %v22386_v21 = vld [vmem:[#allocation52_spill] sm:$0xff]  ;;  %v22389_v60 = vld [vmem:[#allocation57_spill] sm:$0xff] }
  0x9d   :  { %1009 = vmax.xlane.f32.xlu0 %v15483_v42  ;;  %v15510_v5 = vsub.f32 %v22386_v21, %v22385_v45  ;;  %v15512_v19 = vcvt.s32.f32 %v766_v1  ;;  %v603_v62 = vor.u32 %v15111_v43, %v564_v56  ;;  %v511_v41 = vsel %vm435_vm6, %v473_v33, %v22382_v51  ;;  %12330 = vmatmul.mubr.f32.gmra.mrb[10].mxu0 %v22388_v35  ;;  %v22390_v42 = vld [vmem:[#allocation56_spill] sm:$0xff]  ;;  %v22392_v1 = vld [vmem:[#allocation47_spill] sm:$0xff]  ;;  %v22394_v45 = vld [vmem:[#allocation117_spill] sm:$0xff] }
  0x9e   :  { %22383 = vst [vmem:[#allocation40_spill] sm:$0xff] %v15503_v14  ;;  %v15519_v48 = vsub.f32 %v22390_v42, %v22389_v60  ;;  %v15523_v31 = vsel %vm613_vm0, %v604_v16, 2147483648  ;;  %v549_v12 = vand.u32 4294967288, %v511_v41  ;;  %v510_v21 = vsel %vm434_vm7, %v472_v59, %v22384_v54  ;;  %12332 = vmatprep.mubr.f32.mxu0 %v22392_v1  ;;  %v22395_v60 = vld [vmem:[#allocation112_spill] sm:$0xff]  ;;  %v22396_v59 = vld [vmem:[#allocation62_spill] sm:$0xff] }
  0x9f   :  { %22387 = vst [vmem:[#allocation52_spill] sm:$0xff] %v15512_v19  ;;  %22391 = vst [vmem:[#allocation42_spill] sm:$0xff] %v15523_v31  ;;  %v1051_v56 = vshra.s32 %v15523_v31, 16  ;;  %v15529_v33 = vsel %vm613_vm0, %v603_v62, 2147483648  ;;  %v548_v51 = vand.u32 4294967288, %v510_v21  ;;  %vm453_vm8 = vcmp.lt.s32.totalorder %v22394_v45, 0 }
  0xa0   :  { %784 = vmax.xlane.f32.xlu1 %v15503_v14  ;;  %22393 = vst [vmem:[#allocation56_spill] sm:$0xff] %v15529_v33  ;;  %v1036_v42 = vshra.s32 %v15529_v33, 16  ;;  %v588_v16 = vor.u32 %v15111_v43, %v549_v12  ;;  %v491_v41 = vxor.u32 2147483647, %v22394_v45  ;;  %vm452_vm9 = vcmp.lt.s32.totalorder %v22395_v60, 0  ;;  %v22397_v54 = vld [vmem:[#allocation60_spill] sm:$0xff] }
  0xa1   :  { %769 = vmax.xlane.f32.xlu0 %v15512_v19  ;;  %v15539_v14 = vsub.f32 %v22397_v54, %v22396_v59  ;;  %v15541_v31 = vcvt.s32.f32 %v1051_v56  ;;  %v587_v62 = vor.u32 %v15111_v43, %v548_v51  ;;  %v490_v21 = vxor.u32 2147483647, %v22395_v60  ;;  %12333 = vmatmul.mubr.f32.gmra.mrb[12].mxu0 %v22399_v3  ;;  %v22400_v19 = vld [vmem:[#allocation66_spill] sm:$0xff] }
  0xa2   :  { %v15548_v33 = vsub.f32 %v22400_v19, %v14876_v22  ;;  %v15550_v12 = vcvt.s32.f32 %v1036_v42  ;;  %v15553_v11 = vsel %vm613_vm0, %v588_v16, 2147483648  ;;  %v529_v54 = vsel %vm453_vm8, %v491_v41, %v22394_v45  ;;  %12335 = vmatprep.mubr.f32.mxu0 %v15510_v5  ;;  %v22404_v22 = vld [vmem:[#allocation53_spill] sm:$0xff] }
  0xa3   :  { %22398 = vst [vmem:[#allocation47_spill] sm:$0xff] %v15541_v31  ;;  %22402 = vst [vmem:[#allocation51_spill] sm:$0xff] %v15553_v11  ;;  %v811_v51 = vshra.s32 %v15553_v11, 16  ;;  %v15560_v56 = vsel %vm613_vm0, %v587_v62, 2147483648  ;;  %v567_v59 = vand.u32 4294967288, %v529_v54  ;;  %v528_v19 = vsel %vm452_vm9, %v490_v21, %v22395_v60  ;;  %v22406_v11 = vld [vmem:[#allocation49_spill] sm:$0xff] }
  0xa4   :  { %22401 = vst [vmem:[#allocation60_spill] sm:$0xff] %v15550_v12  ;;  %1054 = vmax.xlane.f32.xlu1 %v15541_v31  ;;  %22403 = vst [vmem:[#allocation66_spill] sm:$0xff] %v15560_v56  ;;  %v796_v42 = vshra.s32 %v15560_v56, 16  ;;  %v566_v16 = vand.u32 4294967288, %v528_v19  ;;  %vm437_vm10 = vcmp.lt.s32.totalorder %v22404_v22, 0  ;;  %vm436_vm11 = vcmp.lt.s32.totalorder %v22406_v11, 0 }
  0xa5   :  { %1039 = vmax.xlane.f32.xlu0 %v15550_v12  ;;  %v475_v41 = vxor.u32 2147483647, %v22404_v22  ;;  %v15567_v45 = vcvt.s32.f32 %v811_v51  ;;  %v606_v31 = vor.u32 %v15111_v43, %v567_v59  ;;  %v474_v62 = vxor.u32 2147483647, %v22406_v11  ;;  %12336 = vmatmul.mubr.f32.gmra.mrb[14].mxu0 %v15519_v48  ;;  %v22407_v21 = vld [vmem:[#allocation71_spill] sm:$0xff]  ;;  %v22408_v54 = vld [vmem:[#allocation69_spill] sm:$0xff] }
  0xa6   :  { %v15575_v60 = vsub.f32 %v22408_v54, %v22407_v21  ;;  %v15577_v12 = vcvt.s32.f32 %v796_v42  ;;  %v605_v19 = vor.u32 %v15111_v43, %v566_v16  ;;  %12338 = vmatprep.mubr.f32.mxu0 %v15539_v14  ;;  %v22410_v59 = vld [vmem:[#allocation72_spill] sm:$0xff] }
  0xa7   :  { %22405 = vst [vmem:[#allocation184_spill] sm:$0xff] %v15567_v45  ;;  %v513_v56 = vsel %vm437_vm10, %v475_v41, %v22404_v22  ;;  %v15584_v51 = vsub.f32 %v22410_v59, %v14905_v10  ;;  %v15588_v4 = vsel %vm613_vm0, %v606_v31, 2147483648  ;;  %v512_v54 = vsel %vm436_vm11, %v474_v62, %v22406_v11  ;;  %v22413_v22 = vld [vmem:[#allocation125_spill] sm:$0xff]  ;;  %v22414_v21 = vld [vmem:[#allocation120_spill] sm:$0xff] }
  0xa8   :  { %22409 = vst [vmem:[#allocation69_spill] sm:$0xff] %v15577_v12  ;;  %814 = vmax.xlane.f32.xlu1 %v15567_v45  ;;  %22411 = vst [vmem:[#allocation72_spill] sm:$0xff] %v15588_v4  ;;  %v551_v18 = vand.u32 4294967288, %v513_v56  ;;  %v1081_v42 = vshra.s32 %v15588_v4, 16  ;;  %v15594_v16 = vsel %vm613_vm0, %v605_v19, 2147483648  ;;  %v550_v41 = vand.u32 4294967288, %v512_v54 }
  0xa9   :  { %799 = vmax.xlane.f32.xlu0 %v15577_v12  ;;  %22412 = vst [vmem:[#allocation185_spill] sm:$0xff] %v15594_v16  ;;  %vm455_vm12 = vcmp.lt.s32.totalorder %v22413_v22, 0  ;;  %v1066_v59 = vshra.s32 %v15594_v16, 16  ;;  %v493_v31 = vxor.u32 2147483647, %v22413_v22  ;;  %vm454_vm13 = vcmp.lt.s32.totalorder %v22414_v21, 0  ;;  %12339 = vmatmul.mubr.f32.gmra.mrb[16].mxu0 %v15548_v33 }
  0xaa   :  { %v590_v10 = vor.u32 %v15111_v43, %v551_v18  ;;  %v22415_v56 = vld [vmem:[#allocation77_spill] sm:$0xff]  ;;  %v15606_v11 = vcvt.s32.f32 %v1081_v42  ;;  %v589_v19 = vor.u32 %v15111_v43, %v550_v41  ;;  %v492_v54 = vxor.u32 2147483647, %v22414_v21  ;;  %12341 = vmatprep.mubr.f32.mxu0 %v15575_v60  ;;  %v22417_v12 = vld [vmem:[#allocation83_spill] sm:$0xff] }
  0xab   :  { %v15604_v62 = vsub.f32 %v22415_v56, %v14927_v53  ;;  %v22418_v18 = vld [vmem:[#allocation81_spill] sm:$0xff]  ;;  %v15615_v16 = vcvt.s32.f32 %v1066_v59  ;;  %v531_v56 = vsel %vm455_vm12, %v493_v31, %v22413_v22 }
  0xac   :  { %22416 = vst [vmem:[#allocation77_spill] sm:$0xff] %v15606_v11  ;;  %v15613_v45 = vsub.f32 %v22418_v18, %v22417_v12  ;;  %v15618_v4 = vsel %vm613_vm0, %v590_v10, 2147483648  ;;  %1084 = vmax.xlane.f32.xlu1 %v15606_v11  ;;  %v15624_v41 = vsel %vm613_vm0, %v589_v19, 2147483648  ;;  %v569_v53 = vand.u32 4294967288, %v531_v56  ;;  %v22422_v12 = vld [vmem:[#allocation133_spill] sm:$0xff]  ;;  %v22424_v19 = vld [vmem:[#allocation131_spill] sm:$0xff] }
  0xad   :  { %22419 = vst [vmem:[#allocation81_spill] sm:$0xff] %v15615_v16  ;;  %22420 = vst [vmem:[#allocation186_spill] sm:$0xff] %v15618_v4  ;;  %v841_v42 = vshra.s32 %v15618_v4, 16  ;;  %v530_v24 = vsel %vm454_vm13, %v492_v54, %v22414_v21  ;;  %1069 = vmax.xlane.f32.xlu0 %v15615_v16  ;;  %v826_v59 = vshra.s32 %v15624_v41, 16  ;;  %vm457_vm14 = vcmp.lt.s32.totalorder %v22422_v12, 0  ;;  %12342 = vmatmul.mubr.f32.gmra.mrb[18].mxu0 %v15584_v51  ;;  %v22425_v54 = vld [vmem:[#allocation84_spill] sm:$0xff] }
  0xae   :  { %22421 = vst [vmem:[#allocation187_spill] sm:$0xff] %v15624_v41  ;;  %v568_v18 = vand.u32 4294967288, %v530_v24  ;;  %v495_v10 = vxor.u32 2147483647, %v22422_v12  ;;  %v608_v22 = vor.u32 %v15111_v43, %v569_v53  ;;  %vm456_vm15 = vcmp.lt.s32.totalorder %v22424_v19, 0  ;;  %12344 = vmatprep.mubr.f32.mxu0 %v15604_v62 }
  0xaf   :  { %v15632_v31 = vcvt.s32.f32 %v841_v42  ;;  %v494_v56 = vxor.u32 2147483647, %v22424_v19  ;;  %v15640_v21 = vsub.f32 %v22425_v54, %v14957_v0  ;;  %v15642_v24 = vcvt.s32.f32 %v826_v59  ;;  %v22427_v42 = vld [vmem:[#allocation90_spill] sm:$0xff] }
  0xb0   :  { %v607_v16 = vor.u32 %v15111_v43, %v568_v18  ;;  %v533_v11 = vsel %vm457_vm14, %v495_v10, %v22422_v12  ;;  %v15648_v41 = vsub.f32 %v22427_v42, %v14982_v52  ;;  %v15652_v53 = vsel %vm613_vm0, %v608_v22, 2147483648  ;;  %v22428_v42 = vld [vmem:[#allocation140_spill] sm:$0xff] }
  0xb1   :  { %22423 = vst [vmem:[#allocation188_spill] sm:$0xff] %v15632_v31  ;;  %22426 = vst [vmem:[#allocation84_spill] sm:$0xff] %v15642_v24  ;;  %844 = vmax.xlane.f32.xlu1 %v15632_v31  ;;  %v571_v4 = vand.u32 4294967288, %v533_v11  ;;  %v532_v36 = vsel %vm456_vm15, %v494_v56, %v22424_v19  ;;  %829 = vmax.xlane.f32.xlu0 %v15642_v24  ;;  %v1111_v59 = vshra.s32 %v15652_v53, 16  ;;  %v497_v11 = vxor.u32 2147483647, %v15228_v50 }
  0xb2   :  { %v15658_v18 = vsel %vm613_vm0, %v607_v16, 2147483648  ;;  %v570_v10 = vand.u32 4294967288, %v532_v36  ;;  %12345 = vmatmul.mubr.f32.gmra.mrb[20].mxu0 %v15613_v45  ;;  %vm458_vm2 = vcmp.lt.s32.totalorder %v22428_v42, 0  ;;  %v22429_v56 = vld [vmem:[#allocation94_spill] sm:$0xff]  ;;  %v22430_v19 = vld [vmem:[#allocation92_spill] sm:$0xff] }
  0xb3   :  { %v1096_v54 = vshra.s32 %v15658_v18, 16  ;;  %v610_v22 = vor.u32 %v15111_v43, %v571_v4  ;;  %12347 = vmatprep.mubr.f32.mxu0 %v15640_v21  ;;  %v15669_v12 = vsub.f32 %v22430_v19, %v22429_v56  ;;  %v15671_v16 = vcvt.s32.f32 %v1111_v59 }
  0xb4   :  { %v609_v36 = vor.u32 %v15111_v43, %v570_v10  ;;  %v496_v52 = vxor.u32 2147483647, %v22428_v42  ;;  %v535_v24 = vsel %vm459_vm1, %v497_v11, %v15228_v50  ;;  %v22432_v10 = vld [vmem:[#allocation96_spill] sm:$0xff]  ;;  %v22433_v50 = vld [vmem:[#allocation102_spill] sm:$0xff] }
  0xb5   :  { %v15675_v0 = vcvt.s32.f32 %v1096_v54  ;;  %v15678_v4 = vsel %vm613_vm0, %v610_v22, 2147483648  ;;  %1114 = vmax.xlane.f32.xlu1 %v15671_v16  ;;  %v573_v59 = vand.u32 4294967288, %v535_v24  ;;  %v15690_v54 = vsub.f32 %v22432_v10, %v15009_v23 }
  0xb6   :  { %v1141_v31 = vshra.s32 %v15678_v4, 16  ;;  %v15684_v19 = vsel %vm613_vm0, %v609_v36, 2147483648  ;;  %v534_v56 = vsel %vm458_vm2, %v496_v52, %v22428_v42  ;;  %12348 = vmatmul.mubr.f32.gmra.mrb[22].mxu0 %v15648_v41  ;;  %v15697_v36 = vsub.f32 %v22433_v50, %v15033_v30 }
  0xb7   :  { %22431 = vst [vmem:[#allocation90_spill] sm:$0xff] %v15675_v0  ;;  %1099 = vmax.xlane.f32.xlu0 %v15675_v0  ;;  %v1126_v22 = vshra.s32 %v15684_v19, 16  ;;  %v572_v11 = vand.u32 4294967288, %v534_v56  ;;  %12350 = vmatprep.mubr.f32.mxu0 %v15669_v12  ;;  %v612_v52 = vor.u32 %v15111_v43, %v573_v59  ;;  %v22434_v56 = vld [vmem:[#allocation104_spill] sm:$0xff] }
  0xb8   :  { %v15699_v24 = vcvt.s32.f32 %v1141_v31  ;;  %v15712_v0 = vsub.f32 %v22434_v56, %v15043_v8  ;;  %v22436_v56 = vld [vmem:[#allocation113_spill] sm:$0xff] }
  0xb9   :  { %v15702_v42 = vcvt.s32.f32 %v1126_v22  ;;  %v611_v10 = vor.u32 %v15111_v43, %v572_v11  ;;  %v15707_v23 = vsel %vm613_vm0, %v612_v52, 2147483648  ;;  %v22435_v43 = vld [vmem:[#allocation109_spill] sm:$0xff]  ;;  %v15732_v8 = vsub.f32 %v22436_v56, %v15078_v61  ;;  %v22439_v56 = vld [vmem:[#allocation124_spill] sm:$0xff] }
  0xba   :  { %1144 = vmax.xlane.f32.xlu1 %v15699_v24  ;;  %12351 = vmatmul.mubr.f32.gmra.mrb[24].mxu0 %v15690_v54  ;;  %v1171_v50 = vshra.s32 %v15707_v23, 16  ;;  %v15722_v59 = vsub.f32 %v22435_v43, %v15064_v49  ;;  %v15749_v61 = vsub.f32 %v22439_v56, %v15128_v7  ;;  %v22440_v49 = vld [vmem:[#allocation128_spill] sm:$0xff]  ;;  %v22443_v56 = vld [vmem:[#allocation143_spill] sm:$0xff] }
  0xbb   :  { %1129 = vmax.xlane.f32.xlu0 %v15702_v42  ;;  %v15717_v31 = vsel %vm613_vm0, %v611_v10, 2147483648  ;;  %12353 = vmatprep.mubr.f32.mxu0 %v15697_v36  ;;  %v22437_v10 = vld [vmem:[#allocation116_spill] sm:$0xff]  ;;  %v15769_v7 = vsub.f32 %v22443_v56, %v15226_v57  ;;  %v22447_v56 = vand.u32 4294901760, %v14571_v39  ;;  %v22450_v57 = vand.u32 4294901760, %v14642_v17 }
  0xbc   :  { %v1156_v22 = vshra.s32 %v15717_v31, 16  ;;  %v15725_v11 = vcvt.s32.f32 %v1171_v50  ;;  %v15738_v43 = vsub.f32 %v22437_v10, %v15091_v26  ;;  %v22438_v50 = vld [vmem:[#allocation122_spill] sm:$0xff]  ;;  %v15754_v10 = vsub.f32 %v22440_v49, %v15143_v55  ;;  %v22441_v26 = vld [vmem:[#allocation135_spill] sm:$0xff]  ;;  %v22444_v49 = vld [vmem:[#allocation148_spill] sm:$0xff] }
  0xbd   :  { %v15759_v30 = vsub.f32 %v22441_v26, %v15181_v29  ;;  %v15774_v55 = vsub.f32 %v22444_v49, %v15255_v40  ;;  %v22445_v26 = vand.u32 4294901760, %v14565_v37  ;;  %v22448_v49 = vand.u32 4294901760, %v14581_v47 }
  0xbe   :  { %v15727_v52 = vcvt.s32.f32 %v1156_v22  ;;  %12354 = vmatmul.mubr.f32.gmra.mrb[26].mxu0 %v15712_v0  ;;  %1174 = vmax.xlane.f32.xlu1 %v15725_v11  ;;  %v15744_v22 = vsub.f32 %v22438_v50, %v15117_v34  ;;  %v22442_v50 = vld [vmem:[#allocation138_spill] sm:$0xff]  ;;  %v22449_v40 = vand.u32 4294901760, %v14626_v6  ;;  %v22451_v37 = vand.u32 4294901760, %v14653_v28 }
  0xbf   :  { %12356 = vmatprep.mubr.f32.mxu0 %v15722_v59  ;;  %v15764_v34 = vsub.f32 %v22442_v50, %v15195_v15  ;;  %v22446_v50 = vand.u32 4294901760, %v14568_v38  ;;  %v22452_v38 = vand.u32 4294901760, %v14680_v58  ;;  %v22453_v39 = vand.u32 4294901760, %v14697_v25 }
  0xc0   :  { %1159 = vmax.xlane.f32.xlu0 %v15727_v52  ;;  %v22455_v47 = vand.u32 4294901760, %v22381_v44  ;;  %v22456_v6 = vand.u32 4294901760, %v22388_v35  ;;  %v22457_v17 = vand.u32 4294901760, %v22392_v1  ;;  %v2151_v28 = vand.u32 4294901760, %v15510_v5 }
  0xc1   :  { %v22458_v58 = vand.u32 4294901760, %v22399_v3  ;;  %v2161_v25 = vand.u32 4294901760, %v15519_v48  ;;  %v21607_v44 = vand.u32 4294901760, %v15548_v33  ;;  %v21605_v1 = vand.u32 4294901760, %v15575_v60 }
  0xc2   :  { %12357 = vmatmul.mubr.f32.gmra.mrb[28].mxu0 %v15732_v8 }
  0xc3   :  { %12359 = vmatprep.mubr.f32.mxu0 %v15738_v43 }
  0xc6   :  { %12360 = vmatmul.mubr.f32.gmra.mrb[30].mxu0 %v15744_v22 }
  0xc7   :  { %12362 = vmatprep.mubr.f32.mxu0 %v15749_v61 }
  0xca   :  { %12363 = vmatmul.mubr.f32.gmra.mrb[32].mxu0 %v15754_v10 }
  0xcb   :  { %12365 = vmatprep.mubr.f32.mxu0 %v15759_v30 }
  0xce   :  { %12366 = vmatmul.mubr.f32.gmra.mrb[34].mxu0 %v15764_v34 }
  0xcf   :  { %12368 = vmatprep.mubr.f32.mxu0 %v15769_v7 }
  0xd2   :  { %12369 = vmatmul.mubr.f32.gmra.mrb[36].mxu0 %v15774_v55 }
  0xd3   :  { %12373 = vmatprep.mubr.f32.mxu0 %v22445_v26  ;;  %v22454_v26 = vand.u32 4294901760, %v22379_v20  ;;  %v21609_v20 = vand.u32 4294901760, %v15539_v14 }
  0xd6   :  { %12374 = vmatmul.mubr.f32.vlgmr.msra.gmra.mrb[0].mxu0 %v22446_v50  ;;  %v22460_v50 = vld [vmem:[#allocation137_spill] sm:$0xff] }
  0xd7   :  { %12431 = vmatpush3.msra.mxu0 %v22263_v9  ;;  %12376 = vmatprep.mubr.f32.mxu0 %v22447_v56  ;;  %v870_v56 = vand.u32 65535, %v22460_v50 }
  0xd8   :  { %12489 = vmatprep.subr.mxu0 %v22267_v27 }
  0xda   :  { %12377 = vmatmul.mubr.f32.gmra.mrb[2].mxu0 %v22448_v49  ;;  %v22461_v49 = vld [vmem:[#allocation134_spill] sm:$0xff] }
  0xdb   :  { %12379 = vmatprep.mubr.f32.mxu0 %v22449_v40 }
  0xde   :  { %12380 = vmatmul.mubr.f32.gmra.mrb[4].mxu0 %v22450_v57  ;;  %v22459_v57 = vld [vmem:[#allocation130_spill] sm:$0xff] }
  0xdf   :  { %12382 = vmatprep.mubr.f32.mxu0 %v22451_v37  ;;  %v855_v40 = vand.u32 65535, %v22459_v57  ;;  %v21603_v37 = vand.u32 4294901760, %v15584_v51  ;;  %v21602_v57 = vand.u32 4294901760, %v15613_v45 }
  0xe1   :  { %v857_v35 = vcvt.s32.f32 %v855_v40 }
  0xe2   :  { %12383 = vmatmul.mubr.f32.gmra.mrb[6].mxu0 %v22452_v38 }
  0xe3   :  { %12385 = vmatprep.mubr.f32.mxu0 %v22453_v39  ;;  %v872_v39 = vcvt.s32.f32 %v870_v56 }
  0xe6   :  { %12386 = vmatmul.mubr.f32.gmra.mrb[8].mxu0 %v22454_v26  ;;  %v21601_v26 = vand.u32 4294901760, %v15604_v62 }
  0xe7   :  { %12388 = vmatprep.mubr.f32.mxu0 %v22455_v47  ;;  %v22462_v47 = vld [vmem:[#allocation142_spill] sm:$0xff] }
  0xea   :  { %12389 = vmatmul.mubr.f32.gmra.mrb[10].mxu0 %v22456_v6  ;;  %v615_v6 = vand.u32 65535, %v22462_v47  ;;  %v22464_v47 = vld [vmem:[#allocation146_spill] sm:$0xff] }
  0xeb   :  { %12391 = vmatprep.mubr.f32.mxu0 %v22457_v17 }
  0xec   :  { %v617_v50 = vcvt.s32.f32 %v615_v6 }
  0xee   :  { %12392 = vmatmul.mubr.f32.gmra.mrb[12].mxu0 %v22458_v58  ;;  %v22463_v58 = vld [vmem:[#allocation139_spill] sm:$0xff] }
  0xef   :  { %12394 = vmatprep.mubr.f32.mxu0 %v2151_v28 }
  0xf2   :  { %12395 = vmatmul.mubr.f32.gmra.mrb[14].mxu0 %v2161_v25 }
  0xf3   :  { %12397 = vmatprep.mubr.f32.mxu0 %v21609_v20  ;;  %v645_v20 = vand.u32 65535, %v15294_v13  ;;  %v22470_v13 = vand.u32 4294901760, %v15539_v14 }
  0xf6   :  { %v15817_v3 = vpop.xlane.xlu0 %859  ;;  %12398 = vmatmul.mubr.f32.gmra.mrb[16].mxu0 %v21607_v44  ;;  %v2162_v44 = vsub.f32 %v15519_v48, %v2161_v25  ;;  %v2301_v48 = vand.u32 4294901760, %v15732_v8 }
  0xf7   :  { %vm861_vm3 = vcmp.eq.f32.partialorder %v22461_v49, %v15817_v3  ;;  %12400 = vmatprep.mubr.f32.mxu0 %v21605_v1  ;;  %v630_v49 = vand.u32 65535, %v15258_v32  ;;  %v21610_v32 = vand.u32 4294901760, %v15690_v54  ;;  %v22468_v1 = vld [vmem:[#allocation153_spill] sm:$0xff] }
  0xf8   :  { %v862_v38 = vsel %vm861_vm3, %v857_v35, -inf  ;;  %v21604_v35 = vand.u32 4294901760, %v15640_v21 }
  0xf9   :  { %863 = vmax.xlane.f32.xlu0 %v862_v38  ;;  %v21606_v38 = vand.u32 4294901760, %v15648_v41  ;;  %v632_v6 = vcvt.s32.f32 %v630_v49  ;;  %v2152_v49 = vsub.f32 %v15510_v5, %v2151_v28  ;;  %v21611_v5 = vand.u32 4294901760, %v15722_v59 }
  0xfa   :  { %12401 = vmatmul.mubr.f32.gmra.mrb[18].mxu0 %v21603_v37 }
  0xfb   :  { %v15828_v17 = vpop.xlane.xlu0 %874  ;;  %12403 = vmatprep.mubr.f32.mxu0 %v21601_v26 }
  0xfc   :  { %vm876_vm4 = vcmp.eq.f32.partialorder %v22463_v58, %v15828_v17 }
  0xfd   :  { %v877_v40 = vsel %vm876_vm4, %v872_v39, -inf  ;;  %v21608_v39 = vand.u32 4294901760, %v15669_v12 }
  0xfe   :  { %878 = vmax.xlane.f32.xlu1 %v877_v40  ;;  %12404 = vmatmul.mubr.f32.gmra.mrb[20].mxu0 %v21602_v57  ;;  %v22465_v40 = vld [vmem:[#allocation150_spill] sm:$0xff]  ;;  %v22466_v57 = vld [vmem:[#allocation152_spill] sm:$0xff] }
  0xff   :  { %v15838_v56 = vpop.xlane.xlu1 %619  ;;  %12406 = vmatprep.mubr.f32.mxu0 %v21604_v35  ;;  %v900_v26 = vand.u32 65535, %v22465_v40  ;;  %v885_v37 = vand.u32 65535, %v22466_v57  ;;  %v21612_v57 = vand.u32 4294901760, %v15712_v0 }
 0x100   :  { %vm621_vm5 = vcmp.eq.f32.partialorder %v22464_v47, %v15838_v56  ;;  %v2153_v47 = vand.u32 4294901760, %v2152_v49 }
 0x101   :  { %v622_v58 = vsel %vm621_vm5, %v617_v50, -inf  ;;  %v22467_v50 = vld [vmem:[#allocation151_spill] sm:$0xff]  ;;  %v902_v40 = vcvt.s32.f32 %v900_v26  ;;  %v2172_v26 = vsub.f32 %v15539_v14, %v22470_v13  ;;  %v2311_v14 = vand.u32 4294901760, %v15738_v43 }
 0x102   :  { %623 = vmax.xlane.f32.xlu0 %v622_v58  ;;  %12407 = vmatmul.mubr.f32.gmra.mrb[22].mxu0 %v21606_v38  ;;  %v660_v38 = vand.u32 65535, %v22468_v1  ;;  %v2163_v1 = vand.u32 4294901760, %v2162_v44  ;;  %v22471_v44 = vand.u32 4294901760, %v15548_v33  ;;  %v22475_v13 = vand.u32 4294901760, %v15575_v60 }
 0x103   :  { %12409 = vmatprep.mubr.f32.mxu0 %v21608_v39  ;;  %v887_v39 = vcvt.s32.f32 %v885_v37  ;;  %v930_v37 = vand.u32 65535, %v15318_v46  ;;  %12217 = vmatprep.mubr.f32.mxu1 %v2153_v47  ;;  %v647_v46 = vcvt.s32.f32 %v645_v20  ;;  %v22472_v47 = vld [vmem:[#allocation156_spill] sm:$0xff]  ;;  %v22474_v20 = vld [vmem:[#allocation159_spill] sm:$0xff] }
 0x104   :  { %v662_v49 = vcvt.s32.f32 %v660_v38  ;;  %12218 = vmatmul.mubr.f32.vlgmr.msra.gmra.mrb[0].mxu1 %v2163_v1  ;;  %v22473_v1 = vld [vmem:[#allocation154_spill] sm:$0xff] }
 0x105   :  { %v15857_v35 = vpop.xlane.xlu1 %634 }
 0x106   :  { %vm636_vm6 = vcmp.eq.f32.partialorder %v22467_v50, %v15857_v35  ;;  %12410 = vmatmul.mubr.f32.gmra.mrb[24].mxu0 %v21610_v32  ;;  %v22469_v50 = vand.u32 4294901760, %v15697_v36  ;;  %v2173_v32 = vand.u32 4294901760, %v2172_v26  ;;  %v2192_v26 = vsub.f32 %v15575_v60, %v22475_v13 }
 0x107   :  { %v637_v58 = vsel %vm636_vm6, %v632_v6, -inf  ;;  %v21613_v60 = vand.u32 4294901760, %v15749_v61 }
 0x108   :  { %638 = vmax.xlane.f32.xlu1 %v637_v58  ;;  %12412 = vmatprep.mubr.f32.mxu0 %v22469_v50  ;;  %v2182_v58 = vsub.f32 %v15548_v33, %v22471_v44  ;;  %v915_v50 = vand.u32 65535, %v22472_v47  ;;  %v21616_v33 = vand.u32 4294901760, %v15744_v22  ;;  %v22476_v44 = vld [vmem:[#allocation155_spill] sm:$0xff] }
 0x109   :  { %v15871_v28 = vpop.xlane.xlu1 %904  ;;  %12220 = vmatprep.mubr.f32.mxu1 %v2173_v32 }
 0x10a   :  { %v15874_v25 = vpop.xlane.xlu0 %889  ;;  %vm906_vm7 = vcmp.eq.f32.partialorder %v15276_v2, %v15871_v28  ;;  %12413 = vmatmul.mubr.f32.gmra.mrb[26].mxu0 %v21612_v57  ;;  %v2183_v38 = vand.u32 4294901760, %v2182_v58  ;;  %v22477_v58 = vand.u32 4294901760, %v15584_v51  ;;  %v917_v32 = vcvt.s32.f32 %v915_v50 }
 0x10b   :  { %v907_v6 = vsel %vm906_vm7, %v902_v40, -inf  ;;  %vm891_vm8 = vcmp.eq.f32.partialorder %v15297_v63, %v15874_v25  ;;  %12415 = vmatprep.mubr.f32.mxu0 %v21611_v5  ;;  %v2193_v57 = vand.u32 4294901760, %v2192_v26 }
 0x10c   :  { %908 = vmax.xlane.f32.xlu1 %v907_v6  ;;  %v892_v2 = vsel %vm891_vm8, %v887_v39, -inf  ;;  %v690_v39 = vand.u32 65535, %v22474_v20  ;;  %12221 = vmatmul.mubr.f32.gmra.mrb[2].mxu1 %v2183_v38  ;;  %v2202_v47 = vsub.f32 %v15584_v51, %v22477_v58  ;;  %v22478_v20 = vld [vmem:[#allocation160_spill] sm:$0xff]  ;;  %v22479_v51 = vld [vmem:[#allocation157_spill] sm:$0xff] }
 0x10d   :  { %v15893_v63 = vpop.xlane.xlu1 %664  ;;  %893 = vmax.xlane.f32.xlu0 %v892_v2  ;;  %v932_v2 = vcvt.s32.f32 %v930_v37  ;;  %v675_v5 = vand.u32 65535, %v22478_v20  ;;  %12223 = vmatprep.mubr.f32.mxu1 %v2193_v57  ;;  %v21615_v57 = vand.u32 4294901760, %v15754_v10 }
 0x10e   :  { %v15896_v40 = vpop.xlane.xlu0 %649  ;;  %vm666_vm9 = vcmp.eq.f32.partialorder %v22473_v1, %v15893_v63  ;;  %12416 = vmatmul.mubr.f32.gmra.mrb[28].mxu0 %v2301_v48  ;;  %v692_v13 = vcvt.s32.f32 %v690_v39 }
 0x10f   :  { %v667_v6 = vsel %vm666_vm9, %v662_v49, -inf  ;;  %vm651_vm10 = vcmp.eq.f32.partialorder %v22476_v44, %v15896_v40  ;;  %12418 = vmatprep.mubr.f32.mxu0 %v2311_v14  ;;  %v2203_v49 = vand.u32 4294901760, %v2202_v47  ;;  %v22482_v44 = vld [vmem:[#allocation162_spill] sm:$0xff]  ;;  %v22483_v47 = vand.u32 4294901760, %v15613_v45 }
 0x110   :  { %668 = vmax.xlane.f32.xlu1 %v667_v6  ;;  %v652_v1 = vsel %vm651_vm10, %v647_v46, -inf  ;;  %v22480_v46 = vand.u32 4294901760, %v15604_v62  ;;  %v22481_v6 = vld [vmem:[#allocation158_spill] sm:$0xff]  ;;  %v960_v58 = vand.u32 65535, %v22482_v44  ;;  %v677_v20 = vcvt.s32.f32 %v675_v5  ;;  %v22485_v44 = vld [vmem:[#allocation161_spill] sm:$0xff] }
 0x111   :  { %v15915_v37 = vpop.xlane.xlu1 %934  ;;  %653 = vmax.xlane.f32.xlu0 %v652_v1  ;;  %12224 = vmatmul.mubr.f32.gmra.mrb[4].mxu1 %v2203_v49  ;;  %v2222_v1 = vsub.f32 %v15613_v45, %v22483_v47  ;;  %v22484_v49 = vld [vmem:[#allocation164_spill] sm:$0xff]  ;;  %v22487_v5 = vand.u32 4294901760, %v15640_v21 }
 0x112   :  { %v15917_v38 = vpop.xlane.xlu0 %919  ;;  %vm936_vm11 = vcmp.eq.f32.partialorder %v22479_v51, %v15915_v37  ;;  %v2212_v50 = vsub.f32 %v15604_v62, %v22480_v46  ;;  %12419 = vmatmul.mubr.f32.gmra.mrb[30].mxu0 %v21616_v33  ;;  %v945_v46 = vand.u32 65535, %v22484_v49 }
 0x113   :  { %v937_v26 = vsel %vm936_vm11, %v932_v2, -inf  ;;  %vm921_vm12 = vcmp.eq.f32.partialorder %v22481_v6, %v15917_v38  ;;  %12421 = vmatprep.mubr.f32.mxu0 %v21613_v60  ;;  %v21614_v2 = vand.u32 4294901760, %v15759_v30  ;;  %v2223_v45 = vand.u32 4294901760, %v2222_v1  ;;  %v22488_v60 = vld [vmem:[#allocation163_spill] sm:$0xff] }
 0x114   :  { %938 = vmax.xlane.f32.xlu1 %v937_v26  ;;  %v922_v39 = vsel %vm921_vm12, %v917_v32, -inf  ;;  %v2213_v62 = vand.u32 4294901760, %v2212_v50  ;;  %v22486_v26 = vld [vmem:[#allocation166_spill] sm:$0xff]  ;;  %v2232_v50 = vsub.f32 %v15640_v21, %v22487_v5  ;;  %v22489_v1 = vand.u32 4294901760, %v15648_v41  ;;  %v22491_v5 = vld [vmem:[#allocation165_spill] sm:$0xff] }
 0x115   :  { %v15936_v51 = vpop.xlane.xlu1 %694  ;;  %923 = vmax.xlane.f32.xlu0 %v922_v39  ;;  %v720_v32 = vand.u32 65535, %v22486_v26  ;;  %v962_v39 = vcvt.s32.f32 %v960_v58  ;;  %v21617_v21 = vand.u32 4294901760, %v15769_v7  ;;  %v22490_v58 = vld [vmem:[#allocation168_spill] sm:$0xff] }
 0x116   :  { %v15939_v6 = vpop.xlane.xlu0 %679  ;;  %vm696_vm13 = vcmp.eq.f32.partialorder %v22485_v44, %v15936_v51  ;;  %12226 = vmatprep.mubr.f32.mxu1 %v2213_v62  ;;  %v2242_v49 = vsub.f32 %v15648_v41, %v22489_v1  ;;  %12422 = vmatmul.mubr.f32.gmra.mrb[32].mxu0 %v21615_v57  ;;  %v21618_v44 = vand.u32 4294901760, %v15764_v34  ;;  %v2233_v26 = vand.u32 4294901760, %v2232_v50  ;;  %v22493_v57 = vld [vmem:[#allocation171_spill] sm:$0xff] }
 0x117   :  { %v697_v47 = vsel %vm696_vm13, %v692_v13, -inf  ;;  %vm681_vm14 = vcmp.eq.f32.partialorder %v22488_v60, %v15939_v6  ;;  %12227 = vmatmul.mubr.f32.gmra.mrb[6].mxu1 %v2223_v45  ;;  %12424 = vmatprep.mubr.f32.mxu0 %v21614_v2  ;;  %v947_v13 = vcvt.s32.f32 %v945_v46  ;;  %v705_v45 = vand.u32 65535, %v22490_v58  ;;  %v22496_v58 = vld [vmem:[#allocation172_spill] sm:$0xff] }
 0x118   :  { %698 = vmax.xlane.f32.xlu1 %v697_v47  ;;  %v682_v62 = vsel %vm681_vm14, %v677_v20, -inf  ;;  %v2243_v41 = vand.u32 4294901760, %v2242_v49  ;;  %12229 = vmatprep.mubr.f32.mxu1 %v2233_v26  ;;  %v22492_v47 = vand.u32 4294901760, %v15669_v12  ;;  %v722_v2 = vcvt.s32.f32 %v720_v32  ;;  %v22495_v26 = vld [vmem:[#allocation167_spill] sm:$0xff] }
 0x119   :  { %v15958_v60 = vpop.xlane.xlu1 %964  ;;  %683 = vmax.xlane.f32.xlu0 %v682_v62  ;;  %v990_v33 = vand.u32 65535, %v22493_v57  ;;  %v22494_v46 = vand.u32 4294901760, %v15690_v54  ;;  %v21619_v49 = vand.u32 4294901760, %v15774_v55 }
 0x11a   :  { %vm966_vm15 = vcmp.eq.f32.partialorder %v22491_v5, %v15958_v60  ;;  %v2252_v20 = vsub.f32 %v15669_v12, %v22492_v47  ;;  %v15966_v50 = vpop.xlane.xlu0 %949  ;;  %12425 = vmatmul.mubr.f32.gmra.mrb[34].mxu0 %v21618_v44  ;;  %v22497_v5 = vld [vmem:[#allocation169_spill] sm:$0xff]  ;;  %v22498_v47 = vand.u32 4294901760, %v15697_v36 }
 0x11b   :  { %v967_v1 = vsel %vm966_vm15, %v962_v39, -inf  ;;  %12230 = vmatmul.mubr.f32.gmra.mrb[8].mxu1 %v2243_v41  ;;  %v2262_v62 = vsub.f32 %v15690_v54, %v22494_v46  ;;  %vm951_vm1 = vcmp.eq.f32.partialorder %v22495_v26, %v15966_v50  ;;  %12427 = vmatprep.mubr.f32.mxu0 %v21617_v21  ;;  %v707_v39 = vcvt.s32.f32 %v705_v45  ;;  %v22499_v21 = vld [vmem:[#allocation175_spill] sm:$0xff] }
 0x11c   :  { %968 = vmax.xlane.f32.xlu1 %v967_v1  ;;  %v2253_v12 = vand.u32 4294901760, %v2252_v20  ;;  %v952_v57 = vsel %vm951_vm1, %v947_v13, -inf  ;;  %v975_v41 = vand.u32 65535, %v22496_v58  ;;  %v2272_v1 = vsub.f32 %v15697_v36, %v22498_v47  ;;  %v22502_v36 = vld [vmem:[#allocation10_spill] sm:$0xff] }
 0x11d   :  { %v15979_v32 = vpop.xlane.xlu1 %724  ;;  %v2263_v54 = vand.u32 4294901760, %v2262_v62  ;;  %953 = vmax.xlane.f32.xlu0 %v952_v57  ;;  %v992_v26 = vcvt.s32.f32 %v990_v33  ;;  %v750_v44 = vand.u32 65535, %v22499_v21  ;;  %v22500_v13 = vand.u32 4294901760, %v15712_v0  ;;  %v22501_v62 = vld [vmem:[#allocation170_spill] sm:$0xff]  ;;  %v22503_v21 = vld [vmem:[#allocation176_spill] sm:$0xff] }
 0x11e   :  { %vm726_vm2 = vcmp.eq.f32.partialorder %v22497_v5, %v15979_v32  ;;  %12232 = vmatprep.mubr.f32.mxu1 %v2253_v12  ;;  %v15987_v20 = vpop.xlane.xlu0 %709  ;;  %12428 = vmatmul.mubr.f32.gmra.mrb[36].mxu0 %v21619_v49  ;;  %v2273_v12 = vand.u32 4294901760, %v2272_v1  ;;  %v735_v58 = vand.u32 65535, %v22503_v21  ;;  %v22505_v5 = vand.u32 4294901760, %v15722_v59  ;;  %v22511_v21 = vld [vmem:[#allocation180_spill] sm:$0xff] }
 0x11f   :  { %v727_v46 = vsel %vm726_vm2, %v722_v2, -inf  ;;  %12233 = vmatmul.mubr.f32.gmra.mrb[10].mxu1 %v2263_v54  ;;  %v2282_v45 = vsub.f32 %v15712_v0, %v22500_v13  ;;  %vm711_vm3 = vcmp.eq.f32.partialorder %v22501_v62, %v15987_v20  ;;  %12432 = vmatprep.mubr.f32.mxu0 %v22502_v36  ;;  %v977_v2 = vcvt.s32.f32 %v975_v41  ;;  %v22504_v0 = vld [vmem:[#allocation173_spill] sm:$0xff]  ;;  %v22506_v62 = vld [vmem:[#allocation179_spill] sm:$0xff] }
 0x120   :  { %728 = vmax.xlane.f32.xlu1 %v727_v46  ;;  %v712_v33 = vsel %vm711_vm3, %v707_v39, -inf  ;;  %12235 = vmatprep.mubr.f32.mxu1 %v2273_v12  ;;  %v2292_v47 = vsub.f32 %v15722_v59, %v22505_v5  ;;  %v752_v13 = vcvt.s32.f32 %v750_v44  ;;  %v1020_v49 = vand.u32 65535, %v22506_v62  ;;  %v22507_v41 = vld [vmem:[#allocation11_spill] sm:$0xff]  ;;  %v22509_v59 = vld [vmem:[#allocation12_spill] sm:$0xff] }
 0x121   :  { %v15998_v57 = vpop.xlane.xlu1 %994  ;;  %v2283_v54 = vand.u32 4294901760, %v2282_v45  ;;  %713 = vmax.xlane.f32.xlu0 %v712_v33  ;;  %v2302_v39 = vsub.f32 %v15732_v8, %v2301_v48  ;;  %v22508_v45 = vld [vmem:[#allocation174_spill] sm:$0xff]  ;;  %v737_v33 = vcvt.s32.f32 %v735_v58  ;;  %v22512_v8 = vld [vmem:[#allocation177_spill] sm:$0xff]  ;;  %v2312_v48 = vsub.f32 %v15738_v43, %v2311_v14  ;;  %v22514_v62 = vld [vmem:[#allocation183_spill] sm:$0xff] }
 0x122   :  { %vm996_vm4 = vcmp.eq.f32.partialorder %v22504_v0, %v15998_v57  ;;  %v16006_v46 = vpop.xlane.xlu0 %979  ;;  %12433 = vmatmul.mubr.f32.vlgmr.msra.gmra.mrb[0].mxu0 %v22507_v41  ;;  %v2293_v12 = vand.u32 4294901760, %v2292_v47 }
 0x123   :  { %v997_v1 = vsel %vm996_vm4, %v992_v26, -inf  ;;  %12236 = vmatmul.mubr.f32.gmra.mrb[12].mxu1 %v2283_v54  ;;  %vm981_vm5 = vcmp.eq.f32.partialorder %v22508_v45, %v16006_v46  ;;  %12490 = vmatpush3.msra.mxu0 %v22267_v27  ;;  %v1005_v54 = vand.u32 65535, %v22511_v21  ;;  %v2303_v0 = vand.u32 4294901760, %v2302_v39  ;;  %v22516_v39 = vld [vmem:[#allocation14_spill] sm:$0xff] }
 0x124   :  { %998 = vmax.xlane.f32.xlu1 %v997_v1  ;;  %12435 = vmatprep.mubr.f32.mxu0 %v22509_v59  ;;  %v982_v44 = vsel %vm981_vm5, %v977_v2, -inf  ;;  %v1022_v1 = vcvt.s32.f32 %v1020_v49  ;;  %v780_v45 = vand.u32 65535, %v22514_v62  ;;  %v22515_v2 = vand.u32 4294901760, %v15744_v22  ;;  %v22518_v21 = vld [vmem:[#allocation18_spill] sm:$0xff]  ;;  %v22521_v62 = vld [vmem:[#allocation181_spill] sm:$0xff] }
 0x125   :  { %v16017_v26 = vpop.xlane.xlu1 %754  ;;  %983 = vmax.xlane.f32.xlu0 %v982_v44  ;;  %12238 = vmatprep.mubr.f32.mxu1 %v2293_v12  ;;  %v22517_v12 = vld [vmem:[#allocation178_spill] sm:$0xff]  ;;  %v2313_v44 = vand.u32 4294901760, %v2312_v48  ;;  %v1007_v49 = vcvt.s32.f32 %v1005_v54  ;;  %v22523_v48 = vand.u32 4294901760, %v15749_v61 }
 0x126   :  { %22510 = vst [vmem:[#allocation92_spill] sm:$0xff] %v16017_v26  ;;  %vm756_vm6 = vcmp.eq.f32.partialorder %v22512_v8, %v16017_v26  ;;  %v16025_v5 = vpop.xlane.xlu0 %739  ;;  %v2322_v58 = vsub.f32 %v15744_v22, %v22515_v2  ;;  %12436 = vmatmul.mubr.f32.gmra.mrb[2].mxu0 %v22516_v39  ;;  %v782_v2 = vcvt.s32.f32 %v780_v45  ;;  %v22524_v26 = vld [vmem:[#allocation22_spill] sm:$0xff] }
 0x127   :  { %22513 = vst [vmem:[#allocation96_spill] sm:$0xff] %v16025_v5  ;;  %v757_v47 = vsel %vm756_vm6, %v752_v13, -inf  ;;  %12239 = vmatmul.mubr.f32.gmra.mrb[14].mxu1 %v2303_v0  ;;  %vm741_vm7 = vcmp.eq.f32.partialorder %v22517_v12, %v16025_v5  ;;  %12438 = vmatprep.mubr.f32.mxu0 %v22518_v21  ;;  %v22520_v13 = vld [vmem:[#allocation34_spill] sm:$0xff]  ;;  %v2332_v12 = vsub.f32 %v15749_v61, %v22523_v48  ;;  %v22530_v61 = vand.u32 4294901760, %v15754_v10  ;;  %v22531_v48 = vld [vmem:[#allocation40_spill] sm:$0xff] }
 0x128   :  { %758 = vmax.xlane.f32.xlu1 %v757_v47  ;;  %v742_v14 = vsel %vm741_vm7, %v737_v33, -inf  ;;  %v765_v8 = vand.u32 65535, %v22520_v13  ;;  %v2323_v0 = vand.u32 4294901760, %v2322_v58  ;;  %12241 = vmatprep.mubr.f32.mxu1 %v2313_v44  ;;  %v22525_v33 = vld [vmem:[#allocation182_spill] sm:$0xff]  ;;  %v22528_v44 = vld [vmem:[#allocation23_spill] sm:$0xff] }
 0x129   :  { %v16035_v43 = vpop.xlane.xlu1 %1024  ;;  %743 = vmax.xlane.f32.xlu0 %v742_v14  ;;  %v22526_v54 = vld [vmem:[#allocation42_spill] sm:$0xff]  ;;  %v22527_v14 = vld [vmem:[#allocation56_spill] sm:$0xff] }
 0x12a   :  { %22519 = vst [vmem:[#allocation102_spill] sm:$0xff] %v16035_v43  ;;  %vm1026_vm8 = vcmp.eq.f32.partialorder %v22521_v62, %v16035_v43  ;;  %v16040_v22 = vpop.xlane.xlu0 %1009  ;;  %12439 = vmatmul.mubr.f32.gmra.mrb[4].mxu0 %v22524_v26  ;;  %v1050_v58 = vand.u32 65535, %v22526_v54  ;;  %v1035_v13 = vand.u32 65535, %v22527_v14  ;;  %v767_v45 = vcvt.s32.f32 %v765_v8  ;;  %v22534_v8 = vld [vmem:[#allocation27_spill] sm:$0xff]  ;;  %v22539_v5 = vld [vmem:[#allocation66_spill] sm:$0xff] }
 0x12b   :  { %22522 = vst [vmem:[#allocation104_spill] sm:$0xff] %v16040_v22  ;;  %v1027_v47 = vsel %vm1026_vm8, %v1022_v1, -inf  ;;  %12242 = vmatmul.mubr.f32.gmra.mrb[16].mxu1 %v2323_v0  ;;  %vm1011_vm9 = vcmp.eq.f32.partialorder %v22525_v33, %v16040_v22  ;;  %12441 = vmatprep.mubr.f32.mxu0 %v22528_v44  ;;  %v14478_v0 = vmov 0   ;;  %v2333_v43 = vand.u32 4294901760, %v2332_v12  ;;  %v22535_v12 = vld [vmem:[#allocation52_spill] sm:$0xff] }
 0x12c   :  { %1028 = vmax.xlane.f32.xlu1 %v1027_v47  ;;  %v1012_v1 = vsel %vm1011_vm9, %v1007_v49, -inf  ;;  %v2342_v47 = vsub.f32 %v15754_v10, %v22530_v61  ;;  %v22533_v22 = vand.u32 4294901760, %v15759_v30  ;;  %14246 = vset.pattern.permute.xlu0 %v14478_v0  ;;  %v1052_v10 = vcvt.s32.f32 %v1050_v58  ;;  %v22542_v58 = vld [vmem:[#allocation47_spill] sm:$0xff] }
 0x12d   :  { %v16051_v62 = vpop.xlane.xlu1 %784  ;;  %14247 = vset.pattern.permute.xlu1 %v14478_v0  ;;  %1013 = vmax.xlane.f32.xlu0 %v1012_v1  ;;  %v22536_v1 = vld [vmem:[#allocation51_spill] sm:$0xff] }
 0x12e   :  { %22529 = vst [vmem:[#allocation109_spill] sm:$0xff] %v16051_v62  ;;  %vm786_vm10 = vcmp.eq.f32.partialorder %v22531_v48, %v16051_v62  ;;  %v16058_v33 = vpop.xlane.xlu0 %769  ;;  %12244 = vmatprep.mubr.f32.mxu1 %v2333_v43  ;;  %v2343_v14 = vand.u32 4294901760, %v2342_v47  ;;  %v2352_v49 = vsub.f32 %v15759_v30, %v22533_v22  ;;  %12442 = vmatmul.mubr.f32.gmra.mrb[6].mxu0 %v22534_v8  ;;  %v810_v61 = vand.u32 65535, %v22536_v1  ;;  %v22538_v43 = vld [vmem:[#allocation30_spill] sm:$0xff] }
 0x12f   :  { %22532 = vst [vmem:[#allocation113_spill] sm:$0xff] %v16058_v33  ;;  %v787_v54 = vsel %vm786_vm10, %v782_v2, -inf  ;;  %vm771_vm11 = vcmp.eq.f32.partialorder %v22535_v12, %v16058_v33  ;;  %v22537_v48 = vand.u32 4294901760, %v15764_v34  ;;  %12444 = vmatprep.mubr.f32.mxu0 %v22538_v43  ;;  %v1037_v62 = vcvt.s32.f32 %v1035_v13 }
 0x130   :  { %788 = vmax.xlane.f32.xlu1 %v787_v54  ;;  %v772_v47 = vsel %vm771_vm11, %v767_v45, -inf  ;;  %v795_v30 = vand.u32 65535, %v22539_v5  ;;  %12245 = vmatmul.mubr.f32.gmra.mrb[18].mxu1 %v2343_v14  ;;  %v2353_v22 = vand.u32 4294901760, %v2352_v49  ;;  %v22544_v45 = vld [vmem:[#allocation32_spill] sm:$0xff]  ;;  %v812_v14 = vcvt.s32.f32 %v810_v61 }
 0x131   :  { %v2362_v2 = vsub.f32 %v15764_v34, %v22537_v48  ;;  %v16072_v0 = vpop.xlane.xlu1 %1054  ;;  %773 = vmax.xlane.f32.xlu0 %v772_v47  ;;  %v22543_v34 = vand.u32 4294901760, %v15769_v7  ;;  %v22545_v5 = vld [vmem:[#allocation60_spill] sm:$0xff]  ;;  %v22546_v49 = vand.u32 4294901760, %v15774_v55 }
 0x132   :  { %22540 = vst [vmem:[#allocation116_spill] sm:$0xff] %v16072_v0  ;;  %v16074_v12 = vpop.xlane.xlu0 %1039  ;;  %vm1056_vm12 = vcmp.eq.f32.partialorder %v22542_v58, %v16072_v0  ;;  %12247 = vmatprep.mubr.f32.mxu1 %v2353_v22  ;;  %12445 = vmatmul.mubr.f32.gmra.mrb[8].mxu0 %v22544_v45  ;;  %v797_v22 = vcvt.s32.f32 %v795_v30  ;;  %v22548_v58 = vld [vmem:[#allocation72_spill] sm:$0xff]  ;;  %v22553_v30 = vld [vmem:[#allocation69_spill] sm:$0xff] }
 0x133   :  { %v2363_v54 = vand.u32 4294901760, %v2362_v2  ;;  %22541 = vst [vmem:[#allocation122_spill] sm:$0xff] %v16074_v12  ;;  %v2372_v1 = vsub.f32 %v15769_v7, %v22543_v34  ;;  %v1057_v13 = vsel %vm1056_vm12, %v1052_v10, -inf  ;;  %vm1041_vm13 = vcmp.eq.f32.partialorder %v22545_v5, %v16074_v12  ;;  %v22547_v2 = vld [vmem:[#allocation38_spill] sm:$0xff]  ;;  %v22550_v10 = vld [vmem:[#allocation185_spill] sm:$0xff]  ;;  %v22551_v12 = vld [vmem:[#allocation184_spill] sm:$0xff] }
 0x134   :  { %v2382_v48 = vsub.f32 %v15774_v55, %v22546_v49  ;;  %12447 = vmatprep.mubr.f32.mxu0 %v22547_v2  ;;  %1058 = vmax.xlane.f32.xlu1 %v1057_v13  ;;  %v1042_v47 = vsel %vm1041_vm13, %v1037_v62, -inf  ;;  %v1080_v0 = vand.u32 65535, %v22548_v58  ;;  %v1065_v34 = vand.u32 65535, %v22550_v10  ;;  %v22552_v55 = vld [vmem:[#allocation39_spill] sm:$0xff] }
 0x135   :  { %v2373_v33 = vand.u32 4294901760, %v2372_v1  ;;  %v16089_v7 = vpop.xlane.xlu1 %814  ;;  %1043 = vmax.xlane.f32.xlu0 %v1042_v47  ;;  %12248 = vmatmul.mubr.f32.gmra.mrb[20].mxu1 %v2363_v54  ;;  %v22554_v1 = vld [vmem:[#allocation46_spill] sm:$0xff]  ;;  %v22556_v58 = vld [vmem:[#allocation187_spill] sm:$0xff] }
 0x136   :  { %22549 = vst [vmem:[#allocation124_spill] sm:$0xff] %v16089_v7  ;;  %v2383_v5 = vand.u32 4294901760, %v2382_v48  ;;  %v16092_v61 = vpop.xlane.xlu0 %799  ;;  %vm816_vm14 = vcmp.eq.f32.partialorder %v22551_v12, %v16089_v7  ;;  %12448 = vmatmul.mubr.f32.gmra.mrb[10].mxu0 %v22552_v55  ;;  %v1082_v49 = vcvt.s32.f32 %v1080_v0  ;;  %v22555_v47 = vld [vmem:[#allocation186_spill] sm:$0xff]  ;;  %v1067_v48 = vcvt.s32.f32 %v1065_v34  ;;  %v22564_v7 = vld [vmem:[#allocation57_spill] sm:$0xff] }
 0x137   :  { %12250 = vmatprep.mubr.f32.mxu1 %v2373_v33  ;;  %v817_v62 = vsel %vm816_vm14, %v812_v14, -inf  ;;  %vm801_vm15 = vcmp.eq.f32.partialorder %v22553_v30, %v16092_v61  ;;  %12450 = vmatprep.mubr.f32.mxu0 %v22554_v1  ;;  %v840_v54 = vand.u32 65535, %v22555_v47  ;;  %v825_v10 = vand.u32 65535, %v22556_v58  ;;  %v22558_v33 = vld [vmem:[#allocation48_spill] sm:$0xff]  ;;  %v22560_v30 = vld [vmem:[#allocation77_spill] sm:$0xff] }
 0x138   :  { %818 = vmax.xlane.f32.xlu1 %v817_v62  ;;  %v802_v13 = vsel %vm801_vm15, %v797_v22, -inf  ;;  %v22561_v22 = vld [vmem:[#allocation54_spill] sm:$0xff]  ;;  %v22562_v62 = vld [vmem:[#allocation81_spill] sm:$0xff]  ;;  %v1110_v47 = vand.u32 65535, %v15652_v53 }
 0x139   :  { %803 = vmax.xlane.f32.xlu0 %v802_v13  ;;  %12251 = vmatmul.mubr.f32.gmra.mrb[22].mxu1 %v2383_v5  ;;  %v16102_v12 = vpop.xlane.xlu1 %1084  ;;  %v842_v34 = vcvt.s32.f32 %v840_v54  ;;  %v827_v13 = vcvt.s32.f32 %v825_v10 }
 0x13a   :  { %22557 = vst [vmem:[#allocation128_spill] sm:$0xff] %v16102_v12  ;;  %4948 = vmatprep.mubr.f32.mxu1 %v22267_v27  ;;  %12451 = vmatmul.mubr.f32.gmra.mrb[12].mxu0 %v22558_v33  ;;  %v16106_v14 = vpop.xlane.xlu0 %1069  ;;  %vm1086_vm1 = vcmp.eq.f32.partialorder %v22560_v30, %v16102_v12  ;;  %v1095_v27 = vand.u32 65535, %v15658_v18  ;;  %v22567_v12 = vld [vmem:[#allocation62_spill] sm:$0xff]  ;;  %v1112_v10 = vcvt.s32.f32 %v1110_v47 }
 0x13b   :  { %22559 = vst [vmem:[#allocation135_spill] sm:$0xff] %v16106_v14  ;;  %12453 = vmatprep.mubr.f32.mxu0 %v22561_v22  ;;  %v1087_v0 = vsel %vm1086_vm1, %v1082_v49, -inf  ;;  %vm1071_vm2 = vcmp.eq.f32.partialorder %v22562_v62, %v16106_v14  ;;  %v22566_v49 = vld [vmem:[#allocation188_spill] sm:$0xff]  ;;  %v1125_v62 = vand.u32 65535, %v15684_v19  ;;  %v1170_v19 = vand.u32 65535, %v15707_v23 }
 0x13c   :  { %1088 = vmax.xlane.f32.xlu1 %v1087_v0  ;;  %v1072_v5 = vsel %vm1071_vm2, %v1067_v48, -inf  ;;  %v22568_v48 = vld [vmem:[#allocation84_spill] sm:$0xff]  ;;  %v1140_v0 = vand.u32 65535, %v15678_v4  ;;  %v1097_v18 = vcvt.s32.f32 %v1095_v27 }
 0x13d   :  { %1073 = vmax.xlane.f32.xlu0 %v1072_v5  ;;  %v22569_v5 = vld [vmem:[#allocation68_spill] sm:$0xff]  ;;  %v1127_v47 = vcvt.s32.f32 %v1125_v62 }
 0x13e   :  { %v16114_v58 = vpop.xlane.xlu1 %844  ;;  %12454 = vmatmul.mubr.f32.gmra.mrb[14].mxu0 %v22564_v7  ;;  %v16118_v30 = vpop.xlane.xlu0 %829  ;;  %v1142_v4 = vcvt.s32.f32 %v1140_v0  ;;  %v1172_v0 = vcvt.s32.f32 %v1170_v19  ;;  %v22584_v19 = vld [vmem:[#allocation103_spill] sm:$0xff] }
 0x13f   :  { %22563 = vst [vmem:[#allocation138_spill] sm:$0xff] %v16114_v58  ;;  %22565 = vst [vmem:[#allocation143_spill] sm:$0xff] %v16118_v30  ;;  %vm846_vm3 = vcmp.eq.f32.partialorder %v22566_v49, %v16114_v58  ;;  %12456 = vmatprep.mubr.f32.mxu0 %v22567_v12  ;;  %vm831_vm4 = vcmp.eq.f32.partialorder %v22568_v48, %v16118_v30  ;;  %v22570_v49 = vld [vmem:[#allocation71_spill] sm:$0xff] }
 0x140   :  { %v847_v54 = vsel %vm846_vm3, %v842_v34, -inf  ;;  %v832_v53 = vsel %vm831_vm4, %v827_v13, -inf  ;;  %v22572_v13 = vld [vmem:[#allocation90_spill] sm:$0xff]  ;;  %v22575_v30 = vld [vmem:[#allocation79_spill] sm:$0xff] }
 0x141   :  { %848 = vmax.xlane.f32.xlu1 %v847_v54  ;;  %833 = vmax.xlane.f32.xlu0 %v832_v53  ;;  %v22573_v54 = vld [vmem:[#allocation74_spill] sm:$0xff]  ;;  %v1155_v53 = vand.u32 65535, %v15717_v31 }
 0x142   :  { %12457 = vmatmul.mubr.f32.gmra.mrb[16].mxu0 %v22569_v5  ;;  %v16128_v14 = vpop.xlane.xlu1 %1114 }
 0x143   :  { %12459 = vmatprep.mubr.f32.mxu0 %v22570_v49  ;;  %vm1116_vm5 = vcmp.eq.f32.partialorder %v15671_v16, %v16128_v14  ;;  %v1157_v62 = vcvt.s32.f32 %v1155_v53  ;;  %v22585_v53 = vld [vmem:[#allocation106_spill] sm:$0xff] }
 0x144   :  { %v16131_v58 = vpop.xlane.xlu0 %1099  ;;  %v1117_v34 = vsel %vm1116_vm5, %v1112_v10, -inf }
 0x145   :  { %22571 = vst [vmem:[#allocation148_spill] sm:$0xff] %v16131_v58  ;;  %vm1101_vm6 = vcmp.eq.f32.partialorder %v22572_v13, %v16131_v58  ;;  %1118 = vmax.xlane.f32.xlu1 %v1117_v34  ;;  %v22578_v34 = vld [vmem:[#allocation86_spill] sm:$0xff]  ;;  %v346_v58 = vld [vmem:[%s21249_s1 + $0x98] sm:$0xff] }
 0x146   :  { %v1102_v27 = vsel %vm1101_vm6, %v1097_v18, -inf  ;;  %12460 = vmatmul.mubr.f32.gmra.mrb[18].mxu0 %v22573_v54  ;;  %v22577_v18 = vld [vmem:[#allocation83_spill] sm:$0xff] }
 0x147   :  { %v16139_v48 = vpop.xlane.xlu1 %1144  ;;  %1103 = vmax.xlane.f32.xlu0 %v1102_v27  ;;  %12462 = vmatprep.mubr.f32.mxu0 %v22575_v30  ;;  %v22582_v27 = vld [vmem:[#allocation94_spill] sm:$0xff] }
 0x148   :  { %22574 = vst [vmem:[#allocation130_spill] sm:$0xff] %v16139_v48  ;;  %v16143_v16 = vpop.xlane.xlu0 %1129  ;;  %vm1146_vm7 = vcmp.eq.f32.partialorder %v15699_v24, %v16139_v48  ;;  %v345_v48 = vld [vmem:[%s21249_s1 + $0x90] sm:$0xff] }
 0x149   :  { %22576 = vst [vmem:[#allocation137_spill] sm:$0xff] %v16143_v16  ;;  %v1147_v10 = vsel %vm1146_vm7, %v1142_v4, -inf  ;;  %vm1131_vm8 = vcmp.eq.f32.partialorder %v15702_v42, %v16143_v16  ;;  %v22581_v42 = vld [vmem:[#allocation91_spill] sm:$0xff]  ;;  %v22592_v16 = vld [vmem:[#allocation144_spill] sm:$0xff] }
 0x14a   :  { %1148 = vmax.xlane.f32.xlu1 %v1147_v10  ;;  %v1132_v23 = vsel %vm1131_vm8, %v1127_v47, -inf  ;;  %12463 = vmatmul.mubr.f32.gmra.mrb[20].mxu0 %v22577_v18  ;;  %v22583_v47 = vld [vmem:[#allocation98_spill] sm:$0xff]  ;;  %v22586_v10 = vld [vmem:[#allocation111_spill] sm:$0xff] }
 0x14b   :  { %1133 = vmax.xlane.f32.xlu0 %v1132_v23  ;;  %12465 = vmatprep.mubr.f32.mxu0 %v22578_v34  ;;  %v16151_v31 = vpop.xlane.xlu1 %1174  ;;  %v22588_v23 = vld [vmem:[#allocation118_spill] sm:$0xff] }
 0x14c   :  { %22579 = vst [vmem:[#allocation134_spill] sm:$0xff] %v16151_v31  ;;  %vm1176_vm9 = vcmp.eq.f32.partialorder %v15725_v11, %v16151_v31  ;;  %v22587_v11 = vld [vmem:[#allocation115_spill] sm:$0xff] }
 0x14d   :  { %v16153_v13 = vpop.xlane.xlu0 %1159  ;;  %v1177_v24 = vsel %vm1176_vm9, %v1172_v0, -inf  ;;  %v22589_v0 = vld [vmem:[#allocation123_spill] sm:$0xff] }
 0x14e   :  { %22580 = vst [vmem:[#allocation142_spill] sm:$0xff] %v16153_v13  ;;  %vm1161_vm10 = vcmp.eq.f32.partialorder %v15727_v52, %v16153_v13  ;;  %12466 = vmatmul.mubr.f32.gmra.mrb[22].mxu0 %v22581_v42  ;;  %1178 = vmax.xlane.f32.xlu1 %v1177_v24  ;;  %v344_v52 = vld [vmem:[%s21249_s1 + $0x88] sm:$0xff]  ;;  %v327_v24 = vld [vmem:[%s21249_s1] sm:$0xff] }
 0x14f   :  { %v1162_v4 = vsel %vm1161_vm10, %v1157_v62, -inf  ;;  %12468 = vmatprep.mubr.f32.mxu0 %v22582_v27  ;;  %v22590_v62 = vld [vmem:[#allocation126_spill] sm:$0xff]  ;;  %v328_v31 = vld [vmem:[%s21249_s1 + $0x8] sm:$0xff] }
 0x150   :  { %1163 = vmax.xlane.f32.xlu0 %v1162_v4  ;;  %v22591_v4 = vld [vmem:[#allocation129_spill] sm:$0xff]  ;;  %v343_v13 = vld [vmem:[%s21249_s1 + $0x80] sm:$0xff] }
 0x152   :  { %12469 = vmatmul.mubr.f32.gmra.mrb[24].mxu0 %v22583_v47 }
 0x153   :  { %12471 = vmatprep.mubr.f32.mxu0 %v22584_v19 }
 0x156   :  { %12472 = vmatmul.mubr.f32.gmra.mrb[26].mxu0 %v22585_v53 }
 0x157   :  { %12474 = vmatprep.mubr.f32.mxu0 %v22586_v10 }
 0x15a   :  { %12475 = vmatmul.mubr.f32.gmra.mrb[28].mxu0 %v22587_v11 }
 0x15b   :  { %12477 = vmatprep.mubr.f32.mxu0 %v22588_v23 }
 0x15e   :  { %12478 = vmatmul.mubr.f32.gmra.mrb[30].mxu0 %v22589_v0 }
 0x15f   :  { %12480 = vmatprep.mubr.f32.mxu0 %v22590_v62  ;;  %1616 = vperm.xlu1 %14247, %v344_v52   ;;  %v348_v52 = vld [vmem:[%s21249_s1 + $0xa8] sm:$0xff] }
 0x162   :  { %12481 = vmatmul.mubr.f32.gmra.mrb[32].mxu0 %v22591_v4 }
 0x163   :  { %12483 = vmatprep.mubr.f32.mxu0 %v15181_v29  ;;  %1565 = vperm.xlu1 %14247, %v327_v24   ;;  %v22593_v24 = vld [vmem:[#allocation149_spill] sm:$0xff] }
 0x166   :  { %1613 = vperm.xlu0 %14246, %v343_v13   ;;  %12484 = vmatmul.mubr.f32.gmra.mrb[34].mxu0 %v15195_v15  ;;  %v332_v13 = vld [vmem:[%s21249_s1 + $0x28] sm:$0xff] }
 0x167   :  { %12486 = vmatprep.mubr.f32.mxu0 %v22592_v16  ;;  %1568 = vperm.xlu1 %14247, %v328_v31   ;;  %v350_v31 = vld [vmem:[%s21249_s1 + $0xb8] sm:$0xff] }
 0x16a   :  { %1628 = vperm.xlu0 %14246, %v348_v52   ;;  %12487 = vmatmul.mubr.f32.gmra.mrb[36].mxu0 %v22593_v24  ;;  %v329_v52 = vld [vmem:[%s21249_s1 + $0x10] sm:$0xff] }
 0x16b   :  { %12491 = vmatprep.mubr.f32.mxu0 %v22502_v36  ;;  %1619 = vperm.xlu1 %14247, %v345_v48   ;;  %v334_v36 = vld [vmem:[%s21249_s1 + $0x38] sm:$0xff]  ;;  %v881_v48 = vcvt.f32.s32 %v15828_v17 }
 0x16e   :  { %1580 = vperm.xlu0 %14246, %v332_v13   ;;  %12492 = vmatmul.mubr.f32.vlgmr.msra.gmra.mrb[0].mxu0 %v22507_v41  ;;  %v330_v41 = vld [vmem:[%s21249_s1 + $0x18] sm:$0xff] }
 0x16f   :  { %12494 = vmatprep.mubr.f32.mxu0 %v22509_v59  ;;  %1622 = vperm.xlu1 %14247, %v346_v58   ;;  %v352_v59 = vld [vmem:[%s21249_s1 + $0xc8] sm:$0xff] }
 0x172   :  { %1634 = vperm.xlu0 %14246, %v350_v31   ;;  %12495 = vmatmul.mubr.f32.gmra.mrb[2].mxu0 %v22516_v39  ;;  %v347_v39 = vld [vmem:[%s21249_s1 + $0xa0] sm:$0xff]  ;;  %v882_v31 = vshll.u32 %v881_v48, 16 }
 0x173   :  { %12497 = vmatprep.mubr.f32.mxu0 %v22518_v21  ;;  %1571 = vperm.xlu1 %14247, %v329_v52   ;;  %v336_v21 = vld [vmem:[%s21249_s1 + $0x48] sm:$0xff]  ;;  %v351_v52 = vld [vmem:[%s21249_s1 + $0xc0] sm:$0xff] }
 0x176   :  { %1586 = vperm.xlu0 %14246, %v334_v36   ;;  %12498 = vmatmul.mubr.f32.gmra.mrb[4].mxu0 %v22524_v26  ;;  %v331_v26 = vld [vmem:[%s21249_s1 + $0x20] sm:$0xff]  ;;  %v626_v36 = vcvt.f32.s32 %v15838_v56 }
 0x177   :  { %12500 = vmatprep.mubr.f32.mxu0 %v22528_v44  ;;  %1574 = vperm.xlu1 %14247, %v330_v41   ;;  %v354_v44 = vld [vmem:[%s21249_s1 + $0xd8] sm:$0xff]  ;;  %v335_v56 = vld [vmem:[%s21249_s1 + $0x40] sm:$0xff] }
 0x17a   :  { %1640 = vperm.xlu0 %14246, %v352_v59   ;;  %12501 = vmatmul.mubr.f32.gmra.mrb[6].mxu0 %v22534_v8  ;;  %v866_v8 = vcvt.f32.s32 %v15817_v3 }
 0x17b   :  { %12503 = vmatprep.mubr.f32.mxu0 %v22538_v43  ;;  %1625 = vperm.xlu1 %14247, %v347_v39   ;;  %v349_v43 = vld [vmem:[%s21249_s1 + $0xb0] sm:$0xff] }
 0x17c   :  { %v867_v58 = vshll.u32 %v866_v8, 16  ;;  %v641_v8 = vcvt.f32.s32 %v15857_v35  ;;  %v342_v35 = vld [vmem:[%s21249_s1 + $0x78] sm:$0xff] }
 0x17e   :  { %1592 = vperm.xlu0 %14246, %v336_v21   ;;  %12504 = vmatmul.mubr.f32.gmra.mrb[8].mxu0 %v22544_v45  ;;  %v338_v45 = vld [vmem:[%s21249_s1 + $0x58] sm:$0xff]  ;;  %v627_v21 = vshll.u32 %v626_v36, 16 }
 0x17f   :  { %12506 = vmatprep.mubr.f32.mxu0 %v22547_v2  ;;  %1577 = vperm.xlu1 %14247, %v331_v26   ;;  %v333_v2 = vld [vmem:[%s21249_s1 + $0x30] sm:$0xff] }
 0x182   :  { %1646 = vperm.xlu0 %14246, %v354_v44   ;;  %12507 = vmatmul.mubr.f32.gmra.mrb[10].mxu0 %v22552_v55  ;;  %v356_v55 = vld [vmem:[%s21249_s1 + $0xe8] sm:$0xff] }
 0x183   :  { %12509 = vmatprep.mubr.f32.mxu0 %v22554_v1  ;;  %1631 = vperm.xlu1 %14247, %v349_v43  }
 0x186   :  { %v864_v3 = vpop.xlane.xlu0 %863  ;;  %1598 = vperm.xlu0 %14246, %v338_v45   ;;  %12510 = vmatmul.mubr.f32.gmra.mrb[12].mxu0 %v22558_v33  ;;  %v22594_v45 = vld [vmem:[#allocation2_spill] sm:$0xff] }
 0x187   :  { %v865_v13 = vcvt.f32.s32 %v864_v3  ;;  %12512 = vmatprep.mubr.f32.mxu0 %v22561_v22  ;;  %1583 = vperm.xlu1 %14247, %v333_v2   ;;  %v340_v22 = vld [vmem:[%s21249_s1 + $0x68] sm:$0xff]  ;;  %v21639_v2 = vmov 1.0|1.0  }
 0x189   :  { %v16254_v17 = vadd.s32 %v867_v58, %v865_v13 }
 0x18a   :  { %1652 = vperm.xlu0 %14246, %v356_v55   ;;  %12513 = vmatmul.mubr.f32.gmra.mrb[14].mxu0 %v22564_v7  ;;  %v911_v55 = vcvt.f32.s32 %v15871_v28  ;;  %v355_v28 = vld [vmem:[%s21249_s1 + $0xe0] sm:$0xff] }
 0x18b   :  { %v879_v1 = vpop.xlane.xlu1 %878  ;;  %v1200_v41 = vand.u32 7, %v16254_v17  ;;  %12515 = vmatprep.mubr.f32.mxu0 %v22567_v12  ;;  %1637 = vperm.xlu1 %14247, %v351_v52   ;;  %v358_v12 = vld [vmem:[%s21249_s1 + $0xf8] sm:$0xff] }
 0x18c   :  { %v880_v33 = vcvt.f32.s32 %v879_v1 }
 0x18d   :  { %v1238_v59 = vsub.s32 7, %v1200_v41 }
 0x18e   :  { %v16266_v39 = vadd.s32 %v882_v31, %v880_v33  ;;  %1604 = vperm.xlu0 %14246, %v340_v22   ;;  %12516 = vmatmul.mubr.f32.gmra.mrb[16].mxu0 %v22569_v5  ;;  %v353_v5 = vld [vmem:[%s21249_s1 + $0xd0] sm:$0xff]  ;;  %v896_v31 = vcvt.f32.s32 %v15874_v25  ;;  %v912_v25 = vshll.u32 %v911_v55, 16 }
 0x18f   :  { %v624_v44 = vpop.xlane.xlu0 %623  ;;  %12518 = vmatprep.mubr.f32.mxu0 %v22570_v49  ;;  %vm1466_vm11 = vcmp.eq.s32.totalorder %v22594_v45, %v1238_v59  ;;  %1589 = vperm.xlu1 %14247, %v335_v56   ;;  %v642_v49 = vshll.u32 %v641_v8, 16  ;;  %v671_v8 = vcvt.f32.s32 %v15893_v63 }
 0x190   :  { %v1201_v26 = vand.u32 7, %v16266_v39  ;;  %v625_v7 = vcvt.f32.s32 %v624_v44 }
 0x192   :  { %v1239_v43 = vsub.s32 7, %v1201_v26  ;;  %v16279_v58 = vadd.s32 %v627_v21, %v625_v7  ;;  %1658 = vperm.xlu0 %14246, %v358_v12   ;;  %12519 = vmatmul.mubr.f32.gmra.mrb[18].mxu0 %v22573_v54  ;;  %v337_v54 = vld [vmem:[%s21249_s1 + $0x50] sm:$0xff]  ;;  %v656_v26 = vcvt.f32.s32 %v15896_v40  ;;  %v364_v40 = vld [vmem:[%s21249_s1 + $0x128] sm:$0xff] }
 0x193   :  { %12521 = vmatprep.mubr.f32.mxu0 %v22575_v30  ;;  %1643 = vperm.xlu1 %14247, %v353_v5   ;;  %v360_v30 = vld [vmem:[%s21249_s1 + $0x108] sm:$0xff] }
 0x194   :  { %vm1467_vm12 = vcmp.eq.s32.totalorder %v22594_v45, %v1239_v43  ;;  %v1184_v48 = vand.u32 7, %v16279_v58  ;;  %v657_v43 = vshll.u32 %v656_v26, 16 }
 0x195   :  { %vm12938_vm13 = vmpackc.low %vm1467_vm12, %vm1466_vm11  ;;  %v639_v3 = vpop.xlane.xlu1 %638 }
 0x196   :  { %12939 = vmatprep.subr.msk.bf16.mxu1 %vm12938_vm13, %v21639_v2  ;;  %v640_v13 = vcvt.f32.s32 %v639_v3  ;;  %1610 = vperm.xlu0 %14246, %v342_v35   ;;  %v1222_v1 = vsub.s32 7, %v1184_v48  ;;  %v926_v48 = vcvt.f32.s32 %v15917_v38  ;;  %v941_v3 = vcvt.f32.s32 %v15915_v37  ;;  %v341_v38 = vld [vmem:[%s21249_s1 + $0x70] sm:$0xff] }
 0x197   :  { %12522 = vmatmul.mubr.f32.gmra.mrb[20].mxu0 %v22577_v18  ;;  %1595 = vperm.xlu1 %14247, %v337_v54   ;;  %v897_v18 = vshll.u32 %v896_v31, 16 }
 0x198   :  { %12524 = vmatprep.mubr.f32.mxu0 %v22578_v34  ;;  %v16302_v52 = vadd.s32 %v642_v49, %v640_v13  ;;  %v362_v34 = vld [vmem:[%s21249_s1 + $0x118] sm:$0xff]  ;;  %vm1450_vm14 = vcmp.eq.s32.totalorder %v22594_v45, %v1222_v1  ;;  %v357_v49 = vld [vmem:[%s21249_s1 + $0xf0] sm:$0xff]  ;;  %v672_v13 = vshll.u32 %v671_v8, 16  ;;  %v942_v37 = vshll.u32 %v941_v3, 16 }
 0x199   :  { %v909_v36 = vpop.xlane.xlu1 %908 }
 0x19a   :  { %v894_v41 = vpop.xlane.xlu0 %893  ;;  %v1185_v33 = vand.u32 7, %v16302_v52  ;;  %1664 = vperm.xlu0 %14246, %v360_v30   ;;  %v910_v22 = vcvt.f32.s32 %v909_v36 }
 0x19b   :  { %12525 = vmatmul.mubr.f32.gmra.mrb[22].mxu0 %v22581_v42  ;;  %v895_v59 = vcvt.f32.s32 %v894_v41  ;;  %1649 = vperm.xlu1 %14247, %v355_v28   ;;  %v339_v42 = vld [vmem:[%s21249_s1 + $0x60] sm:$0xff] }
 0x19c   :  { %12527 = vmatprep.mubr.f32.mxu0 %v22582_v27  ;;  %v1223_v56 = vsub.s32 7, %v1185_v33  ;;  %v16320_v7 = vadd.s32 %v912_v25, %v910_v22  ;;  %v701_v22 = vcvt.f32.s32 %v15936_v51 }
 0x19d   :  { %v669_v21 = vpop.xlane.xlu1 %668  ;;  %v16322_v27 = vadd.s32 %v897_v18, %v895_v59 }
 0x19e   :  { %v654_v44 = vpop.xlane.xlu0 %653  ;;  %vm1451_vm15 = vcmp.eq.s32.totalorder %v22594_v45, %v1223_v56  ;;  %1670 = vperm.xlu0 %14246, %v362_v34   ;;  %v1203_v5 = vand.u32 7, %v16320_v7  ;;  %v670_v55 = vcvt.f32.s32 %v669_v21  ;;  %v702_v8 = vshll.u32 %v701_v22, 16 }
 0x19f   :  { %12528 = vmatmul.mubr.f32.gmra.mrb[24].mxu0 %v22583_v47  ;;  %vm12940_vm1 = vmpackc.low %vm1451_vm15, %vm1450_vm14  ;;  %v655_v47 = vcvt.f32.s32 %v654_v44  ;;  %1601 = vperm.xlu1 %14247, %v339_v42   ;;  %v361_v44 = vld [vmem:[%s21249_s1 + $0x110] sm:$0xff] }
 0x1a0   :  { %12530 = vmatprep.mubr.f32.mxu0 %v22584_v19  ;;  %12941 = vmatpush3.bf16.msk.msra.mxu1 %vm12940_vm1, %v21639_v2  ;;  %v1202_v19 = vand.u32 7, %v16322_v27  ;;  %v1241_v54 = vsub.s32 7, %v1203_v5  ;;  %v16351_v33 = vadd.s32 %v672_v13, %v670_v55 }
 0x1a1   :  { %v939_v12 = vpop.xlane.xlu1 %938  ;;  %v16341_v31 = vadd.s32 %v657_v43, %v655_v47  ;;  %v716_v47 = vcvt.f32.s32 %v15987_v20 }
 0x1a2   :  { %v924_v35 = vpop.xlane.xlu0 %923  ;;  %1676 = vperm.xlu0 %14246, %v364_v40   ;;  %v1240_v1 = vsub.s32 7, %v1202_v19  ;;  %v940_v25 = vcvt.f32.s32 %v939_v12  ;;  %vm1469_vm2 = vcmp.eq.s32.totalorder %v22594_v45, %v1241_v54  ;;  %v956_v40 = vcvt.f32.s32 %v15966_v50  ;;  %v363_v50 = vld [vmem:[%s21249_s1 + $0x120] sm:$0xff] }
 0x1a3   :  { %12531 = vmatmul.mubr.f32.gmra.mrb[26].mxu0 %v22585_v53  ;;  %1655 = vperm.xlu1 %14247, %v357_v49   ;;  %v927_v53 = vshll.u32 %v926_v48, 16  ;;  %v925_v36 = vcvt.f32.s32 %v924_v35  ;;  %v1186_v28 = vand.u32 7, %v16341_v31  ;;  %v717_v13 = vshll.u32 %v716_v47, 16  ;;  %v22596_v47 = vld [vmem:[#allocation92_spill] sm:$0xff] }
 0x1a4   :  { %12533 = vmatprep.mubr.f32.mxu0 %v22586_v10  ;;  %v686_v10 = vcvt.f32.s32 %v15939_v6  ;;  %v1187_v6 = vand.u32 7, %v16351_v33  ;;  %vm1468_vm3 = vcmp.eq.s32.totalorder %v22594_v45, %v1240_v1  ;;  %v16367_v21 = vadd.s32 %v942_v37, %v940_v25 }
 0x1a5   :  { %v16339_v63 = vpop.xlane.xlu1 %698  ;;  %vm12942_vm4 = vmpackc.low %vm1469_vm2, %vm1468_vm3  ;;  %v1224_v56 = vsub.s32 7, %v1186_v28  ;;  %v957_v48 = vshll.u32 %v956_v40, 16 }
 0x1a6   :  { %v684_v30 = vpop.xlane.xlu0 %683  ;;  %v687_v34 = vshll.u32 %v686_v10, 16  ;;  %12943 = vmatprep.subr.msk.bf16.mxu1 %vm12942_vm4, %v21639_v2  ;;  %v1225_v51 = vsub.s32 7, %v1187_v6  ;;  %v700_v43 = vcvt.f32.s32 %v16339_v63  ;;  %v1001_v6 = vcvt.f32.s32 %v15998_v57 }
 0x1a7   :  { %12534 = vmatmul.mubr.f32.gmra.mrb[28].mxu0 %v22587_v11  ;;  %1607 = vperm.xlu1 %14247, %v341_v38   ;;  %v359_v11 = vld [vmem:[%s21249_s1 + $0x100] sm:$0xff]  ;;  %vm1452_vm5 = vcmp.eq.s32.totalorder %v22594_v45, %v1224_v56 }
 0x1a8   :  { %12536 = vmatprep.mubr.f32.mxu0 %v22588_v23  ;;  %v16360_v23 = vadd.s32 %v927_v53, %v925_v36  ;;  %vm1453_vm6 = vcmp.eq.s32.totalorder %v22594_v45, %v1225_v51  ;;  %v22595_v51 = vld [vmem:[#allocation96_spill] sm:$0xff] }
 0x1a9   :  { %v16349_v41 = vpop.xlane.xlu1 %968  ;;  %vm12944_vm7 = vmpackc.low %vm1453_vm6, %vm1452_vm5 }
 0x1aa   :  { %v954_v18 = vpop.xlane.xlu0 %953  ;;  %v1204_v42 = vand.u32 7, %v16360_v23  ;;  %12945 = vmatpush3.bf16.msk.msra.mxu1 %vm12944_vm7, %v21639_v2  ;;  %v970_v54 = vcvt.f32.s32 %v16349_v41 }
 0x1ab   :  { %12537 = vmatmul.mubr.f32.gmra.mrb[30].mxu0 %v22589_v0  ;;  %v685_v0 = vcvt.f32.s32 %v684_v30  ;;  %1661 = vperm.xlu1 %14247, %v359_v11   ;;  %v955_v19 = vcvt.f32.s32 %v954_v18 }
 0x1ac   :  { %12539 = vmatprep.mubr.f32.mxu0 %v22590_v62  ;;  %v1205_v62 = vand.u32 7, %v16367_v21  ;;  %v1242_v49 = vsub.s32 7, %v1204_v42  ;;  %v1002_v42 = vshll.u32 %v1001_v6, 16 }
 0x1ad   :  { %v16365_v59 = vpop.xlane.xlu1 %728  ;;  %v16381_v5 = vadd.s32 %v687_v34, %v685_v0  ;;  %v16406_v38 = vadd.s32 %v957_v48, %v955_v19 }
 0x1ae   :  { %v714_v26 = vpop.xlane.xlu0 %713  ;;  %vm1470_vm8 = vcmp.eq.s32.totalorder %v22594_v45, %v1242_v49  ;;  %v730_v10 = vcvt.f32.s32 %v16365_v59  ;;  %v22597_v49 = vld [vmem:[#allocation104_spill] sm:$0xff] }
 0x1af   :  { %12540 = vmatmul.mubr.f32.gmra.mrb[32].mxu0 %v22591_v4  ;;  %1667 = vperm.xlu1 %14247, %v361_v44   ;;  %v971_v4 = vcvt.f32.s32 %v15958_v60  ;;  %v16394_v60 = vadd.s32 %v702_v8, %v700_v43  ;;  %v1188_v20 = vand.u32 7, %v16381_v5  ;;  %v715_v30 = vcvt.f32.s32 %v714_v26 }
 0x1b0   :  { %12542 = vmatprep.mubr.f32.mxu0 %v15181_v29  ;;  %v1243_v29 = vsub.s32 7, %v1205_v62  ;;  %v1206_v18 = vand.u32 7, %v16406_v38  ;;  %v746_v62 = vcvt.f32.s32 %v22595_v51  ;;  %v1016_v48 = vcvt.f32.s32 %v22597_v49  ;;  %v22600_v51 = vld [vmem:[#allocation109_spill] sm:$0xff]  ;;  %v22601_v49 = vld [vmem:[#allocation122_spill] sm:$0xff] }
 0x1b1   :  { %v16378_v12 = vpop.xlane.xlu1 %998  ;;  %v972_v63 = vshll.u32 %v971_v4, 16  ;;  %v16416_v28 = vadd.s32 %v717_v13, %v715_v30 }
 0x1b2   :  { %v984_v35 = vpop.xlane.xlu0 %983  ;;  %vm1471_vm9 = vcmp.eq.s32.totalorder %v22594_v45, %v1243_v29  ;;  %v1244_v26 = vsub.s32 7, %v1206_v18  ;;  %v1000_v40 = vcvt.f32.s32 %v16378_v12  ;;  %v747_v29 = vshll.u32 %v746_v62, 16  ;;  %v22599_v18 = vld [vmem:[#allocation113_spill] sm:$0xff] }
 0x1b3   :  { %12543 = vmatmul.mubr.f32.gmra.mrb[34].mxu0 %v15195_v15  ;;  %1673 = vperm.xlu1 %14247, %v363_v50   ;;  %v731_v15 = vcvt.f32.s32 %v15979_v32  ;;  %vm12946_vm10 = vmpackc.low %vm1471_vm9, %vm1470_vm8  ;;  %v1226_v32 = vsub.s32 7, %v1188_v20  ;;  %v16413_v37 = vadd.s32 %v972_v63, %v970_v54  ;;  %v1190_v59 = vand.u32 7, %v16416_v28 }
 0x1b4   :  { %12545 = vmatprep.mubr.f32.mxu0 %v22592_v16  ;;  %v1189_v16 = vand.u32 7, %v16394_v60  ;;  %12947 = vmatprep.subr.msk.bf16.mxu1 %vm12946_vm10, %v21639_v2  ;;  %v985_v56 = vcvt.f32.s32 %v984_v35  ;;  %v761_v35 = vcvt.f32.s32 %v22596_v47  ;;  %vm1472_vm14 = vcmp.eq.s32.totalorder %v22594_v45, %v1244_v26 }
 0x1b5   :  { %v16392_v3 = vpop.xlane.xlu1 %758  ;;  %v732_v1 = vshll.u32 %v731_v15, 16  ;;  %v1207_v25 = vand.u32 7, %v16413_v37  ;;  %vm1454_vm11 = vcmp.eq.s32.totalorder %v22594_v45, %v1226_v32  ;;  %v1228_v4 = vsub.s32 7, %v1190_v59  ;;  %v22598_v15 = vld [vmem:[#allocation102_spill] sm:$0xff] }
 0x1b6   :  { %v16400_v55 = vpop.xlane.xlu0 %743  ;;  %v1227_v41 = vsub.s32 7, %v1189_v16  ;;  %v16446_v20 = vadd.s32 %v1002_v42, %v1000_v40  ;;  %v1031_v13 = vcvt.f32.s32 %v22598_v15  ;;  %v762_v16 = vshll.u32 %v761_v35, 16 }
 0x1b7   :  { %12546 = vmatmul.mubr.f32.gmra.mrb[36].mxu0 %v22593_v24  ;;  %v986_v24 = vcvt.f32.s32 %v16006_v46  ;;  %v16424_v46 = vadd.s32 %v732_v1, %v730_v10  ;;  %v1245_v0 = vsub.s32 7, %v1207_v25  ;;  %v745_v54 = vcvt.f32.s32 %v16400_v55 }
 0x1b8   :  { %7118 = vmatprep.mubr.f32.mxu0 %v22263_v9  ;;  %vm1455_vm12 = vcmp.eq.s32.totalorder %v22594_v45, %v1227_v41  ;;  %vm1456_vm2 = vcmp.eq.s32.totalorder %v22594_v45, %v1228_v4  ;;  %v1209_v30 = vand.u32 7, %v16446_v20  ;;  %v760_v32 = vcvt.f32.s32 %v16392_v3 }
 0x1b9   :  { %v16408_v53 = vpop.xlane.xlu1 %1028  ;;  %v987_v22 = vshll.u32 %v986_v24, 16  ;;  %v1191_v44 = vand.u32 7, %v16424_v46  ;;  %vm12948_vm13 = vmpackc.low %vm1455_vm12, %vm1454_vm11  ;;  %vm1473_vm15 = vcmp.eq.s32.totalorder %v22594_v45, %v1245_v0  ;;  %v1017_v1 = vshll.u32 %v1016_v48, 16 }
 0x1ba   :  { %v1014_v36 = vpop.xlane.xlu0 %1013  ;;  %12949 = vmatpush3.bf16.msk.msra.mxu1 %vm12948_vm13, %v21639_v2  ;;  %vm12950_vm1 = vmpackc.low %vm1473_vm15, %vm1472_vm14  ;;  %v16458_v24 = vadd.s32 %v747_v29, %v745_v54  ;;  %v1032_v55 = vshll.u32 %v1031_v13, 16  ;;  %v776_v6 = vcvt.f32.s32 %v22599_v18  ;;  %v1247_v59 = vsub.s32 7, %v1209_v30 }
 0x1bb   :  { %v16436_v8 = vadd.s32 %v987_v22, %v985_v56  ;;  %v1229_v50 = vsub.s32 7, %v1191_v44  ;;  %12951 = vmatprep.subr.msk.bf16.mxu1 %vm12950_vm1, %v21639_v2  ;;  %v1015_v10 = vcvt.f32.s32 %v1014_v36  ;;  %v16466_v56 = vadd.s32 %v762_v16, %v760_v32  ;;  %v22602_v16 = vld [vmem:[#allocation116_spill] sm:$0xff] }
 0x1bc   :  { %v1192_v3 = vand.u32 7, %v16458_v24  ;;  %v1030_v0 = vcvt.f32.s32 %v16408_v53  ;;  %v791_v62 = vcvt.f32.s32 %v22600_v51  ;;  %v777_v40 = vshll.u32 %v776_v6, 16 }
 0x1bd   :  { %v16420_v11 = vpop.xlane.xlu1 %788  ;;  %v1208_v12 = vand.u32 7, %v16436_v8  ;;  %vm1457_vm3 = vcmp.eq.s32.totalorder %v22594_v45, %v1229_v50  ;;  %v16470_v26 = vadd.s32 %v1017_v1, %v1015_v10  ;;  %v1193_v36 = vand.u32 7, %v16466_v56 }
 0x1be   :  { %v16426_v34 = vpop.xlane.xlu0 %773  ;;  %vm12952_vm4 = vmpackc.low %vm1457_vm3, %vm1456_vm2  ;;  %v1230_v4 = vsub.s32 7, %v1192_v3  ;;  %v16479_v47 = vadd.s32 %v1032_v55, %v1030_v0  ;;  %vm1475_vm6 = vcmp.eq.s32.totalorder %v22594_v45, %v1247_v59  ;;  %v1046_v48 = vcvt.f32.s32 %v22601_v49 }
 0x1bf   :  { %v1246_v41 = vsub.s32 7, %v1208_v12  ;;  %12953 = vmatpush3.bf16.msk.msra.mxu1 %vm12952_vm4, %v21639_v2  ;;  %v1210_v53 = vand.u32 7, %v16470_v26  ;;  %v775_v35 = vcvt.f32.s32 %v16426_v34  ;;  %v1231_v50 = vsub.s32 7, %v1193_v36  ;;  %v22603_v36 = vld [vmem:[#allocation124_spill] sm:$0xff] }
 0x1c0   :  { %v1211_v29 = vand.u32 7, %v16479_v47  ;;  %v792_v15 = vshll.u32 %v791_v62, 16  ;;  %v790_v13 = vcvt.f32.s32 %v16420_v11  ;;  %vm1458_vm8 = vcmp.eq.s32.totalorder %v22594_v45, %v1230_v4 }
 0x1c1   :  { %v16433_v57 = vpop.xlane.xlu1 %1058  ;;  %vm1474_vm5 = vcmp.eq.s32.totalorder %v22594_v45, %v1246_v41  ;;  %v16490_v54 = vadd.s32 %v777_v40, %v775_v35  ;;  %v1061_v30 = vcvt.f32.s32 %v22602_v16  ;;  %v1248_v32 = vsub.s32 7, %v1210_v53 }
 0x1c2   :  { %v16438_v43 = vpop.xlane.xlu0 %1043  ;;  %vm12954_vm7 = vmpackc.low %vm1475_vm6, %vm1474_vm5  ;;  %v1249_v1 = vsub.s32 7, %v1211_v29  ;;  %vm1459_vm9 = vcmp.eq.s32.totalorder %v22594_v45, %v1231_v50  ;;  %v1047_v10 = vshll.u32 %v1046_v48, 16  ;;  %v806_v55 = vcvt.f32.s32 %v16092_v61 }
 0x1c3   :  { %12955 = vmatprep.subr.msk.bf16.mxu1 %vm12954_vm7, %v21639_v2  ;;  %vm12956_vm10 = vmpackc.low %vm1459_vm9, %vm1458_vm8  ;;  %v16500_v18 = vadd.s32 %v792_v15, %v790_v13  ;;  %v1194_v11 = vand.u32 7, %v16490_v54  ;;  %v1062_v6 = vshll.u32 %v1061_v30, 16  ;;  %v1060_v59 = vcvt.f32.s32 %v16433_v57  ;;  %v22608_v15 = vld [vmem:[#allocation135_spill] sm:$0xff] }
 0x1c4   :  { %12957 = vmatpush3.bf16.msk.msra.mxu1 %vm12956_vm10, %v21639_v2  ;;  %v1045_v3 = vcvt.f32.s32 %v16438_v43  ;;  %vm1476_vm11 = vcmp.eq.s32.totalorder %v22594_v45, %v1248_v32  ;;  %vm1477_vm12 = vcmp.eq.s32.totalorder %v22594_v45, %v1249_v1  ;;  %v821_v51 = vcvt.f32.s32 %v22603_v36 }
 0x1c5   :  { %v16444_v19 = vpop.xlane.xlu1 %818  ;;  %v1195_v0 = vand.u32 7, %v16500_v18  ;;  %vm12958_vm13 = vmpackc.low %vm1477_vm12, %vm1476_vm11  ;;  %v807_v40 = vshll.u32 %v806_v55, 16  ;;  %v1232_v4 = vsub.s32 7, %v1194_v11  ;;  %v16518_v53 = vadd.s32 %v1062_v6, %v1060_v59  ;;  %v22611_v55 = vld [vmem:[#allocation128_spill] sm:$0xff] }
 0x1c6   :  { %v16450_v63 = vpop.xlane.xlu0 %803  ;;  %v16510_v61 = vadd.s32 %v1047_v10, %v1045_v3  ;;  %12959 = vmatprep.subr.msk.bf16.mxu1 %vm12958_vm13, %v21639_v2  ;;  %v822_v48 = vshll.u32 %v821_v51, 16  ;;  %v1076_v13 = vcvt.f32.s32 %v22608_v15  ;;  %v820_v30 = vcvt.f32.s32 %v16444_v19 }
 0x1c7   :  { %v805_v57 = vcvt.f32.s32 %v16450_v63  ;;  %22605 = vst [vmem:[#allocation146_spill] sm:$0xff] %v16518_v53  ;;  %v1233_v29 = vsub.s32 7, %v1195_v0  ;;  %v1213_v16 = vand.u32 7, %v16518_v53  ;;  %vm1460_vm14 = vcmp.eq.s32.totalorder %v22594_v45, %v1232_v4  ;;  %v22616_v4 = vld [vmem:[#allocation143_spill] sm:$0xff] }
 0x1c8   :  { %22604 = vst [vmem:[#allocation139_spill] sm:$0xff] %v16510_v61  ;;  %v1212_v35 = vand.u32 7, %v16510_v61  ;;  %v1091_v11 = vcvt.f32.s32 %v22611_v55  ;;  %v1077_v59 = vshll.u32 %v1076_v13, 16  ;;  %v16539_v0 = vadd.s32 %v822_v48, %v820_v30  ;;  %v22619_v13 = vld [vmem:[#allocation138_spill] sm:$0xff] }
 0x1c9   :  { %v16461_v25 = vpop.xlane.xlu1 %1088  ;;  %v16528_v32 = vadd.s32 %v807_v40, %v805_v57  ;;  %vm1461_vm15 = vcmp.eq.s32.totalorder %v22594_v45, %v1233_v29  ;;  %v1251_v3 = vsub.s32 7, %v1213_v16  ;;  %v836_v57 = vcvt.f32.s32 %v22616_v4 }
 0x1ca   :  { %v16464_v22 = vpop.xlane.xlu0 %1073  ;;  %v1250_v1 = vsub.s32 7, %v1212_v35  ;;  %22613 = vst [vmem:[#allocation154_spill] sm:$0xff] %v16539_v0  ;;  %vm12960_vm1 = vmpackc.low %vm1461_vm15, %vm1460_vm14  ;;  %v1197_v35 = vand.u32 7, %v16539_v0  ;;  %v1092_v48 = vshll.u32 %v1091_v11, 16  ;;  %v851_v16 = vcvt.f32.s32 %v22619_v13 }
 0x1cb   :  { %22609 = vst [vmem:[#allocation151_spill] sm:$0xff] %v16528_v32  ;;  %v1196_v36 = vand.u32 7, %v16528_v32  ;;  %12961 = vmatpush3.bf16.msk.msra.mxu1 %vm12960_vm1, %v21639_v2  ;;  %v1075_v51 = vcvt.f32.s32 %v16464_v22  ;;  %v1090_v30 = vcvt.f32.s32 %v16461_v25  ;;  %vm1479_vm3 = vcmp.eq.s32.totalorder %v22594_v45, %v1251_v3 }
 0x1cc   :  { %vm1478_vm2 = vcmp.eq.s32.totalorder %v22594_v45, %v1250_v1  ;;  %v837_v1 = vshll.u32 %v836_v57, 16  ;;  %v1121_v25 = vcvt.f32.s32 %v16128_v14  ;;  %v852_v3 = vshll.u32 %v851_v16, 16 }
 0x1cd   :  { %v16557_v55 = vadd.s32 %v1077_v59, %v1075_v51  ;;  %v1234_v4 = vsub.s32 7, %v1196_v36  ;;  %vm12962_vm4 = vmpackc.low %vm1479_vm3, %vm1478_vm2  ;;  %v22625_v59 = vld [vmem:[#allocation148_spill] sm:$0xff] }
 0x1ce   :  { %v16474_v44 = vpop.xlane.xlu1 %848  ;;  %v16477_v42 = vpop.xlane.xlu0 %833  ;;  %v1106_v51 = vcvt.f32.s32 %v22625_v59  ;;  %v1122_v16 = vshll.u32 %v1121_v25, 16  ;;  %v22638_v25 = vld [vmem:[#allocation142_spill] sm:$0xff] }
 0x1cf   :  { %22620 = vst [vmem:[#allocation158_spill] sm:$0xff] %v16557_v55  ;;  %v835_v11 = vcvt.f32.s32 %v16477_v42  ;;  %v1214_v36 = vand.u32 7, %v16557_v55  ;;  %v850_v57 = vcvt.f32.s32 %v16474_v44  ;;  %vm1462_vm5 = vcmp.eq.s32.totalorder %v22594_v45, %v1234_v4  ;;  %v22634_v4 = vld [vmem:[#allocation137_spill] sm:$0xff] }
 0x1d1   :  { %v16583_v59 = vadd.s32 %v837_v1, %v835_v11  ;;  %v1252_v55 = vsub.s32 7, %v1214_v36  ;;  %v16593_v32 = vadd.s32 %v852_v3, %v850_v57 }
 0x1d2   :  { %v16487_v12 = vpop.xlane.xlu1 %1118 }
 0x1d3   :  { %22630 = vst [vmem:[#allocation171_spill] sm:$0xff] %v16583_v59  ;;  %22635 = vst [vmem:[#allocation169_spill] sm:$0xff] %v16593_v32  ;;  %v1198_v3 = vand.u32 7, %v16583_v59  ;;  %vm1480_vm9 = vcmp.eq.s32.totalorder %v22594_v45, %v1252_v55 }
 0x1d4   :  { %v16494_v34 = vpop.xlane.xlu0 %1103 }
 0x1d5   :  { %v1105_v44 = vcvt.f32.s32 %v16494_v34  ;;  %v1120_v34 = vcvt.f32.s32 %v16487_v12 }
 0x1d7   :  { %v16497_v41 = vpop.xlane.xlu1 %1148  ;;  %v16521_v50 = vpop.f32.mrb[0].mxu1  ;;  %v16618_v59 = vadd.s32 %v1122_v16, %v1120_v34 }
 0x1d8   :  { %v16512_v62 = vpop.xlane.xlu0 %1133  ;;  %22606 = vst [vmem:[#allocation150_spill] sm:$0xff] %v16521_v50  ;;  %v16523_v49 = vpop.f32.mrb[1].mxu1  ;;  %v1136_v50 = vcvt.f32.s32 %v22634_v4  ;;  %v1199_v4 = vand.u32 7, %v16593_v32  ;;  %v1277_v32 = vand.u32 4294967288, %v16266_v39 }
 0x1d9   :  { %22607 = vst [vmem:[#allocation152_spill] sm:$0xff] %v16523_v49  ;;  %v1276_v49 = vand.u32 4294967288, %v16254_v17  ;;  %v22633_v17 = vld [vmem:[#allocation130_spill] sm:$0xff] }
 0x1da   :  { %vm1315_vm12 = vcmp.lt.s32.totalorder %v1277_v32, 0 }
 0x1db   :  { %v16516_v43 = vpop.xlane.xlu1 %1178  ;;  %vm1314_vm8 = vcmp.lt.s32.totalorder %v1276_v49, 0 }
 0x1dc   :  { %v1180_v39 = vcvt.f32.s32 %v16516_v43 }
 0x1dd   :  { %v16533_v10 = vpop.xlane.xlu0 %1163 }
 0x1df   :  { %v16531_v63 = vpop.permute.xlu1 %1616  ;;  %v16537_v6 = vpop.f32.mrb[2].mxu1 }
 0x1e0   :  { %22610 = vst [vmem:[#allocation153_spill] sm:$0xff] %v16531_v63  ;;  %22612 = vst [vmem:[#allocation156_spill] sm:$0xff] %v16537_v6  ;;  %v16541_v19 = vpop.f32.mrb[3].mxu1  ;;  %v22623_v6 = vmov 1.0|1.0  }
 0x1e1   :  { %22614 = vst [vmem:[#allocation159_spill] sm:$0xff] %v16541_v19  ;;  %v1235_v19 = vsub.s32 7, %v1197_v35  ;;  %12963 = vmatprep.subr.msk.bf16.mxu1 %vm12962_vm4, %v22623_v6 }
 0x1e3   :  { %v16546_v40 = vpop.permute.xlu1 %1565  ;;  %vm1463_vm6 = vcmp.eq.s32.totalorder %v22594_v45, %v1235_v19  ;;  %v22637_v19 = vld [vmem:[#allocation134_spill] sm:$0xff] }
 0x1e4   :  { %22615 = vst [vmem:[#allocation155_spill] sm:$0xff] %v16546_v40  ;;  %v16553_v15 = vpop.f32.mrb[4].mxu1  ;;  %vm12964_vm7 = vmpackc.low %vm1463_vm6, %vm1462_vm5  ;;  %v1181_v11 = vcvt.f32.s32 %v22637_v19 }
 0x1e5   :  { %v16551_v29 = vpop.permute.xlu0 %1613  ;;  %22618 = vst [vmem:[#allocation157_spill] sm:$0xff] %v16553_v15  ;;  %v16560_v22 = vpop.f32.mrb[5].mxu1  ;;  %12965 = vmatpush3.bf16.msk.msra.mxu1 %vm12964_vm7, %v22623_v6 }
 0x1e6   :  { %22617 = vst [vmem:[#allocation160_spill] sm:$0xff] %v16551_v29  ;;  %22621 = vst [vmem:[#allocation162_spill] sm:$0xff] %v16560_v22  ;;  %v16572_v22 = vadd.s32 %v1092_v48, %v1090_v30  ;;  %v1107_v30 = vshll.u32 %v1106_v51, 16  ;;  %v1166_v51 = vcvt.f32.s32 %v22638_v25  ;;  %v1150_v25 = vcvt.f32.s32 %v16497_v41 }
 0x1e7   :  { %v16562_v2 = vpop.permute.xlu1 %1568  ;;  %v1182_v61 = vshll.u32 %v1181_v11, 16  ;;  %v1217_v41 = vand.u32 7, %v16618_v59  ;;  %v1260_v11 = vand.u32 4294967288, %v16279_v58  ;;  %v1165_v58 = vcvt.f32.s32 %v16533_v10 }
 0x1e8   :  { %22622 = vst [vmem:[#allocation164_spill] sm:$0xff] %v16562_v2  ;;  %22627 = vst [vmem:[#allocation163_spill] sm:$0xff] %v16572_v22  ;;  %v1215_v14 = vand.u32 7, %v16572_v22  ;;  %v1352_v22 = vxor.u32 2147483647, %v1276_v49  ;;  %v16607_v57 = vadd.s32 %v1107_v30, %v1105_v44  ;;  %v1167_v30 = vshll.u32 %v1166_v51, 16 }
 0x1e9   :  { %v16566_v15 = vpop.permute.xlu0 %1628  ;;  %v1237_v44 = vsub.s32 7, %v1199_v4  ;;  %vm1298_vm1 = vcmp.lt.s32.totalorder %v1260_v11, 0 }
 0x1ea   :  { %22624 = vst [vmem:[#allocation161_spill] sm:$0xff] %v16566_v15  ;;  %v16570_v13 = vpop.f32.mrb[6].mxu1  ;;  %v1216_v55 = vand.u32 7, %v16607_v57 }
 0x1eb   :  { %22626 = vst [vmem:[#allocation166_spill] sm:$0xff] %v16570_v13  ;;  %v16576_v35 = vpop.f32.mrb[7].mxu1  ;;  %v16580_v42 = vpop.permute.xlu1 %1619  ;;  %v1151_v13 = vcvt.f32.s32 %v22633_v17  ;;  %v1253_v17 = vsub.s32 7, %v1215_v14  ;;  %v16615_v14 = vsel %vm1314_vm8, %v1352_v22, %v1276_v49  ;;  %v1135_v49 = vcvt.f32.s32 %v16512_v62 }
 0x1ec   :  { %22628 = vst [vmem:[#allocation168_spill] sm:$0xff] %v16576_v35  ;;  %22629 = vst [vmem:[#allocation165_spill] sm:$0xff] %v16580_v42  ;;  %v16641_v62 = vadd.s32 %v1182_v61, %v1180_v39  ;;  %vm1465_vm14 = vcmp.eq.s32.totalorder %v22594_v45, %v1237_v44  ;;  %v1261_v39 = vand.u32 4294967288, %v16302_v52 }
 0x1ed   :  { %v16586_v48 = vpop.permute.xlu0 %1580  ;;  %v1152_v19 = vshll.u32 %v1151_v13, 16  ;;  %22643 = vst [vmem:[#allocation179_spill] sm:$0xff] %v16615_v14  ;;  %vm1481_vm10 = vcmp.eq.s32.totalorder %v22594_v45, %v1253_v17  ;;  %v22647_v13 = vld [vmem:[#allocation58_spill] sm:$0xff]  ;;  %v1353_v17 = vxor.u32 2147483647, %v1277_v32 }
 0x1ee   :  { %22631 = vst [vmem:[#allocation167_spill] sm:$0xff] %v16586_v48  ;;  %v16589_v35 = vpop.f32.mrb[8].mxu1  ;;  %vm12966_vm11 = vmpackc.low %vm1481_vm10, %vm1480_vm9  ;;  %v4250_v16 = vsub.f32 %v22647_v13, %v16615_v14  ;;  %v1254_v14 = vsub.s32 7, %v1216_v55  ;;  %vm1299_vm5 = vcmp.lt.s32.totalorder %v1261_v39, 0 }
 0x1ef   :  { %22632 = vst [vmem:[#allocation172_spill] sm:$0xff] %v16589_v35  ;;  %v16596_v1 = vpop.f32.mrb[9].mxu1  ;;  %v16601_v0 = vpop.permute.xlu1 %1622  ;;  %v1137_v35 = vshll.u32 %v1136_v50, 16  ;;  %v16634_v51 = vadd.s32 %v1152_v19, %v1150_v25  ;;  %12967 = vmatprep.subr.msk.bf16.mxu1 %vm12966_vm11, %v22623_v6  ;;  %22650 = vst [vmem:[#allocation183_spill] sm:$0xff] %v16641_v62  ;;  %v1255_v25 = vsub.s32 7, %v1217_v41  ;;  %v21652_v41 = vmov 0.0|0.0  }
 0x1f0   :  { %22636 = vst [vmem:[#allocation175_spill] sm:$0xff] %v16596_v1  ;;  %22639 = vst [vmem:[#allocation170_spill] sm:$0xff] %v16601_v0  ;;  %vm1482_vm2 = vcmp.eq.s32.totalorder %v22594_v45, %v1254_v14 }
 0x1f1   :  { %v16605_v36 = vpop.permute.xlu0 %1634  ;;  %v16639_v4 = vadd.s32 %v1137_v35, %v1135_v49  ;;  %v1221_v35 = vand.u32 7, %v16641_v62  ;;  %v1336_v49 = vxor.u32 2147483647, %v1260_v11  ;;  %v16665_v62 = vsel %vm1315_vm12, %v1353_v17, %v1277_v32 }
 0x1f2   :  { %22640 = vst [vmem:[#allocation10_spill] sm:$0xff] %v16605_v36  ;;  %v16609_v1 = vpop.f32.mrb[10].mxu1  ;;  %22657 = vst [vmem:[#allocation182_spill] sm:$0xff] %v16665_v62  ;;  %vm1483_vm3 = vcmp.eq.s32.totalorder %v22594_v45, %v1255_v25  ;;  %v1279_v32 = vand.u32 4294967288, %v16320_v7  ;;  %v22665_v25 = vmov 0.0|0.0   ;;  %vm21668_vm12 = vcmp.eq.s32.totalorder %v22594_v45, %v16531_v63 }
 0x1f3   :  { %22641 = vst [vmem:[#allocation176_spill] sm:$0xff] %v16609_v1  ;;  %v16613_v12 = vpop.f32.mrb[11].mxu1  ;;  %v16620_v53 = vpop.permute.xlu1 %1571  ;;  %v1236_v1 = vsub.s32 7, %v1198_v3  ;;  %22649 = vst [vmem:[#allocation177_spill] sm:$0xff] %v16639_v4  ;;  %v1219_v3 = vand.u32 7, %v16634_v51 }
 0x1f4   :  { %22642 = vst [vmem:[#allocation173_spill] sm:$0xff] %v16613_v12  ;;  %22644 = vst [vmem:[#allocation11_spill] sm:$0xff] %v16620_v53  ;;  %vm1317_vm11 = vcmp.lt.s32.totalorder %v1279_v32, 0 }
 0x1f5   :  { %v16623_v50 = vpop.permute.xlu0 %1586  ;;  %vm1464_vm13 = vcmp.eq.s32.totalorder %v22594_v45, %v1236_v1  ;;  %v16657_v1 = vadd.s32 %v1167_v30, %v1165_v58  ;;  %v1259_v30 = vsub.s32 7, %v1221_v35  ;;  %v22659_v58 = vmov 1.0   ;;  %vm12971_vm4 = vmpackc.low %vm1483_vm3, %vm1482_vm2 }
 0x1f6   :  { %22645 = vst [vmem:[#allocation174_spill] sm:$0xff] %v16623_v50  ;;  %v16629_v22 = vpop.f32.mrb[12].mxu1  ;;  %vm12968_vm15 = vmpackc.low %vm1465_vm14, %vm1464_vm13  ;;  %vm1678_vm2 = vcmp.eq.s32.totalorder %v22594_v45, %v16546_v40  ;;  %vm1679_vm3 = vcmp.eq.s32.totalorder %v22594_v45, %v16562_v2  ;;  %v22689_v2 = vld [vmem:[#allocation64_spill] sm:$0xff] }
 0x1f7   :  { %22646 = vst [vmem:[#allocation12_spill] sm:$0xff] %v16629_v22  ;;  %v16637_v34 = vpop.f32.mrb[13].mxu1  ;;  %v16643_v43 = vpop.permute.xlu1 %1574  ;;  %12969 = vmatpush3.bf16.msk.msra.mxu1 %vm12968_vm15, %v22623_v6  ;;  %22654 = vst [vmem:[#allocation34_spill] sm:$0xff] %v16657_v1  ;;  %v4304_v22 = vmul.f32 1.442695, %v4250_v16  ;;  %v22663_v16 = vld [vmem:[#allocation61_spill] sm:$0xff]  ;;  %vm1487_vm10 = vcmp.eq.s32.totalorder %v22594_v45, %v1259_v30  ;;  %vm21667_vm15 = vcmp.eq.s32.totalorder %v22594_v45, %v16551_v29 }
 0x1f8   :  { %22648 = vst [vmem:[#allocation180_spill] sm:$0xff] %v16637_v34  ;;  %22651 = vst [vmem:[#allocation14_spill] sm:$0xff] %v16643_v43  ;;  %v1218_v34 = vand.u32 7, %v16639_v4  ;;  %12970 = vmatprep.subr.bf16.mxu1 %v21652_v41  ;;  %v1257_v4 = vsub.s32 7, %v1219_v3  ;;  %v16675_v41 = vsel %vm1298_vm1, %v1336_v49, %v1260_v11  ;;  %v4251_v35 = vsub.f32 %v22663_v16, %v16665_v62 }
 0x1f9   :  { %v16649_v19 = vpop.permute.xlu0 %1640  ;;  %22661 = vst [vmem:[#allocation23_spill] sm:$0xff] %v16675_v41  ;;  %v1263_v11 = vand.u32 4294967288, %v16351_v33  ;;  %14248 = vpow2.f32 %v4304_v22 }
 0x1fa   :  { %22652 = vst [vmem:[#allocation178_spill] sm:$0xff] %v16649_v19  ;;  %v16653_v61 = vpop.f32.mrb[14].mxu1  ;;  %v1256_v10 = vsub.s32 7, %v1218_v34  ;;  %4949 = vmatmul.mubr.f32.vlgmr.msra.gmra.mrb[24].mxu1 %v22659_v58  ;;  %vm1485_vm7 = vcmp.eq.s32.totalorder %v22594_v45, %v1257_v4  ;;  %v4306_v33 = vmul.f32 1.442695, %v4251_v35  ;;  %v22673_v35 = vld [vmem:[#allocation4_spill] sm:$0xff] }
 0x1fb   :  { %22653 = vst [vmem:[#allocation18_spill] sm:$0xff] %v16653_v61  ;;  %v16659_v44 = vpop.f32.mrb[15].mxu1  ;;  %v16662_v55 = vpop.permute.xlu1 %1625  ;;  %v1220_v61 = vand.u32 7, %v16657_v1  ;;  %v1278_v1 = vand.u32 4294967288, %v16322_v27  ;;  %12972 = vmatpush3.bf16.msk.msra.mxu1 %vm12971_vm4, %v22623_v6  ;;  %vm1301_vm1 = vcmp.lt.s32.totalorder %v1263_v11, 0  ;;  %vm12979_vm4 = vmpackc.low %vm21668_vm12, %vm21667_vm15  ;;  %vm21693_vm15 = vcmp.eq.s32.totalorder %v22594_v45, %v16586_v48 }
 0x1fc   :  { %22655 = vst [vmem:[#allocation181_spill] sm:$0xff] %v16659_v44  ;;  %22656 = vst [vmem:[#allocation22_spill] sm:$0xff] %v16662_v55  ;;  %v1337_v44 = vxor.u32 2147483647, %v1261_v39  ;;  %vm1484_vm6 = vcmp.eq.s32.totalorder %v22594_v45, %v1256_v10  ;;  %12973 = vmatprep.subr.bf16.mxu1 %v22665_v25  ;;  %v1355_v10 = vxor.u32 2147483647, %v1279_v32  ;;  %14250 = vpow2.f32 %v4306_v33 }
 0x1fd   :  { %v16668_v52 = vpop.permute.xlu0 %1592  ;;  %v1258_v17 = vsub.s32 7, %v1220_v61  ;;  %v22667_v61 = vld [vmem:[#allocation3_spill] sm:$0xff]  ;;  %vm12974_vm8 = vmpackc.low %vm1485_vm7, %vm1484_vm6  ;;  %vm1316_vm13 = vcmp.lt.s32.totalorder %v1278_v1, 0  ;;  %vm21660_vm6 = vcmp.eq.s32.totalorder %v22594_v45, %v16601_v0  ;;  %vm21743_vm7 = vmmov 0  }
 0x1fe   :  { %22658 = vst [vmem:[#allocation42_spill] sm:$0xff] %v16668_v52  ;;  %v16673_v34 = vpop.f32.mrb[16].mxu1  ;;  %v4234_v49 = vsub.f32 %v22667_v61, %v16675_v41  ;;  %v16696_v27 = vsel %vm1299_vm5, %v1337_v44, %v1261_v39  ;;  %v1339_v41 = vxor.u32 2147483647, %v1263_v11  ;;  %v16721_v12 = vsel %vm1317_vm11, %v1355_v10, %v1279_v32  ;;  %12560 = vmatprep.mubr.msk.f32.mxu1 %vm21743_vm7, %v22263_v9  ;;  %vm16760_vm11 = vmpackc.low %vm1679_vm3, %vm1678_vm2  ;;  %v22688_v33 = vld [vmem:[#allocation67_spill] sm:$0xff] }
 0x1ff   :  { %22660 = vst [vmem:[#allocation56_spill] sm:$0xff] %v16673_v34  ;;  %v16678_v3 = vpop.f32.mrb[17].mxu1  ;;  %v16685_v14 = vpop.permute.xlu1 %1577  ;;  %vm1486_vm9 = vcmp.eq.s32.totalorder %v22594_v45, %v1258_v17  ;;  %22668 = vst [vmem:[#allocation51_spill] sm:$0xff] %v16696_v27  ;;  %12975 = vmatpush3.bf16.msk.msra.mxu1 %vm12974_vm8, %v22623_v6  ;;  %v1262_v34 = vand.u32 4294967288, %v16341_v31  ;;  %v1281_v31 = vand.u32 4294967288, %v16367_v21  ;;  %vm21659_vm5 = vcmp.eq.s32.totalorder %v22594_v45, %v16580_v42 }
 0x200   :  { %22662 = vst [vmem:[#allocation40_spill] sm:$0xff] %v16678_v3  ;;  %22664 = vst [vmem:[#allocation27_spill] sm:$0xff] %v16685_v14  ;;  %v1354_v3 = vxor.u32 2147483647, %v1278_v1  ;;  %12976 = vmatprep.subr.bf16.mxu1 %v22665_v25  ;;  %v4272_v44 = vmul.f32 1.442695, %v4234_v49 }
 0x201   :  { %v16690_v7 = vpop.permute.xlu0 %1646  ;;  %vm12977_vm14 = vmpackc.low %vm1487_vm10, %vm1486_vm9  ;;  %22674 = vst [vmem:[#allocation60_spill] sm:$0xff] %v16721_v12  ;;  %v370_v32 = vadd.s32 256, %v22594_v45  ;;  %vm1300_vm8 = vcmp.lt.s32.totalorder %v1262_v34, 0  ;;  %vm21785_vm9 = vcmask 392192   ;;  %vm1319_vm10 = vcmp.lt.s32.totalorder %v1281_v31, 0 }
 0x202   :  { %22666 = vst [vmem:[#allocation52_spill] sm:$0xff] %v16690_v7  ;;  %v16734_v30 = vsel %vm1316_vm13, %v1354_v3, %v1278_v1  ;;  %v16748_v1 = vsel %vm1301_vm1, %v1339_v41, %v1263_v11  ;;  %v1338_v3 = vxor.u32 2147483647, %v1262_v34  ;;  %v1357_v10 = vxor.u32 2147483647, %v1281_v31 }
 0x203   :  { %v16698_v62 = vpop.f32.mrb[18].mxu1  ;;  %v16703_v4 = vpop.permute.xlu1 %1631  ;;  %22675 = vst [vmem:[#allocation38_spill] sm:$0xff] %v16734_v30  ;;  %12978 = vmatpush3.bf16.msk.msra.mxu1 %vm12977_vm14, %v22623_v6  ;;  %22678 = vst [vmem:[#allocation184_spill] sm:$0xff] %v16748_v1  ;;  %vm377_vm13 = vcmp.lt.s32.totalorder %v370_v32, 300  ;;  %v1265_v11 = vand.u32 4294967288, %v16394_v60  ;;  %vm21669_vm1 = vcmp.eq.s32.totalorder %v22594_v45, %v16620_v53  ;;  %v1264_v42 = vand.u32 4294967288, %v16381_v5 }
 0x204   :  { %22669 = vst [vmem:[#allocation30_spill] sm:$0xff] %v16698_v62  ;;  %22670 = vst [vmem:[#allocation66_spill] sm:$0xff] %v16703_v4  ;;  %v16715_v39 = vpop.f32.mrb[19].mxu1  ;;  %v4235_v62 = vsub.f32 %v22673_v35, %v16696_v27  ;;  %12980 = vmatprep.subr.msk.bf16.mxu1 %vm12979_vm4, %v22623_v6  ;;  %v1280_v27 = vand.u32 4294967288, %v16360_v23  ;;  %vm1681_vm4 = vcmp.eq.s32.totalorder %v22594_v45, %v16643_v43  ;;  %v16780_v32 = vsel %vm377_vm13, 1.0, %v22263_v9  ;;  %v16795_v63 = vpop.eup %14248 }
 0x205   :  { %v16713_v22 = vpop.permute.xlu0 %1598  ;;  %22672 = vst [vmem:[#allocation32_spill] sm:$0xff] %v16715_v39  ;;  %vm16771_vm14 = vmpackc.low %vm21660_vm6, %vm21659_vm5  ;;  %vm21670_vm5 = vcmp.eq.s32.totalorder %v22594_v45, %v16662_v55  ;;  %vm21677_vm6 = vcmp.eq.s32.totalorder %v22594_v45, %v16566_v15  ;;  %14252 = vpow2.f32 %v4272_v44  ;;  %v4253_v5 = vsub.f32 %v22688_v33, %v16721_v12  ;;  %v22698_v15 = vld [vmem:[#allocation5_spill] sm:$0xff] }
 0x206   :  { %22671 = vst [vmem:[#allocation47_spill] sm:$0xff] %v16713_v22  ;;  %22684 = vst [vmem:[#allocation69_spill] sm:$0xff] %v16780_v32  ;;  %12561 = vmatmul.mubr.msk.f32.vlgmr.msra.gmra.mrb[26].mxu1 %vm21785_vm9, %v16780_v32  ;;  %v4274_v40 = vmul.f32 1.442695, %v4235_v62  ;;  %v16810_v44 = vsel %vm1300_vm8, %v1338_v3, %v1262_v34  ;;  %v16813_v62 = vsel %vm1319_vm10, %v1357_v10, %v1281_v31  ;;  %v1356_v12 = vxor.u32 2147483647, %v1280_v27 }
 0x207   :  { %v16741_v21 = vpop.permute.xlu1 %1583  ;;  %12982 = vmatpush3.bf16.msk.msra.mxu1 %vm16760_vm11, %v22623_v6  ;;  %5088 = vmatprep.mubr.f32.mxu1 %v22659_v58  ;;  %22691 = vst [vmem:[#allocation48_spill] sm:$0xff] %v16810_v44  ;;  %22692 = vst [vmem:[#allocation77_spill] sm:$0xff] %v16813_v62  ;;  %vm1318_vm8 = vcmp.lt.s32.totalorder %v1280_v27, 0  ;;  %v1341_v34 = vxor.u32 2147483647, %v1265_v11  ;;  %vm21678_vm13 = vcmp.eq.s32.totalorder %v22594_v45, %v16685_v14  ;;  %vm1303_vm12 = vcmp.lt.s32.totalorder %v1265_v11, 0 }
 0x208   :  { %22676 = vst [vmem:[#allocation72_spill] sm:$0xff] %v16741_v21  ;;  %v16746_v17 = vpop.f32.mrb[20].mxu1  ;;  %vm16821_vm11 = vmpackc.low %vm1681_vm4, %vm21669_vm1  ;;  %12984 = vmatprep.subr.msk.bf16.mxu1 %vm16771_vm14, %v22623_v6  ;;  %v1340_v3 = vxor.u32 2147483647, %v1264_v42  ;;  %vm21682_vm14 = vcmp.eq.s32.totalorder %v22594_v45, %v16703_v4  ;;  %vm21684_vm1 = vcmp.eq.s32.totalorder %v22594_v45, %v16605_v36  ;;  %14254 = vpow2.f32 %v4274_v40 }
 0x209   :  { %22677 = vst [vmem:[#allocation185_spill] sm:$0xff] %v16746_v17  ;;  %v16751_v49 = vpop.f32.mrb[21].mxu1  ;;  %v16782_v60 = vpop.permute.xlu0 %1652  ;;  %vm16834_vm10 = vmpackc.low %vm21677_vm6, %vm21670_vm5  ;;  %v4310_v23 = vmul.f32 1.442695, %v4253_v5  ;;  %vm1302_vm5 = vcmp.lt.s32.totalorder %v1264_v42, 0  ;;  %v4236_v53 = vsub.f32 %v22698_v15, %v16810_v44  ;;  %v16855_v43 = vsel %vm1318_vm8, %v1356_v12, %v1280_v27 }
 0x20a   :  { %22679 = vst [vmem:[#allocation39_spill] sm:$0xff] %v16751_v49  ;;  %22685 = vst [vmem:[#allocation46_spill] sm:$0xff] %v16782_v60  ;;  %v4252_v49 = vsub.f32 %v22689_v2, %v16734_v30  ;;  %v16875_v27 = vsel %vm1303_vm12, %v1341_v34, %v1265_v11  ;;  %vm21685_vm8 = vcmp.eq.s32.totalorder %v22594_v45, %v16741_v21  ;;  %v1282_v11 = vand.u32 4294967288, %v16406_v38  ;;  %v22709_v34 = vld [vmem:[#allocation73_spill] sm:$0xff]  ;;  %v16906_v38 = vpop.eup %14250 }
 0x20b   :  { %v16789_v0 = vpop.permute.xlu1 %1637  ;;  %12986 = vmatpush3.bf16.msk.msra.mxu1 %vm16821_vm11, %v22623_v6  ;;  %22699 = vst [vmem:[#allocation81_spill] sm:$0xff] %v16855_v43  ;;  %vm16863_vm6 = vmpackc.low %vm21693_vm15, %vm21678_vm13  ;;  %v16891_v5 = vsel %vm1302_vm5, %v1340_v3, %v1264_v42  ;;  %vm21692_vm13 = vcmp.eq.s32.totalorder %v22594_v45, %v16649_v19  ;;  %14256 = vpow2.f32 %v4310_v23  ;;  %v4254_v31 = vsub.f32 %v22709_v34, %v16855_v43  ;;  %v22710_v3 = vld [vmem:[#allocation17_spill] sm:$0xff]  ;;  %v22713_v23 = vld [vmem:[#allocation15_spill] sm:$0xff] }
 0x20c   :  { %22686 = vst [vmem:[#allocation186_spill] sm:$0xff] %v16789_v0  ;;  %v16793_v29 = vpop.f32.mrb[22].mxu1  ;;  %v4308_v30 = vmul.f32 1.442695, %v4252_v49  ;;  %12988 = vmatprep.subr.msk.bf16.mxu1 %vm16834_vm10, %v22623_v6  ;;  %22704 = vst [vmem:[#allocation188_spill] sm:$0xff] %v16875_v27  ;;  %vm21686_vm10 = vcmp.eq.s32.totalorder %v22594_v45, %v16623_v50  ;;  %vm21690_vm12 = vcmp.eq.s32.totalorder %v22594_v45, %v16789_v0  ;;  %v1267_v44 = vand.u32 4294967288, %v16424_v46 }
 0x20d   :  { %22687 = vst [vmem:[#allocation187_spill] sm:$0xff] %v16793_v29  ;;  %v16805_v17 = vpop.f32.mrb[23].mxu1  ;;  %v22690_v29 = vld [vmem:[#allocation9_spill] sm:$0xff]  ;;  %v16870_v40 = vpop.permute.xlu0 %1604  ;;  %vm16883_vm11 = vmpackc.low %vm21684_vm1, %vm21682_vm14  ;;  %v4276_v42 = vmul.f32 1.442695, %v4236_v53  ;;  %v4239_v4 = vsub.f32 %v22710_v3, %v16875_v27  ;;  %v16985_v46 = vand.u32 4294967288, %v16416_v28 }
 0x20e   :  { %v4237_v39 = vsub.f32 %v22690_v29, %v16748_v1  ;;  %v1283_v1 = vand.u32 4294967288, %v16413_v37  ;;  %22702 = vst [vmem:[#allocation57_spill] sm:$0xff] %v16870_v40  ;;  %22707 = vst [vmem:[#allocation62_spill] sm:$0xff] %v16891_v5  ;;  %14258 = vpow2.f32 %v4308_v30  ;;  %v4238_v37 = vsub.f32 %v22713_v23, %v16891_v5  ;;  %v22836_v50 = vld [vmem:[#allocation53_spill] sm:$0xff] }
 0x20f   :  { %v16846_v10 = vpop.permute.xlu1 %1589  ;;  %12990 = vmatpush3.bf16.msk.msra.mxu1 %vm16863_vm6, %v22623_v6  ;;  %vm16916_vm14 = vmpackc.low %vm21686_vm10, %vm21685_vm8  ;;  %v16923_v30 = vpop.eup %14252  ;;  %vm21711_vm10 = vcmp.eq.s32.totalorder %v22594_v45, %v16690_v7  ;;  %v4312_v43 = vmul.f32 1.442695, %v4254_v31  ;;  %v1343_v19 = vxor.u32 2147483647, %v1267_v44  ;;  %v22730_v31 = vld [vmem:[#allocation24_spill] sm:$0xff]  ;;  %v1284_v36 = vand.u32 4294967288, %v16436_v8 }
 0x210   :  { %22697 = vst [vmem:[#allocation54_spill] sm:$0xff] %v16846_v10  ;;  %v4278_v55 = vmul.f32 1.442695, %v4237_v39  ;;  %v22703_v39 = vld [vmem:[#allocation76_spill] sm:$0xff]  ;;  %vm1321_vm5 = vcmp.lt.s32.totalorder %v1283_v1, 0  ;;  %12992 = vmatprep.subr.msk.bf16.mxu1 %vm16883_vm11, %v22623_v6  ;;  %vm16933_vm6 = vmpackc.low %vm21692_vm13, %vm21690_vm12  ;;  %vm21694_vm1 = vcmp.eq.s32.totalorder %v22594_v45, %v16846_v10  ;;  %vm1687_vm11 = vcmp.eq.s32.totalorder %v22594_v45, %v16668_v52 }
 0x211   :  { %v4255_v12 = vsub.f32 %v22703_v39, %v16813_v62  ;;  %v1359_v62 = vxor.u32 2147483647, %v1283_v1  ;;  %v16947_v5 = vpop.permute.xlu0 %1658  ;;  %vm1320_vm12 = vcmp.lt.s32.totalorder %v1282_v11, 0  ;;  %vm1305_vm13 = vcmp.lt.s32.totalorder %v1267_v44, 0  ;;  %vm16961_vm15 = vmpackc.low %vm1687_vm11, %vm21694_vm1 }
 0x212   :  { %14260 = vpow2.f32 %v4278_v55  ;;  %22717 = vst [vmem:[#allocation71_spill] sm:$0xff] %v16947_v5  ;;  %v4282_v55 = vmul.f32 1.442695, %v4239_v4  ;;  %vm1689_vm1 = vcmp.eq.s32.totalorder %v22594_v45, %v16713_v22  ;;  %v22721_v4 = vld [vmem:[#allocation85_spill] sm:$0xff]  ;;  %v22741_v8 = vand.u32 4294901760, %v22667_v61 }
 0x213   :  { %v16898_v41 = vpop.permute.xlu1 %1643  ;;  %v4314_v53 = vmul.f32 1.442695, %v4255_v12  ;;  %v1358_v12 = vxor.u32 2147483647, %v1282_v11  ;;  %v16950_v0 = vsel %vm1321_vm5, %v1359_v62, %v1283_v1  ;;  %12994 = vmatpush3.bf16.msk.msra.mxu1 %vm16916_vm14, %v22623_v6  ;;  %14262 = vpow2.f32 %v4276_v42  ;;  %v16968_v1 = vpop.eup %14254 }
 0x214   :  { %22708 = vst [vmem:[#allocation84_spill] sm:$0xff] %v16898_v41  ;;  %vm21695_vm8 = vcmp.eq.s32.totalorder %v22594_v45, %v16898_v41  ;;  %22718 = vst [vmem:[#allocation90_spill] sm:$0xff] %v16950_v0  ;;  %12996 = vmatprep.subr.msk.bf16.mxu1 %vm16933_vm6, %v22623_v6  ;;  %v4280_v62 = vmul.f32 1.442695, %v4238_v37  ;;  %v4257_v27 = vsub.f32 %v22721_v4, %v16950_v0  ;;  %v17031_v0 = vand.u32 4294967288, %v16446_v20 }
 0x215   :  { %14264 = vpow2.f32 %v4314_v53  ;;  %vm12999_vm14 = vmpackc.low %vm21711_vm10, %vm21695_vm8  ;;  %v16982_v42 = vsel %vm1320_vm12, %v1358_v12, %v1282_v11  ;;  %vm21702_vm6 = vcmp.eq.s32.totalorder %v22594_v45, %v16782_v60  ;;  %v16991_v37 = vsel %vm1305_vm13, %v1343_v19, %v1267_v44  ;;  %v17005_v28 = vpop.permute.xlu0 %1610  ;;  %v22727_v19 = vld [vmem:[#allocation80_spill] sm:$0xff] }
 0x216   :  { %22722 = vst [vmem:[#allocation74_spill] sm:$0xff] %v16982_v42  ;;  %14266 = vpow2.f32 %v4312_v43  ;;  %22724 = vst [vmem:[#allocation83_spill] sm:$0xff] %v16991_v37  ;;  %v17007_v43 = vpop.eup %14256  ;;  %v4256_v44 = vsub.f32 %v22727_v19, %v16982_v42  ;;  %vm21715_vm13 = vcmp.eq.s32.totalorder %v22594_v45, %v16870_v40  ;;  %v21712_v60 = vand.u32 4294901760, %v22673_v35 }
 0x217   :  { %v16945_v49 = vpop.permute.xlu1 %1595  ;;  %12998 = vmatpush3.bf16.msk.msra.mxu1 %vm16961_vm15, %v22623_v6  ;;  %14268 = vpow2.f32 %v4282_v55  ;;  %22725 = vst [vmem:[#allocation86_spill] sm:$0xff] %v17005_v28  ;;  %22726 = vst [vmem:[#allocation91_spill] sm:$0xff] %v17007_v43  ;;  %v17025_v55 = vmul.f32 1.442695, %v4257_v27  ;;  %v22736_v40 = vand.u32 4294901760, %v22663_v16  ;;  %v1269_v27 = vand.u32 4294967288, %v16466_v56 }
 0x218   :  { %22716 = vst [vmem:[#allocation68_spill] sm:$0xff] %v16945_v49  ;;  %vm1688_vm5 = vcmp.eq.s32.totalorder %v22594_v45, %v16945_v49  ;;  %13000 = vmatprep.subr.msk.bf16.mxu1 %vm12999_vm14, %v22623_v6  ;;  %14270 = vpow2.f32 %v4280_v62  ;;  %v17023_v12 = vpop.eup %14258  ;;  %vm1304_vm14 = vcmp.lt.s32.totalorder %v16985_v46, 0  ;;  %v1342_v62 = vxor.u32 2147483647, %v16985_v46 }
 0x219   :  { %vm13001_vm12 = vmpackc.low %vm1689_vm1, %vm1688_vm5  ;;  %v17060_v7 = vmul.f32 1.442695, %v4256_v44  ;;  %v17077_v44 = vpop.permute.xlu0 %1664  ;;  %v17083_v22 = vpack.c.bf16 %v21712_v60, %v22741_v8  ;;  %v1361_v56 = vxor.u32 2147483647, %v17031_v0  ;;  %v22748_v60 = vand.u32 4294901760, %v22698_v15 }
 0x21a   :  { %22740 = vst [vmem:[#allocation115_spill] sm:$0xff] %v17077_v44  ;;  %v1345_v35 = vxor.u32 2147483647, %v1269_v27  ;;  %14272 = vpow2.f32 %v17025_v55 }
 0x21b   :  { %v16987_v53 = vpop.permute.xlu1 %1649  ;;  %13002 = vmatpush3.bf16.msk.msra.mxu1 %vm13001_vm12, %v22623_v6  ;;  %vm21725_vm12 = vcmp.eq.s32.totalorder %v22594_v45, %v16947_v5  ;;  %22742 = vst [vmem:[#allocation118_spill] sm:$0xff] %v17083_v22  ;;  %v22754_v5 = vand.u32 4294901760, %v22703_v39  ;;  %v22763_v39 = vand.u32 4294901760, %v22727_v19  ;;  %v1286_v19 = vand.u32 4294967288, %v16470_v26 }
 0x21c   :  { %22723 = vst [vmem:[#allocation79_spill] sm:$0xff] %v16987_v53  ;;  %vm21698_vm8 = vcmp.eq.s32.totalorder %v22594_v45, %v16987_v53  ;;  %v17041_v41 = vpop.eup %14260  ;;  %14274 = vpow2.f32 %v17060_v7 }
 0x21d   :  { %vm17017_vm15 = vmpackc.low %vm21702_vm6, %vm21698_vm8  ;;  %22732 = vst [vmem:[#allocation98_spill] sm:$0xff] %v17041_v41  ;;  %v17071_v11 = vpop.eup %14262 }
 0x21e   :  { %13004 = vmatprep.subr.msk.bf16.mxu1 %vm17017_vm15, %v22623_v6  ;;  %22738 = vst [vmem:[#allocation106_spill] sm:$0xff] %v17071_v11  ;;  %vm1323_vm15 = vcmp.lt.s32.totalorder %v17031_v0, 0 }
 0x21f   :  { %v17033_v42 = vpop.permute.xlu1 %1601  ;;  %v17091_v16 = vpop.eup %14264 }
 0x220   :  { %22731 = vst [vmem:[#allocation94_spill] sm:$0xff] %v17033_v42  ;;  %vm21713_vm8 = vcmp.eq.s32.totalorder %v22594_v45, %v17033_v42  ;;  %v22735_v42 = vand.u32 4294901760, %v22647_v13  ;;  %v22743_v13 = vand.u32 4294901760, %v22689_v2  ;;  %22746 = vst [vmem:[#allocation126_spill] sm:$0xff] %v17091_v16  ;;  %v17113_v8 = vpop.eup %14266 }
 0x221   :  { %vm17050_vm6 = vmpackc.low %vm21715_vm13, %vm21713_vm8  ;;  %22747 = vst [vmem:[#allocation129_spill] sm:$0xff] %v17113_v8  ;;  %vm1693_vm13 = vcmp.eq.s32.totalorder %v22594_v45, %v17005_v28  ;;  %v17126_v20 = vpop.eup %14268 }
 0x222   :  { %v17069_v49 = vpack.c.bf16 %v22736_v40, %v22735_v42  ;;  %v22744_v40 = vand.u32 4294901760, %v22688_v33  ;;  %13006 = vmatpush3.bf16.msk.msra.mxu1 %vm17050_vm6, %v22623_v6  ;;  %vm1322_vm6 = vcmp.lt.s32.totalorder %v1284_v36, 0  ;;  %22751 = vst [vmem:[#allocation149_spill] sm:$0xff] %v17126_v20  ;;  %v1360_v33 = vxor.u32 2147483647, %v1284_v36  ;;  %v17136_v15 = vpop.eup %14270 }
 0x223   :  { %v17075_v53 = vpop.permute.xlu1 %1655  ;;  %22756 = vst [vmem:[#allocation104_spill] sm:$0xff] %v17136_v15  ;;  %v22840_v15 = vand.u32 4294901760, %v22836_v50  ;;  %v22942_v50 = vld [vmem:[#allocation114_spill] sm:$0xff] }
 0x224   :  { %22737 = vst [vmem:[#allocation103_spill] sm:$0xff] %v17069_v49  ;;  %22739 = vst [vmem:[#allocation111_spill] sm:$0xff] %v17075_v53  ;;  %v17089_v42 = vpack.c.bf16 %v22744_v40, %v22743_v13  ;;  %vm21717_vm10 = vcmp.eq.s32.totalorder %v22594_v45, %v17075_v53  ;;  %13363 = vmatprep.subr.bf16.mxu0 %v17069_v49  ;;  %v22749_v13 = vand.u32 4294901760, %v22690_v29  ;;  %v22753_v53 = vand.u32 4294901760, %v22709_v34  ;;  %v22762_v40 = vld [vmem:[#allocation20_spill] sm:$0xff] }
 0x225   :  { %vm13007_vm8 = vmpackc.low %vm21725_vm12, %vm21717_vm10  ;;  %13365 = vmatpush3.bf16.msra.mxu0 %v17083_v22  ;;  %vm1307_vm10 = vcmp.lt.s32.totalorder %v1269_v27, 0  ;;  %v17146_v29 = vsel %vm1304_vm14, %v1342_v62, %v16985_v46  ;;  %vm21801_vm14 = vcmp.eq.s32.totalorder %v22594_v45, %v17077_v44  ;;  %v22764_v34 = vand.u32 4294901760, %v22721_v4 }
 0x226   :  { %22745 = vst [vmem:[#allocation123_spill] sm:$0xff] %v17089_v42  ;;  %13008 = vmatprep.subr.msk.bf16.mxu1 %vm13007_vm8, %v22623_v6  ;;  %13367 = vmatprep.subr.bf16.mxu0 %v17089_v42  ;;  %v17123_v2 = vpack.c.bf16 %v22749_v13, %v22748_v60  ;;  %v17134_v10 = vpack.c.bf16 %v22754_v5, %v22753_v53  ;;  %v1268_v60 = vand.u32 4294967288, %v16458_v24  ;;  %v1287_v13 = vand.u32 4294967288, %v16479_v47  ;;  %v17154_v24 = vpop.permute.xlu0 %1670 }
 0x227   :  { %v17128_v61 = vpop.permute.xlu1 %1607  ;;  %22757 = vst [vmem:[#allocation102_spill] sm:$0xff] %v17146_v29  ;;  %22758 = vst [vmem:[#allocation113_spill] sm:$0xff] %v17154_v24  ;;  %v22759_v47 = vand.u32 4294901760, %v22713_v23  ;;  %v22760_v5 = vand.u32 4294901760, %v22710_v3  ;;  %v17173_v23 = vpack.c.bf16 %v22764_v34, %v22763_v39  ;;  %v22766_v3 = vld [vmem:[#allocation88_spill] sm:$0xff]  ;;  %v17180_v62 = vsel %vm1323_vm15, %v1361_v56, %v17031_v0 }
 0x228   :  { %22750 = vst [vmem:[#allocation144_spill] sm:$0xff] %v17123_v2  ;;  %22752 = vst [vmem:[#allocation96_spill] sm:$0xff] %v17128_v61  ;;  %vm21734_vm8 = vcmp.eq.s32.totalorder %v22594_v45, %v17128_v61  ;;  %v17183_v46 = vsel %vm1322_vm6, %v1360_v33, %v1284_v36  ;;  %v17186_v28 = vsel %vm1307_vm10, %v1345_v35, %v1269_v27  ;;  %v1344_v39 = vxor.u32 2147483647, %v1268_v60  ;;  %v22775_v33 = vld [vmem:[#allocation26_spill] sm:$0xff] }
 0x229   :  { %22755 = vst [vmem:[#allocation92_spill] sm:$0xff] %v17134_v10  ;;  %vm13009_vm12 = vmpackc.low %vm1693_vm13, %vm21734_vm8  ;;  %13369 = vmatpush3.bf16.msra.mxu0 %v17123_v2  ;;  %v17161_v53 = vpack.c.bf16 %v22760_v5, %v22759_v47  ;;  %v21739_v47 = vand.u32 4294901760, %v22766_v3  ;;  %v22767_v5 = vld [vmem:[#allocation93_spill] sm:$0xff]  ;;  %v1363_v34 = vxor.u32 2147483647, %v1287_v13  ;;  %v1271_v0 = vand.u32 4294967288, %v16500_v18 }
 0x22a   :  { %13010 = vmatpush3.bf16.msk.msra.mxu1 %vm13009_vm12, %v22623_v6  ;;  %13371 = vmatprep.subr.bf16.mxu0 %v17134_v10  ;;  %22765 = vst [vmem:[#allocation122_spill] sm:$0xff] %v17173_v23  ;;  %22768 = vst [vmem:[#allocation116_spill] sm:$0xff] %v17180_v62  ;;  %vm1306_vm12 = vcmp.lt.s32.totalorder %v1268_v60, 0  ;;  %v22772_v26 = vand.u32 4294901760, %v22762_v40  ;;  %v22773_v36 = vand.u32 4294901760, %v22730_v31  ;;  %v22776_v18 = vld [vmem:[#allocation29_spill] sm:$0xff]  ;;  %vm21754_vm6 = vcmp.eq.s32.totalorder %v22594_v45, %v17154_v24  ;;  %v17234_v21 = vpop.permute.xlu0 %1676 }
 0x22b   :  { %22761 = vst [vmem:[#allocation109_spill] sm:$0xff] %v17161_v53  ;;  %22769 = vst [vmem:[#allocation124_spill] sm:$0xff] %v17183_v46  ;;  %v17189_v4 = vpop.permute.xlu1 %1661  ;;  %13011 = vmatprep.subr.bf16.mxu1 %v22665_v25  ;;  %vm1325_vm15 = vcmp.lt.s32.totalorder %v1287_v13, 0  ;;  %v1270_v61 = vand.u32 4294967288, %v16490_v54  ;;  %v4240_v54 = vsub.f32 %v22762_v40, %v17146_v29  ;;  %v4259_v27 = vsub.f32 %v22767_v5, %v17180_v62 }
 0x22c   :  { %22770 = vst [vmem:[#allocation135_spill] sm:$0xff] %v17186_v28  ;;  %22771 = vst [vmem:[#allocation128_spill] sm:$0xff] %v17189_v4  ;;  %vm21741_vm8 = vcmp.eq.s32.totalorder %v22594_v45, %v17189_v4  ;;  %v17207_v35 = vpack.c.bf16 %v22773_v36, %v22772_v26  ;;  %v22777_v4 = vand.u32 4294901760, %v22767_v5  ;;  %v22779_v36 = vsub.f32 %v22730_v31, %v16991_v37 }
 0x22d   :  { %vm13012_vm10 = vmpackc.low %vm21801_vm14, %vm21741_vm8  ;;  %5089 = vmatmul.mubr.f32.vlgmr.msra.gmra.mrb[28].mxu1 %v22659_v58  ;;  %13373 = vmatpush3.bf16.msra.mxu0 %v17161_v53  ;;  %v4258_v44 = vsub.f32 %v22766_v3, %v17183_v46  ;;  %22781 = vst [vmem:[#allocation130_spill] sm:$0xff] %v17234_v21  ;;  %v17246_v5 = vsel %vm1325_vm15, %v1363_v34, %v1287_v13  ;;  %vm1324_vm8 = vcmp.lt.s32.totalorder %v1286_v19, 0  ;;  %v1347_v62 = vxor.u32 2147483647, %v1271_v0  ;;  %v22787_v34 = vld [vmem:[#allocation146_spill] sm:$0xff] }
 0x22e   :  { %22774 = vst [vmem:[#allocation143_spill] sm:$0xff] %v17207_v35  ;;  %13013 = vmatpush3.bf16.msk.msra.mxu1 %vm13012_vm10, %v22623_v6  ;;  %13375 = vmatprep.subr.bf16.mxu0 %v17173_v23  ;;  %v17220_v26 = vpack.c.bf16 %v22777_v4, %v21739_v47  ;;  %v4286_v56 = vmul.f32 1.442695, %v22779_v36  ;;  %v4243_v4 = vsub.f32 %v22776_v18, %v17186_v28  ;;  %v1362_v47 = vxor.u32 2147483647, %v1286_v19 }
 0x22f   :  { %v17231_v52 = vpop.permute.xlu1 %1667  ;;  %13014 = vmatprep.subr.bf16.mxu1 %v22665_v25  ;;  %12575 = vmatprep.mubr.msk.f32.mxu1 %vm21743_vm7, %v22263_v9  ;;  %v17241_v36 = vsel %vm1306_vm12, %v1344_v39, %v1268_v60  ;;  %22783 = vst [vmem:[#allocation134_spill] sm:$0xff] %v17246_v5  ;;  %v22784_v60 = vand.u32 4294901760, %v22775_v33  ;;  %v22785_v39 = vand.u32 4294901760, %v22776_v18  ;;  %vm1309_vm12 = vcmp.lt.s32.totalorder %v1271_v0, 0 }
 0x230   :  { %22778 = vst [vmem:[#allocation138_spill] sm:$0xff] %v17220_v26  ;;  %22780 = vst [vmem:[#allocation148_spill] sm:$0xff] %v17231_v52  ;;  %vm21749_vm10 = vcmp.eq.s32.totalorder %v22594_v45, %v17231_v52  ;;  %v1346_v13 = vxor.u32 2147483647, %v1270_v61  ;;  %v1289_v3 = vand.u32 4294967288, %v22787_v34  ;;  %vm21790_vm15 = vcmp.eq.s32.totalorder %v22594_v45, %v17234_v21  ;;  %v22789_v34 = vld [vmem:[#allocation100_spill] sm:$0xff] }
 0x231   :  { %22782 = vst [vmem:[#allocation137_spill] sm:$0xff] %v17241_v36  ;;  %vm13015_vm7 = vmpackc.low %vm21754_vm6, %vm21749_vm10  ;;  %13377 = vmatpush3.bf16.msra.mxu0 %v17207_v35  ;;  %v17259_v28 = vpack.c.bf16 %v22785_v39, %v22784_v60  ;;  %v4284_v31 = vmul.f32 1.442695, %v4240_v54  ;;  %v4242_v37 = vsub.f32 %v22775_v33, %v17241_v36  ;;  %vm1308_vm10 = vcmp.lt.s32.totalorder %v1270_v61, 0  ;;  %v22792_v33 = vld [vmem:[#allocation139_spill] sm:$0xff] }
 0x232   :  { %13016 = vmatpush3.bf16.msk.msra.mxu1 %vm13015_vm7, %v22623_v6  ;;  %13379 = vmatprep.subr.bf16.mxu0 %v17220_v26  ;;  %v4322_v39 = vmul.f32 1.442695, %v4259_v27  ;;  %v4261_v18 = vsub.f32 %v22789_v34, %v17246_v5  ;;  %v17275_v46 = vsel %vm1324_vm8, %v1362_v47, %v1286_v19  ;;  %v4320_v55 = vmul.f32 1.442695, %v4258_v44  ;;  %v22795_v27 = vld [vmem:[#allocation36_spill] sm:$0xff] }
 0x233   :  { %22786 = vst [vmem:[#allocation142_spill] sm:$0xff] %v17259_v28  ;;  %v17269_v60 = vpop.permute.xlu1 %1673  ;;  %13017 = vmatprep.subr.bf16.mxu1 %v22665_v25  ;;  %22790 = vst [vmem:[#allocation189_spill] sm:$0xff] %v17275_v46  ;;  %v17281_v54 = vsel %vm1309_vm12, %v1347_v62, %v1271_v0  ;;  %v1288_v36 = vand.u32 4294967288, %v22792_v33  ;;  %14276 = vpow2.f32 %v4286_v56  ;;  %v4290_v19 = vmul.f32 1.442695, %v4243_v4  ;;  %v22794_v62 = vld [vmem:[#allocation97_spill] sm:$0xff] }
 0x234   :  { %22788 = vst [vmem:[#allocation146_spill] sm:$0xff] %v17269_v60  ;;  %vm21787_vm7 = vcmp.eq.s32.totalorder %v22594_v45, %v17269_v60  ;;  %22791 = vst [vmem:[#allocation190_spill] sm:$0xff] %v17281_v54  ;;  %v17291_v47 = vsel %vm1308_vm10, %v1346_v13, %v1270_v61  ;;  %v1365_v7 = vxor.u32 2147483647, %v1289_v3  ;;  %14278 = vpow2.f32 %v4284_v31  ;;  %v22796_v56 = vld [vmem:[#allocation33_spill] sm:$0xff]  ;;  %v22797_v13 = vld [vmem:[#allocation154_spill] sm:$0xff] }
 0x235   :  { %vm13018_vm6 = vmpackc.low %vm21790_vm15, %vm21787_vm7  ;;  %13381 = vmatpush3.bf16.msra.mxu0 %v17259_v28  ;;  %22793 = vst [vmem:[#allocation139_spill] sm:$0xff] %v17291_v47  ;;  %v4288_v44 = vmul.f32 1.442695, %v4242_v37  ;;  %v4260_v0 = vsub.f32 %v22794_v62, %v17275_v46  ;;  %vm1327_vm8 = vcmp.lt.s32.totalorder %v1289_v3, 0  ;;  %14280 = vpow2.f32 %v4322_v39 }
 0x236   :  { %13019 = vmatpush3.bf16.msk.msra.mxu1 %vm13018_vm6, %v22623_v6  ;;  %v4326_v33 = vmul.f32 1.442695, %v4261_v18  ;;  %v4245_v25 = vsub.f32 %v22795_v27, %v17281_v54  ;;  %14282 = vpow2.f32 %v4320_v55  ;;  %v4244_v4 = vsub.f32 %v22796_v56, %v17291_v47  ;;  %v17306_v18 = vpop.eup %14272  ;;  %v22800_v55 = vld [vmem:[#allocation108_spill] sm:$0xff] }
 0x237   :  { %v1364_v61 = vxor.u32 2147483647, %v1288_v36  ;;  %v1273_v5 = vand.u32 4294967288, %v22797_v13  ;;  %14284 = vpow2.f32 %v4290_v19  ;;  %v17303_v6 = vsel %vm1327_vm8, %v1365_v7, %v1289_v3  ;;  %22799 = vst [vmem:[#allocation191_spill] sm:$0xff] %v17306_v18 }
 0x238   :  { %22798 = vst [vmem:[#allocation154_spill] sm:$0xff] %v17303_v6  ;;  %vm1326_vm6 = vcmp.lt.s32.totalorder %v1288_v36, 0  ;;  %14286 = vpow2.f32 %v4288_v44  ;;  %v4324_v37 = vmul.f32 1.442695, %v4260_v0  ;;  %v4294_v31 = vmul.f32 1.442695, %v4245_v25  ;;  %v17316_v0 = vpop.eup %14274 }
 0x239   :  { %12576 = vmatmul.mubr.msk.f32.vlgmr.msra.gmra.mrb[30].mxu1 %vm21785_vm9, %v16780_v32  ;;  %14288 = vpow2.f32 %v4326_v33  ;;  %v4292_v39 = vmul.f32 1.442695, %v4244_v4  ;;  %v4263_v54 = vsub.f32 %v22800_v55, %v17303_v6  ;;  %v17310_v13 = vsel %vm1326_vm6, %v1364_v61, %v1288_v36  ;;  %22802 = vst [vmem:[#allocation193_spill] sm:$0xff] %v17316_v0  ;;  %v22803_v25 = vld [vmem:[#allocation151_spill] sm:$0xff] }
 0x23a   :  { %5265 = vmatprep.mubr.f32.mxu1 %v22263_v9  ;;  %22801 = vst [vmem:[#allocation192_spill] sm:$0xff] %v17310_v13  ;;  %v1349_v47 = vxor.u32 2147483647, %v1273_v5  ;;  %v21768_v19 = vand.u32 4294901760, %v22794_v62  ;;  %v21765_v3 = vand.u32 4294901760, %v22789_v34  ;;  %v21767_v7 = vand.u32 4294901760, %v22796_v56 }
 0x23b   :  { %v21766_v44 = vand.u32 4294901760, %v22795_v27  ;;  %14290 = vpow2.f32 %v4324_v37  ;;  %vm1311_vm10 = vcmp.lt.s32.totalorder %v1273_v5, 0  ;;  %v1272_v33 = vand.u32 4294967288, %v22803_v25  ;;  %v22804_v4 = vld [vmem:[#allocation163_spill] sm:$0xff]  ;;  %v22819_v56 = vld [vmem:[#allocation158_spill] sm:$0xff] }
 0x23c   :  { %v1291_v32 = vand.u32 4294967288, %v22804_v4  ;;  %14292 = vpow2.f32 %v4294_v31  ;;  %v17326_v36 = vpack.c.bf16 %v21765_v3, %v21768_v19  ;;  %v4330_v25 = vmul.f32 1.442695, %v4263_v54  ;;  %v22809_v4 = vld [vmem:[#allocation105_spill] sm:$0xff] }
 0x23d   :  { %v17320_v6 = vpop.eup %14276  ;;  %v17332_v61 = vpack.c.bf16 %v21766_v44, %v21767_v7  ;;  %14294 = vpow2.f32 %v4292_v39  ;;  %v4262_v46 = vsub.f32 %v22809_v4, %v17310_v13  ;;  %v17342_v34 = vsel %vm1311_vm10, %v1349_v47, %v1273_v5  ;;  %v22814_v19 = vld [vmem:[#allocation41_spill] sm:$0xff]  ;;  %v22815_v13 = vld [vmem:[#allocation44_spill] sm:$0xff] }
 0x23e   :  { %22805 = vst [vmem:[#allocation151_spill] sm:$0xff] %v17320_v6  ;;  %22806 = vst [vmem:[#allocation163_spill] sm:$0xff] %v17326_v36  ;;  %v17334_v37 = vpop.eup %14278  ;;  %13383 = vmatprep.subr.bf16.mxu0 %v17326_v36  ;;  %vm1310_vm12 = vcmp.lt.s32.totalorder %v1272_v33, 0  ;;  %v1348_v39 = vxor.u32 2147483647, %v1272_v33  ;;  %vm1329_vm8 = vcmp.lt.s32.totalorder %v1291_v32, 0  ;;  %v4247_v52 = vsub.f32 %v22815_v13, %v17342_v34 }
 0x23f   :  { %22807 = vst [vmem:[#allocation194_spill] sm:$0xff] %v17332_v61  ;;  %22808 = vst [vmem:[#allocation195_spill] sm:$0xff] %v17334_v37  ;;  %v17340_v62 = vpop.eup %14280  ;;  %v1367_v54 = vxor.u32 2147483647, %v1291_v32  ;;  %13385 = vmatpush3.bf16.msra.mxu0 %v17332_v61  ;;  %v4328_v29 = vmul.f32 1.442695, %v4262_v46 }
 0x240   :  { %22810 = vst [vmem:[#allocation196_spill] sm:$0xff] %v17340_v62  ;;  %22811 = vst [vmem:[#allocation197_spill] sm:$0xff] %v17342_v34  ;;  %v17348_v44 = vpop.eup %14282  ;;  %v17370_v27 = vsel %vm1310_vm12, %v1348_v39, %v1272_v33  ;;  %v1290_v47 = vand.u32 4294967288, %v22819_v56  ;;  %v22823_v34 = vand.u32 4294901760, %v22800_v55  ;;  %v22825_v62 = vand.u32 4294901760, %v22814_v19 }
 0x241   :  { %v17338_v31 = vpop.f32.mrb[0].mxu0  ;;  %22812 = vst [vmem:[#allocation198_spill] sm:$0xff] %v17348_v44  ;;  %v17352_v7 = vpop.eup %14284  ;;  %22818 = vst [vmem:[#allocation202_spill] sm:$0xff] %v17370_v27  ;;  %v17374_v46 = vsel %vm1329_vm8, %v1367_v54, %v1291_v32  ;;  %v22826_v33 = vand.u32 4294901760, %v22815_v13  ;;  %v22829_v54 = vld [vmem:[#allocation112_spill] sm:$0xff] }
 0x242   :  { %14296 = vrsqrt.f32 %v17338_v31  ;;  %v17345_v3 = vpop.f32.mrb[1].mxu0  ;;  %22813 = vst [vmem:[#allocation199_spill] sm:$0xff] %v17352_v7  ;;  %v17358_v40 = vpop.eup %14286  ;;  %22820 = vst [vmem:[#allocation158_spill] sm:$0xff] %v17374_v46  ;;  %v17399_v55 = vmul.f32 1.442695, %v4247_v52  ;;  %vm1328_vm6 = vcmp.lt.s32.totalorder %v1290_v47, 0 }
 0x243   :  { %14298 = vrsqrt.f32 %v17345_v3  ;;  %22816 = vst [vmem:[#allocation200_spill] sm:$0xff] %v17358_v40  ;;  %v17362_v21 = vpop.eup %14288  ;;  %v17389_v39 = vpack.c.bf16 %v22826_v33, %v22825_v62  ;;  %v22830_v40 = vld [vmem:[#allocation117_spill] sm:$0xff]  ;;  %v1366_v6 = vxor.u32 2147483647, %v1290_v47  ;;  %vm3977_vm12 = vcmp.eq.f32.partialorder %v17338_v31, inf }
 0x244   :  { %14300 = vpow2.f32 %v4330_v25  ;;  %22817 = vst [vmem:[#allocation201_spill] sm:$0xff] %v17362_v21  ;;  %v22821_v25 = vld [vmem:[#allocation169_spill] sm:$0xff]  ;;  %v22822_v21 = vand.u32 4294901760, %v22809_v4  ;;  %v22833_v13 = vand.u32 4294901760, %v22830_v40  ;;  %vm3979_vm8 = vcmp.eq.f32.partialorder %v17338_v31, 0.0 }
 0x245   :  { %v17360_v60 = vpop.f32.mrb[2].mxu0  ;;  %v17377_v24 = vand.u32 4294967288, %v22821_v25  ;;  %22827 = vst [vmem:[#allocation203_spill] sm:$0xff] %v17389_v39  ;;  %v17391_v56 = vpop.eup %14290  ;;  %v21783_v25 = vand.u32 4294901760, %v22829_v54  ;;  %vm3970_vm9 = vcmp.eq.f32.partialorder %v17345_v3, inf  ;;  %v3973_v18 = vand.u32 2147483648, %v17345_v3 }
 0x246   :  { %14302 = vrsqrt.f32 %v17360_v60  ;;  %v17367_v5 = vpop.f32.mrb[3].mxu0  ;;  %v17383_v7 = vpack.c.bf16 %v22823_v34, %v22822_v21  ;;  %22828 = vst [vmem:[#allocation204_spill] sm:$0xff] %v17391_v56  ;;  %v17397_v4 = vpop.eup %14292  ;;  %v17407_v34 = vsel %vm613_vm0, %v16795_v63, 0.0  ;;  %v22835_v56 = vld [vmem:[#allocation49_spill] sm:$0xff]  ;;  %v17445_v48 = vsel %vm1328_vm6, %v1366_v6, %v1290_v47 }
 0x247   :  { %14304 = vrsqrt.f32 %v17367_v5  ;;  %22831 = vst [vmem:[#allocation205_spill] sm:$0xff] %v17397_v4  ;;  %vm1313_vm10 = vcmp.lt.s32.totalorder %v17377_v24, 0  ;;  %v1351_v63 = vxor.u32 2147483647, %v17377_v24  ;;  %v17423_v4 = vpack.c.bf16 %v22833_v13, %v21783_v25  ;;  %22838 = vst [vmem:[#allocation209_spill] sm:$0xff] %v17445_v48 }
 0x248   :  { %22824 = vst [vmem:[#allocation169_spill] sm:$0xff] %v17383_v7  ;;  %14306 = vpow2.f32 %v4328_v29  ;;  %13387 = vmatprep.subr.bf16.mxu0 %v17383_v7  ;;  %v17409_v29 = vpop.eup %14294  ;;  %v3980_v13 = vand.u32 2147483648, %v17338_v31  ;;  %vm3972_vm7 = vcmp.eq.f32.partialorder %v17345_v3, 0.0  ;;  %vm3986_vm6 = vcmp.eq.f32.partialorder %v17367_v5, 0.0 }
 0x249   :  { %v17393_v32 = vpop.f32.mrb[4].mxu0  ;;  %22832 = vst [vmem:[#allocation206_spill] sm:$0xff] %v17409_v29  ;;  %13389 = vmatpush3.bf16.msra.mxu0 %v17389_v39  ;;  %22834 = vst [vmem:[#allocation207_spill] sm:$0xff] %v17423_v4 }
 0x24a   :  { %14308 = vrsqrt.f32 %v17393_v32  ;;  %v17402_v21 = vpop.f32.mrb[5].mxu0  ;;  %13391 = vmatprep.subr.bf16.mxu0 %v17423_v4 }
 0x24b   :  { %14310 = vrsqrt.f32 %v17402_v21 }
 0x24c   :  { %v14297_v52 = vpop.eup %14296 }
 0x24d   :  { %v14299_v62 = vpop.eup %14298  ;;  %v17425_v29 = vpop.f32.mrb[6].mxu0  ;;  %v3976_v33 = vmul.f32 %v14297_v52, %v17338_v31 }
 0x24e   :  { %14312 = vrsqrt.f32 %v17425_v29  ;;  %v17432_v37 = vpop.f32.mrb[7].mxu0  ;;  %v3969_v25 = vmul.f32 %v14299_v62, %v17345_v3  ;;  %v17438_v14 = vpop.eup %14300 }
 0x24f   :  { %22837 = vst [vmem:[#allocation208_spill] sm:$0xff] %v17438_v14  ;;  %14314 = vrsqrt.f32 %v17432_v37  ;;  %v3978_v52 = vsel %vm3977_vm12, %v17338_v31, %v3976_v33  ;;  %vm3991_vm12 = vcmp.eq.f32.partialorder %v17360_v60, inf  ;;  %v22839_v33 = vand.u32 4294901760, %v22835_v56 }
 0x250   :  { %v14303_v44 = vpop.eup %14302  ;;  %v3981_v20 = vsel %vm3979_vm8, %v3980_v13, %v3978_v52  ;;  %v3971_v0 = vsel %vm3970_vm9, %v17345_v3, %v3969_v25  ;;  %vm3993_vm9 = vcmp.eq.f32.partialorder %v17360_v60, 0.0  ;;  %vm4005_vm8 = vcmp.eq.f32.partialorder %v17393_v32, inf }
 0x251   :  { %v14305_v62 = vpop.eup %14304  ;;  %v17449_v16 = vpop.f32.mrb[8].mxu0  ;;  %4659 = vperm.xlu0 %14246, %v3981_v20   ;;  %v3974_v14 = vsel %vm3972_vm7, %v3973_v18, %v3971_v0  ;;  %v3990_v31 = vmul.f32 %v14303_v44, %v17360_v60  ;;  %v17457_v6 = vpack.c.bf16 %v22840_v15, %v22839_v33  ;;  %v3994_v20 = vand.u32 2147483648, %v17360_v60 }
 0x252   :  { %14316 = vrsqrt.f32 %v17449_v16  ;;  %v17460_v47 = vpop.f32.mrb[9].mxu0  ;;  %4654 = vperm.xlu1 %14247, %v3974_v14   ;;  %v3983_v18 = vmul.f32 %v14305_v62, %v17367_v5  ;;  %v17465_v3 = vpop.eup %14306  ;;  %vm3984_vm7 = vcmp.eq.f32.partialorder %v17367_v5, inf  ;;  %v3987_v15 = vand.u32 2147483648, %v17367_v5 }
 0x253   :  { %22841 = vst [vmem:[#allocation210_spill] sm:$0xff] %v17457_v6  ;;  %22842 = vst [vmem:[#allocation211_spill] sm:$0xff] %v17465_v3  ;;  %14318 = vrsqrt.f32 %v17460_v47  ;;  %v3992_v44 = vsel %vm3991_vm12, %v17360_v60, %v3990_v31  ;;  %13393 = vmatpush3.bf16.msra.mxu0 %v17457_v6  ;;  %v17480_v60 = vsel %vm1313_vm10, %v1351_v63, %v17377_v24  ;;  %vm4007_vm12 = vcmp.eq.f32.partialorder %v17393_v32, 0.0 }
 0x254   :  { %v14309_v0 = vpop.eup %14308  ;;  %v3995_v25 = vsel %vm3993_vm9, %v3994_v20, %v3992_v44  ;;  %v3985_v13 = vsel %vm3984_vm7, %v17367_v5, %v3983_v18  ;;  %13427 = vmatprep.subr.bf16.mxu0 %v17069_v49  ;;  %22843 = vst [vmem:[#allocation212_spill] sm:$0xff] %v17480_v60  ;;  %v4008_v5 = vand.u32 2147483648, %v17393_v32  ;;  %vm3998_vm10 = vcmp.eq.f32.partialorder %v17402_v21, inf  ;;  %v22938_v60 = vld [vmem:[#allocation110_spill] sm:$0xff] }
 0x255   :  { %v14311_v52 = vpop.eup %14310  ;;  %v17482_v62 = vpop.f32.mrb[10].mxu0  ;;  %4669 = vperm.xlu0 %14246, %v3995_v25   ;;  %v3988_v31 = vsel %vm3986_vm6, %v3987_v15, %v3985_v13  ;;  %v4004_v33 = vmul.f32 %v14309_v0, %v17393_v32  ;;  %v4001_v18 = vand.u32 2147483648, %v17402_v21  ;;  %v22844_v15 = vld [vmem:[#allocation171_spill] sm:$0xff]  ;;  %vm4000_vm9 = vcmp.eq.f32.partialorder %v17402_v21, 0.0 }
 0x256   :  { %14320 = vrsqrt.f32 %v17482_v62  ;;  %v17487_v20 = vpop.f32.mrb[11].mxu0  ;;  %4664 = vperm.xlu1 %14247, %v3988_v31   ;;  %v3997_v24 = vmul.f32 %v14311_v52, %v17402_v21  ;;  %7122 = vmatmul.mubr.f32.vlgmr.msra.gmra.mrb[38].mxu0 %v22263_v9  ;;  %v17500_v0 = vand.u32 4294967288, %v22844_v15  ;;  %v17506_v52 = vand.u32 4294967288, %v16618_v59 }
 0x257   :  { %14322 = vrsqrt.f32 %v17487_v20  ;;  %v4006_v63 = vsel %vm4005_vm8, %v17393_v32, %v4004_v33  ;;  %13429 = vmatpush3.bf16.msra.mxu0 %v17083_v22  ;;  %7392 = vmatprep.mubr.f32.mxu0 %v22659_v58  ;;  %vm4019_vm7 = vcmp.eq.f32.partialorder %v17425_v29, inf  ;;  %vm4021_vm6 = vcmp.eq.f32.partialorder %v17425_v29, 0.0 }
 0x258   :  { %v14313_v44 = vpop.eup %14312  ;;  %v4009_v25 = vsel %vm4007_vm12, %v4008_v5, %v4006_v63  ;;  %v3999_v13 = vsel %vm3998_vm10, %v17402_v21, %v3997_v24  ;;  %13431 = vmatprep.subr.bf16.mxu0 %v17089_v42  ;;  %v4022_v21 = vand.u32 2147483648, %v17425_v29  ;;  %vm4012_vm8 = vcmp.eq.f32.partialorder %v17432_v37, inf }
 0x259   :  { %v14315_v32 = vpop.eup %14314  ;;  %v17508_v31 = vpop.f32.mrb[12].mxu0  ;;  %4679 = vperm.xlu0 %14246, %v4009_v25   ;;  %v4002_v33 = vsel %vm4000_vm9, %v4001_v18, %v3999_v13  ;;  %v4018_v14 = vmul.f32 %v14313_v44, %v17425_v29  ;;  %v4015_v63 = vand.u32 2147483648, %v17432_v37  ;;  %v1350_v44 = vxor.u32 2147483647, %v17500_v0 }
 0x25a   :  { %14324 = vrsqrt.f32 %v17508_v31  ;;  %v17513_v5 = vpop.f32.mrb[13].mxu0  ;;  %4674 = vperm.xlu1 %14247, %v4002_v33   ;;  %v4011_v59 = vmul.f32 %v14315_v32, %v17432_v37  ;;  %vm4014_vm12 = vcmp.eq.f32.partialorder %v17432_v37, 0.0  ;;  %vm4033_vm10 = vcmp.eq.f32.partialorder %v17449_v16, inf }
 0x25b   :  { %14326 = vrsqrt.f32 %v17513_v5  ;;  %v4020_v24 = vsel %vm4019_vm7, %v17425_v29, %v4018_v14  ;;  %13433 = vmatpush3.bf16.msra.mxu0 %v17123_v2  ;;  %v22845_v2 = vld [vmem:[#allocation150_spill] sm:$0xff]  ;;  %vm4035_vm9 = vcmp.eq.f32.partialorder %v17449_v16, 0.0  ;;  %vm4026_vm7 = vcmp.eq.f32.partialorder %v17460_v47, inf }
 0x25c   :  { %v14317_v18 = vpop.eup %14316  ;;  %v4023_v15 = vsel %vm4021_vm6, %v4022_v21, %v4020_v24  ;;  %v4013_v25 = vsel %vm4012_vm8, %v17432_v37, %v4011_v59  ;;  %13435 = vmatprep.subr.bf16.mxu0 %v17134_v10  ;;  %v4036_v37 = vand.u32 2147483648, %v17449_v16  ;;  %v22846_v24 = vld [vmem:[#allocation152_spill] sm:$0xff]  ;;  %vm4028_vm6 = vcmp.eq.f32.partialorder %v17460_v47, 0.0 }
 0x25d   :  { %v14319_v13 = vpop.eup %14318  ;;  %v12514_v29 = vpop.f32.mrb[14].mxu0  ;;  %4689 = vperm.xlu0 %14246, %v4023_v15   ;;  %v4016_v14 = vsel %vm4014_vm12, %v4015_v63, %v4013_v25  ;;  %v4032_v33 = vmul.f32 %v14317_v18, %v17449_v16  ;;  %v4029_v18 = vand.u32 2147483648, %v17460_v47  ;;  %v17544_v15 = vand.u32 4294967288, %v16607_v57  ;;  %v22847_v57 = vld [vmem:[#allocation156_spill] sm:$0xff] }
 0x25e   :  { %v17531_v42 = vadd.f32 %v12514_v29, %v22845_v2  ;;  %v3826_v21 = vpop.f32.mrb[15].mxu0  ;;  %4684 = vperm.xlu1 %14247, %v4016_v14   ;;  %v4025_v59 = vmul.f32 %v14319_v13, %v17460_v47  ;;  %vm1312_vm8 = vcmp.lt.s32.totalorder %v17500_v0, 0  ;;  %vm4047_vm12 = vcmp.eq.f32.partialorder %v17482_v62, inf }
 0x25f   :  { %v17537_v32 = vadd.f32 %v3826_v21, %v22846_v24  ;;  %v4034_v63 = vsel %vm4033_vm10, %v17449_v16, %v4032_v33  ;;  %13437 = vmatpush3.bf16.msra.mxu0 %v17161_v53  ;;  %vm4049_vm10 = vcmp.eq.f32.partialorder %v17482_v62, 0.0  ;;  %v22848_v24 = vld [vmem:[#allocation159_spill] sm:$0xff] }
 0x260   :  { %v14321_v2 = vpop.eup %14320  ;;  %v4037_v25 = vsel %vm4035_vm9, %v4036_v37, %v4034_v63  ;;  %v4027_v29 = vsel %vm4026_vm7, %v17460_v47, %v4025_v59  ;;  %13439 = vmatprep.subr.bf16.mxu0 %v17173_v23  ;;  %v4050_v47 = vand.u32 2147483648, %v17482_v62  ;;  %vm4040_vm9 = vcmp.eq.f32.partialorder %v17487_v20, inf }
 0x261   :  { %v14323_v13 = vpop.eup %14322  ;;  %v12517_v16 = vpop.f32.mrb[16].mxu0  ;;  %4699 = vperm.xlu0 %14246, %v4037_v25   ;;  %v4030_v14 = vsel %vm4028_vm6, %v4029_v18, %v4027_v29  ;;  %v4046_v33 = vmul.f32 %v14321_v2, %v17482_v62  ;;  %vm4042_vm7 = vcmp.eq.f32.partialorder %v17487_v20, 0.0  ;;  %v4043_v2 = vand.u32 2147483648, %v17487_v20 }
 0x262   :  { %v17554_v21 = vadd.f32 %v12517_v16, %v22847_v57  ;;  %v3838_v37 = vpop.f32.mrb[17].mxu0  ;;  %4694 = vperm.xlu1 %14247, %v4030_v14   ;;  %v4039_v59 = vmul.f32 %v14323_v13, %v17487_v20  ;;  %vm4061_vm6 = vcmp.eq.f32.partialorder %v17508_v31, inf  ;;  %v22849_v57 = vld [vmem:[#allocation157_spill] sm:$0xff] }
 0x263   :  { %v17560_v63 = vadd.f32 %v3838_v37, %v22848_v24  ;;  %v4048_v18 = vsel %vm4047_vm12, %v17482_v62, %v4046_v33  ;;  %13441 = vmatpush3.bf16.msra.mxu0 %v17207_v35  ;;  %vm4063_vm12 = vcmp.eq.f32.partialorder %v17508_v31, 0.0  ;;  %v22850_v24 = vld [vmem:[#allocation162_spill] sm:$0xff] }
 0x264   :  { %v14325_v25 = vpop.eup %14324  ;;  %14328 = vrsqrt.f32 %v17554_v21  ;;  %v4051_v29 = vsel %vm4049_vm10, %v4050_v47, %v4048_v18  ;;  %v4041_v16 = vsel %vm4040_vm9, %v17487_v20, %v4039_v59  ;;  %13443 = vmatprep.subr.bf16.mxu0 %v17220_v26  ;;  %v4064_v20 = vand.u32 2147483648, %v17508_v31 }
 0x265   :  { %v14327_v13 = vpop.eup %14326  ;;  %14330 = vrsqrt.f32 %v17560_v63  ;;  %v12520_v62 = vpop.f32.mrb[18].mxu0  ;;  %4709 = vperm.xlu0 %14246, %v4051_v29   ;;  %v4044_v14 = vsel %vm4042_vm7, %v4043_v2, %v4041_v16  ;;  %v4060_v33 = vmul.f32 %v14325_v25, %v17508_v31  ;;  %vm4054_vm10 = vcmp.eq.f32.partialorder %v17513_v5, inf }
 0x266   :  { %v17574_v37 = vadd.f32 %v12520_v62, %v22849_v57  ;;  %v3850_v47 = vpop.f32.mrb[19].mxu0  ;;  %4704 = vperm.xlu1 %14247, %v4044_v14   ;;  %v4053_v59 = vmul.f32 %v14327_v13, %v17513_v5  ;;  %14332 = vrsqrt.f32 %v17531_v42  ;;  %v4057_v25 = vand.u32 2147483648, %v17513_v5 }
 0x267   :  { %v17581_v18 = vadd.f32 %v3850_v47, %v22850_v24  ;;  %v4062_v2 = vsel %vm4061_vm6, %v17508_v31, %v4060_v33  ;;  %13445 = vmatpush3.bf16.msra.mxu0 %v17259_v28  ;;  %vm4056_vm9 = vcmp.eq.f32.partialorder %v17513_v5, 0.0  ;;  %v1368_v13 = vxor.u32 2147483647, %v17544_v15  ;;  %v22851_v33 = vld [vmem:[#allocation166_spill] sm:$0xff] }
 0x268   :  { %14334 = vrsqrt.f32 %v17574_v37  ;;  %v4065_v29 = vsel %vm4063_vm12, %v4064_v20, %v4062_v2  ;;  %v4055_v16 = vsel %vm4054_vm10, %v17513_v5, %v4053_v59  ;;  %13447 = vmatprep.subr.bf16.mxu0 %v17326_v36  ;;  %v17594_v62 = vand.u32 4294967288, %v16634_v51 }
 0x269   :  { %14336 = vrsqrt.f32 %v17581_v18  ;;  %4719 = vperm.xlu0 %14246, %v4065_v29   ;;  %v4058_v14 = vsel %vm4056_vm9, %v4057_v25, %v4055_v16  ;;  %vm1331_vm7 = vcmp.lt.s32.totalorder %v17506_v52, 0  ;;  %vm1330_vm6 = vcmp.lt.s32.totalorder %v17544_v15, 0  ;;  %v22865_v29 = vld [vmem:[#allocation176_spill] sm:$0xff] }
 0x26a   :  { %v12523_v31 = vpop.f32.mrb[20].mxu0  ;;  %14338 = vpow2.f32 %v17399_v55  ;;  %4714 = vperm.xlu1 %14247, %v4058_v14   ;;  %v22852_v51 = vsub.f32 %v22814_v19, %v17370_v27  ;;  %v22854_v20 = vsub.f32 %v22830_v40, %v17374_v46  ;;  %v22856_v55 = vld [vmem:[#allocation168_spill] sm:$0xff]  ;;  %v22857_v2 = vsub.f32 %v22829_v54, %v17445_v48  ;;  %v22901_v46 = vld [vmem:[#allocation87_spill] sm:$0xff]  ;;  %v22903_v54 = vld [vmem:[#allocation25_spill] sm:$0xff] }
 0x26b   :  { %v17601_v5 = vadd.f32 %v12523_v31, %v22851_v33  ;;  %v3862_v57 = vpop.f32.mrb[21].mxu0  ;;  %14340 = vrsqrt.f32 %v17537_v32  ;;  %13449 = vmatpush3.bf16.msra.mxu0 %v17332_v61  ;;  %v17630_v16 = vsel %vm1312_vm8, %v1350_v44, %v17500_v0  ;;  %v22860_v31 = vxor.u32 2147483647, %v17506_v52  ;;  %v22863_v0 = vld [vmem:[#allocation172_spill] sm:$0xff]  ;;  %v22904_v48 = vld [vmem:[#allocation89_spill] sm:$0xff]  ;;  %v22906_v27 = vld [vmem:[#allocation95_spill] sm:$0xff] }
 0x26c   :  { %v17606_v47 = vmul.f32 1.442695, %v22852_v51  ;;  %v17611_v59 = vmul.f32 1.442695, %v22854_v20  ;;  %v17615_v24 = vadd.f32 %v3862_v57, %v22856_v55  ;;  %v17621_v25 = vmul.f32 1.442695, %v22857_v2  ;;  %13451 = vmatprep.subr.bf16.mxu0 %v17383_v7 }
 0x26d   :  { %22859 = vst [vmem:[#allocation156_spill] sm:$0xff] %v17630_v16  ;;  %14342 = vrsqrt.f32 %v17601_v5  ;;  %v17637_v14 = vsel %vm1331_vm7, %v22860_v31, %v17506_v52  ;;  %v17640_v33 = vsel %vm1330_vm6, %v1368_v13, %v17544_v15  ;;  %vm4089_vm8 = vcmp.eq.f32.partialorder %v17554_v21, inf  ;;  %v22864_v31 = vld [vmem:[#allocation175_spill] sm:$0xff] }
 0x26e   :  { %22853 = vst [vmem:[#allocation171_spill] sm:$0xff] %v17606_v47  ;;  %22855 = vst [vmem:[#allocation150_spill] sm:$0xff] %v17611_v59  ;;  %14344 = vrsqrt.f32 %v17615_v24  ;;  %v12526_v51 = vpop.f32.mrb[22].mxu0  ;;  %v14329_v20 = vpop.eup %14328  ;;  %vm4091_vm12 = vcmp.eq.f32.partialorder %v17554_v21, 0.0  ;;  %v4092_v57 = vand.u32 2147483648, %v17554_v21  ;;  %vm4082_vm10 = vcmp.eq.f32.partialorder %v17560_v63, inf }
 0x26f   :  { %22858 = vst [vmem:[#allocation152_spill] sm:$0xff] %v17621_v25  ;;  %22861 = vst [vmem:[#allocation159_spill] sm:$0xff] %v17637_v14  ;;  %v17645_v44 = vadd.f32 %v12526_v51, %v22863_v0  ;;  %v3874_v55 = vpop.f32.mrb[23].mxu0  ;;  %v14331_v2 = vpop.eup %14330  ;;  %v4088_v13 = vmul.f32 %v14329_v20, %v17554_v21  ;;  %13453 = vmatpush3.bf16.msra.mxu0 %v17389_v39  ;;  %vm4084_vm9 = vcmp.eq.f32.partialorder %v17560_v63, 0.0  ;;  %v4085_v0 = vand.u32 2147483648, %v17560_v63 }
 0x270   :  { %22862 = vst [vmem:[#allocation157_spill] sm:$0xff] %v17640_v33  ;;  %v17651_v15 = vadd.f32 %v3874_v55, %v22864_v31  ;;  %v4081_v51 = vmul.f32 %v14331_v2, %v17560_v63  ;;  %vm4075_vm7 = vcmp.eq.f32.partialorder %v17531_v42, inf  ;;  %13455 = vmatprep.subr.bf16.mxu0 %v17423_v4  ;;  %v14333_v55 = vpop.eup %14332  ;;  %vm4103_vm6 = vcmp.eq.f32.partialorder %v17574_v37, inf }
 0x271   :  { %14346 = vrsqrt.f32 %v17645_v44  ;;  %v4090_v31 = vsel %vm4089_vm8, %v17554_v21, %v4088_v13  ;;  %vm4105_vm15 = vcmp.eq.f32.partialorder %v17574_v37, 0.0  ;;  %v4106_v61 = vand.u32 2147483648, %v17574_v37  ;;  %v22866_v13 = vld [vmem:[#allocation173_spill] sm:$0xff] }
 0x272   :  { %14348 = vrsqrt.f32 %v17651_v15  ;;  %v12529_v20 = vpop.f32.mrb[24].mxu0  ;;  %v14335_v2 = vpop.eup %14334  ;;  %v4093_v4 = vsel %vm4091_vm12, %v4092_v57, %v4090_v31  ;;  %v4083_v7 = vsel %vm4082_vm10, %v17560_v63, %v4081_v51  ;;  %vm4096_vm8 = vcmp.eq.f32.partialorder %v17581_v18, inf }
 0x273   :  { %v17670_v52 = vadd.f32 %v12529_v20, %v22865_v29  ;;  %v3886_v39 = vpop.f32.mrb[25].mxu0  ;;  %v14337_v36 = vpop.eup %14336  ;;  %4739 = vperm.xlu0 %14246, %v4093_v4   ;;  %v4086_v26 = vsel %vm4084_vm9, %v4085_v0, %v4083_v7  ;;  %v4102_v29 = vmul.f32 %v14335_v2, %v17574_v37  ;;  %13457 = vmatpush3.bf16.msra.mxu0 %v17457_v6  ;;  %vm4098_vm12 = vcmp.eq.f32.partialorder %v17581_v18, 0.0 }
 0x274   :  { %v17679_v28 = vadd.f32 %v3886_v39, %v22866_v13  ;;  %v17686_v21 = vpop.eup %14338  ;;  %4734 = vperm.xlu1 %14247, %v4086_v26   ;;  %v4095_v57 = vmul.f32 %v14337_v36, %v17581_v18  ;;  %v4099_v4 = vand.u32 2147483648, %v17581_v18  ;;  %vm4117_vm10 = vcmp.eq.f32.partialorder %v17601_v5, inf  ;;  %v22868_v26 = vld [vmem:[#allocation12_spill] sm:$0xff] }
 0x275   :  { %22867 = vst [vmem:[#allocation162_spill] sm:$0xff] %v17686_v21  ;;  %14350 = vrsqrt.f32 %v17670_v52  ;;  %v14341_v39 = vpop.eup %14340  ;;  %v4104_v63 = vsel %vm4103_vm6, %v17574_v37, %v4102_v29  ;;  %v4074_v51 = vmul.f32 %v14333_v55, %v17531_v42  ;;  %vm4119_vm9 = vcmp.eq.f32.partialorder %v17601_v5, 0.0  ;;  %v22869_v29 = vld [vmem:[#allocation180_spill] sm:$0xff] }
 0x276   :  { %14352 = vrsqrt.f32 %v17679_v28  ;;  %v12532_v7 = vpop.f32.mrb[26].mxu0  ;;  %v4107_v31 = vsel %vm4105_vm15, %v4106_v61, %v4104_v63  ;;  %v4097_v2 = vsel %vm4096_vm8, %v17581_v18, %v4095_v57  ;;  %7394 = vmatmul.mubr.f32.vlgmr.msra.gmra.mrb[40].mxu0 %v22659_v58  ;;  %v4120_v61 = vand.u32 2147483648, %v17601_v5 }
 0x277   :  { %v14343_v0 = vpop.eup %14342  ;;  %v17699_v20 = vadd.f32 %v12532_v7, %v22868_v26  ;;  %v3898_v36 = vpop.f32.mrb[27].mxu0  ;;  %4749 = vperm.xlu0 %14246, %v4107_v31   ;;  %v4100_v55 = vsel %vm4098_vm12, %v4099_v4, %v4097_v2  ;;  %8011 = vmatprep.mubr.f32.mxu0 %v22263_v9  ;;  %vm4110_vm15 = vcmp.eq.f32.partialorder %v17615_v24, inf  ;;  %vm4112_vm6 = vcmp.eq.f32.partialorder %v17615_v24, 0.0  ;;  %v22870_v26 = vld [vmem:[#allocation18_spill] sm:$0xff] }
 0x278   :  { %v14345_v13 = vpop.eup %14344  ;;  %v17709_v6 = vadd.f32 %v3898_v36, %v22869_v29  ;;  %v4116_v7 = vmul.f32 %v14343_v0, %v17601_v5  ;;  %4744 = vperm.xlu1 %14247, %v4100_v55   ;;  %v4113_v4 = vand.u32 2147483648, %v17615_v24  ;;  %v17728_v63 = vsel %vm4075_vm7, %v17531_v42, %v4074_v51 }
 0x279   :  { %14354 = vrsqrt.f32 %v17699_v20  ;;  %v4109_v37 = vmul.f32 %v14345_v13, %v17615_v24  ;;  %v17737_v29 = vmul.f32 %v14341_v39, %v17537_v32  ;;  %vm4131_vm7 = vcmp.eq.f32.partialorder %v17645_v44, inf }
 0x27a   :  { %14356 = vrsqrt.f32 %v17709_v6  ;;  %v12535_v57 = vpop.f32.mrb[28].mxu0  ;;  %v4118_v18 = vsel %vm4117_vm10, %v17601_v5, %v4116_v7  ;;  %v22871_v7 = vld [vmem:[#allocation181_spill] sm:$0xff]  ;;  %vm4133_vm8 = vcmp.eq.f32.partialorder %v17645_v44, 0.0  ;;  %v4134_v5 = vand.u32 2147483648, %v17645_v44 }
 0x27b   :  { %v14347_v0 = vpop.eup %14346  ;;  %v17731_v36 = vadd.f32 %v12535_v57, %v22870_v26  ;;  %v3910_v31 = vpop.f32.mrb[29].mxu0  ;;  %v4121_v2 = vsel %vm4119_vm9, %v4120_v61, %v4118_v18  ;;  %v4111_v13 = vsel %vm4110_vm15, %v17615_v24, %v4109_v37  ;;  %vm4124_vm12 = vcmp.eq.f32.partialorder %v17651_v15, inf  ;;  %v22872_v18 = vld [vmem:[#allocation56_spill] sm:$0xff] }
 0x27c   :  { %v14349_v55 = vpop.eup %14348  ;;  %v17740_v35 = vadd.f32 %v3910_v31, %v22871_v7  ;;  %4759 = vperm.xlu0 %14246, %v4121_v2   ;;  %v4114_v51 = vsel %vm4112_vm6, %v4113_v4, %v4111_v13  ;;  %v4130_v23 = vmul.f32 %v14347_v0, %v17645_v44  ;;  %v4127_v37 = vand.u32 2147483648, %v17651_v15  ;;  %v22873_v13 = vld [vmem:[#allocation40_spill] sm:$0xff] }
 0x27d   :  { %14358 = vrsqrt.f32 %v17731_v36  ;;  %4754 = vperm.xlu1 %14247, %v4114_v51   ;;  %v4123_v24 = vmul.f32 %v14349_v55, %v17651_v15  ;;  %vm4126_vm10 = vcmp.eq.f32.partialorder %v17651_v15, 0.0  ;;  %vm4145_vm9 = vcmp.eq.f32.partialorder %v17670_v52, inf }
 0x27e   :  { %14360 = vrsqrt.f32 %v17740_v35  ;;  %v12538_v39 = vpop.f32.mrb[30].mxu0  ;;  %v4132_v61 = vsel %vm4131_vm7, %v17645_v44, %v4130_v23  ;;  %vm4147_vm15 = vcmp.eq.f32.partialorder %v17670_v52, 0.0  ;;  %v4148_v7 = vand.u32 2147483648, %v17670_v52 }
 0x27f   :  { %v14351_v57 = vpop.eup %14350  ;;  %v17753_v4 = vadd.f32 %v12538_v39, %v22872_v18  ;;  %v3922_v0 = vpop.f32.mrb[31].mxu0  ;;  %v4135_v26 = vsel %vm4133_vm8, %v4134_v5, %v4132_v61  ;;  %v4125_v31 = vsel %vm4124_vm12, %v17651_v15, %v4123_v24  ;;  %vm4138_vm6 = vcmp.eq.f32.partialorder %v17679_v28, inf  ;;  %v22874_v61 = vld [vmem:[#allocation30_spill] sm:$0xff] }
 0x280   :  { %v14353_v2 = vpop.eup %14352  ;;  %v17758_v55 = vadd.f32 %v3922_v0, %v22873_v13  ;;  %4769 = vperm.xlu0 %14246, %v4135_v26   ;;  %v4128_v23 = vsel %vm4126_vm10, %v4127_v37, %v4125_v31  ;;  %v4144_v44 = vmul.f32 %v14351_v57, %v17670_v52  ;;  %v4141_v24 = vand.u32 2147483648, %v17679_v28  ;;  %v22875_v31 = vld [vmem:[#allocation32_spill] sm:$0xff] }
 0x281   :  { %14362 = vrsqrt.f32 %v17753_v4  ;;  %4764 = vperm.xlu1 %14247, %v4128_v23   ;;  %v4137_v51 = vmul.f32 %v14353_v2, %v17679_v28  ;;  %vm4140_vm7 = vcmp.eq.f32.partialorder %v17679_v28, 0.0  ;;  %vm4159_vm8 = vcmp.eq.f32.partialorder %v17699_v20, inf }
 0x282   :  { %14364 = vrsqrt.f32 %v17758_v55  ;;  %v12541_v15 = vpop.f32.mrb[32].mxu0  ;;  %v4146_v5 = vsel %vm4145_vm9, %v17670_v52, %v4144_v44  ;;  %vm4161_vm12 = vcmp.eq.f32.partialorder %v17699_v20, 0.0  ;;  %v4162_v23 = vand.u32 2147483648, %v17699_v20 }
 0x283   :  { %v14355_v39 = vpop.eup %14354  ;;  %v17771_v37 = vadd.f32 %v12541_v15, %v22874_v61  ;;  %v3934_v57 = vpop.f32.mrb[33].mxu0  ;;  %v4149_v18 = vsel %vm4147_vm15, %v4148_v7, %v4146_v5  ;;  %v4139_v0 = vsel %vm4138_vm6, %v17679_v28, %v4137_v51  ;;  %vm4152_vm10 = vcmp.eq.f32.partialorder %v17709_v6, inf  ;;  %v22876_v5 = vld [vmem:[#allocation185_spill] sm:$0xff] }
 0x284   :  { %v14357_v26 = vpop.eup %14356  ;;  %v17776_v2 = vadd.f32 %v3934_v57, %v22875_v31  ;;  %4779 = vperm.xlu0 %14246, %v4149_v18   ;;  %v4142_v52 = vsel %vm4140_vm7, %v4141_v24, %v4139_v0  ;;  %v4158_v13 = vmul.f32 %v14355_v39, %v17699_v20  ;;  %v4155_v51 = vand.u32 2147483648, %v17709_v6 }
 0x285   :  { %14366 = vrsqrt.f32 %v17771_v37  ;;  %4774 = vperm.xlu1 %14247, %v4142_v52   ;;  %v4151_v44 = vmul.f32 %v14357_v26, %v17709_v6  ;;  %vm4068_vm9 = vcmp.eq.f32.partialorder %v17537_v32, inf  ;;  %vm4154_vm15 = vcmp.eq.f32.partialorder %v17709_v6, 0.0 }
 0x286   :  { %14368 = vrsqrt.f32 %v17776_v2  ;;  %v12544_v28 = vpop.f32.mrb[34].mxu0  ;;  %v4160_v7 = vsel %vm4159_vm8, %v17699_v20, %v4158_v13  ;;  %vm4077_vm6 = vcmp.eq.f32.partialorder %v17531_v42, 0.0  ;;  %v22877_v20 = vld [vmem:[#allocation39_spill] sm:$0xff]  ;;  %vm4173_vm7 = vcmp.eq.f32.partialorder %v17731_v36, inf }
 0x287   :  { %v14359_v15 = vpop.eup %14358  ;;  %v17790_v24 = vadd.f32 %v12544_v28, %v22876_v5  ;;  %v3946_v39 = vpop.f32.mrb[35].mxu0  ;;  %v4163_v61 = vsel %vm4161_vm12, %v4162_v23, %v4160_v7  ;;  %v4153_v57 = vsel %vm4152_vm10, %v17709_v6, %v4151_v44  ;;  %vm4175_vm8 = vcmp.eq.f32.partialorder %v17731_v36, 0.0  ;;  %v22878_v7 = vld [vmem:[#allocation187_spill] sm:$0xff] }
 0x288   :  { %v14361_v18 = vpop.eup %14360  ;;  %v17796_v0 = vadd.f32 %v3946_v39, %v22877_v20  ;;  %4789 = vperm.xlu0 %14246, %v4163_v61   ;;  %v4156_v26 = vsel %vm4154_vm15, %v4155_v51, %v4153_v57  ;;  %v4172_v31 = vmul.f32 %v14359_v15, %v17731_v36  ;;  %v4176_v52 = vand.u32 2147483648, %v17731_v36 }
 0x289   :  { %14370 = vrsqrt.f32 %v17790_v24  ;;  %4784 = vperm.xlu1 %14247, %v4156_v26   ;;  %v4165_v6 = vmul.f32 %v14361_v18, %v17740_v35  ;;  %vm4070_vm12 = vcmp.eq.f32.partialorder %v17537_v32, 0.0  ;;  %vm4166_vm10 = vcmp.eq.f32.partialorder %v17740_v35, inf }
 0x28a   :  { %14372 = vrsqrt.f32 %v17796_v0  ;;  %v12547_v13 = vpop.f32.mrb[36].mxu0  ;;  %v4174_v23 = vsel %vm4173_vm7, %v17731_v36, %v4172_v31  ;;  %v4169_v44 = vand.u32 2147483648, %v17740_v35  ;;  %vm4168_vm15 = vcmp.eq.f32.partialorder %v17740_v35, 0.0 }
 0x28b   :  { %v14363_v28 = vpop.eup %14362  ;;  %v17810_v51 = vadd.f32 %v12547_v13, %v22878_v7  ;;  %v3958_v15 = vpop.f32.mrb[37].mxu0  ;;  %v4177_v5 = vsel %vm4175_vm8, %v4176_v52, %v4174_v23  ;;  %v4167_v39 = vsel %vm4166_vm10, %v17740_v35, %v4165_v6  ;;  %vm4187_vm7 = vcmp.eq.f32.partialorder %v17753_v4, inf }
 0x28c   :  { %v14365_v61 = vpop.eup %14364  ;;  %v17815_v57 = vadd.f32 %v3958_v15, %v16805_v17  ;;  %4799 = vperm.xlu0 %14246, %v4177_v5   ;;  %v4170_v36 = vsel %vm4168_vm15, %v4169_v44, %v4167_v39  ;;  %v4186_v18 = vmul.f32 %v14363_v28, %v17753_v4  ;;  %vm4189_vm14 = vcmp.eq.f32.partialorder %v17753_v4, 0.0  ;;  %v22880_v5 = vld [vmem:[#allocation59_spill] sm:$0xff] }
 0x28d   :  { %14374 = vrsqrt.f32 %v17810_v51  ;;  %4794 = vperm.xlu1 %14247, %v4170_v36   ;;  %v4190_v20 = vand.u32 2147483648, %v17753_v4  ;;  %v4179_v26 = vmul.f32 %v14365_v61, %v17758_v55  ;;  %vm4180_vm8 = vcmp.eq.f32.partialorder %v17758_v55, inf  ;;  %v22881_v39 = vld [vmem:[#allocation63_spill] sm:$0xff] }
 0x28e   :  { %14376 = vrsqrt.f32 %v17815_v57  ;;  %v4188_v17 = vsel %vm4187_vm7, %v17753_v4, %v4186_v18  ;;  %v4183_v35 = vand.u32 2147483648, %v17758_v55  ;;  %vm4182_vm10 = vcmp.eq.f32.partialorder %v17758_v55, 0.0  ;;  %v22883_v18 = vld [vmem:[#allocation7_spill] sm:$0xff] }
 0x28f   :  { %v14367_v31 = vpop.eup %14366  ;;  %v4191_v52 = vsel %vm4189_vm14, %v4190_v20, %v4188_v17  ;;  %v4181_v6 = vsel %vm4180_vm8, %v17758_v55, %v4179_v26  ;;  %v4069_v13 = vsel %vm4068_vm9, %v17537_v32, %v17737_v29  ;;  %v22879_v4 = vand.u32 2147483648, %v17531_v42  ;;  %v22882_v42 = vld [vmem:[#allocation6_spill] sm:$0xff] }
 0x290   :  { %v14369_v23 = vpop.eup %14368  ;;  %4809 = vperm.xlu0 %14246, %v4191_v52   ;;  %v4184_v44 = vsel %vm4182_vm10, %v4183_v35, %v4181_v6  ;;  %v4071_v7 = vand.u32 2147483648, %v17537_v32  ;;  %v4200_v15 = vmul.f32 %v14367_v31, %v17771_v37  ;;  %vm4201_vm14 = vcmp.eq.f32.partialorder %v17771_v37, inf  ;;  %v22885_v31 = vld [vmem:[#allocation65_spill] sm:$0xff] }
 0x291   :  { %v4079_v28 = vsel %vm4077_vm6, %v22879_v4, %v17728_v63  ;;  %4804 = vperm.xlu1 %14247, %v4184_v44   ;;  %v4193_v55 = vmul.f32 %v14369_v23, %v17776_v2  ;;  %v21805_v29 = vand.u32 4294901760, %v22880_v5  ;;  %v21804_v61 = vand.u32 4294901760, %v22881_v39 }
 0x292   :  { %v4072_v36 = vsel %vm4070_vm12, %v4071_v7, %v4069_v13  ;;  %vm4203_vm9 = vcmp.eq.f32.partialorder %v17771_v37, 0.0  ;;  %v21803_v63 = vand.u32 4294901760, %v22882_v42  ;;  %v21802_v20 = vand.u32 4294901760, %v22883_v18 }
 0x293   :  { %v14371_v26 = vpop.eup %14370  ;;  %v4204_v17 = vand.u32 2147483648, %v17771_v37  ;;  %vm4194_vm6 = vcmp.eq.f32.partialorder %v17776_v2, inf  ;;  %v17855_v35 = vpack.c.bf16 %v21804_v61, %v21805_v29  ;;  %v21810_v32 = vand.u32 4294901760, %v22885_v31 }
 0x294   :  { %v14373_v52 = vpop.eup %14372  ;;  %4729 = vperm.xlu0 %14246, %v4079_v28   ;;  %v4202_v6 = vsel %vm4201_vm14, %v17771_v37, %v4200_v15  ;;  %vm4196_vm12 = vcmp.eq.f32.partialorder %v17776_v2, 0.0  ;;  %v4214_v13 = vmul.f32 %v14371_v26, %v17790_v24  ;;  %v17865_v23 = vpack.c.bf16 %v21802_v20, %v21803_v63  ;;  %v22887_v28 = vld [vmem:[#allocation70_spill] sm:$0xff]  ;;  %v22888_v26 = vld [vmem:[#allocation8_spill] sm:$0xff]  ;;  %v22889_v63 = vld [vmem:[#allocation13_spill] sm:$0xff] }
 0x295   :  { %22884 = vst [vmem:[#allocation166_spill] sm:$0xff] %v17855_v35  ;;  %4724 = vperm.xlu1 %14247, %v4072_v36   ;;  %v4195_v44 = vsel %vm4194_vm6, %v17776_v2, %v4193_v55  ;;  %v4197_v4 = vand.u32 2147483648, %v17776_v2  ;;  %v4207_v7 = vmul.f32 %v14373_v52, %v17796_v0  ;;  %13513 = vmatprep.subr.bf16.mxu0 %v17855_v35  ;;  %v21809_v15 = vand.u32 4294901760, %v22887_v28 }
 0x296   :  { %22886 = vst [vmem:[#allocation168_spill] sm:$0xff] %v17865_v23  ;;  %vm4215_vm15 = vcmp.eq.f32.partialorder %v17790_v24, inf  ;;  %vm4217_vm7 = vcmp.eq.f32.partialorder %v17790_v24, 0.0  ;;  %13515 = vmatpush3.bf16.msra.mxu0 %v17865_v23  ;;  %v4205_v55 = vsel %vm4203_vm9, %v4204_v17, %v4202_v6  ;;  %v4218_v52 = vand.u32 2147483648, %v17790_v24 }
 0x297   :  { %v14375_v61 = vpop.eup %14374  ;;  %vm4208_vm8 = vcmp.eq.f32.partialorder %v17796_v0, inf  ;;  %v17885_v29 = vpack.c.bf16 %v21809_v15, %v21810_v32  ;;  %v4198_v20 = vsel %vm4196_vm12, %v4197_v4, %v4195_v44  ;;  %v4216_v36 = vsel %vm4215_vm15, %v17790_v24, %v4214_v13  ;;  %v22895_v44 = vld [vmem:[#allocation78_spill] sm:$0xff]  ;;  %v22896_v13 = vld [vmem:[#allocation16_spill] sm:$0xff] }
 0x298   :  { %v14377_v53 = vpop.eup %14376  ;;  %4819 = vperm.xlu0 %14246, %v4205_v55   ;;  %v4228_v37 = vmul.f32 %v14375_v61, %v17810_v51  ;;  %v22891_v17 = vand.u32 4294901760, %v22888_v26  ;;  %v22892_v6 = vand.u32 4294901760, %v22889_v63  ;;  %v4209_v22 = vsel %vm4208_vm8, %v17796_v0, %v4207_v7  ;;  %v22894_v55 = vld [vmem:[#allocation75_spill] sm:$0xff] }
 0x299   :  { %22890 = vst [vmem:[#allocation172_spill] sm:$0xff] %v17885_v29  ;;  %4814 = vperm.xlu1 %14247, %v4198_v20   ;;  %v4221_v15 = vmul.f32 %v14377_v53, %v17815_v57  ;;  %13517 = vmatprep.subr.bf16.mxu0 %v17885_v29  ;;  %v7971_v2 = vand.u32 4294901760, %v22894_v55  ;;  %v7974_v4 = vand.u32 4294901760, %v22895_v44  ;;  %vm4210_vm10 = vcmp.eq.f32.partialorder %v17796_v0, 0.0  ;;  %v22915_v29 = vld [vmem:[#allocation101_spill] sm:$0xff] }
 0x29a   :  { %v17895_v10 = vpack.c.bf16 %v22892_v6, %v22891_v17  ;;  %v4211_v61 = vand.u32 2147483648, %v17796_v0  ;;  %v7923_v17 = vand.u32 4294901760, %v22896_v13  ;;  %v22897_v6 = vld [vmem:[#allocation19_spill] sm:$0xff]  ;;  %v4219_v7 = vsel %vm4217_vm7, %v4218_v52, %v4216_v36  ;;  %v22900_v52 = vld [vmem:[#allocation82_spill] sm:$0xff] }
 0x29b   :  { %v21815_v20 = vand.u32 4294901760, %v22897_v6  ;;  %vm4229_vm14 = vcmp.eq.f32.partialorder %v17810_v51, inf  ;;  %vm4231_vm9 = vcmp.eq.f32.partialorder %v17810_v51, 0.0  ;;  %v17911_v53 = vpack.c.bf16 %v7974_v4, %v7971_v2 }
 0x29c   :  { %22893 = vst [vmem:[#allocation175_spill] sm:$0xff] %v17895_v10  ;;  %13519 = vmatpush3.bf16.msra.mxu0 %v17895_v10  ;;  %4829 = vperm.xlu0 %14246, %v4219_v7   ;;  %v4212_v32 = vsel %vm4210_vm10, %v4211_v61, %v4209_v22  ;;  %v4230_v49 = vsel %vm4229_vm14, %v17810_v51, %v4228_v37  ;;  %vm4222_vm6 = vcmp.eq.f32.partialorder %v17815_v57, inf  ;;  %v4232_v24 = vand.u32 2147483648, %v17810_v51  ;;  %v22902_v37 = vld [vmem:[#allocation21_spill] sm:$0xff] }
 0x29d   :  { %22898 = vst [vmem:[#allocation176_spill] sm:$0xff] %v17911_v53  ;;  %v17917_v0 = vpack.c.bf16 %v21815_v20, %v7923_v17  ;;  %4824 = vperm.xlu1 %14247, %v4212_v32   ;;  %v4223_v36 = vsel %vm4222_vm6, %v17815_v57, %v4221_v15  ;;  %13521 = vmatprep.subr.bf16.mxu0 %v17911_v53  ;;  %v7977_v40 = vand.u32 4294901760, %v22900_v52  ;;  %v7980_v7 = vand.u32 4294901760, %v22901_v46 }
 0x29e   :  { %v4225_v22 = vand.u32 2147483648, %v17815_v57  ;;  %v7929_v61 = vand.u32 4294901760, %v22902_v37  ;;  %v7932_v20 = vand.u32 4294901760, %v22903_v54  ;;  %v7983_v32 = vand.u32 4294901760, %v22904_v48 }
 0x29f   :  { %22899 = vst [vmem:[#allocation173_spill] sm:$0xff] %v17917_v0  ;;  %v4233_v19 = vsel %vm4231_vm9, %v4232_v24, %v4230_v49  ;;  %vm4224_vm12 = vcmp.eq.f32.partialorder %v17815_v57, 0.0  ;;  %v17932_v15 = vpack.c.bf16 %v7980_v7, %v7977_v40  ;;  %v7986_v21 = vand.u32 4294901760, %v22906_v27 }
 0x2a0   :  { %13523 = vmatpush3.bf16.msra.mxu0 %v17917_v0  ;;  %4839 = vperm.xlu0 %14246, %v4233_v19   ;;  %v4226_v3 = vsel %vm4224_vm12, %v4225_v22, %v4223_v36  ;;  %v17937_v0 = vsel %vm613_vm0, %v16906_v38, 0.0  ;;  %v17941_v53 = vsel %vm613_vm0, %v16923_v30, 0.0  ;;  %v17943_v10 = vpack.c.bf16 %v7932_v20, %v7929_v61  ;;  %v22910_v38 = vld [vmem:[#allocation28_spill] sm:$0xff]  ;;  %v22914_v36 = vld [vmem:[#allocation99_spill] sm:$0xff] }
 0x2a1   :  { %22905 = vst [vmem:[#allocation12_spill] sm:$0xff] %v17932_v15  ;;  %4834 = vperm.xlu1 %14247, %v4226_v3   ;;  %v17947_v49 = vsel %vm613_vm0, %v17023_v12, 0.0  ;;  %v17951_v51 = vsel %vm613_vm0, %v16968_v1, 0.0  ;;  %13525 = vmatprep.subr.bf16.mxu0 %v17932_v15  ;;  %v17954_v19 = vpack.c.bf16 %v7986_v21, %v7983_v32  ;;  %v7935_v57 = vand.u32 4294901760, %v22910_v38  ;;  %v22913_v3 = vld [vmem:[#allocation31_spill] sm:$0xff] }
 0x2a2   :  { %22907 = vst [vmem:[#allocation180_spill] sm:$0xff] %v17943_v10  ;;  %22908 = vst [vmem:[#allocation18_spill] sm:$0xff] %v17951_v51  ;;  %v22911_v30 = vand.u32 4294901760, %v22880_v5  ;;  %v7938_v12 = vand.u32 4294901760, %v22913_v3  ;;  %v7989_v22 = vand.u32 4294901760, %v22914_v36  ;;  %v7992_v1 = vand.u32 4294901760, %v22915_v29 }
 0x2a3   :  { %22909 = vst [vmem:[#allocation181_spill] sm:$0xff] %v17954_v19  ;;  %v22916_v23 = vand.u32 4294901760, %v22881_v39  ;;  %v22918_v35 = vand.u32 4294901760, %v22882_v42  ;;  %v22922_v25 = vand.u32 4294901760, %v22883_v18  ;;  %v22924_v59 = vand.u32 4294901760, %v22885_v31 }
 0x2a4   :  { %v17960_v24 = vsub.f32 %v22880_v5, %v22911_v30  ;;  %13527 = vmatpush3.bf16.msra.mxu0 %v17943_v10  ;;  %v22920_v5 = vld [vmem:[#allocation35_spill] sm:$0xff]  ;;  %v22921_v10 = vld [vmem:[#allocation37_spill] sm:$0xff]  ;;  %v22930_v47 = vand.u32 4294901760, %v22888_v26  ;;  %v18032_v11 = vsub.f32 %v22900_v52, %v7977_v40  ;;  %v18041_v51 = vsub.f32 %v22902_v37, %v7929_v61 }
 0x2a5   :  { %v17969_v15 = vsub.f32 %v22881_v39, %v22916_v23  ;;  %v17974_v45 = vsub.f32 %v22882_v42, %v22918_v35  ;;  %13529 = vmatprep.subr.bf16.mxu0 %v17954_v19  ;;  %v7941_v30 = vand.u32 4294901760, %v22920_v5  ;;  %v7944_v41 = vand.u32 4294901760, %v22921_v10 }
 0x2a6   :  { %22912 = vst [vmem:[#allocation56_spill] sm:$0xff] %v17960_v24  ;;  %v17982_v8 = vsub.f32 %v22883_v18, %v22922_v25  ;;  %v17987_v39 = vsub.f32 %v22885_v31, %v22924_v59  ;;  %v17989_v23 = vpack.c.bf16 %v7938_v12, %v7935_v57  ;;  %v17991_v42 = vpack.c.bf16 %v7992_v1, %v7989_v22 }
 0x2a7   :  { %22917 = vst [vmem:[#allocation40_spill] sm:$0xff] %v17969_v15  ;;  %22919 = vst [vmem:[#allocation30_spill] sm:$0xff] %v17974_v45  ;;  %v22928_v35 = vand.u32 4294901760, %v22887_v28  ;;  %v18001_v43 = vsub.f32 %v22888_v26, %v22930_v47  ;;  %v22932_v25 = vand.u32 4294901760, %v22889_v63  ;;  %v18009_v59 = vsub.f32 %v22894_v55, %v7971_v2  ;;  %v22941_v55 = vld [vmem:[#allocation45_spill] sm:$0xff] }
 0x2a8   :  { %22923 = vst [vmem:[#allocation32_spill] sm:$0xff] %v17982_v8  ;;  %22925 = vst [vmem:[#allocation185_spill] sm:$0xff] %v17987_v39  ;;  %v18012_v31 = vsub.f32 %v22895_v44, %v7974_v4  ;;  %13531 = vmatpush3.bf16.msra.mxu0 %v17989_v23  ;;  %v7998_v47 = vand.u32 4294901760, %v22938_v60  ;;  %v18020_v26 = vsub.f32 %v22896_v13, %v7923_v17  ;;  %v22943_v4 = vand.u32 4294901760, %v22897_v6  ;;  %v22947_v13 = vld [vmem:[#allocation119_spill] sm:$0xff] }
 0x2a9   :  { %22926 = vst [vmem:[#allocation39_spill] sm:$0xff] %v17989_v23  ;;  %22927 = vst [vmem:[#allocation187_spill] sm:$0xff] %v17991_v42  ;;  %v17996_v19 = vsub.f32 %v22887_v28, %v22928_v35  ;;  %v18006_v18 = vsub.f32 %v22889_v63, %v22932_v25  ;;  %v18015_v28 = vpack.c.bf16 %v7944_v41, %v7941_v30  ;;  %v22937_v35 = vld [vmem:[#allocation107_spill] sm:$0xff]  ;;  %13533 = vmatprep.subr.bf16.mxu0 %v17991_v42 }
 0x2aa   :  { %22931 = vst [vmem:[#allocation63_spill] sm:$0xff] %v18001_v43  ;;  %22934 = vst [vmem:[#allocation7_spill] sm:$0xff] %v18009_v59  ;;  %v7995_v33 = vand.u32 4294901760, %v22937_v35  ;;  %v22940_v63 = vld [vmem:[#allocation43_spill] sm:$0xff]  ;;  %v18029_v23 = vsub.f32 %v22897_v6, %v22943_v4  ;;  %v21847_v17 = vand.u32 4294901760, %v22947_v13  ;;  %v18038_v42 = vsub.f32 %v22901_v46, %v7980_v7  ;;  %v22956_v7 = vld [vmem:[#allocation50_spill] sm:$0xff] }
 0x2ab   :  { %22929 = vst [vmem:[#allocation59_spill] sm:$0xff] %v17996_v19  ;;  %22933 = vst [vmem:[#allocation6_spill] sm:$0xff] %v18006_v18  ;;  %v7947_v25 = vand.u32 4294901760, %v22940_v63  ;;  %v18044_v44 = vsub.f32 %v22903_v54, %v7932_v20  ;;  %v18047_v2 = vsub.f32 %v22904_v48, %v7983_v32  ;;  %v18050_v6 = vsub.f32 %v22906_v27, %v7986_v21  ;;  %v22959_v27 = vld [vmem:[#allocation55_spill] sm:$0xff] }
 0x2ac   :  { %22935 = vst [vmem:[#allocation65_spill] sm:$0xff] %v18012_v31  ;;  %22936 = vst [vmem:[#allocation70_spill] sm:$0xff] %v18015_v28  ;;  %v18034_v14 = vpack.c.bf16 %v7998_v47, %v7995_v33  ;;  %v18053_v40 = vsub.f32 %v22910_v38, %v7935_v57  ;;  %13535 = vmatpush3.bf16.msra.mxu0 %v18015_v28  ;;  %v22954_v46 = vand.u32 4294901760, %v22941_v55  ;;  %v21852_v37 = vand.u32 4294901760, %v22956_v7 }
 0x2ad   :  { %22939 = vst [vmem:[#allocation8_spill] sm:$0xff] %v18020_v26  ;;  %22944 = vst [vmem:[#allocation13_spill] sm:$0xff] %v18029_v23  ;;  %v22957_v54 = vand.u32 4294901760, %v22942_v50  ;;  %v21850_v21 = vand.u32 4294901760, %v22959_v27  ;;  %v21849_v20 = vand.u32 4294901760, %v17960_v24  ;;  %v21848_v61 = vand.u32 4294901760, %v17969_v15 }
 0x2ae   :  { %22945 = vst [vmem:[#allocation75_spill] sm:$0xff] %v18032_v11  ;;  %22946 = vst [vmem:[#allocation78_spill] sm:$0xff] %v18034_v14  ;;  %v18058_v52 = vpack.c.bf16 %v22954_v46, %v7947_v25  ;;  %13537 = vmatprep.subr.bf16.mxu0 %v18034_v14  ;;  %v18072_v32 = vsub.f32 %v22913_v3, %v7938_v12  ;;  %v18075_v38 = vsub.f32 %v22914_v36, %v7989_v22 }
 0x2af   :  { %22948 = vst [vmem:[#allocation16_spill] sm:$0xff] %v18038_v42  ;;  %22949 = vst [vmem:[#allocation19_spill] sm:$0xff] %v18041_v51  ;;  %v18066_v48 = vpack.c.bf16 %v21847_v17, %v22957_v54  ;;  %v21851_v57 = vand.u32 4294901760, %v17974_v45  ;;  %v21853_v4 = vand.u32 4294901760, %v17982_v8  ;;  %v18080_v46 = vsub.f32 %v22915_v29, %v7992_v1 }
 0x2b0   :  { %22950 = vst [vmem:[#allocation82_spill] sm:$0xff] %v18044_v44  ;;  %22951 = vst [vmem:[#allocation87_spill] sm:$0xff] %v18047_v2  ;;  %v18083_v54 = vsub.f32 %v22920_v5, %v7941_v30  ;;  %v8138_v17 = vsub.f32 %v17960_v24, %v21849_v20  ;;  %v8145_v3 = vsub.f32 %v17969_v15, %v21848_v61  ;;  %13539 = vmatpush3.bf16.msra.mxu0 %v18058_v52  ;;  %v23040_v15 = vld [vmem:[#allocation174_spill] sm:$0xff]  ;;  %v23043_v24 = vld [vmem:[#allocation72_spill] sm:$0xff] }
 0x2b1   :  { %22952 = vst [vmem:[#allocation21_spill] sm:$0xff] %v18050_v6  ;;  %22953 = vst [vmem:[#allocation25_spill] sm:$0xff] %v18053_v40  ;;  %v18096_v12 = vpack.c.bf16 %v21850_v21, %v21852_v37  ;;  %v8026_v29 = vsub.f32 %v17974_v45, %v21851_v57  ;;  %v8033_v36 = vsub.f32 %v17982_v8, %v21853_v4  ;;  %v21863_v22 = vand.u32 4294901760, %v17987_v39 }
 0x2b2   :  { %22955 = vst [vmem:[#allocation89_spill] sm:$0xff] %v18058_v52  ;;  %22958 = vst [vmem:[#allocation95_spill] sm:$0xff] %v18066_v48  ;;  %v18106_v1 = vsub.f32 %v22921_v10, %v7944_v41  ;;  %13541 = vmatprep.subr.bf16.mxu0 %v18066_v48  ;;  %v8139_v5 = vand.u32 4294901760, %v8138_v17  ;;  %v8146_v30 = vand.u32 4294901760, %v8145_v3  ;;  %v21856_v61 = vand.u32 4294901760, %v17996_v19 }
 0x2b3   :  { %22960 = vst [vmem:[#allocation28_spill] sm:$0xff] %v18072_v32  ;;  %22961 = vst [vmem:[#allocation31_spill] sm:$0xff] %v18075_v38  ;;  %v8027_v20 = vand.u32 4294901760, %v8026_v29  ;;  %v8034_v21 = vand.u32 4294901760, %v8033_v36  ;;  %v8152_v57 = vsub.f32 %v17987_v39, %v21863_v22  ;;  %v21862_v37 = vand.u32 4294901760, %v18001_v43 }
 0x2b4   :  { %22962 = vst [vmem:[#allocation99_spill] sm:$0xff] %v18080_v46  ;;  %22963 = vst [vmem:[#allocation101_spill] sm:$0xff] %v18083_v54  ;;  %v18115_v4 = vsub.f32 %v22937_v35, %v7995_v33  ;;  %v13544_v8 = vpack.c.bf16 %v8146_v30, %v8139_v5  ;;  %v8159_v10 = vsub.f32 %v17996_v19, %v21856_v61  ;;  %v21858_v41 = vand.u32 4294901760, %v18006_v18  ;;  %v23036_v19 = vld [vmem:[#allocation176_spill] sm:$0xff] }
 0x2b5   :  { %22964 = vst [vmem:[#allocation35_spill] sm:$0xff] %v18096_v12  ;;  %22965 = vst [vmem:[#allocation37_spill] sm:$0xff] %v18106_v1  ;;  %13543 = vmatpush3.bf16.msra.mxu0 %v18096_v12  ;;  %v13546_v17 = vpack.c.bf16 %v8034_v21, %v8027_v20  ;;  %v8153_v3 = vand.u32 4294901760, %v8152_v57  ;;  %v8040_v29 = vsub.f32 %v18001_v43, %v21862_v37  ;;  %v21857_v36 = vand.u32 4294901760, %v18009_v59 }
 0x2b6   :  { %22966 = vst [vmem:[#allocation107_spill] sm:$0xff] %v18115_v4  ;;  %v18127_v33 = vsub.f32 %v22938_v60, %v7998_v47  ;;  %13545 = vmatprep.subr.bf16.mxu0 %v13544_v8  ;;  %v8160_v35 = vand.u32 4294901760, %v8159_v10  ;;  %v8047_v5 = vsub.f32 %v18006_v18, %v21858_v41  ;;  %v21861_v30 = vand.u32 4294901760, %v18012_v31 }
 0x2b7   :  { %v8041_v61 = vand.u32 4294901760, %v8040_v29  ;;  %v8166_v21 = vsub.f32 %v18009_v59, %v21857_v36  ;;  %v21859_v20 = vand.u32 4294901760, %v18020_v26  ;;  %v21860_v57 = vand.u32 4294901760, %v18029_v23 }
 0x2b8   :  { %22967 = vst [vmem:[#allocation110_spill] sm:$0xff] %v18127_v33  ;;  %v18139_v60 = vsub.f32 %v22940_v63, %v7947_v25  ;;  %8017 = vmatmul.mubr.f32.vlgmr.msra.gmra.mrb[42].mxu0 %v22263_v9  ;;  %v13548_v8 = vpack.c.bf16 %v8160_v35, %v8153_v3  ;;  %v8048_v47 = vand.u32 4294901760, %v8047_v5  ;;  %v8173_v10 = vsub.f32 %v18012_v31, %v21861_v30 }
 0x2b9   :  { %13547 = vmatpush3.bf16.msra.mxu0 %v13546_v17  ;;  %v8167_v29 = vand.u32 4294901760, %v8166_v21  ;;  %v8054_v36 = vsub.f32 %v18020_v26, %v21859_v20  ;;  %v8061_v41 = vsub.f32 %v18029_v23, %v21860_v57  ;;  %v21881_v63 = vand.u32 4294901760, %v18032_v11  ;;  %8247 = vmatprep.mubr.f32.mxu0 %v22659_v58 }
 0x2ba   :  { %22968 = vst [vmem:[#allocation43_spill] sm:$0xff] %v18139_v60  ;;  %v22969_v25 = vand.u32 4294901760, %v22941_v55  ;;  %13549 = vmatprep.subr.bf16.mxu0 %v13548_v8  ;;  %v13550_v17 = vpack.c.bf16 %v8048_v47, %v8041_v61  ;;  %v8174_v35 = vand.u32 4294901760, %v8173_v10  ;;  %v21867_v5 = vand.u32 4294901760, %v18038_v42 }
 0x2bb   :  { %v8055_v21 = vand.u32 4294901760, %v8054_v36  ;;  %v8062_v20 = vand.u32 4294901760, %v8061_v41  ;;  %v8180_v57 = vsub.f32 %v18032_v11, %v21881_v63  ;;  %v21866_v30 = vand.u32 4294901760, %v18041_v51  ;;  %v22986_v63 = vld [vmem:[#allocation157_spill] sm:$0xff] }
 0x2bc   :  { %v18156_v3 = vsub.f32 %v22941_v55, %v22969_v25  ;;  %v22971_v37 = vand.u32 4294901760, %v22942_v50  ;;  %v13552_v55 = vpack.c.bf16 %v8174_v35, %v8167_v29  ;;  %v8187_v61 = vsub.f32 %v18038_v42, %v21867_v5 }
 0x2bd   :  { %v21864_v8 = vand.u32 4294901760, %v18044_v44  ;;  %13551 = vmatpush3.bf16.msra.mxu0 %v13550_v17  ;;  %v13554_v41 = vpack.c.bf16 %v8062_v20, %v8055_v21  ;;  %v8181_v36 = vand.u32 4294901760, %v8180_v57  ;;  %v8068_v47 = vsub.f32 %v18041_v51, %v21866_v30  ;;  %v23031_v51 = vld [vmem:[#allocation175_spill] sm:$0xff] }
 0x2be   :  { %22970 = vst [vmem:[#allocation45_spill] sm:$0xff] %v18156_v3  ;;  %v18166_v22 = vsub.f32 %v22942_v50, %v22971_v37  ;;  %v21865_v10 = vand.u32 4294901760, %v18047_v2  ;;  %v22973_v25 = vand.u32 4294901760, %v22947_v13  ;;  %13553 = vmatprep.subr.bf16.mxu0 %v13552_v55  ;;  %v8188_v37 = vand.u32 4294901760, %v8187_v61 }
 0x2bf   :  { %v8075_v29 = vsub.f32 %v18044_v44, %v21864_v8  ;;  %v21870_v20 = vand.u32 4294901760, %v18050_v6  ;;  %v8069_v57 = vand.u32 4294901760, %v8068_v47  ;;  %v21869_v35 = vand.u32 4294901760, %v18053_v40  ;;  %4400 = vadd.xlane.f32.xlu0 %v17937_v0 }
 0x2c0   :  { %22972 = vst [vmem:[#allocation114_spill] sm:$0xff] %v18166_v22  ;;  %v18179_v50 = vsub.f32 %v22947_v13, %v22973_v25  ;;  %v8194_v17 = vsub.f32 %v18047_v2, %v21865_v10  ;;  %v21868_v21 = vand.u32 4294901760, %v18072_v32  ;;  %v22975_v13 = vand.u32 4294901760, %v22956_v7 }
 0x2c1   :  { %v13556_v61 = vpack.c.bf16 %v8188_v37, %v8181_v36  ;;  %v8076_v25 = vand.u32 4294901760, %v8075_v29  ;;  %v8201_v8 = vsub.f32 %v18050_v6, %v21870_v20  ;;  %13555 = vmatpush3.bf16.msra.mxu0 %v13554_v41  ;;  %v8082_v10 = vsub.f32 %v18053_v40, %v21869_v35  ;;  %v23021_v40 = vld [vmem:[#allocation149_spill] sm:$0xff] }
 0x2c2   :  { %22974 = vst [vmem:[#allocation119_spill] sm:$0xff] %v18179_v50  ;;  %v18193_v55 = vsub.f32 %v22956_v7, %v22975_v13  ;;  %v8195_v47 = vand.u32 4294901760, %v8194_v17  ;;  %v8089_v30 = vsub.f32 %v18072_v32, %v21868_v21  ;;  %v21880_v5 = vand.u32 4294901760, %v18075_v38 }
 0x2c3   :  { %v22977_v7 = vand.u32 4294901760, %v22959_v27  ;;  %13557 = vmatprep.subr.bf16.mxu0 %v13556_v61  ;;  %v13558_v41 = vpack.c.bf16 %v8076_v25, %v8069_v57  ;;  %v8202_v37 = vand.u32 4294901760, %v8201_v8  ;;  %v21879_v29 = vand.u32 4294901760, %v18080_v46  ;;  %4349 = vadd.xlane.f32.xlu0 %v17941_v53 }
 0x2c4   :  { %22976 = vst [vmem:[#allocation50_spill] sm:$0xff] %v18193_v55  ;;  %v8083_v17 = vand.u32 4294901760, %v8082_v10  ;;  %v8090_v13 = vand.u32 4294901760, %v8089_v30  ;;  %v8208_v21 = vsub.f32 %v18075_v38, %v21880_v5  ;;  %v21874_v35 = vand.u32 4294901760, %v18083_v54 }
 0x2c5   :  { %v18209_v36 = vsub.f32 %v22959_v27, %v22977_v7  ;;  %v13560_v20 = vpack.c.bf16 %v8202_v37, %v8195_v47  ;;  %v8215_v0 = vsub.f32 %v18080_v46, %v21879_v29  ;;  %v21872_v27 = vand.u32 4294901760, %v18106_v1  ;;  %13559 = vmatpush3.bf16.msra.mxu0 %v13558_v41  ;;  %4397 = vadd.xlane.f32.xlu1 %v17407_v34  ;;  %v22984_v29 = vld [vmem:[#allocation212_spill] sm:$0xff] }
 0x2c6   :  { %v21871_v57 = vand.u32 4294901760, %v18115_v4  ;;  %v13562_v8 = vpack.c.bf16 %v8090_v13, %v8083_v17  ;;  %v8209_v61 = vand.u32 4294901760, %v8208_v21  ;;  %v8096_v30 = vsub.f32 %v18083_v54, %v21874_v35 }
 0x2c7   :  { %22978 = vst [vmem:[#allocation55_spill] sm:$0xff] %v18209_v36  ;;  %v21873_v10 = vand.u32 4294901760, %v18127_v33  ;;  %13561 = vmatprep.subr.bf16.mxu0 %v13560_v20  ;;  %v8216_v25 = vand.u32 4294901760, %v8215_v0  ;;  %v8103_v47 = vsub.f32 %v18106_v1, %v21872_v27  ;;  %v21878_v21 = vand.u32 4294901760, %v18139_v60  ;;  %4403 = vadd.xlane.f32.xlu0 %v17947_v49  ;;  %v22979_v49 = vld [vmem:[#allocation18_spill] sm:$0xff] }
 0x2c8   :  { %v8222_v7 = vsub.f32 %v18115_v4, %v21871_v57  ;;  %v8097_v41 = vand.u32 4294901760, %v8096_v30  ;;  %v21875_v17 = vand.u32 4294901760, %v18156_v3  ;;  %v21876_v53 = vand.u32 4294901760, %v18166_v22 }
 0x2c9   :  { %v8229_v37 = vsub.f32 %v18127_v33, %v21873_v10  ;;  %v13564_v20 = vpack.c.bf16 %v8216_v25, %v8209_v61  ;;  %v8104_v13 = vand.u32 4294901760, %v8103_v47  ;;  %v8110_v57 = vsub.f32 %v18139_v60, %v21878_v21  ;;  %13563 = vmatpush3.bf16.msra.mxu0 %v13562_v8  ;;  %4352 = vadd.xlane.f32.xlu1 %v22979_v49  ;;  %v22983_v21 = vld [vmem:[#allocation53_spill] sm:$0xff]  ;;  %v22993_v60 = vld [vmem:[#allocation150_spill] sm:$0xff] }
 0x2ca   :  { %v8223_v0 = vand.u32 4294901760, %v8222_v7  ;;  %v8117_v30 = vsub.f32 %v18156_v3, %v21875_v17  ;;  %v8236_v10 = vsub.f32 %v18166_v22, %v21876_v53  ;;  %v21877_v35 = vand.u32 4294901760, %v18179_v50  ;;  %v22992_v3 = vld [vmem:[#allocation171_spill] sm:$0xff] }
 0x2cb   :  { %v8230_v27 = vand.u32 4294901760, %v8229_v37  ;;  %13565 = vmatprep.subr.bf16.mxu0 %v13564_v20  ;;  %v13566_v34 = vpack.c.bf16 %v8104_v13, %v8097_v41  ;;  %v8111_v61 = vand.u32 4294901760, %v8110_v57  ;;  %v21884_v25 = vand.u32 4294901760, %v18193_v55  ;;  %v22981_v41 = vld [vmem:[#allocation125_spill] sm:$0xff]  ;;  %v22982_v13 = vld [vmem:[#allocation106_spill] sm:$0xff] }
 0x2cc   :  { %v21887_v8 = vand.u32 4294901760, %v18209_v36  ;;  %v8118_v7 = vand.u32 4294901760, %v8117_v30  ;;  %v8237_v37 = vand.u32 4294901760, %v8236_v10  ;;  %v8243_v17 = vsub.f32 %v18179_v50, %v21877_v35  ;;  %v22980_v10 = vld [vmem:[#allocation159_spill] sm:$0xff]  ;;  %v22987_v50 = vld [vmem:[#allocation120_spill] sm:$0xff] }
 0x2cd   :  { %v13568_v47 = vpack.c.bf16 %v8230_v27, %v8223_v0  ;;  %v4248_v53 = vsub.f32 %v22835_v56, %v17630_v16  ;;  %vm1333_vm15 = vcmp.lt.s32.totalorder %v17594_v62, 0  ;;  %v8124_v57 = vsub.f32 %v18193_v55, %v21884_v25  ;;  %13567 = vmatpush3.bf16.msra.mxu0 %v13566_v34  ;;  %v23066_v56 = vld [vmem:[#allocation196_spill] sm:$0xff] }
 0x2ce   :  { %v8131_v27 = vsub.f32 %v18209_v36, %v21887_v8  ;;  %v4267_v20 = vsub.f32 %v22981_v41, %v22980_v10  ;;  %v4354_v0 = vsel %vm613_vm0, %v22982_v13, 0.0  ;;  %v13570_v30 = vpack.c.bf16 %v8118_v7, %v8111_v61  ;;  %v22990_v13 = vld [vmem:[#allocation177_spill] sm:$0xff]  ;;  %v22991_v61 = vld [vmem:[#allocation91_spill] sm:$0xff] }
 0x2cf   :  { %v8244_v35 = vand.u32 4294901760, %v8243_v17  ;;  %v22985_v49 = vsub.f32 %v22983_v21, %v22984_v29  ;;  %v4266_v25 = vsub.f32 %v22987_v50, %v22986_v63  ;;  %4355 = vadd.xlane.f32.xlu0 %v4354_v0  ;;  %13569 = vmatprep.subr.bf16.mxu0 %v13568_v47  ;;  %v8125_v55 = vand.u32 4294901760, %v8124_v57  ;;  %v22994_v57 = vld [vmem:[#allocation129_spill] sm:$0xff]  ;;  %v23051_v50 = vld [vmem:[#allocation200_spill] sm:$0xff] }
 0x2d0   :  { %v8132_v8 = vand.u32 4294901760, %v8131_v27  ;;  %v22988_v36 = vxor.u32 2147483647, %v17594_v62  ;;  %v1294_v34 = vand.u32 4294967288, %v22990_v13  ;;  %v4405_v17 = vsel %vm613_vm0, %v22991_v61, 0.0  ;;  %v22996_v13 = vld [vmem:[#allocation133_spill] sm:$0xff] }
 0x2d1   :  { %v4302_v5 = vmul.f32 1.442695, %v22985_v49  ;;  %v13572_v7 = vpack.c.bf16 %v8244_v35, %v8237_v37  ;;  %14378 = vpow2.f32 %v22992_v3  ;;  %v4300_v49 = vmul.f32 1.442695, %v4248_v53  ;;  %4406 = vadd.xlane.f32.xlu1 %v4405_v17  ;;  %13571 = vmatpush3.bf16.msra.mxu0 %v13570_v30  ;;  %v22997_v61 = vld [vmem:[#allocation183_spill] sm:$0xff]  ;;  %v22998_v53 = vld [vmem:[#allocation98_spill] sm:$0xff]  ;;  %v4660_v30 = vpop.permute.xlu0 %4659 }
 0x2d2   :  { %v18277_v22 = vsel %vm1333_vm15, %v22988_v36, %v17594_v62  ;;  %14380 = vpow2.f32 %v22993_v60  ;;  %v4338_v47 = vmul.f32 1.442695, %v4267_v20  ;;  %v4408_v27 = vsel %vm613_vm0, %v22994_v57, 0.0  ;;  %v22995_v62 = vld [vmem:[#allocation152_spill] sm:$0xff]  ;;  %v22999_v37 = vld [vmem:[#allocation34_spill] sm:$0xff] }
 0x2d3   :  { %22989 = vst [vmem:[#allocation18_spill] sm:$0xff] %v18277_v22  ;;  %v13574_v0 = vpack.c.bf16 %v8132_v8, %v8125_v55  ;;  %14382 = vpow2.f32 %v22995_v62  ;;  %v4336_v36 = vmul.f32 1.442695, %v4266_v25  ;;  %v4269_v33 = vsub.f32 %v22996_v13, %v18277_v22  ;;  %4409 = vadd.xlane.f32.xlu0 %v4408_v27  ;;  %13573 = vmatprep.subr.bf16.mxu0 %v13572_v7  ;;  %v23000_v55 = vld [vmem:[#allocation2_spill] sm:$0xff]  ;;  %v23005_v57 = vld [vmem:[#allocation104_spill] sm:$0xff] }
 0x2d4   :  { %v1297_v35 = vand.u32 4294967288, %v22997_v61  ;;  %14384 = vpow2.f32 %v4302_v5  ;;  %v1370_v3 = vxor.u32 2147483647, %v1294_v34  ;;  %v4357_v60 = vsel %vm613_vm0, %v22998_v53, 0.0  ;;  %v23008_v25 = vld [vmem:[#allocation126_spill] sm:$0xff]  ;;  %v23060_v63 = vld [vmem:[#allocation180_spill] sm:$0xff] }
 0x2d5   :  { %14386 = vpow2.f32 %v4300_v49  ;;  %vm1332_vm7 = vcmp.lt.s32.totalorder %v1294_v34, 0  ;;  %v1296_v20 = vand.u32 4294967288, %v22999_v37  ;;  %4358 = vadd.xlane.f32.xlu1 %v4357_v60  ;;  %v18297_v8 = vsel %vm1679_vm3, 1.0, %v22263_v9  ;;  %v4655_v49 = vpop.permute.xlu1 %4654  ;;  %13575 = vmatpush3.bf16.msra.mxu0 %v13574_v0 }
 0x2d6   :  { %23002 = vst [vmem:[#allocation106_spill] sm:$0xff] %v18297_v8  ;;  %14388 = vpow2.f32 %v4338_v47  ;;  %v18300_v17 = vmul.f32 %v18297_v8, %v4660_v30  ;;  %v18306_v7 = vsel %vm1678_vm2, 1.0, %v22263_v9  ;;  %v4360_v27 = vsel %vm613_vm0, %v23005_v57, 0.0  ;;  %v23006_v47 = vld [vmem:[#allocation166_spill] sm:$0xff]  ;;  %v23012_v57 = vld [vmem:[#allocation11_spill] sm:$0xff] }
 0x2d7   :  { %23004 = vst [vmem:[#allocation177_spill] sm:$0xff] %v18306_v7  ;;  %14390 = vpow2.f32 %v4336_v36  ;;  %v4342_v62 = vmul.f32 1.442695, %v4269_v33  ;;  %vm1335_vm3 = vcmp.lt.s32.totalorder %v1297_v35, 0  ;;  %v18311_v61 = vmul.f32 %v18306_v7, %v4655_v49  ;;  %4361 = vadd.xlane.f32.xlu0 %v4360_v27  ;;  %13609 = vmatprep.subr.bf16.mxu0 %v23006_v47  ;;  %v4670_v49 = vpop.permute.xlu0 %4669  ;;  %v23016_v33 = vld [vmem:[#allocation168_spill] sm:$0xff]  ;;  %v23102_v7 = vld [vmem:[#allocation211_spill] sm:$0xff] }
 0x2d8   :  { %v18315_v53 = vsel %vm1332_vm7, %v1370_v3, %v1294_v34  ;;  %v1373_v60 = vxor.u32 2147483647, %v1297_v35  ;;  %v21900_v37 = vand.u32 4294901760, %v18300_v17  ;;  %v4411_v30 = vsel %vm613_vm0, %v23008_v25, 0.0  ;;  %8249 = vmatmul.mubr.f32.vlgmr.msra.gmra.mrb[44].mxu0 %v22659_v58 }
 0x2d9   :  { %23007 = vst [vmem:[#allocation91_spill] sm:$0xff] %v18315_v53  ;;  %vm1334_vm2 = vcmp.lt.s32.totalorder %v1296_v20, 0  ;;  %v1372_v0 = vxor.u32 2147483647, %v1296_v20  ;;  %4412 = vadd.xlane.f32.xlu1 %v4411_v30  ;;  %v18325_v5 = vsel %vm1681_vm4, 1.0, %v22263_v9  ;;  %vm23013_vm8 = vcmp.eq.s32.totalorder %v23000_v55, %v23012_v57  ;;  %v4665_v25 = vpop.permute.xlu1 %4664  ;;  %v23015_v30 = vld [vmem:[#allocation193_spill] sm:$0xff]  ;;  %13611 = vmatpush3.bf16.msra.mxu0 %v23016_v33 }
 0x2da   :  { %23010 = vst [vmem:[#allocation171_spill] sm:$0xff] %v18325_v5  ;;  %v18331_v34 = vsub.f32 %v18300_v17, %v21900_v37  ;;  %v18334_v3 = vmul.f32 %v18325_v5, %v4670_v49  ;;  %v18340_v27 = vsel %vm23013_vm8, 1.0, %v22263_v9  ;;  %v4414_v36 = vsel %vm613_vm0, %v23015_v30, 0.0  ;;  %8491 = vmatprep.mubr.f32.mxu0 %v22263_v9  ;;  %v23017_v49 = vld [vmem:[#allocation131_spill] sm:$0xff]  ;;  %v23019_v30 = vld [vmem:[#allocation172_spill] sm:$0xff] }
 0x2db   :  { %23014 = vst [vmem:[#allocation129_spill] sm:$0xff] %v18340_v27  ;;  %v18346_v4 = vpop.eup %14378  ;;  %14392 = vpow2.f32 %v4342_v62  ;;  %v4268_v37 = vsub.f32 %v23017_v49, %v18315_v53  ;;  %v23018_v1 = vand.u32 4294901760, %v18311_v61  ;;  %v18356_v54 = vmul.f32 %v18340_v27, %v4665_v25  ;;  %4415 = vadd.xlane.f32.xlu0 %v4414_v36  ;;  %13613 = vmatprep.subr.bf16.mxu0 %v23019_v30  ;;  %v4680_v62 = vpop.permute.xlu0 %4679  ;;  %v23030_v36 = vld [vmem:[#allocation195_spill] sm:$0xff] }
 0x2dc   :  { %23011 = vst [vmem:[#allocation150_spill] sm:$0xff] %v18331_v34  ;;  %v18359_v46 = vpop.eup %14380  ;;  %v18362_v38 = vsel %vm1335_vm3, %v1373_v60, %v1297_v35  ;;  %v4363_v6 = vsel %vm613_vm0, %v23021_v40, 0.0  ;;  %v18371_v25 = vsel %vm1334_vm2, %v1372_v0, %v1296_v20  ;;  %v23023_v35 = vld [vmem:[#allocation167_spill] sm:$0xff]  ;;  %v23026_v40 = vand.u32 4294901760, %v18334_v3 }
 0x2dd   :  { %v18353_v57 = vsub.f32 %v18311_v61, %v23018_v1  ;;  %23020 = vst [vmem:[#allocation152_spill] sm:$0xff] %v18362_v38  ;;  %v18368_v1 = vpop.eup %14382  ;;  %23022 = vst [vmem:[#allocation183_spill] sm:$0xff] %v18371_v25  ;;  %4364 = vadd.xlane.f32.xlu1 %v4363_v6  ;;  %vm23024_vm4 = vcmp.eq.s32.totalorder %v23000_v55, %v23023_v35  ;;  %v23027_v6 = vld [vmem:[#allocation27_spill] sm:$0xff]  ;;  %v4675_v35 = vpop.permute.xlu1 %4674  ;;  %v4366_v2 = vsel %vm613_vm0, %v23030_v36, 0.0  ;;  %13615 = vmatpush3.bf16.msra.mxu0 %v23031_v51  ;;  %v23034_v36 = vld [vmem:[#allocation140_spill] sm:$0xff] }
 0x2de   :  { %v18379_v60 = vsel %vm23024_vm4, 1.0, %v22263_v9  ;;  %v18381_v32 = vpop.eup %14384  ;;  %v18386_v44 = vsub.f32 %v18334_v3, %v23026_v40  ;;  %vm23028_vm10 = vcmp.eq.s32.totalorder %v23000_v55, %v23027_v6  ;;  %v4340_v11 = vmul.f32 1.442695, %v4268_v37  ;;  %v23032_v40 = vld [vmem:[#allocation145_spill] sm:$0xff]  ;;  %v23035_v37 = vld [vmem:[#allocation191_spill] sm:$0xff]  ;;  %13617 = vmatprep.subr.bf16.mxu0 %v23036_v19 }
 0x2df   :  { %23025 = vst [vmem:[#allocation98_spill] sm:$0xff] %v18379_v60  ;;  %v18389_v20 = vmul.f32 %v18379_v60, %v4680_v62  ;;  %v18395_v0 = vsel %vm23028_vm10, 1.0, %v22263_v9  ;;  %v18400_v42 = vpop.eup %14386  ;;  %v4271_v23 = vsub.f32 %v23032_v40, %v18362_v38  ;;  %v23033_v62 = vand.u32 4294901760, %v18356_v54  ;;  %4367 = vadd.xlane.f32.xlu0 %v4366_v2  ;;  %v23048_v38 = vld [vmem:[#allocation173_spill] sm:$0xff]  ;;  %v23050_v53 = vld [vmem:[#allocation151_spill] sm:$0xff]  ;;  %v23084_v60 = vld [vmem:[#allocation206_spill] sm:$0xff] }
 0x2e0   :  { %23029 = vst [vmem:[#allocation34_spill] sm:$0xff] %v18395_v0  ;;  %v18410_v6 = vmul.f32 %v18395_v0, %v4675_v35  ;;  %v18412_v31 = vpop.eup %14388  ;;  %v4270_v59 = vsub.f32 %v23034_v36, %v18371_v25  ;;  %v4417_v43 = vsel %vm613_vm0, %v23035_v37, 0.0  ;;  %v23037_v39 = vand.u32 4294901760, %v18353_v57  ;;  %v4690_v37 = vpop.permute.xlu0 %4689  ;;  %v23085_v5 = vld [vmem:[#allocation187_spill] sm:$0xff] }
 0x2e1   :  { %v18407_v26 = vsub.f32 %v18356_v54, %v23033_v62  ;;  %v23038_v62 = vand.u32 4294901760, %v18331_v34  ;;  %v18426_v35 = vpop.eup %14390  ;;  %4418 = vadd.xlane.f32.xlu1 %v4417_v43  ;;  %vm23041_vm14 = vcmp.eq.s32.totalorder %v23000_v55, %v23040_v15  ;;  %vm23044_vm9 = vcmp.eq.s32.totalorder %v23000_v55, %v23043_v24  ;;  %v4685_v49 = vpop.permute.xlu1 %4684  ;;  %13619 = vmatpush3.bf16.msra.mxu0 %v23048_v38 }
 0x2e2   :  { %v18433_v18 = vsel %vm23041_vm14, 1.0, %v22263_v9  ;;  %v18439_v36 = vsel %vm23044_vm9, 1.0, %v22263_v9  ;;  %v23047_v2 = vand.u32 4294901760, %v18389_v20  ;;  %14394 = vpow2.f32 %v4340_v11  ;;  %v23052_v11 = vld [vmem:[#allocation12_spill] sm:$0xff] }
 0x2e3   :  { %v18424_v45 = vpack.c.bf16 %v23038_v62, %v23037_v39  ;;  %23042 = vst [vmem:[#allocation164_spill] sm:$0xff] %v18433_v18  ;;  %23045 = vst [vmem:[#allocation155_spill] sm:$0xff] %v18439_v36  ;;  %v23046_v39 = vld [vmem:[#allocation198_spill] sm:$0xff]  ;;  %v18451_v25 = vmul.f32 %v18433_v18, %v4690_v37  ;;  %v4346_v24 = vmul.f32 1.442695, %v4271_v23  ;;  %v23049_v13 = vand.u32 4294901760, %v18410_v6  ;;  %13621 = vmatprep.subr.bf16.mxu0 %v23052_v11 }
 0x2e4   :  { %v4420_v62 = vsel %vm613_vm0, %v23046_v39, 0.0  ;;  %v18448_v15 = vsub.f32 %v18389_v20, %v23047_v2  ;;  %v18460_v40 = vmul.f32 %v18439_v36, %v4685_v49  ;;  %v4344_v43 = vmul.f32 1.442695, %v4270_v59 }
 0x2e5   :  { %23039 = vst [vmem:[#allocation2_spill] sm:$0xff] %v18424_v45  ;;  %v18457_v39 = vsub.f32 %v18410_v6, %v23049_v13  ;;  %4421 = vadd.xlane.f32.xlu0 %v4420_v62  ;;  %v4369_v37 = vsel %vm613_vm0, %v23050_v53, 0.0  ;;  %v4372_v22 = vsel %vm613_vm0, %v23051_v50, 0.0  ;;  %v18468_v23 = vpop.eup %14392  ;;  %v18476_v49 = vsel %vm1687_vm11, 1.0, %v22263_v9  ;;  %v4700_v62 = vpop.permute.xlu0 %4699  ;;  %v23055_v53 = vld [vmem:[#allocation54_spill] sm:$0xff]  ;;  %13623 = vmatpush3.bf16.msra.mxu0 %v23060_v63 }
 0x2e6   :  { %4370 = vadd.xlane.f32.xlu1 %v4369_v37  ;;  %23054 = vst [vmem:[#allocation104_spill] sm:$0xff] %v18476_v49  ;;  %vm23056_vm6 = vcmp.eq.s32.totalorder %v23000_v55, %v23055_v53  ;;  %v23058_v13 = vand.u32 4294901760, %v18451_v25  ;;  %v18491_v37 = vmul.f32 %v18476_v49, %v4700_v62  ;;  %v4695_v59 = vpop.permute.xlu1 %4694  ;;  %v23061_v10 = vand.u32 4294901760, %v18407_v26  ;;  %v23067_v49 = vld [vmem:[#allocation204_spill] sm:$0xff] }
 0x2e7   :  { %v18482_v50 = vsel %vm23056_vm6, 1.0, %v22263_v9  ;;  %v23062_v21 = vand.u32 4294901760, %v18386_v44  ;;  %14396 = vpow2.f32 %v4346_v24  ;;  %v23064_v2 = vand.u32 4294901760, %v18460_v40 }
 0x2e8   :  { %23057 = vst [vmem:[#allocation166_spill] sm:$0xff] %v18482_v50  ;;  %v18488_v41 = vsub.f32 %v18451_v25, %v23058_v13  ;;  %v18506_v13 = vmul.f32 %v18482_v50, %v4695_v59  ;;  %14398 = vpow2.f32 %v4344_v43  ;;  %v4423_v16 = vsel %vm613_vm0, %v23066_v56, 0.0  ;;  %v23076_v50 = vld [vmem:[#allocation39_spill] sm:$0xff] }
 0x2e9   :  { %v18498_v53 = vpack.c.bf16 %v23062_v21, %v23061_v10  ;;  %v18503_v29 = vsub.f32 %v18460_v40, %v23064_v2  ;;  %4373 = vadd.xlane.f32.xlu0 %v4372_v22  ;;  %v4426_v21 = vsel %vm613_vm0, %v23067_v49, 0.0  ;;  %v23068_v10 = vld [vmem:[#allocation181_spill] sm:$0xff]  ;;  %v18520_v22 = vsel %vm1689_vm1, 1.0, %v22263_v9  ;;  %v4710_v43 = vpop.permute.xlu0 %4709 }
 0x2ea   :  { %23059 = vst [vmem:[#allocation126_spill] sm:$0xff] %v18488_v41  ;;  %13625 = vmatprep.subr.bf16.mxu0 %v23068_v10  ;;  %4424 = vadd.xlane.f32.xlu1 %v4423_v16  ;;  %23070 = vst [vmem:[#allocation193_spill] sm:$0xff] %v18520_v22  ;;  %v18526_v62 = vsel %vm1688_vm5, 1.0, %v22263_v9  ;;  %v23073_v24 = vand.u32 4294901760, %v18491_v37  ;;  %v18535_v16 = vmul.f32 %v18520_v22, %v4710_v43  ;;  %v4705_v59 = vpop.permute.xlu1 %4704  ;;  %v23078_v18 = vand.u32 4294901760, %v18448_v15  ;;  %v23083_v22 = vld [vmem:[#allocation199_spill] sm:$0xff] }
 0x2eb   :  { %23063 = vst [vmem:[#allocation14_spill] sm:$0xff] %v18498_v53  ;;  %23065 = vst [vmem:[#allocation11_spill] sm:$0xff] %v18503_v29  ;;  %13627 = vmatpush3.bf16.msra.mxu0 %v23076_v50  ;;  %v23077_v53 = vand.u32 4294901760, %v18457_v39  ;;  %v23080_v45 = vand.u32 4294901760, %v18506_v13  ;;  %v4375_v36 = vsel %vm613_vm0, %v23083_v22, 0.0  ;;  %v4378_v0 = vsel %vm613_vm0, %v23084_v60, 0.0 }
 0x2ec   :  { %23072 = vst [vmem:[#allocation168_spill] sm:$0xff] %v18526_v62  ;;  %v18532_v2 = vsub.f32 %v18491_v37, %v23073_v24  ;;  %23075 = vst [vmem:[#allocation149_spill] sm:$0xff] %v18535_v16  ;;  %v18550_v24 = vmul.f32 %v18526_v62, %v4705_v59  ;;  %13629 = vmatprep.subr.bf16.mxu0 %v23085_v5  ;;  %v23086_v59 = vld [vmem:[#allocation57_spill] sm:$0xff]  ;;  %v23089_v22 = vld [vmem:[#allocation94_spill] sm:$0xff]  ;;  %v23096_v27 = vand.u32 4294901760, %v18488_v41 }
 0x2ed   :  { %v18542_v56 = vpack.c.bf16 %v23078_v18, %v23077_v53  ;;  %v18547_v49 = vsub.f32 %v18506_v13, %v23080_v45  ;;  %4427 = vadd.xlane.f32.xlu0 %v4426_v21  ;;  %v14395_v18 = vpop.eup %14394  ;;  %vm23087_vm1 = vcmp.eq.s32.totalorder %v23000_v55, %v23086_v59  ;;  %v4720_v43 = vpop.permute.xlu0 %4719  ;;  %vm23090_vm11 = vcmp.eq.s32.totalorder %v23000_v55, %v23089_v22 }
 0x2ee   :  { %23074 = vst [vmem:[#allocation172_spill] sm:$0xff] %v18532_v2  ;;  %23082 = vst [vmem:[#allocation195_spill] sm:$0xff] %v18550_v24  ;;  %4376 = vadd.xlane.f32.xlu1 %v4375_v36  ;;  %v18564_v21 = vsel %vm23087_vm1, 1.0, %v22263_v9  ;;  %v18570_v60 = vsel %vm23090_vm11, 1.0, %v22263_v9  ;;  %v23092_v53 = vand.u32 4294901760, %v18535_v16  ;;  %v4715_v59 = vpop.permute.xlu1 %4714  ;;  %v23098_v8 = vand.u32 4294901760, %v18550_v24 }
 0x2ef   :  { %23079 = vst [vmem:[#allocation167_spill] sm:$0xff] %v18542_v56  ;;  %23081 = vst [vmem:[#allocation27_spill] sm:$0xff] %v18547_v49  ;;  %v18579_v36 = vmul.f32 %v18564_v21, %v4720_v43  ;;  %13631 = vmatpush3.bf16.msra.mxu0 %v18015_v28  ;;  %v23095_v56 = vand.u32 4294901760, %v18503_v29  ;;  %v23101_v43 = vld [vmem:[#allocation201_spill] sm:$0xff]  ;;  %v4432_v28 = vsel %vm613_vm0, %v23102_v7, 0.0 }
 0x2f0   :  { %23088 = vst [vmem:[#allocation175_spill] sm:$0xff] %v18564_v21  ;;  %23091 = vst [vmem:[#allocation191_spill] sm:$0xff] %v18570_v60  ;;  %v18576_v45 = vsub.f32 %v18535_v16, %v23092_v53  ;;  %v18591_v62 = vsub.f32 %v18550_v24, %v23098_v8  ;;  %v18594_v53 = vmul.f32 %v18570_v60, %v4715_v59  ;;  %v4429_v21 = vsel %vm613_vm0, %v23101_v43, 0.0  ;;  %v23104_v60 = vld [vmem:[#allocation208_spill] sm:$0xff] }
 0x2f1   :  { %23094 = vst [vmem:[#allocation174_spill] sm:$0xff] %v18579_v36  ;;  %v18586_v22 = vpack.c.bf16 %v23096_v27, %v23095_v56  ;;  %4379 = vadd.xlane.f32.xlu0 %v4378_v0  ;;  %v23103_v56 = vld [vmem:[#allocation205_spill] sm:$0xff]  ;;  %v4384_v8 = vsel %vm613_vm0, %v18346_v4, 0.0  ;;  %13633 = vmatprep.subr.bf16.mxu0 %v18034_v14  ;;  %v14397_v59 = vpop.eup %14396  ;;  %v4435_v7 = vsel %vm613_vm0, %v23104_v60, 0.0  ;;  %v4438_v16 = vsel %vm613_vm0, %v18368_v1, 0.0  ;;  %v23107_v4 = vld [vmem:[#allocation162_spill] sm:$0xff] }
 0x2f2   :  { %23093 = vst [vmem:[#allocation176_spill] sm:$0xff] %v18576_v45  ;;  %23099 = vst [vmem:[#allocation198_spill] sm:$0xff] %v18591_v62  ;;  %v21972_v43 = vand.u32 4294901760, %v18594_v53  ;;  %4430 = vadd.xlane.f32.xlu1 %v4429_v21  ;;  %v14399_v27 = vpop.eup %14398  ;;  %v18620_v14 = vsel %vm613_vm0, %v23107_v4, 0.0  ;;  %v18624_v0 = vsel %vm613_vm0, %v18400_v42, 0.0  ;;  %v23108_v21 = vand.u32 4294901760, %v18547_v49 }
 0x2f3   :  { %23097 = vst [vmem:[#allocation72_spill] sm:$0xff] %v18586_v22  ;;  %23100 = vst [vmem:[#allocation173_spill] sm:$0xff] %v18594_v53  ;;  %v4381_v22 = vsel %vm613_vm0, %v23103_v56, 0.0  ;;  %v23105_v56 = vand.u32 4294901760, %v18579_v36  ;;  %13635 = vmatpush3.bf16.msra.mxu0 %v18058_v52  ;;  %v23109_v1 = vand.u32 4294901760, %v18532_v2  ;;  %v18640_v4 = vsel %vm613_vm0, %v18359_v46, 0.0 }
 0x2f4   :  { %v18644_v42 = vsel %vm613_vm0, %v18426_v35, 0.0  ;;  %v18648_v52 = vsel %vm613_vm0, %v18381_v32, 0.0  ;;  %13637 = vmatprep.subr.bf16.mxu0 %v18066_v48  ;;  %v23112_v46 = vand.u32 4294901760, %v18591_v62  ;;  %v23113_v35 = vand.u32 4294901760, %v18576_v45 }
 0x2f5   :  { %v18616_v24 = vsub.f32 %v18579_v36, %v23105_v56  ;;  %v18631_v60 = vpack.c.bf16 %v23109_v1, %v23108_v21  ;;  %v18636_v56 = vsub.f32 %v18594_v53, %v21972_v43  ;;  %4433 = vadd.xlane.f32.xlu0 %v4432_v28  ;;  %v18652_v1 = vsel %vm613_vm0, %v14395_v18, 0.0  ;;  %v4735_v53 = vpop.permute.xlu1 %4734 }
 0x2f6   :  { %v18656_v28 = vsel %vm613_vm0, %v18412_v31, 0.0  ;;  %v18663_v43 = vpack.c.bf16 %v23113_v35, %v23112_v46  ;;  %4382 = vadd.xlane.f32.xlu1 %v4381_v22  ;;  %v18667_v21 = vsel %vm613_vm0, %v14399_v27, 0.0  ;;  %v18671_v18 = vsel %vm613_vm0, %v18468_v23, 0.0  ;;  %v23120_v46 = vld [vmem:[#allocation160_spill] sm:$0xff]  ;;  %v23123_v27 = vld [vmem:[#allocation170_spill] sm:$0xff] }
 0x2f7   :  { %23106 = vst [vmem:[#allocation151_spill] sm:$0xff] %v18616_v24  ;;  %23110 = vst [vmem:[#allocation200_spill] sm:$0xff] %v18631_v60  ;;  %v18674_v31 = vsel %vm613_vm0, %v14397_v59, 0.0  ;;  %v23117_v60 = vld [vmem:[#allocation153_spill] sm:$0xff]  ;;  %vm23121_vm12 = vcmp.eq.s32.totalorder %v23000_v55, %v23120_v46  ;;  %vm23124_vm15 = vcmp.eq.s32.totalorder %v23000_v55, %v23123_v27  ;;  %13639 = vmatpush3.bf16.msra.mxu0 %v18096_v12  ;;  %v23132_v27 = vld [vmem:[#allocation22_spill] sm:$0xff] }
 0x2f8   :  { %23111 = vst [vmem:[#allocation12_spill] sm:$0xff] %v18636_v56  ;;  %23114 = vst [vmem:[#allocation42_spill] sm:$0xff] %v18663_v43  ;;  %vm23118_vm5 = vcmp.eq.s32.totalorder %v23000_v55, %v23117_v60  ;;  %v18686_v22 = vsel %vm23121_vm12, 1.0, %v22263_v9  ;;  %v18692_v23 = vsel %vm23124_vm15, 1.0, %v22263_v9  ;;  %v23126_v59 = vld [vmem:[#allocation165_spill] sm:$0xff]  ;;  %v4740_v60 = vpop.permute.xlu0 %4739  ;;  %vm23133_vm3 = vcmp.eq.s32.totalorder %v23000_v55, %v23132_v27  ;;  %13673 = vmatprep.subr.bf16.mxu0 %v23006_v47  ;;  %v23141_v27 = vld [vmem:[#allocation66_spill] sm:$0xff] }
 0x2f9   :  { %23115 = vst [vmem:[#allocation54_spill] sm:$0xff] %v18671_v18  ;;  %23116 = vst [vmem:[#allocation180_spill] sm:$0xff] %v18674_v31  ;;  %v18680_v62 = vsel %vm23118_vm5, 1.0, %v22263_v9  ;;  %vm23127_vm0 = vcmp.eq.s32.totalorder %v23000_v55, %v23126_v59  ;;  %4385 = vadd.xlane.f32.xlu0 %v4384_v8  ;;  %v23129_v46 = vld [vmem:[#allocation161_spill] sm:$0xff]  ;;  %v18711_v43 = vsel %vm23133_vm3, 1.0, %v22263_v9  ;;  %v23135_v59 = vld [vmem:[#allocation10_spill] sm:$0xff]  ;;  %vm23142_vm8 = vcmp.eq.s32.totalorder %v23000_v55, %v23141_v27 }
 0x2fa   :  { %23119 = vst [vmem:[#allocation196_spill] sm:$0xff] %v18680_v62  ;;  %23122 = vst [vmem:[#allocation204_spill] sm:$0xff] %v18686_v22  ;;  %v18698_v35 = vsel %vm23127_vm0, 1.0, %v22263_v9  ;;  %vm23130_vm7 = vcmp.eq.s32.totalorder %v23000_v55, %v23129_v46  ;;  %vm23136_vm2 = vcmp.eq.s32.totalorder %v23000_v55, %v23135_v59  ;;  %v23138_v8 = vand.u32 4294901760, %v18636_v56  ;;  %v23144_v59 = vld [vmem:[#allocation178_spill] sm:$0xff]  ;;  %4436 = vadd.xlane.f32.xlu1 %v4435_v7  ;;  %v23159_v7 = vld [vmem:[#allocation79_spill] sm:$0xff] }
 0x2fb   :  { %23125 = vst [vmem:[#allocation181_spill] sm:$0xff] %v18692_v23  ;;  %23128 = vst [vmem:[#allocation47_spill] sm:$0xff] %v18698_v35  ;;  %v18705_v32 = vsel %vm23130_vm7, 1.0, %v22263_v9  ;;  %v18717_v48 = vsel %vm23136_vm2, 1.0, %v22263_v9  ;;  %v23139_v46 = vand.u32 4294901760, %v18616_v24  ;;  %v4859_v36 = vmul.f32 %v18680_v62, %v4740_v60  ;;  %v23147_v56 = vld [vmem:[#allocation186_spill] sm:$0xff]  ;;  %8495 = vmatmul.mubr.f32.vlgmr.msra.gmra.mrb[46].mxu0 %v22263_v9 }
 0x2fc   :  { %23131 = vst [vmem:[#allocation68_spill] sm:$0xff] %v18705_v32  ;;  %23134 = vst [vmem:[#allocation39_spill] sm:$0xff] %v18711_v43  ;;  %v18731_v45 = vsel %vm23142_vm8, 1.0, %v22263_v9  ;;  %vm23145_vm4 = vcmp.eq.s32.totalorder %v23000_v55, %v23144_v59  ;;  %vm23148_vm10 = vcmp.eq.s32.totalorder %v23000_v55, %v23147_v56  ;;  %v4858_v60 = vmul.f32 %v18686_v22, %v4735_v53  ;;  %v23153_v59 = vld [vmem:[#allocation84_spill] sm:$0xff]  ;;  %v23156_v56 = vld [vmem:[#allocation46_spill] sm:$0xff] }
 0x2fd   :  { %23137 = vst [vmem:[#allocation199_spill] sm:$0xff] %v18717_v48  ;;  %v18724_v12 = vpack.c.bf16 %v23139_v46, %v23138_v8  ;;  %23143 = vst [vmem:[#allocation187_spill] sm:$0xff] %v18731_v45  ;;  %v18737_v47 = vsel %vm23145_vm4, 1.0, %v22263_v9  ;;  %v18743_v8 = vsel %vm23148_vm10, 1.0, %v22263_v9  ;;  %v23150_v46 = vld [vmem:[#allocation52_spill] sm:$0xff]  ;;  %vm23154_vm9 = vcmp.eq.s32.totalorder %v23000_v55, %v23153_v59  ;;  %v23162_v59 = vld [vmem:[#allocation71_spill] sm:$0xff]  ;;  %13675 = vmatpush3.bf16.msra.mxu0 %v23016_v33 }
 0x2fe   :  { %23146 = vst [vmem:[#allocation57_spill] sm:$0xff] %v18737_v47  ;;  %23149 = vst [vmem:[#allocation94_spill] sm:$0xff] %v18743_v8  ;;  %vm23151_vm14 = vcmp.eq.s32.totalorder %v23000_v55, %v23150_v46  ;;  %vm23157_vm6 = vcmp.eq.s32.totalorder %v23000_v55, %v23156_v56  ;;  %v5216_v53 = vand.u32 4294901760, %v4859_v36  ;;  %vm23160_vm1 = vcmp.eq.s32.totalorder %v23000_v55, %v23159_v7  ;;  %v23165_v56 = vld [vmem:[#allocation111_spill] sm:$0xff]  ;;  %v4750_v7 = vpop.permute.xlu0 %4749 }
 0x2ff   :  { %23140 = vst [vmem:[#allocation206_spill] sm:$0xff] %v18724_v12  ;;  %v18750_v27 = vsel %vm23151_vm14, 1.0, %v22263_v9  ;;  %v18756_v12 = vsel %vm23154_vm9, 1.0, %v22263_v9  ;;  %v18762_v62 = vsel %vm23157_vm6, 1.0, %v22263_v9  ;;  %v18769_v46 = vsel %vm23160_vm1, 1.0, %v22263_v9  ;;  %8765 = vmatprep.mubr.f32.mxu0 %v22659_v58  ;;  %4439 = vadd.xlane.f32.xlu0 %v4438_v16  ;;  %v23173_v33 = vld [vmem:[#allocation115_spill] sm:$0xff] }
 0x300   :  { %23152 = vst [vmem:[#allocation201_spill] sm:$0xff] %v18750_v27  ;;  %23155 = vst [vmem:[#allocation211_spill] sm:$0xff] %v18756_v12  ;;  %vm23163_vm11 = vcmp.eq.s32.totalorder %v23000_v55, %v23162_v59  ;;  %vm23166_vm5 = vcmp.eq.s32.totalorder %v23000_v55, %v23165_v56  ;;  %v5213_v31 = vand.u32 4294901760, %v4858_v60  ;;  %v18789_v59 = vsel %vm1693_vm13, 1.0, %v22263_v9  ;;  %13677 = vmatprep.subr.bf16.mxu0 %v23019_v30 }
 0x301   :  { %23158 = vst [vmem:[#allocation205_spill] sm:$0xff] %v18762_v62  ;;  %23161 = vst [vmem:[#allocation208_spill] sm:$0xff] %v18769_v46  ;;  %v18775_v22 = vsel %vm23163_vm11, 1.0, %v22263_v9  ;;  %v18781_v24 = vsel %vm23166_vm5, 1.0, %v22263_v9  ;;  %vm23174_vm15 = vcmp.eq.s32.totalorder %v23000_v55, %v23173_v33  ;;  %v23176_v16 = vand.u32 4294901760, %v18331_v34  ;;  %v4745_v62 = vpop.permute.xlu1 %4744  ;;  %4388 = vadd.xlane.f32.xlu1 %v18620_v14  ;;  %13679 = vmatpush3.bf16.msra.mxu0 %v23031_v51 }
 0x302   :  { %23164 = vst [vmem:[#allocation162_spill] sm:$0xff] %v18775_v22  ;;  %23167 = vst [vmem:[#allocation153_spill] sm:$0xff] %v18781_v24  ;;  %v23170_v22 = vld [vmem:[#allocation96_spill] sm:$0xff]  ;;  %v18801_v58 = vsel %vm23174_vm15, 1.0, %v22263_v9  ;;  %v18807_v24 = vsub.f32 %v4859_v36, %v5216_v53  ;;  %v23180_v33 = vand.u32 4294901760, %v18353_v57  ;;  %v18819_v30 = vsub.f32 %v4858_v60, %v5213_v31  ;;  %13681 = vmatprep.subr.bf16.mxu0 %v23036_v19 }
 0x303   :  { %23169 = vst [vmem:[#allocation160_spill] sm:$0xff] %v18789_v59  ;;  %vm23171_vm12 = vcmp.eq.s32.totalorder %v23000_v55, %v23170_v22  ;;  %23175 = vst [vmem:[#allocation165_spill] sm:$0xff] %v18801_v58  ;;  %v5287_v46 = vsub.f32 %v18331_v34, %v23176_v16  ;;  %v4861_v59 = vmul.f32 %v18692_v23, %v4750_v7  ;;  %v23177_v22 = vld [vmem:[#allocation128_spill] sm:$0xff]  ;;  %v23182_v7 = vand.u32 4294901760, %v18311_v61 }
 0x304   :  { %v18795_v56 = vsel %vm23171_vm12, 1.0, %v22263_v9  ;;  %vm23178_vm13 = vcmp.eq.s32.totalorder %v23000_v55, %v23177_v22  ;;  %v5280_v58 = vsub.f32 %v18353_v57, %v23180_v33  ;;  %v4860_v18 = vmul.f32 %v18698_v35, %v4745_v62  ;;  %v23185_v33 = vld [vmem:[#allocation113_spill] sm:$0xff]  ;;  %4391 = vadd.xlane.f32.xlu0 %v18624_v0 }
 0x305   :  { %23172 = vst [vmem:[#allocation170_spill] sm:$0xff] %v18795_v56  ;;  %v18814_v56 = vsel %vm23178_vm13, 1.0, %v22263_v9  ;;  %v18823_v36 = vpack.c.bf16 %v5216_v53, %v5213_v31  ;;  %v23183_v16 = vand.u32 4294901760, %v18300_v17  ;;  %v5222_v34 = vand.u32 4294901760, %v4861_v59  ;;  %4442 = vadd.xlane.f32.xlu1 %v18640_v4  ;;  %13683 = vmatpush3.bf16.msra.mxu0 %v23048_v38 }
 0x306   :  { %23179 = vst [vmem:[#allocation161_spill] sm:$0xff] %v18814_v56  ;;  %vm23186_vm0 = vcmp.eq.s32.totalorder %v23000_v55, %v23185_v33  ;;  %v23188_v14 = vand.u32 4294901760, %v18386_v44  ;;  %v23189_v61 = vand.u32 4294901760, %v18356_v54  ;;  %v23190_v17 = vand.u32 4294901760, %v18334_v3  ;;  %v4755_v3 = vpop.permute.xlu1 %4754  ;;  %13685 = vmatprep.subr.bf16.mxu0 %v23052_v11 }
 0x307   :  { %23181 = vst [vmem:[#allocation22_spill] sm:$0xff] %v18823_v36  ;;  %v18829_v23 = vpack.c.bf16 %v23183_v16, %v23182_v7  ;;  %v18836_v60 = vsel %vm23186_vm0, 1.0, %v22263_v9  ;;  %v5219_v7 = vand.u32 4294901760, %v4860_v18  ;;  %13021 = vmatprep.subr.bf16.mxu1 %v18823_v36  ;;  %v4760_v16 = vpop.permute.xlu0 %4759  ;;  %v5288_v33 = vand.u32 4294901760, %v5287_v46 }
 0x308   :  { %23187 = vst [vmem:[#allocation66_spill] sm:$0xff] %v18836_v60  ;;  %v5301_v62 = vsub.f32 %v18386_v44, %v23188_v14  ;;  %v18846_v31 = vpack.c.bf16 %v23190_v17, %v23189_v61  ;;  %v23192_v51 = vand.u32 4294901760, %v18407_v26  ;;  %v18854_v14 = vsub.f32 %v4861_v59, %v5222_v34  ;;  %4445 = vadd.xlane.f32.xlu0 %v18644_v42 }
 0x309   :  { %23184 = vst [vmem:[#allocation10_spill] sm:$0xff] %v18829_v23  ;;  %v4863_v54 = vmul.f32 %v18705_v32, %v4760_v16  ;;  %13023 = vmatpush3.bf16.msra.mxu1 %v18829_v23  ;;  %v5281_v61 = vand.u32 4294901760, %v5280_v58  ;;  %v18859_v17 = vsub.f32 %v4860_v18, %v5219_v7  ;;  %v4862_v0 = vmul.f32 %v18711_v43, %v4755_v3 }
 0x30a   :  { %23191 = vst [vmem:[#allocation178_spill] sm:$0xff] %v18846_v31  ;;  %v5294_v22 = vsub.f32 %v18407_v26, %v23192_v51  ;;  %v18863_v46 = vpack.c.bf16 %v5222_v34, %v5219_v7  ;;  %v23194_v51 = vand.u32 4294901760, %v18448_v15  ;;  %v23195_v16 = vand.u32 4294901760, %v18457_v39  ;;  %v23202_v34 = vld [vmem:[#allocation130_spill] sm:$0xff]  ;;  %4394 = vadd.xlane.f32.xlu1 %v18648_v52  ;;  %13687 = vmatpush3.bf16.msra.mxu0 %v23060_v63 }
 0x30b   :  { %v5228_v32 = vand.u32 4294901760, %v4863_v54  ;;  %v23196_v58 = vand.u32 4294901760, %v18819_v30  ;;  %v23197_v19 = vand.u32 4294901760, %v18807_v24  ;;  %v5225_v7 = vand.u32 4294901760, %v4862_v0  ;;  %v4770_v3 = vpop.permute.xlu0 %4769  ;;  %13689 = vmatprep.subr.bf16.mxu0 %v23068_v10 }
 0x30c   :  { %23193 = vst [vmem:[#allocation186_spill] sm:$0xff] %v18863_v46  ;;  %v5315_v59 = vsub.f32 %v18448_v15, %v23194_v51  ;;  %v5308_v53 = vsub.f32 %v18457_v39, %v23195_v16  ;;  %13025 = vmatprep.subr.bf16.mxu1 %v18863_v46  ;;  %v23199_v51 = vld [vmem:[#allocation148_spill] sm:$0xff]  ;;  %v5302_v16 = vand.u32 4294901760, %v5301_v62  ;;  %v5295_v43 = vand.u32 4294901760, %v5294_v22  ;;  %4451 = vadd.xlane.f32.xlu0 %v18652_v1  ;;  %v23216_v1 = vld [vmem:[#allocation146_spill] sm:$0xff]  ;;  %v23255_v46 = vld [vmem:[#allocation153_spill] sm:$0xff] }
 0x30d   :  { %v18876_v18 = vpack.c.bf16 %v23197_v19, %v23196_v58  ;;  %vm23200_vm7 = vcmp.eq.s32.totalorder %v23000_v55, %v23199_v51  ;;  %v4865_v58 = vmul.f32 %v18717_v48, %v4770_v3  ;;  %v4765_v19 = vpop.permute.xlu1 %4764  ;;  %13027 = vmatpush3.bf16.msra.mxu1 %v18846_v31  ;;  %vm23203_vm3 = vcmp.eq.s32.totalorder %v23000_v55, %v23202_v34 }
 0x30e   :  { %v18886_v38 = vsel %vm23200_vm7, 1.0, %v22263_v9  ;;  %v18894_v42 = vsel %vm23203_vm3, 1.0, %v22263_v9  ;;  %v23205_v4 = vand.u32 4294901760, %v18410_v6  ;;  %v23206_v51 = vand.u32 4294901760, %v18389_v20  ;;  %4448 = vadd.xlane.f32.xlu1 %v18656_v28  ;;  %13691 = vmatpush3.bf16.msra.mxu0 %v23076_v50 }
 0x30f   :  { %23198 = vst [vmem:[#allocation52_spill] sm:$0xff] %v18876_v18  ;;  %23201 = vst [vmem:[#allocation84_spill] sm:$0xff] %v18886_v38  ;;  %v4864_v22 = vmul.f32 %v18731_v45, %v4765_v19  ;;  %v18905_v62 = vpack.c.bf16 %v5228_v32, %v5225_v7  ;;  %v18907_v3 = vpack.c.bf16 %v5288_v33, %v5281_v61  ;;  %v5316_v48 = vand.u32 4294901760, %v5315_v59  ;;  %v4780_v33 = vpop.permute.xlu0 %4779 }
 0x310   :  { %23204 = vst [vmem:[#allocation46_spill] sm:$0xff] %v18894_v42  ;;  %v18901_v18 = vpack.c.bf16 %v23206_v51, %v23205_v4  ;;  %v5309_v34 = vand.u32 4294901760, %v5308_v53  ;;  %v23209_v35 = vand.u32 4294901760, %v18460_v40  ;;  %v23210_v11 = vand.u32 4294901760, %v18451_v25  ;;  %4457 = vadd.xlane.f32.xlu0 %v18667_v21  ;;  %13693 = vmatprep.subr.bf16.mxu0 %v23085_v5 }
 0x311   :  { %23208 = vst [vmem:[#allocation71_spill] sm:$0xff] %v18905_v62  ;;  %v5234_v6 = vand.u32 4294901760, %v4865_v58  ;;  %v18916_v20 = vsub.f32 %v4863_v54, %v5228_v32  ;;  %v18918_v4 = vsub.f32 %v4862_v0, %v5225_v7  ;;  %v5231_v52 = vand.u32 4294901760, %v4864_v22  ;;  %13029 = vmatprep.subr.bf16.mxu1 %v18905_v62  ;;  %v4775_v54 = vpop.permute.xlu1 %4774 }
 0x312   :  { %23207 = vst [vmem:[#allocation79_spill] sm:$0xff] %v18901_v18  ;;  %v18913_v31 = vpack.c.bf16 %v23210_v11, %v23209_v35  ;;  %v23212_v53 = vand.u32 4294901760, %v18859_v17  ;;  %v23213_v40 = vand.u32 4294901760, %v18854_v14  ;;  %v23215_v35 = vand.u32 4294901760, %v18488_v41  ;;  %13031 = vmatpush3.bf16.msra.mxu1 %v18901_v18  ;;  %v23253_v18 = vld [vmem:[#allocation162_spill] sm:$0xff] }
 0x313   :  { %v4867_v32 = vmul.f32 %v18737_v47, %v4780_v33  ;;  %vm23217_vm2 = vcmp.eq.s32.totalorder %v23000_v55, %v23216_v1  ;;  %v18939_v0 = vpack.c.bf16 %v5302_v16, %v5295_v43  ;;  %v23219_v59 = vand.u32 4294901760, %v18503_v29  ;;  %v23235_v47 = vld [vmem:[#allocation70_spill] sm:$0xff] }
 0x314   :  { %23211 = vst [vmem:[#allocation111_spill] sm:$0xff] %v18913_v31  ;;  %v18926_v25 = vpack.c.bf16 %v23213_v40, %v23212_v53  ;;  %v5329_v63 = vsub.f32 %v18488_v41, %v23215_v35  ;;  %v18937_v61 = vsel %vm23217_vm2, 1.0, %v22263_v9  ;;  %v23220_v19 = vand.u32 4294901760, %v18506_v13  ;;  %13695 = vmatpush3.bf16.msra.mxu0 %v23235_v47 }
 0x315   :  { %23218 = vst [vmem:[#allocation96_spill] sm:$0xff] %v18937_v61  ;;  %v5322_v7 = vsub.f32 %v18503_v29, %v23219_v59  ;;  %v23221_v51 = vand.u32 4294901760, %v18491_v37  ;;  %v4866_v33 = vmul.f32 %v18743_v8, %v4775_v54  ;;  %v18953_v55 = vpack.c.bf16 %v5234_v6, %v5231_v52  ;;  %v4790_v59 = vpop.permute.xlu0 %4789 }
 0x316   :  { %23214 = vst [vmem:[#allocation86_spill] sm:$0xff] %v18926_v25  ;;  %v5240_v43 = vand.u32 4294901760, %v4867_v32  ;;  %v23224_v16 = vand.u32 4294901760, %v18819_v30  ;;  %v23225_v53 = vand.u32 4294901760, %v18807_v24  ;;  %v18961_v13 = vpack.c.bf16 %v5316_v48, %v5309_v34 }
 0x317   :  { %v18949_v11 = vpack.c.bf16 %v23221_v51, %v23220_v19  ;;  %23223 = vst [vmem:[#allocation128_spill] sm:$0xff] %v18953_v55  ;;  %v23226_v37 = vand.u32 4294901760, %v18532_v2  ;;  %v5426_v28 = vand.u32 4294901760, %v18916_v20  ;;  %v5237_v1 = vand.u32 4294901760, %v4866_v33  ;;  %13033 = vmatprep.subr.bf16.mxu1 %v18953_v55  ;;  %v4785_v51 = vpop.permute.xlu1 %4784 }
 0x318   :  { %v5392_v10 = vsub.f32 %v18819_v30, %v23224_v16  ;;  %v5399_v40 = vsub.f32 %v18807_v24, %v23225_v53  ;;  %v5330_v19 = vand.u32 4294901760, %v5329_v63  ;;  %v18973_v48 = vsub.f32 %v4865_v58, %v5234_v6  ;;  %13035 = vmatpush3.bf16.msra.mxu1 %v18913_v31  ;;  %v23228_v63 = vld [vmem:[#allocation54_spill] sm:$0xff] }
 0x319   :  { %23222 = vst [vmem:[#allocation115_spill] sm:$0xff] %v18949_v11  ;;  %v18967_v35 = vsub.f32 %v18532_v2, %v23226_v37  ;;  %v18975_v34 = vsub.f32 %v4864_v22, %v5231_v52  ;;  %v4869_v50 = vmul.f32 %v18750_v27, %v4790_v59  ;;  %v5323_v16 = vand.u32 4294901760, %v5322_v7  ;;  %4454 = vadd.xlane.f32.xlu1 %v23228_v63  ;;  %v23230_v22 = vld [vmem:[#allocation195_spill] sm:$0xff]  ;;  %v23232_v52 = vld [vmem:[#allocation149_spill] sm:$0xff]  ;;  %v4800_v63 = vpop.permute.xlu0 %4799 }
 0x31a   :  { %v23227_v53 = vand.u32 4294901760, %v18547_v49  ;;  %v4868_v37 = vmul.f32 %v18756_v12, %v4785_v51  ;;  %v18987_v58 = vpack.c.bf16 %v5240_v43, %v5237_v1  ;;  %v23231_v6 = vand.u32 4294901760, %v23230_v22  ;;  %v23236_v12 = vld [vmem:[#allocation78_spill] sm:$0xff] }
 0x31b   :  { %v23233_v59 = vand.u32 4294901760, %v23232_v52  ;;  %v5246_v27 = vand.u32 4294901760, %v4869_v50  ;;  %v5393_v5 = vand.u32 4294901760, %v5392_v10  ;;  %v5400_v7 = vand.u32 4294901760, %v5399_v40  ;;  %13697 = vmatprep.subr.bf16.mxu0 %v23236_v12  ;;  %v23241_v12 = vld [vmem:[#allocation180_spill] sm:$0xff] }
 0x31c   :  { %v18983_v21 = vsub.f32 %v18547_v49, %v23227_v53  ;;  %23229 = vst [vmem:[#allocation113_spill] sm:$0xff] %v18987_v58  ;;  %v18996_v8 = vsub.f32 %v4867_v32, %v5240_v43  ;;  %v18998_v53 = vsub.f32 %v4866_v33, %v5237_v1  ;;  %v5243_v51 = vand.u32 4294901760, %v4868_v37  ;;  %13037 = vmatprep.subr.bf16.mxu1 %v18987_v58  ;;  %v23239_v32 = vld [vmem:[#allocation205_spill] sm:$0xff]  ;;  %v4795_v33 = vpop.permute.xlu1 %4794  ;;  %v23240_v1 = vld [vmem:[#allocation208_spill] sm:$0xff] }
 0x31d   :  { %v18993_v54 = vpack.c.bf16 %v23233_v59, %v23231_v6  ;;  %v23237_v22 = vand.u32 4294901760, %v18918_v4  ;;  %v5440_v10 = vand.u32 4294901760, %v18973_v48  ;;  %v5433_v47 = vand.u32 4294901760, %v18975_v34  ;;  %13039 = vmatpush3.bf16.msra.mxu1 %v18949_v11  ;;  %4460 = vadd.xlane.f32.xlu1 %v23241_v12  ;;  %v23243_v6 = vld [vmem:[#allocation176_spill] sm:$0xff]  ;;  %v23245_v58 = vld [vmem:[#allocation173_spill] sm:$0xff] }
 0x31e   :  { %v4871_v43 = vmul.f32 %v23239_v32, %v4800_v63  ;;  %v4870_v59 = vmul.f32 %v23240_v1, %v4795_v33  ;;  %v19014_v25 = vpack.c.bf16 %v5246_v27, %v5243_v51  ;;  %v23246_v63 = vand.u32 4294901760, %v23245_v58  ;;  %v23247_v32 = vld [vmem:[#allocation174_spill] sm:$0xff]  ;;  %v23251_v1 = vld [vmem:[#allocation89_spill] sm:$0xff] }
 0x31f   :  { %23234 = vst [vmem:[#allocation148_spill] sm:$0xff] %v18993_v54  ;;  %v19004_v52 = vpack.c.bf16 %v5426_v28, %v23237_v22  ;;  %v19016_v22 = vpack.c.bf16 %v5330_v19, %v5323_v16  ;;  %v23248_v31 = vand.u32 4294901760, %v23247_v32  ;;  %v23250_v33 = vand.u32 4294901760, %v18854_v14  ;;  %13699 = vmatpush3.bf16.msra.mxu0 %v23251_v1  ;;  %v23252_v32 = vld [vmem:[#allocation95_spill] sm:$0xff] }
 0x320   :  { %23242 = vst [vmem:[#allocation146_spill] sm:$0xff] %v19014_v25  ;;  %v5252_v40 = vand.u32 4294901760, %v4871_v43  ;;  %v5454_v19 = vand.u32 4294901760, %v18996_v8  ;;  %v5447_v16 = vand.u32 4294901760, %v18998_v53  ;;  %v5249_v55 = vand.u32 4294901760, %v4870_v59  ;;  %13041 = vmatprep.subr.bf16.mxu1 %v19014_v25  ;;  %13701 = vmatprep.subr.bf16.mxu0 %v23252_v32  ;;  %v4805_v62 = vpop.permute.xlu1 %4804  ;;  %v23261_v25 = vld [vmem:[#allocation160_spill] sm:$0xff] }
 0x321   :  { %23238 = vst [vmem:[#allocation130_spill] sm:$0xff] %v19004_v52  ;;  %v23244_v52 = vand.u32 4294901760, %v23243_v6  ;;  %v19027_v11 = vpack.c.bf16 %v23248_v31, %v23246_v63  ;;  %v5413_v12 = vsub.f32 %v18854_v14, %v23250_v33  ;;  %v19036_v58 = vpack.c.bf16 %v5400_v7, %v5393_v5  ;;  %13043 = vmatpush3.bf16.msra.mxu1 %v18993_v54 }
 0x322   :  { %v19039_v31 = vsub.f32 %v4869_v50, %v5246_v27  ;;  %v19041_v63 = vsub.f32 %v4868_v37, %v5243_v51  ;;  %v19045_v1 = vpack.c.bf16 %v5440_v10, %v5433_v47  ;;  %v4872_v23 = vmul.f32 %v23255_v46, %v4805_v62 }
 0x323   :  { %v19021_v45 = vsub.f32 %v23243_v6, %v23244_v52  ;;  %23249 = vst [vmem:[#allocation54_spill] sm:$0xff] %v19027_v11  ;;  %v4810_v52 = vpop.permute.xlu0 %4809  ;;  %v19048_v36 = vpack.c.bf16 %v5252_v40, %v5249_v55  ;;  %v23257_v5 = vand.u32 4294901760, %v18859_v17  ;;  %v5427_v27 = vsub.f32 %v18916_v20, %v5426_v28 }
 0x324   :  { %v4873_v33 = vmul.f32 %v23253_v18, %v4810_v52  ;;  %23254 = vst [vmem:[#allocation195_spill] sm:$0xff] %v19045_v1  ;;  %v23258_v37 = vand.u32 4294901760, %v18918_v4  ;;  %v5434_v52 = vsub.f32 %v18975_v34, %v5433_v47  ;;  %v5441_v32 = vsub.f32 %v18973_v48, %v5440_v10  ;;  %v23259_v18 = vld [vmem:[#allocation35_spill] sm:$0xff]  ;;  %v4725_v6 = vpop.permute.xlu1 %4724  ;;  %v23262_v10 = vld [vmem:[#allocation170_spill] sm:$0xff] }
 0x325   :  { %23256 = vst [vmem:[#allocation149_spill] sm:$0xff] %v19048_v36  ;;  %v5406_v7 = vsub.f32 %v18859_v17, %v23257_v5  ;;  %13703 = vmatpush3.bf16.msra.mxu0 %v23259_v18  ;;  %v19060_v62 = vsub.f32 %v4871_v43, %v5252_v40  ;;  %v19062_v46 = vsub.f32 %v4870_v59, %v5249_v55  ;;  %v5255_v1 = vand.u32 4294901760, %v4872_v23 }
 0x326   :  { %v5258_v50 = vand.u32 4294901760, %v4873_v33  ;;  %v5420_v51 = vsub.f32 %v18918_v4, %v23258_v37  ;;  %13045 = vmatprep.subr.bf16.mxu1 %v19048_v36  ;;  %v19065_v28 = vpack.c.bf16 %v5454_v19, %v5447_v16  ;;  %v5468_v54 = vand.u32 4294901760, %v19039_v31 }
 0x327   :  { %v4730_v5 = vpop.permute.xlu0 %4729  ;;  %13047 = vmatpush3.bf16.msra.mxu1 %v19027_v11  ;;  %v5414_v18 = vand.u32 4294901760, %v5413_v12  ;;  %v4856_v43 = vmul.f32 %v23262_v10, %v4725_v6  ;;  %v5407_v40 = vand.u32 4294901760, %v5406_v7  ;;  %v5428_v59 = vand.u32 4294901760, %v5427_v27 }
 0x328   :  { %23260 = vst [vmem:[#allocation70_spill] sm:$0xff] %v19065_v28  ;;  %v4857_v47 = vmul.f32 %v23261_v25, %v4730_v5  ;;  %v19072_v55 = vpack.c.bf16 %v5258_v50, %v5255_v1  ;;  %v23264_v36 = vmov 1.0   ;;  %v5421_v28 = vand.u32 4294901760, %v5420_v51  ;;  %v23265_v51 = vld [vmem:[#allocation165_spill] sm:$0xff] }
 0x329   :  { %8767 = vmatmul.mubr.f32.vlgmr.msra.gmra.mrb[48].mxu0 %v23264_v36  ;;  %v5435_v49 = vand.u32 4294901760, %v5434_v52  ;;  %v5442_v41 = vand.u32 4294901760, %v5441_v32  ;;  %v5207_v25 = vand.u32 4294901760, %v4856_v43  ;;  %v19080_v12 = vsub.f32 %v18996_v8, %v5454_v19  ;;  %v4815_v32 = vpop.permute.xlu1 %4814 }
 0x32a   :  { %23263 = vst [vmem:[#allocation78_spill] sm:$0xff] %v19072_v55  ;;  %v5210_v2 = vand.u32 4294901760, %v4857_v47  ;;  %9384 = vmatprep.mubr.f32.mxu0 %v22263_v9  ;;  %13049 = vmatprep.subr.bf16.mxu1 %v19072_v55  ;;  %v19082_v7 = vsub.f32 %v4873_v33, %v5258_v50  ;;  %v19084_v27 = vsub.f32 %v4872_v23, %v5255_v1  ;;  %v23266_v10 = vand.u32 4294901760, %v19041_v63 }
 0x32b   :  { %v4820_v6 = vpop.permute.xlu0 %4819  ;;  %v4874_v37 = vmul.f32 %v18814_v56, %v4815_v32  ;;  %v13056_v55 = vpack.c.bf16 %v5414_v18, %v5407_v40  ;;  %v19095_v29 = vsub.f32 %v18998_v53, %v5447_v16  ;;  %v13060_v23 = vpack.c.bf16 %v5428_v59, %v5421_v28 }
 0x32c   :  { %v4875_v52 = vmul.f32 %v23265_v51, %v4820_v6  ;;  %v19089_v11 = vpack.c.bf16 %v5468_v54, %v23266_v10  ;;  %v19091_v5 = vpack.c.bf16 %v5210_v2, %v5207_v25  ;;  %v19097_v19 = vsub.f32 %v4857_v47, %v5210_v2 }
 0x32d   :  { %v19099_v1 = vpack.c.bf16 %v5442_v41, %v5435_v49  ;;  %v19101_v50 = vsub.f32 %v4856_v43, %v5207_v25  ;;  %v6027_v6 = vand.u32 4294901760, %v4874_v37  ;;  %v23268_v32 = vand.u32 4294901760, %v19062_v46  ;;  %v4825_v25 = vpop.permute.xlu1 %4824 }
 0x32e   :  { %23267 = vst [vmem:[#allocation180_spill] sm:$0xff] %v19091_v5  ;;  %v6030_v33 = vand.u32 4294901760, %v4875_v52  ;;  %13051 = vmatpush3.bf16.msra.mxu1 %v19091_v5  ;;  %v23269_v18 = vand.u32 4294901760, %v19060_v62  ;;  %v22046_v2 = vand.u32 4294901760, %v19082_v7  ;;  %v22047_v28 = vand.u32 4294901760, %v19084_v27 }
 0x32f   :  { %v4830_v10 = vpop.permute.xlu0 %4829  ;;  %13053 = vmatprep.subr.bf16.mxu1 %v19036_v58  ;;  %v19119_v43 = vsub.f32 %v4874_v37, %v6027_v6  ;;  %v4876_v40 = vmul.f32 %v18886_v38, %v4825_v25  ;;  %vm10671_vm8 = vcmask 1040384   ;;  %vm23461_vm4 = vcmask 392192  }
 0x330   :  { %v19109_v16 = vpack.c.bf16 %v23269_v18, %v23268_v32  ;;  %v19113_v41 = vsub.f32 %v4875_v52, %v6030_v33  ;;  %v4877_v49 = vmul.f32 %v18836_v60, %v4830_v10  ;;  %v19117_v47 = vpack.c.bf16 %v6030_v33, %v6027_v6  ;;  %vm23667_vm14 = vmmov %vm23461_vm4 }
 0x331   :  { %23273 = vst [vmem:[#allocation95_spill] sm:$0xff] %v19119_v43  ;;  %5271 = vmatmul.mubr.f32.vlgmr.msra.gmra.mrb[32].mxu1 %v22263_v9  ;;  %v19127_v52 = vsub.f32 %v19039_v31, %v5468_v54  ;;  %v6110_v33 = vand.u32 4294901760, %v19119_v43  ;;  %v6033_v6 = vand.u32 4294901760, %v4876_v40  ;;  %v4835_v32 = vpop.permute.xlu1 %4834  ;;  %v19143_v58 = vpack.c.bf16 %v22046_v2, %v22047_v28  ;;  %vm23759_vm9 = vmmov %vm23461_vm4 }
 0x332   :  { %23270 = vst [vmem:[#allocation173_spill] sm:$0xff] %v19109_v16  ;;  %23271 = vst [vmem:[#allocation174_spill] sm:$0xff] %v19113_v41  ;;  %v6117_v18 = vand.u32 4294901760, %v19113_v41  ;;  %v6036_v51 = vand.u32 4294901760, %v4877_v49  ;;  %13055 = vmatpush3.bf16.msra.mxu1 %v18907_v3  ;;  %5501 = vmatprep.mubr.f32.mxu1 %v23264_v36  ;;  %v4878_v60 = vmul.f32 %v18937_v61, %v4835_v32  ;;  %v23281_v61 = vand.u32 4294901760, %v19097_v19 }
 0x333   :  { %23272 = vst [vmem:[#allocation89_spill] sm:$0xff] %v19117_v47  ;;  %v4840_v10 = vpop.permute.xlu0 %4839  ;;  %13057 = vmatprep.subr.bf16.mxu1 %v13056_v55  ;;  %23275 = vst [vmem:[#allocation213_spill] sm:$0xff] %v19143_v58  ;;  %v6111_v37 = vsub.f32 %v19119_v43, %v6110_v33  ;;  %v19148_v38 = vsub.f32 %v4876_v40, %v6033_v6  ;;  %v23278_v55 = vand.u32 4294901760, %v19041_v63  ;;  %vm23561_vm10 = vmmov 0  }
 0x334   :  { %v6118_v25 = vsub.f32 %v19113_v41, %v6117_v18  ;;  %v19136_v59 = vsub.f32 %v4877_v49, %v6036_v51  ;;  %v4879_v54 = vmul.f32 %v18894_v42, %v4840_v10  ;;  %v19146_v3 = vpack.c.bf16 %v6036_v51, %v6033_v6  ;;  %v11134_v6 = vpop.f32.mrb[24].mxu1  ;;  %vm23792_vm6 = vmmov %vm23461_vm4 }
 0x335   :  { %23277 = vst [vmem:[#allocation215_spill] sm:$0xff] %v19148_v38  ;;  %v5462_v42 = vsub.f32 %v19041_v63, %v23278_v55  ;;  %v6112_v41 = vand.u32 4294901760, %v6111_v37  ;;  %v6124_v2 = vand.u32 4294901760, %v19148_v38  ;;  %v6039_v51 = vand.u32 4294901760, %v4878_v60  ;;  %vm23812_vm1 = vmmov %vm23461_vm4 }
 0x336   :  { %23274 = vst [vmem:[#allocation35_spill] sm:$0xff] %v19136_v59  ;;  %23276 = vst [vmem:[#allocation214_spill] sm:$0xff] %v19146_v3  ;;  %v6119_v49 = vand.u32 4294901760, %v6118_v25  ;;  %v6131_v56 = vand.u32 4294901760, %v19136_v59  ;;  %v6042_v10 = vand.u32 4294901760, %v4879_v54  ;;  %13059 = vmatpush3.bf16.msra.mxu1 %v18939_v0  ;;  %v23280_v25 = vand.u32 4294901760, %v19101_v50 }
 0x337   :  { %13061 = vmatprep.subr.bf16.mxu1 %v13060_v23  ;;  %v19168_v37 = vpack.c.bf16 %v6117_v18, %v6110_v33  ;;  %v6125_v43 = vsub.f32 %v19148_v38, %v6124_v2  ;;  %v19173_v3 = vsub.f32 %v4878_v60, %v6039_v51  ;;  %v11135_v0 = vpop.f32.mrb[25].mxu1  ;;  %vm23825_vm11 = vmmov %vm23812_vm1  ;;  %vm10673_vm0 = vcmask 1041408  }
 0x338   :  { %v6132_v40 = vsub.f32 %v19136_v59, %v6131_v56  ;;  %v19160_v32 = vsub.f32 %v4879_v54, %v6042_v10  ;;  %v19166_v55 = vpack.c.bf16 %v23281_v61, %v23280_v25  ;;  %v19171_v28 = vpack.c.bf16 %v6042_v10, %v6039_v51  ;;  %v5020_v58 = vpop.f32.mrb[26].mxu1  ;;  %v23287_v61 = vld [vmem:[#allocation198_spill] sm:$0xff]  ;;  %vm23837_vm5 = vmmov %vm23812_vm1 }
 0x339   :  { %23282 = vst [vmem:[#allocation217_spill] sm:$0xff] %v19168_v37  ;;  %23284 = vst [vmem:[#allocation219_spill] sm:$0xff] %v19173_v3  ;;  %v19175_v59 = vpack.c.bf16 %v6119_v49, %v6112_v41  ;;  %v11136_v47 = vadd.f32 %v11135_v0, %v11134_v6  ;;  %v19178_v16 = vpack.c.bf16 %v6131_v56, %v6124_v2  ;;  %v23288_v25 = vand.u32 4294901760, %v23287_v61  ;;  %v12562_v41 = vpop.f32.mrb[27].mxu1 }
 0x33a   :  { %23279 = vst [vmem:[#allocation216_spill] sm:$0xff] %v19160_v32  ;;  %23283 = vst [vmem:[#allocation218_spill] sm:$0xff] %v19171_v28  ;;  %v6133_v54 = vand.u32 4294901760, %v6132_v40  ;;  %v6145_v23 = vand.u32 4294901760, %v19160_v32  ;;  %v6126_v33 = vand.u32 4294901760, %v6125_v43  ;;  %v6138_v10 = vand.u32 4294901760, %v19173_v3  ;;  %13063 = vmatpush3.bf16.msra.mxu1 %v18961_v13 }
 0x33b   :  { %23285 = vst [vmem:[#allocation220_spill] sm:$0xff] %v19175_v59  ;;  %23286 = vst [vmem:[#allocation221_spill] sm:$0xff] %v19178_v16  ;;  %v5350_v18 = vsub.f32 %v23287_v61, %v23288_v25  ;;  %13065 = vmatprep.subr.bf16.mxu1 %v19099_v1  ;;  %v5463_v51 = vand.u32 4294901760, %v5462_v42  ;;  %v5470_v56 = vand.u32 4294901760, %v19127_v52  ;;  %v5021_v2 = vadd.f32 %v11136_v47, %v5020_v58  ;;  %v11176_v40 = vpop.f32.mrb[28].mxu1 }
 0x33c   :  { %v6146_v49 = vsub.f32 %v19160_v32, %v6145_v23  ;;  %v6139_v6 = vsub.f32 %v19173_v3, %v6138_v10  ;;  %v23289_v43 = vand.u32 4294901760, %v19060_v62  ;;  %v11177_v25 = vpop.f32.mrb[29].mxu1  ;;  %v19194_v60 = vpack.c.bf16 %v6133_v54, %v6126_v33  ;;  %v23368_v32 = vld [vmem:[#allocation80_spill] sm:$0xff]  ;;  %vm23875_vm12 = vmmov %vm23812_vm1 }
 0x33d   :  { %v19196_v13 = vpack.c.bf16 %v6145_v23, %v6138_v10  ;;  %v23292_v16 = vand.u32 4294901760, %v19095_v29  ;;  %v23293_v42 = vand.u32 4294901760, %v19080_v12  ;;  %v23294_v47 = vand.u32 4294901760, %v19062_v46  ;;  %v23297_v29 = vld [vmem:[#allocation151_spill] sm:$0xff]  ;;  %vm23876_vm15 = vmmov %vm23812_vm1 }
 0x33e   :  { %v5483_v0 = vsub.f32 %v19060_v62, %v23289_v43  ;;  %23290 = vst [vmem:[#allocation198_spill] sm:$0xff] %v19194_v60  ;;  %v6147_v41 = vand.u32 4294901760, %v6146_v49  ;;  %v11178_v58 = vadd.f32 %v11177_v25, %v11176_v40  ;;  %v6140_v37 = vand.u32 4294901760, %v6139_v6  ;;  %13067 = vmatpush3.bf16.msra.mxu1 %v19016_v22  ;;  %v5160_v40 = vpop.f32.mrb[30].mxu1  ;;  %vm23883_vm13 = vmmov %vm23812_vm1 }
 0x33f   :  { %23291 = vst [vmem:[#allocation222_spill] sm:$0xff] %v19196_v13  ;;  %v13068_v1 = vpack.c.bf16 %v23293_v42, %v23292_v16  ;;  %v5476_v52 = vsub.f32 %v19062_v46, %v23294_v47  ;;  %v23295_v43 = vand.u32 4294901760, %v18983_v21  ;;  %v23296_v54 = vand.u32 4294901760, %v18967_v35  ;;  %v23299_v16 = vld [vmem:[#allocation12_spill] sm:$0xff]  ;;  %v12577_v21 = vpop.f32.mrb[31].mxu1  ;;  %vm23949_vm7 = vmmov %vm23812_vm1 }
 0x340   :  { %v5358_v33 = vand.u32 4294901760, %v19021_v45  ;;  %v5351_v10 = vand.u32 4294901760, %v5350_v18  ;;  %v23298_v49 = vand.u32 4294901760, %v23297_v29  ;;  %v23300_v42 = vand.u32 4294901760, %v23299_v16  ;;  %vm23950_vm3 = vmmov %vm23812_vm1 }
 0x341   :  { %v13070_v23 = vpack.c.bf16 %v23296_v54, %v23295_v43  ;;  %13069 = vmatprep.subr.bf16.mxu1 %v13068_v1  ;;  %v13072_v6 = vpack.c.bf16 %v5470_v56, %v5463_v51  ;;  %v5484_v22 = vand.u32 4294901760, %v5483_v0  ;;  %v5161_v25 = vadd.f32 %v11178_v58, %v5160_v40  ;;  %vm23952_vm2 = vmmov %vm23812_vm1 }
 0x342   :  { %v5371_v12 = vsub.f32 %v23297_v29, %v23298_v49  ;;  %v5364_v47 = vsub.f32 %v23299_v16, %v23300_v42  ;;  %v19217_v13 = vpack.c.bf16 %v6147_v41, %v6140_v37  ;;  %v5477_v35 = vand.u32 4294901760, %v5476_v52 }
 0x343   :  { %v23302_v45 = vand.u32 4294901760, %v19084_v27  ;;  %v23303_v43 = vand.u32 4294901760, %v19082_v7  ;;  %13071 = vmatpush3.bf16.msra.mxu1 %v13070_v23  ;;  %v10657_v49 = vrot.slane %v5161_v25, 7  ;;  %v13074_v51 = vpack.c.bf16 %v5358_v33, %v5351_v10 }
 0x344   :  { %23301 = vst [vmem:[#allocation151_spill] sm:$0xff] %v19217_v13  ;;  %v5372_v1 = vand.u32 4294901760, %v5371_v12  ;;  %13073 = vmatprep.subr.bf16.mxu1 %v13072_v6  ;;  %v5365_v56 = vand.u32 4294901760, %v5364_v47  ;;  %v23304_v0 = vand.u32 4294901760, %v19097_v19  ;;  %v23305_v41 = vand.u32 4294901760, %v19101_v50  ;;  %v23373_v13 = vld [vmem:[#allocation20_spill] sm:$0xff] }
 0x345   :  { %v5490_v18 = vsub.f32 %v19084_v27, %v23302_v45  ;;  %v5497_v54 = vsub.f32 %v19082_v7, %v23303_v43  ;;  %v19231_v58 = vsel %vm10671_vm8, %v5021_v2, %v10657_v49  ;;  %v13076_v42 = vpack.c.bf16 %v5484_v22, %v5477_v35  ;;  %v23307_v2 = vld [vmem:[#allocation150_spill] sm:$0xff] }
 0x346   :  { %v5385_v37 = vsub.f32 %v19097_v19, %v23304_v0  ;;  %v5378_v52 = vsub.f32 %v19101_v50, %v23305_v41  ;;  %23306 = vst [vmem:[#allocation12_spill] sm:$0xff] %v19231_v58  ;;  %v13078_v6 = vpack.c.bf16 %v5372_v1, %v5365_v56  ;;  %v13084_v47 = vpack.c.bf16 %v18807_v24, %v18819_v30  ;;  %v23313_v56 = vld [vmem:[#allocation182_spill] sm:$0xff] }
 0x347   :  { %v5491_v40 = vand.u32 4294901760, %v5490_v18  ;;  %v5498_v21 = vand.u32 4294901760, %v5497_v54  ;;  %13075 = vmatpush3.bf16.msra.mxu1 %v13074_v51  ;;  %v13086_v25 = vpack.c.bf16 %v23307_v2, %v18353_v57  ;;  %v13088_v22 = vpack.c.bf16 %v18854_v14, %v18859_v17  ;;  %v23308_v14 = vld [vmem:[#allocation11_spill] sm:$0xff]  ;;  %v23309_v17 = vld [vmem:[#allocation126_spill] sm:$0xff] }
 0x348   :  { %13077 = vmatprep.subr.bf16.mxu1 %v13076_v42  ;;  %v5386_v23 = vand.u32 4294901760, %v5385_v37  ;;  %v5379_v12 = vand.u32 4294901760, %v5378_v52  ;;  %v13090_v35 = vpack.c.bf16 %v18386_v44, %v18407_v26  ;;  %v13092_v24 = vpack.c.bf16 %v18916_v20, %v18918_v4  ;;  %v23310_v44 = vld [vmem:[#allocation27_spill] sm:$0xff]  ;;  %v23311_v20 = vld [vmem:[#allocation172_spill] sm:$0xff] }
 0x349   :  { %v13080_v33 = vpack.c.bf16 %v5498_v21, %v5491_v40  ;;  %v13094_v57 = vpack.c.bf16 %v18448_v15, %v18457_v39  ;;  %v13096_v30 = vpack.c.bf16 %v18973_v48, %v18975_v34  ;;  %v13098_v45 = vpack.c.bf16 %v23309_v17, %v23308_v14  ;;  %v23312_v48 = vld [vmem:[#allocation176_spill] sm:$0xff]  ;;  %v23315_v37 = vld [vmem:[#allocation23_spill] sm:$0xff]  ;;  %v23317_v21 = vld [vmem:[#allocation10_spill] sm:$0xff] }
 0x34a   :  { %v13082_v10 = vpack.c.bf16 %v5386_v23, %v5379_v12  ;;  %v13100_v18 = vpack.c.bf16 %v18996_v8, %v18998_v53  ;;  %v13102_v4 = vpack.c.bf16 %v23311_v20, %v23310_v44  ;;  %v13104_v15 = vpack.c.bf16 %v19039_v31, %v19041_v63  ;;  %v23318_v23 = vld [vmem:[#allocation179_spill] sm:$0xff]  ;;  %v23322_v14 = vld [vmem:[#allocation38_spill] sm:$0xff] }
 0x34b   :  { %13079 = vmatpush3.bf16.msra.mxu1 %v13078_v6  ;;  %v13106_v34 = vpack.c.bf16 %v23312_v48, %v23287_v61  ;;  %v13108_v8 = vpack.c.bf16 %v19060_v62, %v19062_v46  ;;  %v13110_v54 = vpack.c.bf16 %v23297_v29, %v23299_v16  ;;  %v13112_v63 = vpack.c.bf16 %v19082_v7, %v19084_v27  ;;  %v23314_v16 = vld [vmem:[#allocation22_spill] sm:$0xff]  ;;  %v23320_v2 = vld [vmem:[#allocation3_spill] sm:$0xff]  ;;  %v23327_v48 = vld [vmem:[#allocation204_spill] sm:$0xff] }
 0x34c   :  { %13081 = vmatprep.subr.bf16.mxu1 %v13080_v33  ;;  %v4401_v26 = vpop.xlane.xlu0 %4400  ;;  %v13114_v46 = vpack.c.bf16 %v19097_v19, %v19101_v50  ;;  %v23316_v50 = vld [vmem:[#allocation61_spill] sm:$0xff]  ;;  %v23319_v33 = vld [vmem:[#allocation186_spill] sm:$0xff]  ;;  %v23325_v44 = vld [vmem:[#allocation51_spill] sm:$0xff]  ;;  %vm10675_vm8 = vcmask 1042432  }
 0x34d   :  { %14400 = vlog2.f32 %v4401_v26 }
 0x34f   :  { %13083 = vmatpush3.bf16.msra.mxu1 %v13082_v10 }
 0x350   :  { %13085 = vmatprep.subr.bf16.mxu1 %v13084_v47  ;;  %v4350_v39 = vpop.xlane.xlu0 %4349 }
 0x351   :  { %14402 = vlog2.f32 %v4350_v39 }
 0x352   :  { %5503 = vmatmul.mubr.f32.vlgmr.msra.gmra.mrb[34].mxu1 %v23264_v36  ;;  %v4398_v43 = vpop.xlane.xlu1 %4397 }
 0x353   :  { %13087 = vmatpush3.bf16.msra.mxu1 %v13086_v25  ;;  %5638 = vmatprep.mubr.f32.mxu1 %v22263_v9  ;;  %14404 = vlog2.f32 %v4398_v43 }
 0x354   :  { %13089 = vmatprep.subr.bf16.mxu1 %v13088_v22  ;;  %v4404_v53 = vpop.xlane.xlu0 %4403  ;;  %v23321_v22 = vld [vmem:[#allocation58_spill] sm:$0xff] }
 0x355   :  { %14406 = vlog2.f32 %v4404_v53 }
 0x356   :  { %v4353_v31 = vpop.xlane.xlu1 %4352 }
 0x357   :  { %13091 = vmatpush3.bf16.msra.mxu1 %v13090_v35  ;;  %v14401_v49 = vpop.eup %14400  ;;  %14408 = vlog2.f32 %v4353_v31 }
 0x358   :  { %13093 = vmatprep.subr.bf16.mxu1 %v13092_v24  ;;  %v4497_v61 = vmul.f32 0.6931472, %v14401_v49 }
 0x35a   :  { %v4555_v0 = vadd.f32 %v4497_v61, %v23313_v56 }
 0x35b   :  { %13095 = vmatpush3.bf16.msra.mxu1 %v13094_v57  ;;  %v14403_v51 = vpop.eup %14402 }
 0x35c   :  { %13097 = vmatprep.subr.bf16.mxu1 %v13096_v30  ;;  %v4356_v1 = vpop.xlane.xlu0 %4355  ;;  %v4463_v29 = vmul.f32 0.6931472, %v14403_v51  ;;  %v4593_v40 = vsub.f32 %v4555_v0, %v23316_v50  ;;  %v23331_v51 = vld [vmem:[#allocation64_spill] sm:$0xff]  ;;  %v23332_v0 = vld [vmem:[#allocation79_spill] sm:$0xff] }
 0x35d   :  { %14410 = vlog2.f32 %v4356_v1  ;;  %v14405_v27 = vpop.eup %14404 }
 0x35e   :  { %v4407_v62 = vpop.xlane.xlu1 %4406  ;;  %v4538_v41 = vadd.f32 %v4463_v29, %v23315_v37  ;;  %v4495_v52 = vmul.f32 0.6931472, %v14405_v27  ;;  %v23334_v37 = vld [vmem:[#allocation60_spill] sm:$0xff] }
 0x35f   :  { %13099 = vmatpush3.bf16.msra.mxu1 %v13098_v45  ;;  %14412 = vlog2.f32 %v4407_v62  ;;  %v14407_v19 = vpop.eup %14406  ;;  %v23323_v45 = vld [vmem:[#allocation178_spill] sm:$0xff] }
 0x360   :  { %13101 = vmatprep.subr.bf16.mxu1 %v13100_v18  ;;  %v4410_v7 = vpop.xlane.xlu0 %4409  ;;  %v4554_v12 = vadd.f32 %v4495_v52, %v23318_v23  ;;  %v4499_v6 = vmul.f32 0.6931472, %v14407_v19  ;;  %v4576_v25 = vsub.f32 %v4538_v41, %v23320_v2  ;;  %v23324_v18 = vld [vmem:[#allocation196_spill] sm:$0xff]  ;;  %v23336_v23 = vld [vmem:[#allocation5_spill] sm:$0xff] }
 0x361   :  { %14414 = vlog2.f32 %v4410_v7  ;;  %v14409_v47 = vpop.eup %14408  ;;  %v19281_v26 = vmul.f32 %v23324_v18, %v4593_v40  ;;  %v23333_v7 = vld [vmem:[#allocation106_spill] sm:$0xff] }
 0x362   :  { %v4359_v42 = vpop.xlane.xlu1 %4358  ;;  %v4592_v35 = vsub.f32 %v4554_v12, %v23321_v22  ;;  %v4465_v24 = vmul.f32 0.6931472, %v14409_v47  ;;  %v4556_v17 = vadd.f32 %v4499_v6, %v23322_v14 }
 0x363   :  { %13103 = vmatpush3.bf16.msra.mxu1 %v13102_v4  ;;  %14416 = vlog2.f32 %v4359_v42  ;;  %v22056_v29 = vand.u32 4294901760, %v19281_v26  ;;  %v23335_v42 = vld [vmem:[#allocation128_spill] sm:$0xff] }
 0x364   :  { %13105 = vmatprep.subr.bf16.mxu1 %v13104_v15  ;;  %v4362_v10 = vpop.xlane.xlu0 %4361  ;;  %v4539_v20 = vadd.f32 %v4465_v24, %v23325_v44  ;;  %v23326_v15 = vld [vmem:[#allocation71_spill] sm:$0xff]  ;;  %v4594_v56 = vsub.f32 %v4556_v17, %v23331_v51 }
 0x365   :  { %14418 = vlog2.f32 %v4362_v10  ;;  %v23338_v10 = vld [vmem:[#allocation67_spill] sm:$0xff] }
 0x366   :  { %v4413_v57 = vpop.xlane.xlu1 %4412  ;;  %v23340_v17 = vld [vmem:[#allocation111_spill] sm:$0xff] }
 0x367   :  { %13107 = vmatpush3.bf16.msra.mxu1 %v13106_v34  ;;  %v14411_v30 = vpop.eup %14410  ;;  %14420 = vlog2.f32 %v4413_v57  ;;  %v19286_v34 = vmul.f32 %v23327_v48, %v4592_v35  ;;  %v23341_v44 = vld [vmem:[#allocation47_spill] sm:$0xff] }
 0x368   :  { %13109 = vmatprep.subr.bf16.mxu1 %v13108_v8  ;;  %v4467_v4 = vmul.f32 0.6931472, %v14411_v30  ;;  %v4416_v39 = vpop.xlane.xlu0 %4415  ;;  %v23328_v8 = vld [vmem:[#allocation177_spill] sm:$0xff] }
 0x369   :  { %v14413_v43 = vpop.eup %14412  ;;  %v19289_v53 = vmul.f32 %v23328_v8, %v4576_v25  ;;  %14422 = vlog2.f32 %v4416_v39  ;;  %v23339_v30 = vld [vmem:[#allocation81_spill] sm:$0xff] }
 0x36a   :  { %v4501_v61 = vmul.f32 0.6931472, %v14413_v43  ;;  %v4365_v1 = vpop.xlane.xlu1 %4364  ;;  %v23343_v43 = vld [vmem:[#allocation113_spill] sm:$0xff] }
 0x36b   :  { %13111 = vmatpush3.bf16.msra.mxu1 %v13110_v54  ;;  %v23329_v54 = vld [vmem:[#allocation4_spill] sm:$0xff]  ;;  %v14415_v62 = vpop.eup %14414  ;;  %14424 = vlog2.f32 %v4365_v1  ;;  %v22054_v24 = vand.u32 4294901760, %v19289_v53 }
 0x36c   :  { %13113 = vmatprep.subr.bf16.mxu1 %v13112_v63  ;;  %v4577_v31 = vsub.f32 %v4539_v20, %v23329_v54  ;;  %v23330_v63 = vld [vmem:[#allocation48_spill] sm:$0xff]  ;;  %v4557_v41 = vadd.f32 %v4501_v61, %v23334_v37  ;;  %v4503_v52 = vmul.f32 0.6931472, %v14415_v62  ;;  %v4368_v19 = vpop.xlane.xlu0 %4367  ;;  %v19316_v20 = vmul.f32 %v23341_v44, %v4594_v56  ;;  %v23345_v61 = vld [vmem:[#allocation129_spill] sm:$0xff]  ;;  %v23348_v37 = vld [vmem:[#allocation62_spill] sm:$0xff] }
 0x36d   :  { %v4540_v49 = vadd.f32 %v4467_v4, %v23330_v63  ;;  %v14417_v40 = vpop.eup %14416  ;;  %14426 = vlog2.f32 %v4368_v19  ;;  %v23342_v4 = vld [vmem:[#allocation184_spill] sm:$0xff]  ;;  %v23347_v56 = vld [vmem:[#allocation9_spill] sm:$0xff] }
 0x36e   :  { %v19298_v27 = vmul.f32 %v23333_v7, %v4577_v31  ;;  %v4595_v47 = vsub.f32 %v4557_v41, %v23338_v10  ;;  %v4469_v25 = vmul.f32 0.6931472, %v14417_v40  ;;  %v4419_v35 = vpop.xlane.xlu1 %4418  ;;  %v4558_v14 = vadd.f32 %v4503_v52, %v23339_v30  ;;  %v23344_v31 = vld [vmem:[#allocation181_spill] sm:$0xff]  ;;  %v23351_v30 = vld [vmem:[#allocation171_spill] sm:$0xff] }
 0x36f   :  { %13115 = vmatpush3.bf16.msra.mxu1 %v13114_v46  ;;  %v22055_v46 = vand.u32 4294901760, %v19286_v34  ;;  %v4578_v12 = vsub.f32 %v4540_v49, %v23336_v23  ;;  %v14419_v57 = vpop.eup %14418  ;;  %14428 = vlog2.f32 %v4419_v35 }
 0x370   :  { %13117 = vmatprep.subr.bf16.mxu1 %v23314_v16  ;;  %v22053_v18 = vand.u32 4294901760, %v19298_v27  ;;  %v4541_v39 = vadd.f32 %v4469_v25, %v23342_v4  ;;  %v4471_v48 = vmul.f32 0.6931472, %v14419_v57  ;;  %v19321_v63 = vmul.f32 %v23344_v31, %v4595_v47  ;;  %v23349_v25 = vld [vmem:[#allocation73_spill] sm:$0xff] }
 0x371   :  { %v19307_v6 = vpack.c.bf16 %v22056_v29, %v22055_v46  ;;  %v14421_v49 = vpop.eup %14420  ;;  %v19324_v1 = vmul.f32 %v23345_v61, %v4578_v12  ;;  %v4596_v35 = vsub.f32 %v4558_v14, %v23349_v25  ;;  %v23350_v12 = vld [vmem:[#allocation115_spill] sm:$0xff]  ;;  %v22058_v57 = vand.u32 4294901760, %v19316_v20  ;;  %v23352_v4 = vld [vmem:[#allocation77_spill] sm:$0xff] }
 0x372   :  { %5641 = vmatmul.mubr.f32.vlgmr.msra.gmra.mrb[36].mxu1 %v22263_v9  ;;  %v4422_v8 = vpop.xlane.xlu0 %4421  ;;  %v19330_v62 = vpack.c.bf16 %v22053_v18, %v22054_v24  ;;  %v4579_v7 = vsub.f32 %v4541_v39, %v23347_v56  ;;  %v4542_v41 = vadd.f32 %v4471_v48, %v23348_v37  ;;  %v4505_v52 = vmul.f32 0.6931472, %v14421_v49  ;;  %v23354_v61 = vld [vmem:[#allocation15_spill] sm:$0xff] }
 0x373   :  { %13119 = vmatpush3.bf16.msra.mxu1 %v23317_v21  ;;  %5745 = vmatprep.mubr.f32.mxu1 %v22263_v9  ;;  %23337 = vst [vmem:[#allocation150_spill] sm:$0xff] %v19307_v6  ;;  %14430 = vlog2.f32 %v4422_v8  ;;  %v4371_v19 = vpop.xlane.xlu1 %4370  ;;  %v22057_v40 = vand.u32 4294901760, %v19321_v63  ;;  %v14423_v47 = vpop.eup %14422  ;;  %v23353_v8 = vld [vmem:[#allocation146_spill] sm:$0xff]  ;;  %v23359_v46 = vld [vmem:[#allocation39_spill] sm:$0xff] }
 0x374   :  { %13121 = vmatprep.subr.bf16.mxu1 %v23319_v33  ;;  %13759 = vmatprep.subr.bf16.mxu0 %v19307_v6  ;;  %23346 = vst [vmem:[#allocation11_spill] sm:$0xff] %v19330_v62  ;;  %14432 = vlog2.f32 %v4371_v19  ;;  %v19340_v44 = vmul.f32 %v23351_v30, %v4579_v7  ;;  %v4559_v39 = vadd.f32 %v4505_v52, %v23352_v4  ;;  %v4507_v48 = vmul.f32 0.6931472, %v14423_v47  ;;  %v23356_v19 = vld [vmem:[#allocation76_spill] sm:$0xff]  ;;  %v23357_v4 = vld [vmem:[#allocation74_spill] sm:$0xff] }
 0x375   :  { %13761 = vmatpush3.bf16.msra.mxu0 %v19330_v62  ;;  %v14425_v49 = vpop.eup %14424  ;;  %v4580_v37 = vsub.f32 %v4542_v41, %v23354_v61  ;;  %v19349_v14 = vpack.c.bf16 %v22057_v40, %v22058_v57  ;;  %v23358_v41 = vld [vmem:[#allocation148_spill] sm:$0xff]  ;;  %v19358_v29 = vmul.f32 %v23359_v46, %v4596_v35  ;;  %v23366_v35 = vld [vmem:[#allocation17_spill] sm:$0xff] }
 0x376   :  { %v4374_v31 = vpop.xlane.xlu0 %4373  ;;  %v4597_v18 = vsub.f32 %v4559_v39, %v23356_v19  ;;  %v4473_v7 = vmul.f32 0.6931472, %v14425_v49  ;;  %v4560_v24 = vadd.f32 %v4507_v48, %v23357_v4  ;;  %v23360_v40 = vld [vmem:[#allocation188_spill] sm:$0xff]  ;;  %v23361_v49 = vld [vmem:[#allocation149_spill] sm:$0xff] }
 0x377   :  { %13123 = vmatpush3.bf16.msra.mxu1 %v23323_v45  ;;  %14434 = vlog2.f32 %v4374_v31  ;;  %23355 = vst [vmem:[#allocation126_spill] sm:$0xff] %v19349_v14  ;;  %v4425_v30 = vpop.xlane.xlu1 %4424  ;;  %v14427_v47 = vpop.eup %14426  ;;  %13763 = vmatprep.subr.bf16.mxu0 %v19349_v14  ;;  %v22068_v31 = vand.u32 4294901760, %v19340_v44  ;;  %v23362_v52 = vld [vmem:[#allocation68_spill] sm:$0xff]  ;;  %v23364_v14 = vand.u32 4294901760, %v19324_v1 }
 0x378   :  { %13125 = vmatprep.subr.bf16.mxu1 %v23326_v15  ;;  %14436 = vlog2.f32 %v4425_v30  ;;  %v4543_v57 = vadd.f32 %v4473_v7, %v23360_v40  ;;  %v4475_v39 = vmul.f32 0.6931472, %v14427_v47  ;;  %v19363_v6 = vmul.f32 %v23362_v52, %v4597_v18  ;;  %v23363_v30 = vld [vmem:[#allocation34_spill] sm:$0xff] }
 0x379   :  { %v14429_v48 = vpop.eup %14428  ;;  %v19366_v4 = vmul.f32 %v23363_v30, %v4580_v37  ;;  %v19372_v46 = vpack.c.bf16 %v22068_v31, %v23364_v14  ;;  %v23367_v7 = vld [vmem:[#allocation102_spill] sm:$0xff]  ;;  %v4598_v38 = vsub.f32 %v4560_v24, %v23368_v32  ;;  %v22072_v37 = vand.u32 4294901760, %v19358_v29 }
 0x37a   :  { %v4428_v62 = vpop.xlane.xlu0 %4427  ;;  %v4581_v40 = vsub.f32 %v4543_v57, %v23366_v35  ;;  %v4544_v47 = vadd.f32 %v4475_v39, %v23367_v7  ;;  %v4509_v58 = vmul.f32 0.6931472, %v14429_v48  ;;  %v23370_v14 = vld [vmem:[#allocation98_spill] sm:$0xff] }
 0x37b   :  { %13127 = vmatpush3.bf16.msra.mxu1 %v23332_v0  ;;  %14438 = vlog2.f32 %v4428_v62  ;;  %23365 = vst [vmem:[#allocation27_spill] sm:$0xff] %v19372_v46  ;;  %v4377_v3 = vpop.xlane.xlu1 %4376  ;;  %13765 = vmatpush3.bf16.msra.mxu0 %v19372_v46  ;;  %v23369_v62 = vld [vmem:[#allocation54_spill] sm:$0xff]  ;;  %v23376_v46 = vld [vmem:[#allocation85_spill] sm:$0xff] }
 0x37c   :  { %13129 = vmatprep.subr.bf16.mxu1 %v23335_v42  ;;  %14440 = vlog2.f32 %v4377_v3  ;;  %v19382_v30 = vmul.f32 %v23370_v14, %v4581_v40  ;;  %v23371_v57 = vld [vmem:[#allocation90_spill] sm:$0xff]  ;;  %v4582_v60 = vsub.f32 %v4544_v47, %v23373_v13  ;;  %v23374_v3 = vand.u32 4294901760, %v19363_v6 }
 0x37d   :  { %v14431_v52 = vpop.eup %14430  ;;  %v4561_v31 = vadd.f32 %v4509_v58, %v23371_v57  ;;  %v23372_v48 = vld [vmem:[#allocation78_spill] sm:$0xff]  ;;  %v23377_v57 = vld [vmem:[#allocation124_spill] sm:$0xff]  ;;  %v23381_v58 = vld [vmem:[#allocation199_spill] sm:$0xff] }
 0x37e   :  { %v4511_v39 = vmul.f32 0.6931472, %v14431_v52  ;;  %v4380_v7 = vpop.xlane.xlu0 %4379  ;;  %v14433_v18 = vpop.eup %14432  ;;  %v19391_v24 = vpack.c.bf16 %v23374_v3, %v22072_v37  ;;  %v22075_v47 = vand.u32 4294901760, %v19382_v30  ;;  %v23379_v3 = vld [vmem:[#allocation83_spill] sm:$0xff] }
 0x37f   :  { %13131 = vmatpush3.bf16.msra.mxu1 %v23340_v17  ;;  %14442 = vlog2.f32 %v4380_v7  ;;  %v4599_v59 = vsub.f32 %v4561_v31, %v23376_v46  ;;  %v4477_v40 = vmul.f32 0.6931472, %v14433_v18  ;;  %v4431_v14 = vpop.xlane.xlu1 %4430  ;;  %v23378_v7 = vld [vmem:[#allocation187_spill] sm:$0xff]  ;;  %v23380_v18 = vld [vmem:[#allocation52_spill] sm:$0xff] }
 0x380   :  { %13133 = vmatprep.subr.bf16.mxu1 %v23343_v43  ;;  %23375 = vst [vmem:[#allocation172_spill] sm:$0xff] %v19391_v24  ;;  %v4562_v28 = vadd.f32 %v4511_v39, %v23377_v57  ;;  %14444 = vlog2.f32 %v4431_v14  ;;  %13767 = vmatprep.subr.bf16.mxu0 %v19391_v24  ;;  %v19400_v13 = vmul.f32 %v23378_v7, %v4598_v38  ;;  %v23382_v14 = vld [vmem:[#allocation155_spill] sm:$0xff]  ;;  %v23383_v24 = vand.u32 4294901760, %v19366_v4  ;;  %v23385_v7 = vld [vmem:[#allocation24_spill] sm:$0xff] }
 0x381   :  { %v14435_v52 = vpop.eup %14434  ;;  %v4545_v37 = vadd.f32 %v4477_v40, %v23379_v3  ;;  %v19405_v32 = vmul.f32 %v23381_v58, %v4599_v59  ;;  %v19408_v57 = vmul.f32 %v23382_v14, %v4582_v60  ;;  %v23387_v60 = vld [vmem:[#allocation88_spill] sm:$0xff] }
 0x382   :  { %v4479_v31 = vmul.f32 0.6931472, %v14435_v52  ;;  %v4434_v46 = vpop.xlane.xlu0 %4433  ;;  %v14437_v39 = vpop.eup %14436  ;;  %v19414_v38 = vpack.c.bf16 %v22075_v47, %v23383_v24  ;;  %v23386_v52 = vld [vmem:[#allocation137_spill] sm:$0xff]  ;;  %v4600_v14 = vsub.f32 %v4562_v28, %v23387_v60  ;;  %v22079_v24 = vand.u32 4294901760, %v19400_v13  ;;  %v23389_v47 = vld [vmem:[#allocation164_spill] sm:$0xff]  ;;  %v23392_v28 = vld [vmem:[#allocation26_spill] sm:$0xff] }
 0x383   :  { %13135 = vmatpush3.bf16.msra.mxu1 %v23350_v12  ;;  %14446 = vlog2.f32 %v4434_v46  ;;  %v4583_v40 = vsub.f32 %v4545_v37, %v23385_v7  ;;  %v4383_v35 = vpop.xlane.xlu1 %4382  ;;  %v23388_v46 = vld [vmem:[#allocation2_spill] sm:$0xff] }
 0x384   :  { %13137 = vmatprep.subr.bf16.mxu1 %v23353_v8  ;;  %23384 = vst [vmem:[#allocation176_spill] sm:$0xff] %v19414_v38  ;;  %v4546_v3 = vadd.f32 %v4479_v31, %v23386_v52  ;;  %14448 = vlog2.f32 %v4383_v35  ;;  %13769 = vmatpush3.bf16.msra.mxu0 %v19414_v38  ;;  %v23390_v31 = vld [vmem:[#allocation116_spill] sm:$0xff]  ;;  %v23391_v7 = vld [vmem:[#allocation86_spill] sm:$0xff] }
 0x385   :  { %v14439_v58 = vpop.eup %14438  ;;  %v19425_v37 = vmul.f32 %v23389_v47, %v4583_v40  ;;  %v23395_v47 = vand.u32 4294901760, %v23321_v22 }
 0x386   :  { %v4515_v52 = vmul.f32 0.6931472, %v14439_v58  ;;  %v4386_v61 = vpop.xlane.xlu0 %4385  ;;  %v14441_v59 = vpop.eup %14440  ;;  %v4584_v35 = vsub.f32 %v4546_v3, %v23392_v28  ;;  %v23398_v3 = vld [vmem:[#allocation189_spill] sm:$0xff]  ;;  %v23399_v28 = vld [vmem:[#allocation14_spill] sm:$0xff] }
 0x387   :  { %13139 = vmatpush3.bf16.msra.mxu1 %v23358_v41  ;;  %14450 = vlog2.f32 %v4386_v61  ;;  %v19440_v40 = vsub.f32 %v23321_v22, %v23395_v47  ;;  %v4481_v58 = vmul.f32 0.6931472, %v14441_v59  ;;  %v23401_v22 = vand.u32 4294901760, %v23316_v50 }
 0x388   :  { %13141 = vmatprep.subr.bf16.mxu1 %v23361_v49  ;;  %v4564_v61 = vadd.f32 %v4515_v52, %v23398_v3 }
 0x389   :  { %23396 = vst [vmem:[#allocation22_spill] sm:$0xff] %v19440_v40  ;;  %v19454_v59 = vsub.f32 %v23316_v50, %v23401_v22  ;;  %v23404_v40 = vld [vmem:[#allocation130_spill] sm:$0xff]  ;;  %v23409_v50 = vand.u32 4294901760, %v19408_v57 }
 0x38b   :  { %13143 = vmatpush3.bf16.msra.mxu1 %v23369_v62  ;;  %23402 = vst [vmem:[#allocation23_spill] sm:$0xff] %v19454_v59 }
 0x38c   :  { %13145 = vmatprep.subr.bf16.mxu1 %v23372_v48  ;;  %v4440_v52 = vpop.xlane.xlu0 %4439 }
 0x38f   :  { %13147 = vmatpush3.bf16.msra.mxu1 %v19091_v5  ;;  %v14443_v5 = vpop.eup %14442 }
 0x390   :  { %13149 = vmatprep.subr.bf16.mxu1 %v23380_v18  ;;  %v4513_v18 = vmul.f32 0.6931472, %v14437_v39  ;;  %v4483_v60 = vmul.f32 0.6931472, %v14443_v5  ;;  %v23410_v5 = vand.u32 4294901760, %v19425_v37 }
 0x392   :  { %5749 = vmatmul.mubr.f32.vlgmr.msra.gmra.mrb[38].mxu1 %v22263_v9  ;;  %v4563_v39 = vadd.f32 %v4513_v18, %v23390_v31  ;;  %v23397_v18 = vld [vmem:[#allocation93_spill] sm:$0xff]  ;;  %v4437_v31 = vpop.xlane.xlu1 %4436 }
 0x393   :  { %13151 = vmatpush3.bf16.msra.mxu1 %v23388_v46  ;;  %5915 = vmatprep.mubr.f32.mxu1 %v23264_v36  ;;  %v23393_v46 = vand.u32 4294901760, %v19405_v32  ;;  %14452 = vlog2.f32 %v4437_v31  ;;  %v23405_v31 = vld [vmem:[#allocation57_spill] sm:$0xff] }
 0x394   :  { %13153 = vmatprep.subr.bf16.mxu1 %v23391_v7  ;;  %v4601_v7 = vsub.f32 %v4563_v39, %v23397_v18  ;;  %v23403_v39 = vld [vmem:[#allocation135_spill] sm:$0xff]  ;;  %14454 = vlog2.f32 %v4440_v52  ;;  %v23416_v52 = vld [vmem:[#allocation97_spill] sm:$0xff]  ;;  %v23421_v18 = vld [vmem:[#allocation134_spill] sm:$0xff] }
 0x395   :  { %v19435_v38 = vpack.c.bf16 %v23393_v46, %v22079_v24  ;;  %v23400_v24 = vld [vmem:[#allocation94_spill] sm:$0xff]  ;;  %v4547_v47 = vadd.f32 %v4481_v58, %v23403_v39  ;;  %v23406_v46 = vand.u32 4294901760, %v23320_v2  ;;  %v19473_v58 = vpack.c.bf16 %v23410_v5, %v23409_v50  ;;  %v23417_v50 = vld [vmem:[#allocation167_spill] sm:$0xff]  ;;  %v23420_v5 = vld [vmem:[#allocation104_spill] sm:$0xff] }
 0x396   :  { %v19449_v48 = vmul.f32 %v23400_v24, %v4600_v14  ;;  %v19459_v3 = vmul.f32 %v23405_v31, %v4601_v7  ;;  %v23408_v24 = vld [vmem:[#allocation166_spill] sm:$0xff]  ;;  %v23413_v7 = vld [vmem:[#allocation139_spill] sm:$0xff]  ;;  %v4389_v59 = vpop.xlane.xlu1 %4388 }
 0x397   :  { %23394 = vst [vmem:[#allocation182_spill] sm:$0xff] %v19435_v38  ;;  %13771 = vmatprep.subr.bf16.mxu0 %v19435_v38  ;;  %13155 = vmatpush3.bf16.msra.mxu1 %v23399_v28  ;;  %v14445_v28 = vpop.eup %14444  ;;  %v19464_v14 = vsub.f32 %v23320_v2, %v23406_v46  ;;  %v19467_v38 = vmul.f32 %v23408_v24, %v4584_v35  ;;  %23411 = vst [vmem:[#allocation10_spill] sm:$0xff] %v19473_v58  ;;  %v23414_v46 = vand.u32 4294901760, %v23329_v54 }
 0x398   :  { %13157 = vmatprep.subr.bf16.mxu1 %v23404_v40  ;;  %v23412_v40 = vld [vmem:[#allocation29_spill] sm:$0xff]  ;;  %v4548_v39 = vadd.f32 %v4483_v60, %v23413_v7  ;;  %v4517_v31 = vmul.f32 0.6931472, %v14445_v28  ;;  %v14447_v2 = vpop.eup %14446  ;;  %v4602_v24 = vsub.f32 %v4564_v61, %v23416_v52  ;;  %14456 = vlog2.f32 %v4389_v59  ;;  %13773 = vmatpush3.bf16.msra.mxu0 %v19473_v58  ;;  %v4392_v61 = vpop.xlane.xlu0 %4391 }
 0x399   :  { %23407 = vst [vmem:[#allocation61_spill] sm:$0xff] %v19464_v14  ;;  %v4585_v22 = vsub.f32 %v4547_v47, %v23412_v40  ;;  %v19481_v35 = vsub.f32 %v23329_v54, %v23414_v46  ;;  %v23418_v60 = vand.u32 4294901760, %v23331_v51  ;;  %v4519_v46 = vmul.f32 0.6931472, %v14447_v2  ;;  %v14449_v59 = vpop.eup %14448  ;;  %v23430_v2 = vld [vmem:[#allocation33_spill] sm:$0xff] }
 0x39a   :  { %v4565_v54 = vadd.f32 %v4517_v31, %v23421_v18  ;;  %v23423_v58 = vand.u32 4294901760, %v23338_v10  ;;  %v23425_v47 = vand.u32 4294901760, %v23336_v23  ;;  %14458 = vlog2.f32 %v4392_v61  ;;  %v4443_v14 = vpop.xlane.xlu1 %4442  ;;  %v23434_v61 = vld [vmem:[#allocation211_spill] sm:$0xff] }
 0x39b   :  { %23415 = vst [vmem:[#allocation179_spill] sm:$0xff] %v19481_v35  ;;  %13159 = vmatpush3.bf16.msra.mxu1 %v23417_v50  ;;  %v19490_v28 = vsub.f32 %v23331_v51, %v23418_v60  ;;  %v19493_v7 = vmul.f32 %v23420_v5, %v4585_v22  ;;  %v23422_v35 = vld [vmem:[#allocation195_spill] sm:$0xff]  ;;  %v23427_v22 = vand.u32 4294901760, %v19449_v48  ;;  %v23428_v18 = vand.u32 4294901760, %v19459_v3  ;;  %v23431_v60 = vld [vmem:[#allocation100_spill] sm:$0xff] }
 0x39c   :  { %13161 = vmatprep.subr.bf16.mxu1 %v23422_v35  ;;  %v19500_v50 = vsub.f32 %v23338_v10, %v23423_v58  ;;  %v19505_v51 = vsub.f32 %v23336_v23, %v23425_v47  ;;  %v4586_v35 = vsub.f32 %v4548_v39, %v23430_v2  ;;  %v4603_v5 = vsub.f32 %v4565_v54, %v23431_v60  ;;  %v14451_v58 = vpop.eup %14450  ;;  %v23433_v23 = vld [vmem:[#allocation72_spill] sm:$0xff] }
 0x39d   :  { %23419 = vst [vmem:[#allocation186_spill] sm:$0xff] %v19490_v28  ;;  %v19511_v31 = vpack.c.bf16 %v23428_v18, %v23427_v22  ;;  %v4485_v28 = vmul.f32 0.6931472, %v14449_v59  ;;  %14460 = vlog2.f32 %v4443_v14  ;;  %v19521_v22 = vmul.f32 %v23434_v61, %v4602_v24  ;;  %v23437_v59 = vld [vmem:[#allocation190_spill] sm:$0xff]  ;;  %v23439_v14 = vld [vmem:[#allocation201_spill] sm:$0xff]  ;;  %v23453_v2 = vld [vmem:[#allocation200_spill] sm:$0xff] }
 0x39e   :  { %23424 = vst [vmem:[#allocation3_spill] sm:$0xff] %v19500_v50  ;;  %23426 = vst [vmem:[#allocation58_spill] sm:$0xff] %v19505_v51  ;;  %v23432_v50 = vld [vmem:[#allocation192_spill] sm:$0xff]  ;;  %v23435_v39 = vand.u32 4294901760, %v19281_v26  ;;  %v4487_v10 = vmul.f32 0.6931472, %v14451_v58 }
 0x39f   :  { %23429 = vst [vmem:[#allocation38_spill] sm:$0xff] %v19511_v31  ;;  %v4566_v52 = vadd.f32 %v4519_v46, %v23432_v50  ;;  %13775 = vmatprep.subr.bf16.mxu0 %v19511_v31  ;;  %13163 = vmatpush3.bf16.msra.mxu1 %v23433_v23  ;;  %v4549_v18 = vadd.f32 %v4485_v28, %v23437_v59  ;;  %v23438_v51 = vld [vmem:[#allocation70_spill] sm:$0xff]  ;;  %v14453_v50 = vpop.eup %14452  ;;  %v23440_v23 = vand.u32 4294901760, %v23347_v56  ;;  %v23442_v24 = vand.u32 4294901760, %v23349_v25  ;;  %v4395_v31 = vpop.xlane.xlu1 %4394 }
 0x3a0   :  { %v19526_v54 = vsub.f32 %v19281_v26, %v23435_v39  ;;  %13165 = vmatprep.subr.bf16.mxu1 %v23438_v51  ;;  %v19531_v46 = vmul.f32 %v23439_v14, %v4603_v5  ;;  %v23444_v26 = vand.u32 4294901760, %v19286_v34  ;;  %v23446_v51 = vand.u32 4294901760, %v19467_v38  ;;  %v23449_v39 = vld [vmem:[#allocation168_spill] sm:$0xff] }
 0x3a1   :  { %v19536_v47 = vsub.f32 %v23347_v56, %v23440_v23  ;;  %v19541_v61 = vsub.f32 %v23349_v25, %v23442_v24  ;;  %v23447_v5 = vand.u32 4294901760, %v19493_v7  ;;  %v19555_v59 = vmul.f32 %v23449_v39, %v4586_v35  ;;  %v23450_v56 = vld [vmem:[#allocation36_spill] sm:$0xff]  ;;  %v14455_v24 = vpop.eup %14454  ;;  %v23454_v35 = vld [vmem:[#allocation193_spill] sm:$0xff] }
 0x3a2   :  { %23436 = vst [vmem:[#allocation178_spill] sm:$0xff] %v19526_v54  ;;  %v19546_v28 = vsub.f32 %v19286_v34, %v23444_v26  ;;  %v4587_v14 = vsub.f32 %v4549_v18, %v23450_v56  ;;  %v4521_v23 = vmul.f32 0.6931472, %v14453_v50  ;;  %v23452_v34 = vld [vmem:[#allocation202_spill] sm:$0xff]  ;;  %14462 = vlog2.f32 %v4395_v31  ;;  %v23467_v56 = vld [vmem:[#allocation208_spill] sm:$0xff]  ;;  %v23470_v25 = vld [vmem:[#allocation205_spill] sm:$0xff] }
 0x3a3   :  { %23441 = vst [vmem:[#allocation196_spill] sm:$0xff] %v19536_v47  ;;  %23443 = vst [vmem:[#allocation51_spill] sm:$0xff] %v19541_v61  ;;  %v19552_v58 = vpack.c.bf16 %v23447_v5, %v23446_v51  ;;  %v23451_v61 = vld [vmem:[#allocation105_spill] sm:$0xff]  ;;  %v4550_v26 = vadd.f32 %v4487_v10, %v23452_v34  ;;  %13167 = vmatpush3.bf16.msra.mxu1 %v23453_v2  ;;  %v22098_v51 = vand.u32 4294901760, %v19521_v22  ;;  %v23455_v18 = vld [vmem:[#allocation154_spill] sm:$0xff]  ;;  %v23456_v10 = vand.u32 4294901760, %v23356_v19 }
 0x3a4   :  { %23445 = vst [vmem:[#allocation71_spill] sm:$0xff] %v19546_v28  ;;  %v4604_v47 = vsub.f32 %v4566_v52, %v23451_v61  ;;  %v19565_v5 = vmul.f32 %v23454_v35, %v4587_v14  ;;  %v4567_v50 = vadd.f32 %v4521_v23, %v23455_v18  ;;  %v4523_v39 = vmul.f32 0.6931472, %v14455_v24  ;;  %13169 = vmatprep.subr.bf16.mxu1 %v19089_v11  ;;  %v14457_v52 = vpop.eup %14456  ;;  %v23460_v23 = vld [vmem:[#allocation69_spill] sm:$0xff]  ;;  %v23463_v18 = vld [vmem:[#allocation108_spill] sm:$0xff]  ;;  %v23466_v14 = vld [vmem:[#allocation42_spill] sm:$0xff] }
 0x3a5   :  { %23448 = vst [vmem:[#allocation204_spill] sm:$0xff] %v19552_v58  ;;  %13777 = vmatpush3.bf16.msra.mxu0 %v19552_v58  ;;  %v19573_v31 = vsub.f32 %v23356_v19, %v23456_v10  ;;  %v23458_v2 = vand.u32 4294901760, %v19531_v46  ;;  %v19584_v24 = vsel %vm23461_vm4, %v23460_v23, 0  ;;  %v23462_v11 = vand.u32 4294901760, %v19289_v53  ;;  %v14459_v58 = vpop.eup %14458 }
 0x3a6   :  { %v4605_v19 = vsub.f32 %v4567_v50, %v23463_v18  ;;  %v4489_v10 = vmul.f32 0.6931472, %v14457_v52  ;;  %v19599_v60 = vmul.f32 %v23467_v56, %v4604_v47  ;;  %v4491_v50 = vmul.f32 0.6931472, %v14459_v58  ;;  %v23469_v52 = vld [vmem:[#allocation173_spill] sm:$0xff] }
 0x3a7   :  { %23457 = vst [vmem:[#allocation177_spill] sm:$0xff] %v19573_v31  ;;  %v19579_v34 = vpack.c.bf16 %v23458_v2, %v22098_v51  ;;  %v19589_v35 = vsub.f32 %v19289_v53, %v23462_v11  ;;  %v23464_v31 = vld [vmem:[#allocation41_spill] sm:$0xff]  ;;  %13171 = vmatpush3.bf16.msra.mxu1 %v23466_v14  ;;  %v23472_v14 = vand.u32 4294901760, %v19298_v27  ;;  %v23473_v47 = vand.u32 4294901760, %v19316_v20 }
 0x3a8   :  { %v4588_v2 = vsub.f32 %v4550_v26, %v23464_v31  ;;  %v23465_v51 = vld [vmem:[#allocation209_spill] sm:$0xff]  ;;  %13173 = vmatprep.subr.bf16.mxu1 %v23469_v52  ;;  %v19604_v18 = vmul.f32 %v23470_v25, %v4605_v19  ;;  %v23471_v26 = vand.u32 4294901760, %v19526_v54  ;;  %v23474_v58 = vand.u32 4294901760, %v19555_v59 }
 0x3a9   :  { %23459 = vst [vmem:[#allocation4_spill] sm:$0xff] %v19579_v34  ;;  %v4568_v61 = vadd.f32 %v4523_v39, %v23465_v51  ;;  %13779 = vmatprep.subr.bf16.mxu0 %v19579_v34  ;;  %v23468_v53 = vld [vmem:[#allocation197_spill] sm:$0xff]  ;;  %v14461_v39 = vpop.eup %14460  ;;  %v19612_v23 = vsub.f32 %v19298_v27, %v23472_v14  ;;  %v19617_v56 = vsub.f32 %v19316_v20, %v23473_v47  ;;  %v23475_v25 = vand.u32 4294901760, %v19565_v5  ;;  %v23480_v47 = vld [vmem:[#allocation191_spill] sm:$0xff] }
 0x3aa   :  { %v4551_v11 = vadd.f32 %v4489_v10, %v23468_v53  ;;  %v9518_v51 = vsub.f32 %v19526_v54, %v23471_v26  ;;  %v23477_v10 = vand.u32 4294901760, %v19546_v28  ;;  %v23478_v52 = vand.u32 4294901760, %v19324_v1  ;;  %v23479_v26 = vld [vmem:[#allocation44_spill] sm:$0xff] }
 0x3ab   :  { %v19623_v19 = vpack.c.bf16 %v23475_v25, %v23474_v58  ;;  %v4525_v34 = vmul.f32 0.6931472, %v14461_v39  ;;  %v19636_v31 = vmul.f32 %v23480_v47, %v4588_v2  ;;  %v23481_v54 = vld [vmem:[#allocation112_spill] sm:$0xff]  ;;  %v23485_v39 = vand.u32 4294901760, %v19358_v29 }
 0x3ac   :  { %v9511_v53 = vsub.f32 %v19546_v28, %v23477_v10  ;;  %v19631_v27 = vsub.f32 %v19324_v1, %v23478_v52  ;;  %v4589_v14 = vsub.f32 %v4551_v11, %v23479_v26  ;;  %v4606_v58 = vsub.f32 %v4568_v61, %v23481_v54  ;;  %v23482_v25 = vld [vmem:[#allocation156_spill] sm:$0xff]  ;;  %v23483_v10 = vld [vmem:[#allocation206_spill] sm:$0xff]  ;;  %v23486_v52 = vld [vmem:[#allocation175_spill] sm:$0xff] }
 0x3ad   :  { %23476 = vst [vmem:[#allocation48_spill] sm:$0xff] %v19623_v19  ;;  %v4552_v40 = vadd.f32 %v4491_v50, %v23482_v25  ;;  %13781 = vmatpush3.bf16.msra.mxu0 %v19623_v19  ;;  %13175 = vmatpush3.bf16.msra.mxu1 %v23483_v10  ;;  %v23484_v1 = vand.u32 4294901760, %v19321_v63  ;;  %v19651_v2 = vsub.f32 %v19358_v29, %v23485_v39  ;;  %v23487_v50 = vld [vmem:[#allocation158_spill] sm:$0xff]  ;;  %v23488_v25 = vld [vmem:[#allocation213_spill] sm:$0xff]  ;;  %v14463_v10 = vpop.eup %14462  ;;  %v23489_v20 = vand.u32 4294901760, %v19340_v44 }
 0x3ae   :  { %v19654_v61 = vmul.f32 %v23486_v52, %v4589_v14  ;;  %v4569_v47 = vadd.f32 %v4525_v34, %v23487_v50  ;;  %13177 = vmatprep.subr.bf16.mxu1 %v23488_v25  ;;  %v9512_v29 = vand.u32 4294901760, %v9511_v53  ;;  %v23493_v39 = vld [vmem:[#allocation117_spill] sm:$0xff]  ;;  %v4493_v34 = vmul.f32 0.6931472, %v14463_v10  ;;  %v23498_v10 = vld [vmem:[#allocation212_spill] sm:$0xff] }
 0x3af   :  { %v19646_v11 = vsub.f32 %v19321_v63, %v23484_v1  ;;  %v19661_v28 = vsub.f32 %v19340_v44, %v23489_v20  ;;  %v23490_v63 = vand.u32 4294901760, %v19599_v60  ;;  %v23491_v1 = vand.u32 4294901760, %v19604_v18  ;;  %v23494_v54 = vld [vmem:[#allocation49_spill] sm:$0xff] }
 0x3b0   :  { %v4607_v52 = vsub.f32 %v4569_v47, %v23493_v39  ;;  %v9519_v50 = vand.u32 4294901760, %v9518_v51  ;;  %v4590_v26 = vsub.f32 %v4552_v40, %v23494_v54  ;;  %v9320_v44 = vand.u32 4294901760, %v19636_v31 }
 0x3b1   :  { %v19667_v19 = vpack.c.bf16 %v23491_v1, %v23490_v63  ;;  %13179 = vmatpush3.bf16.msra.mxu1 %v19166_v55  ;;  %v22107_v20 = vand.u32 4294901760, %v19654_v61  ;;  %v23495_v63 = vld [vmem:[#allocation153_spill] sm:$0xff]  ;;  %v23496_v1 = vand.u32 4294901760, %v19363_v6  ;;  %v23497_v51 = vand.u32 4294901760, %v19366_v4  ;;  %v23499_v55 = vld [vmem:[#allocation162_spill] sm:$0xff] }
 0x3b2   :  { %v19678_v53 = vmul.f32 %v23495_v63, %v4606_v58  ;;  %v4553_v25 = vadd.f32 %v4493_v34, %v23498_v10  ;;  %13181 = vmatprep.subr.bf16.mxu1 %v23314_v16  ;;  %v19693_v14 = vmul.f32 %v23499_v55, %v4607_v52  ;;  %v23500_v58 = vand.u32 4294901760, %v19400_v13 }
 0x3b3   :  { %23492 = vst [vmem:[#allocation64_spill] sm:$0xff] %v19667_v19  ;;  %13783 = vmatprep.subr.bf16.mxu0 %v19667_v19  ;;  %v19683_v47 = vsub.f32 %v19363_v6, %v23496_v1  ;;  %v19688_v40 = vsub.f32 %v19366_v4, %v23497_v51  ;;  %v19702_v6 = vpack.c.bf16 %v22107_v20, %v9320_v44  ;;  %v23502_v4 = vand.u32 4294901760, %v19589_v35 }
 0x3b4   :  { %v19698_v63 = vsub.f32 %v19400_v13, %v23500_v58  ;;  %v13790_v1 = vpack.c.bf16 %v9519_v50, %v9512_v29  ;;  %v23503_v34 = vand.u32 4294901760, %v19382_v30  ;;  %v23504_v52 = vand.u32 4294901760, %v19408_v57  ;;  %v23505_v13 = vld [vmem:[#allocation53_spill] sm:$0xff]  ;;  %5917 = vmatmul.mubr.f32.vlgmr.msra.gmra.mrb[40].mxu1 %v23264_v36  ;;  %v23507_v58 = vld [vmem:[#allocation170_spill] sm:$0xff] }
 0x3b5   :  { %23501 = vst [vmem:[#allocation79_spill] sm:$0xff] %v19702_v6  ;;  %v9399_v51 = vsub.f32 %v19589_v35, %v23502_v4  ;;  %v4591_v55 = vsub.f32 %v4553_v25, %v23505_v13  ;;  %v23506_v29 = vand.u32 4294901760, %v19612_v23  ;;  %v19723_v4 = vmul.f32 %v23507_v58, %v4590_v26  ;;  %13785 = vmatpush3.bf16.msra.mxu0 %v19702_v6  ;;  %v23510_v58 = vld [vmem:[#allocation160_spill] sm:$0xff] }
 0x3b6   :  { %v19710_v16 = vsub.f32 %v19382_v30, %v23503_v34  ;;  %v19715_v10 = vsub.f32 %v19408_v57, %v23504_v52  ;;  %13183 = vmatpush3.bf16.msra.mxu1 %v23317_v21  ;;  %v9374_v30 = vand.u32 4294901760, %v19678_v53  ;;  %v23508_v25 = vand.u32 4294901760, %v19405_v32  ;;  %6019 = vmatprep.mubr.f32.mxu1 %v23264_v36 }
 0x3b7   :  { %v9406_v50 = vsub.f32 %v19612_v23, %v23506_v29  ;;  %v23509_v29 = vand.u32 4294901760, %v19449_v48  ;;  %v19741_v20 = vmul.f32 %v23510_v58, %v4591_v55  ;;  %13185 = vmatprep.subr.bf16.mxu1 %v23319_v33  ;;  %v23511_v34 = vand.u32 4294901760, %v19425_v37 }
 0x3b8   :  { %v19733_v52 = vsub.f32 %v19405_v32, %v23508_v25  ;;  %v23512_v32 = vand.u32 4294901760, %v19467_v38  ;;  %v23515_v33 = vand.u32 4294901760, %v19459_v3  ;;  %v23516_v21 = vand.u32 4294901760, %v19521_v22 }
 0x3b9   :  { %v19738_v26 = vsub.f32 %v19449_v48, %v23509_v29  ;;  %v19749_v57 = vsub.f32 %v19425_v37, %v23511_v34  ;;  %v23513_v48 = vand.u32 4294901760, %v19693_v14  ;;  %v9400_v29 = vand.u32 4294901760, %v9399_v51 }
 0x3ba   :  { %v19754_v25 = vsub.f32 %v19467_v38, %v23512_v32  ;;  %v19763_v58 = vsub.f32 %v19459_v3, %v23515_v33  ;;  %v19768_v37 = vsub.f32 %v19521_v22, %v23516_v21  ;;  %v9407_v34 = vand.u32 4294901760, %v9406_v50  ;;  %13187 = vmatpush3.bf16.msra.mxu1 %v23323_v45 }
 0x3bb   :  { %v19758_v55 = vpack.c.bf16 %v23513_v48, %v9374_v30  ;;  %v23517_v6 = vand.u32 4294901760, %v19646_v11  ;;  %v9326_v51 = vand.u32 4294901760, %v19723_v4  ;;  %v23518_v22 = vand.u32 4294901760, %v19493_v7  ;;  %13189 = vmatprep.subr.bf16.mxu1 %v23326_v15 }
 0x3bc   :  { %v23519_v21 = vand.u32 4294901760, %v19555_v59  ;;  %v23520_v45 = vand.u32 4294901760, %v19617_v56  ;;  %v23521_v48 = vand.u32 4294901760, %v19531_v46  ;;  %v23525_v15 = vand.u32 4294901760, %v19661_v28 }
 0x3bd   :  { %23514 = vst [vmem:[#allocation106_spill] sm:$0xff] %v19758_v55  ;;  %v9532_v38 = vsub.f32 %v19646_v11, %v23517_v6  ;;  %13787 = vmatprep.subr.bf16.mxu0 %v19758_v55  ;;  %v19782_v50 = vsub.f32 %v19493_v7, %v23518_v22  ;;  %v23522_v7 = vand.u32 4294901760, %v19599_v60  ;;  %v23526_v3 = vand.u32 4294901760, %v19565_v5 }
 0x3be   :  { %v19787_v6 = vsub.f32 %v19555_v59, %v23519_v21  ;;  %v9525_v33 = vsub.f32 %v19617_v56, %v23520_v45  ;;  %v19797_v32 = vsub.f32 %v19531_v46, %v23521_v48  ;;  %v23523_v59 = vand.u32 4294901760, %v19741_v20  ;;  %13191 = vmatpush3.bf16.msra.mxu1 %v23332_v0 }
 0x3bf   :  { %v19802_v22 = vsub.f32 %v19599_v60, %v23522_v7  ;;  %v9420_v45 = vsub.f32 %v19661_v28, %v23525_v15  ;;  %v19814_v55 = vsub.f32 %v19565_v5, %v23526_v3  ;;  %v19817_v46 = vsub.f32 %v19636_v31, %v9320_v44  ;;  %13193 = vmatprep.subr.bf16.mxu1 %v23335_v42 }
 0x3c0   :  { %v19806_v21 = vpack.c.bf16 %v23523_v59, %v9326_v51  ;;  %v13792_v48 = vpack.c.bf16 %v9407_v34, %v9400_v29  ;;  %v9533_v19 = vand.u32 4294901760, %v9532_v38  ;;  %v23527_v60 = vand.u32 4294901760, %v19631_v27 }
 0x3c1   :  { %v22115_v59 = vand.u32 4294901760, %v19683_v47  ;;  %v22114_v5 = vand.u32 4294901760, %v19710_v16  ;;  %v23528_v3 = vand.u32 4294901760, %v19604_v18  ;;  %v9526_v44 = vand.u32 4294901760, %v9525_v33 }
 0x3c2   :  { %23524 = vst [vmem:[#allocation60_spill] sm:$0xff] %v19806_v21  ;;  %13789 = vmatpush3.bf16.msra.mxu0 %v19806_v21  ;;  %v9413_v7 = vsub.f32 %v19631_v27, %v23527_v60  ;;  %v23529_v0 = vand.u32 4294901760, %v19651_v2  ;;  %v22135_v34 = vand.u32 4294901760, %v19698_v63  ;;  %v19838_v38 = vsub.f32 %v19678_v53, %v9374_v30  ;;  %13195 = vmatpush3.bf16.msra.mxu1 %v23340_v17 }
 0x3c3   :  { %v19830_v31 = vsub.f32 %v19604_v18, %v23528_v3  ;;  %13791 = vmatprep.subr.bf16.mxu0 %v13790_v1  ;;  %v9421_v60 = vand.u32 4294901760, %v9420_v45  ;;  %v9546_v15 = vsub.f32 %v19683_v47, %v22115_v59  ;;  %v9434_v18 = vsub.f32 %v19710_v16, %v22114_v5  ;;  %13197 = vmatprep.subr.bf16.mxu1 %v23343_v43 }
 0x3c4   :  { %v9539_v29 = vsub.f32 %v19651_v2, %v23529_v0  ;;  %v23530_v42 = vand.u32 4294901760, %v19654_v61  ;;  %v13794_v33 = vpack.c.bf16 %v9533_v19, %v9526_v44  ;;  %v22134_v53 = vand.u32 4294901760, %v19733_v52 }
 0x3c5   :  { %9390 = vmatmul.mubr.f32.vlgmr.msra.gmra.mrb[50].mxu0 %v22263_v9  ;;  %v22119_v30 = vand.u32 4294901760, %v19715_v10  ;;  %v9414_v45 = vand.u32 4294901760, %v9413_v7  ;;  %v9547_v3 = vand.u32 4294901760, %v9546_v15  ;;  %v23531_v0 = vand.u32 4294901760, %v19688_v40 }
 0x3c6   :  { %v19849_v1 = vsub.f32 %v19654_v61, %v23530_v42  ;;  %13793 = vmatpush3.bf16.msra.mxu0 %v13792_v48  ;;  %v22117_v59 = vand.u32 4294901760, %v19749_v57  ;;  %v19860_v61 = vsub.f32 %v19723_v4, %v9326_v51  ;;  %v9540_v19 = vand.u32 4294901760, %v9539_v29  ;;  %9620 = vmatprep.mubr.f32.mxu0 %v23264_v36 }
 0x3c7   :  { %v9427_v5 = vsub.f32 %v19688_v40, %v23531_v0  ;;  %13795 = vmatprep.subr.bf16.mxu0 %v13794_v33  ;;  %v9553_v48 = vsub.f32 %v19698_v63, %v22135_v34  ;;  %v9560_v17 = vsub.f32 %v19733_v52, %v22134_v53  ;;  %v13796_v7 = vpack.c.bf16 %v9421_v60, %v9414_v45 }
 0x3c8   :  { %23532 = vst [vmem:[#allocation128_spill] sm:$0xff] %v19860_v61  ;;  %v9435_v15 = vand.u32 4294901760, %v9434_v18  ;;  %v9448_v44 = vsub.f32 %v19749_v57, %v22117_v59  ;;  %v22116_v4 = vand.u32 4294901760, %v19738_v26  ;;  %v13798_v43 = vpack.c.bf16 %v9547_v3, %v9540_v19  ;;  %13199 = vmatpush3.bf16.msra.mxu1 %v23350_v12 }
 0x3c9   :  { %v9561_v51 = vand.u32 4294901760, %v9560_v17  ;;  %v9441_v29 = vsub.f32 %v19715_v10, %v22119_v30  ;;  %v22118_v42 = vand.u32 4294901760, %v19763_v58  ;;  %v9428_v60 = vand.u32 4294901760, %v9427_v5  ;;  %13201 = vmatprep.subr.bf16.mxu1 %v23353_v8 }
 0x3ca   :  { %13797 = vmatpush3.bf16.msra.mxu0 %v13796_v7  ;;  %v9567_v18 = vsub.f32 %v19738_v26, %v22116_v4  ;;  %v22133_v33 = vand.u32 4294901760, %v19754_v25  ;;  %v22132_v45 = vand.u32 4294901760, %v19782_v50  ;;  %v9554_v3 = vand.u32 4294901760, %v9553_v48 }
 0x3cb   :  { %13799 = vmatprep.subr.bf16.mxu0 %v13798_v43  ;;  %v9574_v0 = vsub.f32 %v19763_v58, %v22118_v42  ;;  %v22130_v19 = vand.u32 4294901760, %v19768_v37  ;;  %v22120_v12 = vand.u32 4294901760, %v19797_v32  ;;  %v23533_v5 = vand.u32 4294901760, %v19693_v14 }
 0x3cc   :  { %v13800_v7 = vpack.c.bf16 %v9435_v15, %v9428_v60  ;;  %v9449_v4 = vand.u32 4294901760, %v9448_v44  ;;  %v9462_v8 = vsub.f32 %v19782_v50, %v22132_v45  ;;  %v13802_v48 = vpack.c.bf16 %v9561_v51, %v9554_v3  ;;  %13203 = vmatpush3.bf16.msra.mxu1 %v23358_v41 }
 0x3cd   :  { %v19893_v17 = vsub.f32 %v19693_v14, %v23533_v5  ;;  %v9442_v43 = vand.u32 4294901760, %v9441_v29  ;;  %v9575_v59 = vand.u32 4294901760, %v9574_v0  ;;  %v9588_v42 = vsub.f32 %v19797_v32, %v22120_v12  ;;  %13205 = vmatprep.subr.bf16.mxu1 %v23361_v49 }
 0x3ce   :  { %13801 = vmatpush3.bf16.msra.mxu0 %v13800_v7  ;;  %v9568_v30 = vand.u32 4294901760, %v9567_v18  ;;  %v9455_v14 = vsub.f32 %v19754_v25, %v22133_v33  ;;  %v22123_v15 = vand.u32 4294901760, %v19787_v6  ;;  %v22122_v44 = vand.u32 4294901760, %v19814_v55 }
 0x3cf   :  { %v23534_v51 = vand.u32 4294901760, %v19741_v20  ;;  %13803 = vmatprep.subr.bf16.mxu0 %v13802_v48  ;;  %v9581_v41 = vsub.f32 %v19768_v37, %v22130_v19  ;;  %v22124_v60 = vand.u32 4294901760, %v19802_v22  ;;  %v22121_v18 = vand.u32 4294901760, %v19830_v31  ;;  %v19977_v19 = vpop.xlane.xlu1 %4448 }
 0x3d0   :  { %v13804_v3 = vpack.c.bf16 %v9449_v4, %v9442_v43  ;;  %v13806_v0 = vpack.c.bf16 %v9575_v59, %v9568_v30  ;;  %v9463_v5 = vand.u32 4294901760, %v9462_v8  ;;  %v9476_v7 = vsub.f32 %v19814_v55, %v22122_v44  ;;  %13207 = vmatpush3.bf16.msra.mxu1 %v23369_v62 }
 0x3d1   :  { %v19910_v29 = vsub.f32 %v19741_v20, %v23534_v51  ;;  %v9589_v20 = vand.u32 4294901760, %v9588_v42  ;;  %v9602_v49 = vsub.f32 %v19830_v31, %v22121_v18  ;;  %v22128_v48 = vand.u32 4294901760, %v19817_v46  ;;  %v23536_v42 = vld [vmem:[#allocation78_spill] sm:$0xff] }
 0x3d2   :  { %v22126_v51 = vand.u32 4294901760, %v19849_v1  ;;  %13805 = vmatpush3.bf16.msra.mxu0 %v13804_v3  ;;  %v9456_v12 = vand.u32 4294901760, %v9455_v14  ;;  %v9469_v59 = vsub.f32 %v19787_v6, %v22123_v15  ;;  %v22127_v30 = vand.u32 4294901760, %v19838_v38  ;;  %13209 = vmatprep.subr.bf16.mxu1 %v23536_v42 }
 0x3d3   :  { %23535 = vst [vmem:[#allocation5_spill] sm:$0xff] %v19910_v29  ;;  %v19933_v4 = vsub.f32 %v19584_v24, %v19584_v24  ;;  %13807 = vmatprep.subr.bf16.mxu0 %v13806_v0  ;;  %v9582_v8 = vand.u32 4294901760, %v9581_v41  ;;  %v9595_v43 = vsub.f32 %v19802_v22, %v22124_v60  ;;  %v22125_v62 = vand.u32 4294901760, %v19893_v17  ;;  %v19951_v60 = vpop.xlane.xlu0 %4445 }
 0x3d4   :  { %v22129_v14 = vand.u32 4294901760, %v19860_v61  ;;  %v13808_v3 = vpack.c.bf16 %v9463_v5, %v9456_v12  ;;  %v9477_v18 = vand.u32 4294901760, %v9476_v7  ;;  %v9490_v44 = vsub.f32 %v19849_v1, %v22126_v51  ;;  %v23537_v12 = vld [vmem:[#allocation180_spill] sm:$0xff] }
 0x3d5   :  { %v22131_v24 = vand.u32 4294901760, %v19910_v29  ;;  %v13810_v0 = vpack.c.bf16 %v9589_v20, %v9582_v8  ;;  %v9603_v15 = vand.u32 4294901760, %v9602_v49  ;;  %v9483_v41 = vsub.f32 %v19817_v46, %v22128_v48  ;;  %13211 = vmatpush3.bf16.msra.mxu1 %v23537_v12  ;;  %v23538_v8 = vld [vmem:[#allocation15_spill] sm:$0xff] }
 0x3d6   :  { %v9616_v42 = vsub.f32 %v19893_v17, %v22125_v62  ;;  %13809 = vmatpush3.bf16.msra.mxu0 %v13808_v3  ;;  %v9470_v5 = vand.u32 4294901760, %v9469_v59  ;;  %v9609_v7 = vsub.f32 %v19838_v38, %v22127_v30  ;;  %v9497_v20 = vsub.f32 %v19860_v61, %v22129_v14  ;;  %v23540_v3 = vld [vmem:[#allocation17_spill] sm:$0xff] }
 0x3d7   :  { %v9504_v49 = vsub.f32 %v19910_v29, %v22131_v24  ;;  %v23539_v62 = vand.u32 4294901760, %v23538_v8  ;;  %v23541_v12 = vand.u32 4294901760, %v23540_v3  ;;  %13811 = vmatprep.subr.bf16.mxu0 %v13810_v0  ;;  %v23543_v30 = vmov 0.0|0.0  }
 0x3d8   :  { %13212 = vmatprep.subr.bf16.mxu1 %v23543_v30  ;;  %v9596_v48 = vand.u32 4294901760, %v9595_v43  ;;  %v19975_v14 = vand.u32 4294901760, %v19933_v4  ;;  %v13812_v24 = vpack.c.bf16 %v9477_v18, %v9470_v5  ;;  %v9491_v45 = vand.u32 4294901760, %v9490_v44  ;;  %v23551_v43 = vld [vmem:[#allocation20_spill] sm:$0xff]  ;;  %6021 = vmatmul.mubr.f32.vlgmr.msra.gmra.mrb[42].mxu1 %v23264_v36 }
 0x3d9   :  { %v19966_v51 = vsub.f32 %v23538_v8, %v23539_v62  ;;  %v19971_v59 = vsub.f32 %v23540_v3, %v23541_v12  ;;  %v9617_v33 = vand.u32 4294901760, %v9616_v42  ;;  %v9505_v53 = vand.u32 4294901760, %v9504_v49  ;;  %v23545_v62 = vld [vmem:[#allocation80_spill] sm:$0xff]  ;;  %v23548_v3 = vld [vmem:[#allocation85_spill] sm:$0xff]  ;;  %12590 = vmatprep.mubr.msk.f32.mxu1 %vm23561_vm10, %v22263_v9 }
 0x3da   :  { %23544 = vst [vmem:[#allocation81_spill] sm:$0xff] %v19975_v14  ;;  %v23546_v8 = vand.u32 4294901760, %v23545_v62  ;;  %v23549_v12 = vand.u32 4294901760, %v23548_v3  ;;  %v23552_v21 = vand.u32 4294901760, %v23551_v43  ;;  %v13814_v44 = vpack.c.bf16 %v9603_v15, %v9596_v48  ;;  %v23554_v18 = vld [vmem:[#allocation24_spill] sm:$0xff]  ;;  %13813 = vmatpush3.bf16.msra.mxu0 %v13812_v24  ;;  %v23556_v49 = vld [vmem:[#allocation89_spill] sm:$0xff]  ;;  %v4452_v24 = vpop.xlane.xlu0 %4451 }
 0x3db   :  { %23542 = vst [vmem:[#allocation67_spill] sm:$0xff] %v19971_v59  ;;  %v23555_v42 = vand.u32 4294901760, %v23554_v18  ;;  %13214 = vmatpush3.bf16.msra.mxu1 %v23556_v49  ;;  %v6100_v48 = vsub.f32 %v19933_v4, %v19975_v14  ;;  %v23578_v14 = vand.u32 4294901760, %v19698_v63  ;;  %14464 = vlog2.f32 %v19951_v60 }
 0x3dc   :  { %v19982_v34 = vsub.f32 %v23545_v62, %v23546_v8  ;;  %v19987_v0 = vsub.f32 %v23548_v3, %v23549_v12  ;;  %v19992_v59 = vsub.f32 %v23551_v43, %v23552_v21  ;;  %v9484_v62 = vand.u32 4294901760, %v9483_v41  ;;  %v23557_v12 = vld [vmem:[#allocation88_spill] sm:$0xff]  ;;  %v23559_v21 = vld [vmem:[#allocation93_spill] sm:$0xff]  ;;  %13815 = vmatprep.subr.bf16.mxu0 %v13814_v44  ;;  %13215 = vmatprep.subr.bf16.mxu1 %v23543_v30 }
 0x3dd   :  { %v19998_v5 = vsub.f32 %v23554_v18, %v23555_v42  ;;  %v9610_v8 = vand.u32 4294901760, %v9609_v7  ;;  %v9498_v3 = vand.u32 4294901760, %v9497_v20  ;;  %v23560_v43 = vand.u32 4294901760, %v23559_v21 }
 0x3de   :  { %23547 = vst [vmem:[#allocation111_spill] sm:$0xff] %v19982_v34  ;;  %23550 = vst [vmem:[#allocation47_spill] sm:$0xff] %v19987_v0  ;;  %v23558_v0 = vand.u32 4294901760, %v23557_v12  ;;  %v13816_v41 = vpack.c.bf16 %v9491_v45, %v9484_v62  ;;  %v23563_v18 = vand.u32 4294901760, %v19612_v23  ;;  %v23565_v44 = vand.u32 4294901760, %v19617_v56 }
 0x3df   :  { %23553 = vst [vmem:[#allocation184_spill] sm:$0xff] %v19992_v59  ;;  %v20009_v15 = vsub.f32 %v23559_v21, %v23560_v43  ;;  %v13818_v7 = vpack.c.bf16 %v9617_v33, %v9610_v8  ;;  %v13820_v20 = vpack.c.bf16 %v9505_v53, %v9498_v3  ;;  %v23568_v43 = vand.u32 4294901760, %v19631_v27 }
 0x3e0   :  { %v20004_v34 = vsub.f32 %v23557_v12, %v23558_v0  ;;  %v23562_v0 = vand.u32 4294901760, %v19589_v35  ;;  %v23566_v12 = vand.u32 4294901760, %v19646_v11  ;;  %v23569_v33 = vand.u32 4294901760, %v19661_v28  ;;  %13817 = vmatpush3.bf16.msra.mxu0 %v13816_v41 }
 0x3e1   :  { %v23571_v45 = vand.u32 4294901760, %v19651_v2  ;;  %v23572_v62 = vand.u32 4294901760, %v19683_v47  ;;  %v23574_v3 = vand.u32 4294901760, %v19688_v40  ;;  %13819 = vmatprep.subr.bf16.mxu0 %v13818_v7  ;;  %v23587_v41 = vand.u32 4294901760, %v19754_v25 }
 0x3e2   :  { %v20020_v42 = vpack.c.bf16 %v23563_v18, %v23562_v0  ;;  %v20026_v21 = vpack.c.bf16 %v23566_v12, %v23565_v44  ;;  %v20032_v53 = vpack.c.bf16 %v23569_v33, %v23568_v43  ;;  %v23575_v0 = vand.u32 4294901760, %v19710_v16  ;;  %v4455_v44 = vpop.xlane.xlu1 %4454  ;;  %v23577_v12 = vld [vmem:[#allocation214_spill] sm:$0xff] }
 0x3e3   :  { %v20038_v8 = vpack.c.bf16 %v23572_v62, %v23571_v45  ;;  %13217 = vmatpush3.bf16.msra.mxu1 %v23577_v12  ;;  %v23579_v43 = vand.u32 4294901760, %v19733_v52  ;;  %v23582_v45 = vand.u32 4294901760, %v19749_v57  ;;  %v23596_v7 = vand.u32 4294901760, %v19802_v22 }
 0x3e4   :  { %23564 = vst [vmem:[#allocation113_spill] sm:$0xff] %v20020_v42  ;;  %23567 = vst [vmem:[#allocation181_spill] sm:$0xff] %v20026_v21  ;;  %v20044_v18 = vpack.c.bf16 %v23575_v0, %v23574_v3  ;;  %v23585_v3 = vand.u32 4294901760, %v19763_v58  ;;  %13218 = vmatprep.subr.bf16.mxu1 %v23543_v30  ;;  %v23610_v21 = vld [vmem:[#allocation29_spill] sm:$0xff]  ;;  %v23613_v42 = vld [vmem:[#allocation178_spill] sm:$0xff]  ;;  %13821 = vmatpush3.bf16.msra.mxu0 %v13820_v20  ;;  %14466 = vlog2.f32 %v4452_v24  ;;  %vm59_vm4 = vcmask 62464  }
 0x3e5   :  { %23570 = vst [vmem:[#allocation129_spill] sm:$0xff] %v20032_v53  ;;  %23573 = vst [vmem:[#allocation9_spill] sm:$0xff] %v20038_v8  ;;  %v20051_v33 = vpack.c.bf16 %v23579_v43, %v23578_v14  ;;  %v23581_v53 = vand.u32 4294901760, %v19715_v10  ;;  %v23584_v8 = vand.u32 4294901760, %v19738_v26  ;;  %v23588_v14 = vand.u32 4294901760, %v19782_v50 }
 0x3e6   :  { %23576 = vst [vmem:[#allocation62_spill] sm:$0xff] %v20044_v18  ;;  %14468 = vlog2.f32 %v19977_v19  ;;  %v13824_v24 = vpack.c.bf16 %v19612_v23, %v19589_v35  ;;  %v23639_v35 = vand.u32 4294901760, %v23493_v39  ;;  %60 = vst.msk [vmem:[%s21250_s2] sm:$0x3f] %vm59_vm4, %v22263_v9 }
 0x3e7   :  { %23580 = vst [vmem:[#allocation73_spill] sm:$0xff] %v20051_v33  ;;  %v20057_v62 = vpack.c.bf16 %v23582_v45, %v23581_v53  ;;  %v20063_v0 = vpack.c.bf16 %v23585_v3, %v23584_v8  ;;  %v20070_v43 = vpack.c.bf16 %v23588_v14, %v23587_v41  ;;  %v23590_v33 = vand.u32 4294901760, %v19768_v37  ;;  %9622 = vmatmul.mubr.f32.vlgmr.msra.gmra.mrb[52].mxu0 %v23264_v36 }
 0x3e8   :  { %v23591_v53 = vand.u32 4294901760, %v19797_v32  ;;  %v23594_v8 = vand.u32 4294901760, %v19814_v55  ;;  %v23599_v41 = vand.u32 4294901760, %v19817_v46  ;;  %v23600_v14 = vand.u32 4294901760, %v19849_v1  ;;  %9757 = vmatprep.mubr.f32.mxu0 %v22263_v9 }
 0x3e9   :  { %23583 = vst [vmem:[#allocation115_spill] sm:$0xff] %v20057_v62  ;;  %23586 = vst [vmem:[#allocation171_spill] sm:$0xff] %v20063_v0  ;;  %v23593_v62 = vand.u32 4294901760, %v19787_v6  ;;  %v23597_v0 = vand.u32 4294901760, %v19830_v31 }
 0x3ea   :  { %23589 = vst [vmem:[#allocation77_spill] sm:$0xff] %v20070_v43  ;;  %v20076_v45 = vpack.c.bf16 %v23591_v53, %v23590_v33  ;;  %v20094_v43 = vpack.c.bf16 %v23600_v14, %v23599_v41  ;;  %v23602_v33 = vand.u32 4294901760, %v19838_v38  ;;  %v23603_v53 = vand.u32 4294901760, %v19893_v17 }
 0x3eb   :  { %v20082_v3 = vpack.c.bf16 %v23594_v8, %v23593_v62  ;;  %v20088_v18 = vpack.c.bf16 %v23597_v0, %v23596_v7  ;;  %v23605_v62 = vand.u32 4294901760, %v19860_v61  ;;  %v23606_v8 = vand.u32 4294901760, %v19910_v29  ;;  %v23608_v0 = vld [vmem:[#allocation26_spill] sm:$0xff] }
 0x3ec   :  { %23592 = vst [vmem:[#allocation146_spill] sm:$0xff] %v20076_v45  ;;  %23601 = vst [vmem:[#allocation148_spill] sm:$0xff] %v20094_v43  ;;  %v20100_v45 = vpack.c.bf16 %v23603_v53, %v23602_v33  ;;  %v23609_v7 = vand.u32 4294901760, %v23608_v0  ;;  %v23611_v41 = vand.u32 4294901760, %v23610_v21  ;;  %v23612_v43 = vld [vmem:[#allocation71_spill] sm:$0xff]  ;;  %v20120_v53 = vand.u32 4294901760, %v6100_v48 }
 0x3ed   :  { %23595 = vst [vmem:[#allocation76_spill] sm:$0xff] %v20082_v3  ;;  %23598 = vst [vmem:[#allocation74_spill] sm:$0xff] %v20088_v18  ;;  %v20106_v3 = vpack.c.bf16 %v23606_v8, %v23605_v62  ;;  %v13822_v33 = vpack.c.bf16 %v23613_v42, %v23612_v43  ;;  %v23618_v8 = vld [vmem:[#allocation100_spill] sm:$0xff]  ;;  %v23624_v48 = vld [vmem:[#allocation218_spill] sm:$0xff] }
 0x3ee   :  { %23604 = vst [vmem:[#allocation39_spill] sm:$0xff] %v20100_v45  ;;  %v20111_v18 = vsub.f32 %v23608_v0, %v23609_v7  ;;  %v20116_v14 = vsub.f32 %v23610_v21, %v23611_v41  ;;  %23614 = vst [vmem:[#allocation149_spill] sm:$0xff] %v20120_v53  ;;  %v23615_v45 = vld [vmem:[#allocation97_spill] sm:$0xff]  ;;  %v4458_v41 = vpop.xlane.xlu0 %4457  ;;  %13220 = vmatpush3.bf16.msra.mxu1 %v23624_v48  ;;  %v23625_v42 = vld [vmem:[#allocation36_spill] sm:$0xff] }
 0x3ef   :  { %23607 = vst [vmem:[#allocation188_spill] sm:$0xff] %v20106_v3  ;;  %v23616_v12 = vand.u32 4294901760, %v23615_v45  ;;  %v23619_v3 = vand.u32 4294901760, %v23618_v8  ;;  %v23621_v7 = vld [vmem:[#allocation33_spill] sm:$0xff]  ;;  %v23626_v43 = vand.u32 4294901760, %v23625_v42  ;;  %13823 = vmatprep.subr.bf16.mxu0 %v13822_v33  ;;  %13221 = vmatprep.subr.bf16.mxu1 %v23543_v30  ;;  %14470 = vlog2.f32 %v4458_v41 }
 0x3f0   :  { %v23622_v29 = vand.u32 4294901760, %v23621_v7  ;;  %v23632_v48 = vld [vmem:[#allocation41_spill] sm:$0xff]  ;;  %v20184_v41 = vsub.f32 %v23493_v39, %v23639_v35  ;;  %14472 = vlog2.f32 %v4455_v44  ;;  %13825 = vmatpush3.bf16.msra.mxu0 %v13824_v24  ;;  %v13828_v39 = vpack.c.bf16 %v19661_v28, %v19631_v27  ;;  %v20232_v35 = vpop.eup %14464 }
 0x3f1   :  { %v20125_v62 = vsub.f32 %v23615_v45, %v23616_v12  ;;  %v20130_v0 = vsub.f32 %v23618_v8, %v23619_v3  ;;  %v20142_v12 = vsub.f32 %v23625_v42, %v23626_v43  ;;  %v23627_v45 = vld [vmem:[#allocation105_spill] sm:$0xff]  ;;  %v23630_v8 = vld [vmem:[#allocation108_spill] sm:$0xff]  ;;  %v23633_v49 = vand.u32 4294901760, %v23632_v48  ;;  %12591 = vmatmul.mubr.f32.vlgmr.msra.gmra.mrb[44].mxu1 %v20120_v53  ;;  %23650 = vst [vmem:[#allocation90_spill] sm:$0xff] %v20232_v35 }
 0x3f2   :  { %v20135_v21 = vsub.f32 %v23621_v7, %v23622_v29  ;;  %v23628_v61 = vand.u32 4294901760, %v23627_v45  ;;  %v23629_v29 = vld [vmem:[#allocation22_spill] sm:$0xff]  ;;  %v23631_v20 = vand.u32 4294901760, %v23630_v8  ;;  %v23635_v43 = vld [vmem:[#allocation44_spill] sm:$0xff]  ;;  %v13830_v44 = vpack.c.bf16 %v19683_v47, %v19651_v2  ;;  %12605 = vmatprep.mubr.msk.f32.mxu1 %vm23561_vm10, %v22263_v9  ;;  %v23645_v2 = vld [vmem:[#allocation61_spill] sm:$0xff] }
 0x3f3   :  { %23617 = vst [vmem:[#allocation68_spill] sm:$0xff] %v20125_v62  ;;  %23620 = vst [vmem:[#allocation34_spill] sm:$0xff] %v20130_v0  ;;  %v22145_v60 = vand.u32 4294901760, %v23629_v29  ;;  %v20159_v42 = vsub.f32 %v23632_v48, %v23633_v49  ;;  %v23636_v33 = vand.u32 4294901760, %v23635_v43  ;;  %v13826_v49 = vpack.c.bf16 %v19646_v11, %v19617_v56  ;;  %v23637_v48 = vld [vmem:[#allocation112_spill] sm:$0xff] }
 0x3f4   :  { %23623 = vst [vmem:[#allocation102_spill] sm:$0xff] %v20135_v21  ;;  %v20147_v3 = vsub.f32 %v23627_v45, %v23628_v61  ;;  %v20154_v7 = vsub.f32 %v23630_v8, %v23631_v20  ;;  %v4461_v61 = vpop.xlane.xlu1 %4460  ;;  %v23638_v8 = vand.u32 4294901760, %v23637_v48  ;;  %v23640_v20 = vld [vmem:[#allocation220_spill] sm:$0xff]  ;;  %v23642_v11 = vand.u32 4294901760, %v23494_v54 }
 0x3f5   :  { %23634 = vst [vmem:[#allocation54_spill] sm:$0xff] %v20159_v42  ;;  %v20167_v45 = vsub.f32 %v23635_v43, %v23636_v33  ;;  %v6765_v19 = vsub.f32 %v23629_v29, %v22145_v60  ;;  %13223 = vmatpush3.bf16.msra.mxu1 %v23640_v20  ;;  %v23641_v43 = vld [vmem:[#allocation23_spill] sm:$0xff]  ;;  %v23644_v60 = vand.u32 4294901760, %v23505_v13  ;;  %14474 = vlog2.f32 %v4461_v61  ;;  %13827 = vmatprep.subr.bf16.mxu0 %v13826_v49  ;;  %v23653_v20 = vld [vmem:[#allocation58_spill] sm:$0xff] }
 0x3f6   :  { %v20179_v23 = vsub.f32 %v23637_v48, %v23638_v8  ;;  %v22147_v56 = vand.u32 4294901760, %v23641_v43  ;;  %v20191_v33 = vsub.f32 %v23494_v54, %v23642_v11  ;;  %13224 = vmatprep.subr.bf16.mxu1 %v23543_v30  ;;  %v13832_v24 = vpack.c.bf16 %v19710_v16, %v19688_v40  ;;  %13829 = vmatpush3.bf16.msra.mxu0 %v13828_v39  ;;  %v23646_v40 = vld [vmem:[#allocation198_spill] sm:$0xff]  ;;  %v23657_v16 = vld [vmem:[#allocation51_spill] sm:$0xff] }
 0x3f7   :  { %v20196_v48 = vsub.f32 %v23505_v13, %v23644_v60  ;;  %v6766_v54 = vand.u32 4294901760, %v6765_v19  ;;  %v13834_v60 = vpack.c.bf16 %v19733_v52, %v19698_v63  ;;  %v13836_v28 = vpack.c.bf16 %v19749_v57, %v19715_v10  ;;  %v23647_v19 = vld [vmem:[#allocation179_spill] sm:$0xff]  ;;  %13831 = vmatprep.subr.bf16.mxu0 %v13830_v44  ;;  %v23648_v52 = vld [vmem:[#allocation186_spill] sm:$0xff] }
 0x3f8   :  { %23643 = vst [vmem:[#allocation98_spill] sm:$0xff] %v20191_v33  ;;  %v6772_v13 = vsub.f32 %v23641_v43, %v22147_v56  ;;  %v13838_v27 = vpack.c.bf16 %v19763_v58, %v19738_v26  ;;  %v22146_v47 = vand.u32 4294901760, %v23645_v2  ;;  %v22148_v63 = vand.u32 4294901760, %v23647_v19  ;;  %v23649_v58 = vld [vmem:[#allocation3_spill] sm:$0xff] }
 0x3f9   :  { %13226 = vmatpush3.bf16.msra.mxu1 %v23646_v40  ;;  %v22152_v26 = vand.u32 4294901760, %v23648_v52  ;;  %v22151_v8 = vand.u32 4294901760, %v23649_v58  ;;  %v22153_v10 = vand.u32 4294901760, %v23653_v20 }
 0x3fa   :  { %v6773_v49 = vand.u32 4294901760, %v6772_v13  ;;  %13227 = vmatprep.subr.bf16.mxu1 %v23543_v30  ;;  %v6653_v57 = vsub.f32 %v23645_v2, %v22146_v47  ;;  %v6660_v44 = vsub.f32 %v23647_v19, %v22148_v63  ;;  %v20243_v13 = vpop.eup %14466  ;;  %13833 = vmatpush3.bf16.msra.mxu0 %v13832_v24  ;;  %v23656_v63 = vld [vmem:[#allocation196_spill] sm:$0xff] }
 0x3fb   :  { %23652 = vst [vmem:[#allocation187_spill] sm:$0xff] %v20243_v13  ;;  %v6779_v47 = vsub.f32 %v23648_v52, %v22152_v26  ;;  %v6786_v56 = vsub.f32 %v23649_v58, %v22151_v8  ;;  %v20252_v11 = vpop.eup %14468  ;;  %13835 = vmatprep.subr.bf16.mxu0 %v13834_v60  ;;  %v6667_v24 = vsub.f32 %v23653_v20, %v22153_v10  ;;  %v23663_v60 = vand.u32 4294901760, %v23657_v16  ;;  %v23666_v10 = vld [vmem:[#allocation69_spill] sm:$0xff] }
 0x3fc   :  { %v20238_v39 = vpack.c.bf16 %v6773_v49, %v6766_v54  ;;  %v6654_v40 = vand.u32 4294901760, %v6653_v57  ;;  %23654 = vst [vmem:[#allocation83_spill] sm:$0xff] %v20252_v11  ;;  %v23655_v54 = vld [vmem:[#allocation151_spill] sm:$0xff]  ;;  %v6661_v49 = vand.u32 4294901760, %v6660_v44  ;;  %v20258_v13 = vpop.eup %14470  ;;  %v23662_v57 = vand.u32 4294901760, %v23656_v63 }
 0x3fd   :  { %13229 = vmatpush3.bf16.msra.mxu1 %v23655_v54  ;;  %23659 = vst [vmem:[#allocation52_spill] sm:$0xff] %v20258_v13  ;;  %v6780_v8 = vand.u32 4294901760, %v6779_v47  ;;  %v6787_v26 = vand.u32 4294901760, %v6786_v56  ;;  %v20265_v44 = vpop.eup %14472  ;;  %v6793_v13 = vsub.f32 %v23657_v16, %v23663_v60  ;;  %v23670_v60 = vld [vmem:[#allocation174_spill] sm:$0xff]  ;;  %v23671_v11 = vld [vmem:[#allocation95_spill] sm:$0xff] }
 0x3fe   :  { %23651 = vst [vmem:[#allocation124_spill] sm:$0xff] %v20238_v39  ;;  %v23658_v39 = vld [vmem:[#allocation177_spill] sm:$0xff]  ;;  %13230 = vmatprep.subr.bf16.mxu1 %v23543_v30  ;;  %23660 = vst [vmem:[#allocation199_spill] sm:$0xff] %v20265_v44  ;;  %v20267_v61 = vpack.c.bf16 %v6661_v49, %v6654_v40  ;;  %v6674_v53 = vsub.f32 %v23656_v63, %v23662_v57  ;;  %v6668_v40 = vand.u32 4294901760, %v6667_v24  ;;  %v23668_v49 = vand.u32 4294901760, %v19966_v51  ;;  %v23673_v16 = vld [vmem:[#allocation111_spill] sm:$0xff] }
 0x3ff   :  { %v23664_v56 = vand.u32 4294901760, %v23658_v39  ;;  %v20278_v35 = vpop.eup %14474  ;;  %v20282_v54 = vpack.c.bf16 %v6787_v26, %v6780_v8  ;;  %13837 = vmatpush3.bf16.msra.mxu0 %v13836_v28  ;;  %v23672_v36 = vpack.c.bf16 %v23670_v60, %v23671_v11  ;;  %v22158_v63 = vand.u32 4294901760, %v23673_v16  ;;  %v23674_v24 = vld [vmem:[#allocation47_spill] sm:$0xff] }
 0x400   :  { %23661 = vst [vmem:[#allocation155_spill] sm:$0xff] %v20267_v61  ;;  %23665 = vst [vmem:[#allocation137_spill] sm:$0xff] %v20278_v35  ;;  %12606 = vmatmul.mubr.msk.f32.vlgmr.msra.gmra.mrb[44].mxu1 %vm23667_vm14, %v23666_v10  ;;  %v6681_v57 = vsub.f32 %v19966_v51, %v23668_v49  ;;  %v23669_v61 = vld [vmem:[#allocation67_spill] sm:$0xff]  ;;  %13839 = vmatprep.subr.bf16.mxu0 %v13838_v27  ;;  %v22159_v49 = vand.u32 4294901760, %v23674_v24  ;;  %v22161_v28 = vand.u32 4294901760, %v19992_v59  ;;  %v22165_v11 = vand.u32 4294901760, %v19998_v5 }
 0x401   :  { %v6800_v47 = vsub.f32 %v23658_v39, %v23664_v56  ;;  %v22160_v44 = vand.u32 4294901760, %v23669_v61  ;;  %13232 = vmatpush3.bf16.msra.mxu1 %v23672_v36  ;;  %v6675_v56 = vand.u32 4294901760, %v6674_v53  ;;  %v6794_v39 = vand.u32 4294901760, %v6793_v13  ;;  %12620 = vmatprep.mubr.msk.f32.mxu1 %vm23561_vm10, %v22263_v9  ;;  %v23677_v60 = vld [vmem:[#allocation215_spill] sm:$0xff] }
 0x402   :  { %13233 = vmatprep.subr.bf16.mxu1 %v23543_v30  ;;  %v6682_v26 = vand.u32 4294901760, %v6681_v57  ;;  %v6807_v27 = vsub.f32 %v23673_v16, %v22158_v63  ;;  %v6695_v57 = vsub.f32 %v19992_v59, %v22161_v28  ;;  %v23679_v28 = vpack.c.bf16 %v19797_v32, %v19768_v37 }
 0x403   :  { %v6801_v35 = vand.u32 4294901760, %v6800_v47  ;;  %v6688_v8 = vsub.f32 %v23669_v61, %v22160_v44  ;;  %v20300_v36 = vpack.c.bf16 %v6675_v56, %v6668_v40  ;;  %v6814_v47 = vsub.f32 %v23674_v24, %v22159_v49 }
 0x404   :  { %v22163_v40 = vand.u32 4294901760, %v20004_v34  ;;  %v6808_v63 = vand.u32 4294901760, %v6807_v27  ;;  %v22162_v49 = vand.u32 4294901760, %v20009_v15  ;;  %v22164_v44 = vand.u32 4294901760, %v20111_v18 }
 0x405   :  { %v20302_v53 = vpack.c.bf16 %v6801_v35, %v6794_v39  ;;  %v6689_v13 = vand.u32 4294901760, %v6688_v8  ;;  %v23675_v35 = vpack.c.bf16 %v19782_v50, %v19754_v25  ;;  %v23676_v39 = vld [vmem:[#allocation35_spill] sm:$0xff]  ;;  %v6702_v8 = vsub.f32 %v19998_v5, %v22165_v11 }
 0x406   :  { %v23678_v56 = vpack.c.bf16 %v23676_v39, %v23677_v60  ;;  %v6815_v50 = vand.u32 4294901760, %v6814_v47  ;;  %v6821_v27 = vsub.f32 %v20004_v34, %v22163_v40  ;;  %v6828_v60 = vsub.f32 %v20009_v15, %v22162_v49 }
 0x407   :  { %13841 = vmatpush3.bf16.msra.mxu0 %v23675_v35  ;;  %v20330_v25 = vpack.c.bf16 %v6689_v13, %v6682_v26  ;;  %v6696_v35 = vand.u32 4294901760, %v6695_v57  ;;  %v6703_v39 = vand.u32 4294901760, %v6702_v8  ;;  %v6709_v37 = vsub.f32 %v20111_v18, %v22164_v44  ;;  %v23682_v8 = vld [vmem:[#allocation219_spill] sm:$0xff] }
 0x408   :  { %13235 = vmatpush3.bf16.msra.mxu1 %v23678_v56  ;;  %13843 = vmatprep.subr.bf16.mxu0 %v23679_v28  ;;  %v22177_v32 = vand.u32 4294901760, %v20116_v14  ;;  %v20342_v28 = vpack.c.bf16 %v6815_v50, %v6808_v63  ;;  %v6822_v26 = vand.u32 4294901760, %v6821_v27  ;;  %v22176_v13 = vand.u32 4294901760, %v20125_v62  ;;  %v23681_v56 = vld [vmem:[#allocation216_spill] sm:$0xff] }
 0x409   :  { %13236 = vmatprep.subr.bf16.mxu1 %v23543_v30  ;;  %v22170_v47 = vand.u32 4294901760, %v20130_v0  ;;  %v23680_v57 = vpack.c.bf16 %v19814_v55, %v19787_v6  ;;  %v23683_v49 = vpack.c.bf16 %v23681_v56, %v23682_v8  ;;  %v20352_v40 = vpack.c.bf16 %v6703_v39, %v6696_v35 }
 0x40a   :  { %v6829_v44 = vand.u32 4294901760, %v6828_v60  ;;  %v6710_v11 = vand.u32 4294901760, %v6709_v37  ;;  %v6716_v63 = vsub.f32 %v20116_v14, %v22177_v32  ;;  %v23684_v50 = vpack.c.bf16 %v19830_v31, %v19802_v22  ;;  %v23699_v32 = vld [vmem:[#allocation181_spill] sm:$0xff] }
 0x40b   :  { %13845 = vmatpush3.bf16.msra.mxu0 %v23680_v57  ;;  %v13850_v55 = vpack.c.bf16 %v19893_v17, %v19838_v38  ;;  %v6835_v6 = vsub.f32 %v20125_v62, %v22176_v13  ;;  %v22168_v35 = vand.u32 4294901760, %v20135_v21  ;;  %v22167_v22 = vand.u32 4294901760, %v20142_v12  ;;  %v23697_v13 = vld [vmem:[#allocation51_spill] sm:$0xff] }
 0x40c   :  { %13238 = vmatpush3.bf16.msra.mxu1 %v23683_v49  ;;  %13847 = vmatprep.subr.bf16.mxu0 %v23684_v50  ;;  %v6842_v49 = vsub.f32 %v20130_v0, %v22170_v47  ;;  %v20370_v27 = vpack.c.bf16 %v6829_v44, %v6822_v26  ;;  %v6717_v39 = vand.u32 4294901760, %v6716_v63  ;;  %v22166_v31 = vand.u32 4294901760, %v20147_v3  ;;  %v23686_v44 = vld [vmem:[#allocation89_spill] sm:$0xff]  ;;  %v23687_v50 = vld [vmem:[#allocation128_spill] sm:$0xff]  ;;  %v23693_v47 = vld [vmem:[#allocation214_spill] sm:$0xff] }
 0x40d   :  { %13239 = vmatprep.subr.bf16.mxu1 %v23543_v30  ;;  %v6836_v38 = vand.u32 4294901760, %v6835_v6  ;;  %v6723_v60 = vsub.f32 %v20135_v21, %v22168_v35  ;;  %v22169_v37 = vand.u32 4294901760, %v20154_v7  ;;  %v23685_v57 = vpack.c.bf16 %v19849_v1, %v19817_v46  ;;  %v23688_v46 = vld [vmem:[#allocation5_spill] sm:$0xff] }
 0x40e   :  { %v6843_v17 = vand.u32 4294901760, %v6842_v49  ;;  %v20383_v26 = vpack.c.bf16 %v6717_v39, %v6710_v11  ;;  %v6730_v56 = vsub.f32 %v20142_v12, %v22167_v22  ;;  %v6849_v8 = vsub.f32 %v20147_v3, %v22166_v31  ;;  %v23689_v22 = vld [vmem:[#allocation71_spill] sm:$0xff] }
 0x40f   :  { %12621 = vmatmul.mubr.f32.vlgmr.msra.gmra.mrb[44].mxu1 %v19933_v4  ;;  %13849 = vmatpush3.bf16.msra.mxu0 %v23685_v57  ;;  %v22171_v63 = vand.u32 4294901760, %v20159_v42  ;;  %v13852_v1 = vpack.c.bf16 %v23688_v46, %v23687_v50  ;;  %v6724_v11 = vand.u32 4294901760, %v6723_v60  ;;  %v6856_v49 = vsub.f32 %v20154_v7, %v22169_v37 }
 0x410   :  { %13241 = vmatpush3.bf16.msra.mxu1 %v23686_v44  ;;  %13851 = vmatprep.subr.bf16.mxu0 %v13850_v55  ;;  %v20395_v6 = vpack.c.bf16 %v6843_v17, %v6836_v38  ;;  %v6731_v39 = vand.u32 4294901760, %v6730_v56  ;;  %v6850_v57 = vand.u32 4294901760, %v6849_v8  ;;  %v22175_v31 = vand.u32 4294901760, %v20167_v45  ;;  %v23691_v38 = vld [vmem:[#allocation178_spill] sm:$0xff] }
 0x411   :  { %13242 = vmatprep.subr.bf16.mxu1 %v23543_v30  ;;  %12635 = vmatprep.mubr.msk.f32.mxu1 %vm23561_vm10, %v22263_v9  ;;  %v6737_v55 = vsub.f32 %v20159_v42, %v22171_v63  ;;  %v23690_v50 = vand.u32 4294901760, %v23689_v22  ;;  %v23692_v17 = vand.u32 4294901760, %v23691_v38  ;;  %v6857_v46 = vand.u32 4294901760, %v6856_v49 }
 0x412   :  { %v22174_v35 = vand.u32 4294901760, %v20179_v23  ;;  %v22172_v37 = vand.u32 4294901760, %v20184_v41  ;;  %v20413_v56 = vpack.c.bf16 %v6731_v39, %v6724_v11  ;;  %v6744_v63 = vsub.f32 %v20167_v45, %v22175_v31  ;;  %v23705_v31 = vld [vmem:[#allocation217_spill] sm:$0xff] }
 0x413   :  { %v13886_v60 = vpack.c.bf16 %v23692_v17, %v23690_v50  ;;  %13853 = vmatpush3.bf16.msra.mxu0 %v13852_v1  ;;  %v6738_v8 = vand.u32 4294901760, %v6737_v55  ;;  %v22173_v22 = vand.u32 4294901760, %v20191_v33  ;;  %v20420_v49 = vpack.c.bf16 %v6857_v46, %v6850_v57  ;;  %v23696_v57 = vld [vmem:[#allocation196_spill] sm:$0xff] }
 0x414   :  { %13244 = vmatpush3.bf16.msra.mxu1 %v23693_v47  ;;  %v6863_v1 = vsub.f32 %v20179_v23, %v22174_v35  ;;  %v6870_v11 = vsub.f32 %v20184_v41, %v22172_v37  ;;  %v22178_v39 = vand.u32 4294901760, %v20196_v48  ;;  %v6745_v55 = vand.u32 4294901760, %v6744_v63  ;;  %v23694_v37 = vld [vmem:[#allocation113_spill] sm:$0xff] }
 0x415   :  { %13887 = vmatprep.subr.bf16.mxu0 %v13886_v60  ;;  %13245 = vmatprep.subr.bf16.mxu1 %v23543_v30  ;;  %v6751_v50 = vsub.f32 %v20191_v33, %v22173_v22  ;;  %v23695_v22 = vld [vmem:[#allocation218_spill] sm:$0xff]  ;;  %vm10679_vm14 = vcmask 1044480  }
 0x416   :  { %9760 = vmatmul.mubr.f32.vlgmr.msra.gmra.mrb[54].mxu0 %v22263_v9  ;;  %v6864_v17 = vand.u32 4294901760, %v6863_v1  ;;  %v6871_v60 = vand.u32 4294901760, %v6870_v11  ;;  %v6758_v46 = vsub.f32 %v20196_v48, %v22178_v39  ;;  %v20444_v35 = vpack.c.bf16 %v6745_v55, %v6738_v8  ;;  %v23698_v1 = vld [vmem:[#allocation177_spill] sm:$0xff] }
 0x417   :  { %13889 = vmatpush3.bf16.msra.mxu0 %v23694_v37  ;;  %v6752_v38 = vand.u32 4294901760, %v6751_v50  ;;  %v23701_v55 = vmov 1.0   ;;  %v23704_v11 = vld [vmem:[#allocation129_spill] sm:$0xff]  ;;  %v23707_v8 = vand.u32 4294901760, %v23641_v43  ;;  %v23709_v37 = vld [vmem:[#allocation83_spill] sm:$0xff]  ;;  %v23715_v50 = vand.u32 4294901760, %v23649_v58 }
 0x418   :  { %13247 = vmatpush3.bf16.msra.mxu1 %v23695_v22  ;;  %13891 = vmatprep.subr.bf16.mxu0 %v23699_v32  ;;  %v20452_v39 = vpack.c.bf16 %v6871_v60, %v6864_v17  ;;  %v6759_v63 = vand.u32 4294901760, %v6758_v46  ;;  %v23702_v60 = vld [vmem:[#allocation81_spill] sm:$0xff] }
 0x419   :  { %13248 = vmatprep.subr.bf16.mxu1 %v23543_v30  ;;  %10034 = vmatprep.mubr.f32.mxu0 %v23701_v55 }
 0x41a   :  { %23700 = vst [vmem:[#allocation2_spill] sm:$0xff] %v20452_v39  ;;  %v20468_v46 = vpack.c.bf16 %v6759_v63, %v6752_v38  ;;  %v23706_v63 = vand.u32 4294901760, %v23629_v29  ;;  %v23710_v39 = vld [vmem:[#allocation9_spill] sm:$0xff]  ;;  %v23714_v38 = vand.u32 4294901760, %v23648_v52 }
 0x41b   :  { %12636 = vmatmul.mubr.f32.vlgmr.msra.gmra.mrb[44].mxu1 %v23702_v60  ;;  %13893 = vmatpush3.bf16.msra.mxu0 %v23704_v11  ;;  %v23712_v11 = vand.u32 4294901760, %v23647_v19 }
 0x41c   :  { %23703 = vst [vmem:[#allocation164_spill] sm:$0xff] %v20468_v46  ;;  %13250 = vmatpush3.bf16.msra.mxu1 %v23705_v31  ;;  %v20486_v32 = vpack.c.bf16 %v23707_v8, %v23706_v63  ;;  %v4529_v46 = vmul.f32 0.6931472, %v23709_v37  ;;  %13895 = vmatprep.subr.bf16.mxu0 %v23710_v39  ;;  %v23711_v31 = vand.u32 4294901760, %v23645_v2  ;;  %v20501_v29 = vpack.c.bf16 %v23715_v50, %v23714_v38  ;;  %v11218_v39 = vpop.f32.mrb[32].mxu1 }
 0x41d   :  { %13251 = vmatprep.subr.bf16.mxu1 %v23543_v30  ;;  %v23717_v8 = vand.u32 4294901760, %v23653_v20  ;;  %v23718_v37 = vand.u32 4294901760, %v23696_v57  ;;  %12650 = vmatprep.mubr.msk.f32.mxu1 %vm23561_vm10, %v22263_v9  ;;  %v23724_v50 = vand.u32 4294901760, %v23669_v61  ;;  %v23728_v57 = vld [vmem:[#allocation221_spill] sm:$0xff] }
 0x41e   :  { %23708 = vst [vmem:[#allocation116_spill] sm:$0xff] %v20486_v32  ;;  %v20495_v17 = vpack.c.bf16 %v23712_v11, %v23711_v31  ;;  %23716 = vst [vmem:[#allocation189_spill] sm:$0xff] %v20501_v29  ;;  %v23720_v32 = vand.u32 4294901760, %v23697_v13  ;;  %v23721_v31 = vand.u32 4294901760, %v23698_v1  ;;  %v23726_v29 = vld [vmem:[#allocation90_spill] sm:$0xff]  ;;  %v23729_v13 = vld [vmem:[#allocation159_spill] sm:$0xff] }
 0x41f   :  { %v20507_v63 = vpack.c.bf16 %v23718_v37, %v23717_v8  ;;  %v4527_v20 = vmul.f32 0.6931472, %v23726_v29  ;;  %v11219_v8 = vpop.f32.mrb[33].mxu1  ;;  %v4571_v52 = vadd.f32 %v4529_v46, %v23729_v13  ;;  %v23730_v1 = vld [vmem:[#allocation199_spill] sm:$0xff]  ;;  %v23738_v13 = vand.u32 4294901760, %v20004_v34 }
 0x420   :  { %23713 = vst [vmem:[#allocation86_spill] sm:$0xff] %v20495_v17  ;;  %v20515_v11 = vpack.c.bf16 %v23721_v31, %v23720_v32  ;;  %v23723_v17 = vand.u32 4294901760, %v19966_v51  ;;  %v20524_v37 = vadd.f32 %v11219_v8, %v11218_v39  ;;  %13253 = vmatpush3.bf16.msra.mxu1 %v23728_v57  ;;  %v4533_v32 = vmul.f32 0.6931472, %v23730_v1  ;;  %v23731_v31 = vld [vmem:[#allocation73_spill] sm:$0xff] }
 0x421   :  { %23719 = vst [vmem:[#allocation14_spill] sm:$0xff] %v20507_v63  ;;  %v23727_v63 = vld [vmem:[#allocation62_spill] sm:$0xff]  ;;  %13254 = vmatprep.subr.bf16.mxu1 %v23543_v30  ;;  %v23735_v39 = vand.u32 4294901760, %v19992_v59  ;;  %v23739_v57 = vand.u32 4294901760, %v20009_v15  ;;  %v23741_v46 = vand.u32 4294901760, %v20111_v18  ;;  %v23746_v59 = vld [vmem:[#allocation115_spill] sm:$0xff] }
 0x422   :  { %23722 = vst [vmem:[#allocation94_spill] sm:$0xff] %v20515_v11  ;;  %v20521_v38 = vpack.c.bf16 %v23724_v50, %v23723_v17  ;;  %13897 = vmatpush3.bf16.msra.mxu0 %v23727_v63  ;;  %v23732_v17 = vand.u32 4294901760, %v23673_v16  ;;  %v23733_v50 = vand.u32 4294901760, %v23674_v24  ;;  %v23736_v63 = vand.u32 4294901760, %v19998_v5 }
 0x423   :  { %13899 = vmatprep.subr.bf16.mxu0 %v23731_v31  ;;  %v20548_v1 = vpack.c.bf16 %v23739_v57, %v23738_v13  ;;  %v23742_v31 = vand.u32 4294901760, %v20116_v14  ;;  %v23751_v57 = vld [vmem:[#allocation171_spill] sm:$0xff] }
 0x424   :  { %23725 = vst [vmem:[#allocation135_spill] sm:$0xff] %v20521_v38  ;;  %v20536_v29 = vpack.c.bf16 %v23733_v50, %v23732_v17  ;;  %v20542_v8 = vpack.c.bf16 %v23736_v63, %v23735_v39  ;;  %v23744_v17 = vld [vmem:[#allocation157_spill] sm:$0xff]  ;;  %v23747_v39 = vld [vmem:[#allocation222_spill] sm:$0xff]  ;;  %v23748_v63 = vand.u32 4294901760, %v20125_v62  ;;  %v23758_v62 = vld [vmem:[#allocation120_spill] sm:$0xff] }
 0x425   :  { %23740 = vst [vmem:[#allocation166_spill] sm:$0xff] %v20548_v1  ;;  %v20554_v38 = vpack.c.bf16 %v23742_v31, %v23741_v46  ;;  %v4570_v50 = vadd.f32 %v4527_v20, %v23744_v17  ;;  %13256 = vmatpush3.bf16.msra.mxu1 %v23747_v39  ;;  %v23752_v46 = vand.u32 4294901760, %v20135_v21  ;;  %v23753_v20 = vand.u32 4294901760, %v20142_v12  ;;  %v23756_v17 = vld [vmem:[#allocation18_spill] sm:$0xff]  ;;  %v23762_v21 = vld [vmem:[#allocation77_spill] sm:$0xff] }
 0x426   :  { %23734 = vst [vmem:[#allocation130_spill] sm:$0xff] %v20536_v29  ;;  %23737 = vst [vmem:[#allocation57_spill] sm:$0xff] %v20542_v8  ;;  %v23745_v29 = vld [vmem:[#allocation187_spill] sm:$0xff]  ;;  %13901 = vmatpush3.bf16.msra.mxu0 %v23746_v59  ;;  %v23749_v8 = vand.u32 4294901760, %v20130_v0  ;;  %13257 = vmatprep.subr.bf16.mxu1 %v23543_v30  ;;  %v4573_v39 = vadd.f32 %v4533_v32, %v23756_v17  ;;  %v23770_v17 = vld [vmem:[#allocation165_spill] sm:$0xff] }
 0x427   :  { %23743 = vst [vmem:[#allocation139_spill] sm:$0xff] %v20554_v38  ;;  %v4531_v11 = vmul.f32 0.6931472, %v23745_v29  ;;  %13903 = vmatprep.subr.bf16.mxu0 %v23751_v57  ;;  %v20572_v31 = vpack.c.bf16 %v23753_v20, %v23752_v46  ;;  %v23755_v29 = vld [vmem:[#allocation125_spill] sm:$0xff]  ;;  %v4608_v0 = vsub.f32 %v4570_v50, %v23758_v62  ;;  %v23761_v57 = vld [vmem:[#allocation52_spill] sm:$0xff]  ;;  %v23763_v46 = vand.u32 4294901760, %v20147_v3 }
 0x428   :  { %v20564_v13 = vpack.c.bf16 %v23749_v8, %v23748_v63  ;;  %v4609_v59 = vsub.f32 %v4571_v52, %v23755_v29  ;;  %v23757_v38 = vld [vmem:[#allocation137_spill] sm:$0xff]  ;;  %12651 = vmatmul.mubr.msk.f32.vlgmr.msra.gmra.mrb[44].mxu1 %vm23759_vm9, %v23666_v10  ;;  %v23760_v8 = vld [vmem:[#allocation91_spill] sm:$0xff]  ;;  %v23764_v52 = vand.u32 4294901760, %v20154_v7  ;;  %v23767_v50 = vand.u32 4294901760, %v20159_v42  ;;  %v23776_v42 = vld [vmem:[#allocation76_spill] sm:$0xff] }
 0x429   :  { %23754 = vst [vmem:[#allocation104_spill] sm:$0xff] %v20572_v31  ;;  %v4537_v1 = vmul.f32 0.6931472, %v23757_v38  ;;  %v4572_v63 = vadd.f32 %v4531_v11, %v23760_v8  ;;  %13259 = vmatpush3.bf16.msra.mxu1 %v23686_v44  ;;  %v23766_v38 = vld [vmem:[#allocation146_spill] sm:$0xff]  ;;  %v23768_v11 = vand.u32 4294901760, %v20167_v45  ;;  %v23771_v8 = vld [vmem:[#allocation133_spill] sm:$0xff]  ;;  %12665 = vmatprep.mubr.msk.f32.mxu1 %vm23561_vm10, %v22263_v9 }
 0x42a   :  { %23750 = vst [vmem:[#allocation167_spill] sm:$0xff] %v20564_v13  ;;  %v4535_v13 = vmul.f32 0.6931472, %v23761_v57  ;;  %13905 = vmatpush3.bf16.msra.mxu0 %v23762_v21  ;;  %v20588_v32 = vpack.c.bf16 %v23764_v52, %v23763_v46  ;;  %13260 = vmatprep.subr.bf16.mxu1 %v23543_v30  ;;  %v4647_v21 = vmul.f32 %v23770_v17, %v4609_v59  ;;  %v23772_v57 = vld [vmem:[#allocation152_spill] sm:$0xff]  ;;  %v23773_v46 = vld [vmem:[#allocation161_spill] sm:$0xff]  ;;  %v23778_v59 = vand.u32 4294901760, %v20184_v41 }
 0x42b   :  { %13907 = vmatprep.subr.bf16.mxu0 %v23766_v38  ;;  %v20596_v20 = vpack.c.bf16 %v23768_v11, %v23767_v50  ;;  %v4611_v44 = vsub.f32 %v4573_v39, %v23771_v8  ;;  %v4575_v29 = vadd.f32 %v4537_v1, %v23772_v57  ;;  %v4646_v52 = vmul.f32 %v23773_v46, %v4608_v0  ;;  %v23774_v38 = vld [vmem:[#allocation131_spill] sm:$0xff]  ;;  %v23780_v1 = vld [vmem:[#allocation74_spill] sm:$0xff]  ;;  %v23786_v57 = vld [vmem:[#allocation84_spill] sm:$0xff] }
 0x42c   :  { %23765 = vst [vmem:[#allocation134_spill] sm:$0xff] %v20588_v32  ;;  %v4610_v62 = vsub.f32 %v4572_v63, %v23774_v38  ;;  %v23775_v32 = vld [vmem:[#allocation183_spill] sm:$0xff]  ;;  %v23777_v50 = vand.u32 4294901760, %v20179_v23  ;;  %v23781_v0 = vand.u32 4294901760, %v20191_v33  ;;  %v23782_v63 = vand.u32 4294901760, %v20196_v48  ;;  %v23787_v8 = vld [vmem:[#allocation140_spill] sm:$0xff] }
 0x42d   :  { %23769 = vst [vmem:[#allocation195_spill] sm:$0xff] %v20596_v20  ;;  %v4574_v31 = vadd.f32 %v4535_v13, %v23775_v32  ;;  %13262 = vmatpush3.bf16.msra.mxu1 %v23693_v47  ;;  %v23784_v13 = vld [vmem:[#allocation66_spill] sm:$0xff]  ;;  %v23785_v32 = vld [vmem:[#allocation145_spill] sm:$0xff]  ;;  %v10149_v17 = vand.u32 4294901760, %v4647_v21  ;;  %v23789_v38 = vld [vmem:[#allocation39_spill] sm:$0xff] }
 0x42e   :  { %13909 = vmatpush3.bf16.msra.mxu0 %v23776_v42  ;;  %v20612_v39 = vpack.c.bf16 %v23778_v59, %v23777_v50  ;;  %13263 = vmatprep.subr.bf16.mxu1 %v23543_v30  ;;  %v20620_v11 = vpack.c.bf16 %v23782_v63, %v23781_v0  ;;  %v4649_v42 = vmul.f32 %v23784_v13, %v4611_v44  ;;  %v23788_v59 = vld [vmem:[#allocation148_spill] sm:$0xff]  ;;  %v23791_v0 = vld [vmem:[#allocation46_spill] sm:$0xff] }
 0x42f   :  { %13911 = vmatprep.subr.bf16.mxu0 %v23780_v1  ;;  %v4613_v47 = vsub.f32 %v4575_v29, %v23785_v32  ;;  %v4648_v46 = vmul.f32 %v23786_v57, %v4610_v62  ;;  %v4612_v50 = vsub.f32 %v4574_v31, %v23787_v8  ;;  %v10146_v1 = vand.u32 4294901760, %v4646_v52  ;;  %v23793_v62 = vld [vmem:[#allocation96_spill] sm:$0xff]  ;;  %v23795_v13 = vld [vmem:[#allocation118_spill] sm:$0xff] }
 0x430   :  { %23779 = vst [vmem:[#allocation192_spill] sm:$0xff] %v20612_v39  ;;  %23783 = vst [vmem:[#allocation72_spill] sm:$0xff] %v20620_v11  ;;  %v23790_v39 = vld [vmem:[#allocation103_spill] sm:$0xff]  ;;  %v20631_v11 = vsub.f32 %v4647_v21, %v10149_v17  ;;  %v10155_v44 = vand.u32 4294901760, %v4649_v42  ;;  %v23794_v31 = vld [vmem:[#allocation188_spill] sm:$0xff] }
 0x431   :  { %13265 = vmatpush3.bf16.msra.mxu1 %v23695_v22  ;;  %v4651_v63 = vmul.f32 %v23791_v0, %v4613_v47  ;;  %v4650_v29 = vmul.f32 %v23793_v62, %v4612_v50  ;;  %v20638_v22 = vsub.f32 %v4646_v52, %v10146_v1  ;;  %v10152_v57 = vand.u32 4294901760, %v4648_v46  ;;  %v23797_v52 = vld [vmem:[#allocation144_spill] sm:$0xff] }
 0x432   :  { %13913 = vmatpush3.bf16.msra.mxu0 %v23788_v59  ;;  %13267 = vmatprep.subr.bf16.mxu1 %v23790_v39  ;;  %v20642_v39 = vpack.c.bf16 %v10149_v17, %v10146_v1  ;;  %v20644_v21 = vsub.f32 %v4649_v42, %v10155_v44  ;;  %v22190_v59 = vand.u32 4294901760, %v20631_v11  ;;  %v23798_v42 = vld [vmem:[#allocation92_spill] sm:$0xff] }
 0x433   :  { %13915 = vmatprep.subr.bf16.mxu0 %v23789_v38  ;;  %v23796_v38 = vld [vmem:[#allocation123_spill] sm:$0xff]  ;;  %v10161_v47 = vand.u32 4294901760, %v4651_v63  ;;  %v20651_v50 = vsub.f32 %v4648_v46, %v10152_v57  ;;  %v10158_v0 = vand.u32 4294901760, %v4650_v29  ;;  %v22191_v62 = vand.u32 4294901760, %v20638_v22 }
 0x434   :  { %12666 = vmatmul.mubr.msk.f32.vlgmr.msra.gmra.mrb[44].mxu1 %vm23792_vm6, %v23666_v10  ;;  %v20656_v17 = vpack.c.bf16 %v10155_v44, %v10152_v57  ;;  %v22192_v46 = vand.u32 4294901760, %v20644_v21  ;;  %v23800_v57 = vld [vmem:[#allocation122_spill] sm:$0xff] }
 0x435   :  { %13269 = vmatpush3.bf16.msra.mxu1 %v23795_v13  ;;  %6638 = vmatprep.mubr.f32.mxu1 %v22263_v9  ;;  %v20658_v1 = vsub.f32 %v4651_v63, %v10161_v47  ;;  %v23799_v13 = vld [vmem:[#allocation109_spill] sm:$0xff]  ;;  %v10230_v63 = vsub.f32 %v20638_v22, %v22191_v62  ;;  %v23801_v62 = vld [vmem:[#allocation143_spill] sm:$0xff]  ;;  %v23802_v20 = vand.u32 4294901760, %v20651_v50 }
 0x436   :  { %13917 = vmatpush3.bf16.msra.mxu0 %v23794_v31  ;;  %13271 = vmatprep.subr.bf16.mxu1 %v23796_v38  ;;  %v10237_v31 = vsub.f32 %v20631_v11, %v22190_v59  ;;  %v20668_v38 = vsub.f32 %v4650_v29, %v10158_v0 }
 0x437   :  { %13950 = vmatprep.subr.bf16.mxu0 %v23543_v30  ;;  %v10231_v44 = vand.u32 4294901760, %v10230_v63  ;;  %v23806_v63 = vld [vmem:[#allocation142_spill] sm:$0xff] }
 0x438   :  { %v10238_v59 = vand.u32 4294901760, %v10237_v31 }
 0x439   :  { %10036 = vmatmul.mubr.f32.vlgmr.msra.gmra.mrb[56].mxu0 %v23701_v55  ;;  %13273 = vmatpush3.bf16.msra.mxu1 %v23797_v52  ;;  %v11253_v52 = vpop.f32.mrb[34].mxu1 }
 0x43a   :  { %13952 = vmatpush3.bf16.msra.mxu0 %v20642_v39  ;;  %13275 = vmatprep.subr.bf16.mxu1 %v23798_v42  ;;  %v20676_v42 = vpack.c.bf16 %v10161_v47, %v10158_v0  ;;  %v11254_v32 = vpop.f32.mrb[35].mxu1  ;;  %v10257_v47 = vand.u32 4294901760, %v20668_v38  ;;  %v23803_v0 = vld [vmem:[#allocation138_spill] sm:$0xff] }
 0x43b   :  { %13953 = vmatprep.subr.bf16.mxu0 %v23543_v30  ;;  %12860 = vmatprep.mubr.msk.f32.mxu0 %vm23561_vm10, %v22263_v9  ;;  %v11255_v8 = vadd.f32 %v11254_v32, %v11253_v52  ;;  %v23804_v32 = vand.u32 4294901760, %v20658_v1 }
 0x43c   :  { %v10258_v33 = vsub.f32 %v20668_v38, %v10257_v47 }
 0x43d   :  { %13277 = vmatpush3.bf16.msra.mxu1 %v23799_v13  ;;  %v10251_v13 = vsub.f32 %v20644_v21, %v22192_v46  ;;  %v5505_v31 = vadd.f32 %v11255_v8, %v20524_v37  ;;  %v13960_v46 = vpack.c.bf16 %v10238_v59, %v10231_v44  ;;  %v10265_v52 = vsub.f32 %v20658_v1, %v23804_v32  ;;  %v23808_v59 = vld [vmem:[#allocation194_spill] sm:$0xff]  ;;  %v23809_v44 = vld [vmem:[#allocation169_spill] sm:$0xff]  ;;  %v23811_v32 = vld [vmem:[#allocation207_spill] sm:$0xff] }
 0x43e   :  { %13955 = vmatpush3.bf16.msra.mxu0 %v20656_v17  ;;  %13279 = vmatprep.subr.bf16.mxu1 %v23800_v57  ;;  %v10244_v57 = vsub.f32 %v20651_v50, %v23802_v20 }
 0x43f   :  { %13956 = vmatprep.subr.bf16.mxu0 %v23543_v30  ;;  %v10252_v29 = vand.u32 4294901760, %v10251_v13  ;;  %v10266_v8 = vand.u32 4294901760, %v10265_v52  ;;  %v23814_v52 = vld [vmem:[#allocation124_spill] sm:$0xff] }
 0x440   :  { %v10245_v20 = vand.u32 4294901760, %v10244_v57  ;;  %v23810_v57 = vld [vmem:[#allocation203_spill] sm:$0xff] }
 0x441   :  { %13281 = vmatpush3.bf16.msra.mxu1 %v23801_v62  ;;  %v23805_v62 = vld [vmem:[#allocation149_spill] sm:$0xff] }
 0x442   :  { %13958 = vmatpush3.bf16.msra.mxu0 %v20676_v42  ;;  %13283 = vmatprep.subr.bf16.mxu1 %v23803_v0  ;;  %v23807_v0 = vld [vmem:[#allocation163_spill] sm:$0xff]  ;;  %v13963_v37 = vpack.c.bf16 %v10252_v29, %v10245_v20  ;;  %v13969_v29 = vpack.c.bf16 %v20631_v11, %v20638_v22 }
 0x443   :  { %13959 = vmatprep.subr.bf16.mxu0 %v23543_v30  ;;  %v23815_v20 = vld [vmem:[#allocation155_spill] sm:$0xff] }
 0x445   :  { %12861 = vmatmul.mubr.f32.vlgmr.msra.gmra.mrb[58].mxu0 %v23805_v62  ;;  %13285 = vmatpush3.bf16.msra.mxu1 %v23806_v63  ;;  %v13972_v63 = vpack.c.bf16 %v20644_v21, %v20651_v50 }
 0x446   :  { %13961 = vmatpush3.bf16.msra.mxu0 %v13960_v46  ;;  %13287 = vmatprep.subr.bf16.mxu1 %v23807_v0  ;;  %v10259_v46 = vand.u32 4294901760, %v10258_v33  ;;  %v23813_v33 = vld [vmem:[#allocation210_spill] sm:$0xff]  ;;  %v13975_v0 = vpack.c.bf16 %v20658_v1, %v20668_v38 }
 0x447   :  { %13962 = vmatprep.subr.bf16.mxu0 %v23543_v30  ;;  %12875 = vmatprep.mubr.msk.f32.mxu0 %vm23561_vm10, %v22263_v9  ;;  %v23830_v38 = vld [vmem:[#allocation58_spill] sm:$0xff] }
 0x448   :  { %v13966_v13 = vpack.c.bf16 %v10266_v8, %v10259_v46 }
 0x449   :  { %13289 = vmatpush3.bf16.msra.mxu1 %v23808_v59 }
 0x44a   :  { %13964 = vmatpush3.bf16.msra.mxu0 %v13963_v37  ;;  %13291 = vmatprep.subr.bf16.mxu1 %v23809_v44  ;;  %v23838_v44 = vld [vmem:[#allocation184_spill] sm:$0xff] }
 0x44b   :  { %13965 = vmatprep.subr.bf16.mxu0 %v23543_v30 }
 0x44d   :  { %13293 = vmatpush3.bf16.msra.mxu1 %v23810_v57 }
 0x44e   :  { %13967 = vmatpush3.bf16.msra.mxu0 %v13966_v13  ;;  %13295 = vmatprep.subr.bf16.mxu1 %v23811_v32  ;;  %v23839_v13 = vpack.c.bf16 %v19998_v5, %v23838_v44  ;;  %v23845_v32 = vld [vmem:[#allocation102_spill] sm:$0xff]  ;;  %v23847_v5 = vpack.c.bf16 %v20154_v7, %v20147_v3  ;;  %v23855_v3 = vld [vmem:[#allocation189_spill] sm:$0xff] }
 0x44f   :  { %13968 = vmatprep.subr.bf16.mxu0 %v23543_v30  ;;  %v23856_v7 = vld [vmem:[#allocation14_spill] sm:$0xff] }
 0x451   :  { %12876 = vmatmul.mubr.msk.f32.vlgmr.msra.gmra.mrb[58].mxu0 %vm23812_vm1, %v23666_v10  ;;  %13297 = vmatpush3.bf16.msra.mxu1 %v23813_v33 }
 0x452   :  { %13970 = vmatpush3.bf16.msra.mxu0 %v13969_v29  ;;  %13299 = vmatprep.subr.bf16.mxu1 %v23814_v52  ;;  %v23846_v29 = vpack.c.bf16 %v20142_v12, %v23845_v32  ;;  %v23853_v52 = vld [vmem:[#allocation116_spill] sm:$0xff]  ;;  %v23854_v12 = vld [vmem:[#allocation86_spill] sm:$0xff] }
 0x453   :  { %13971 = vmatprep.subr.bf16.mxu0 %v23543_v30  ;;  %12890 = vmatprep.mubr.msk.f32.mxu0 %vm23561_vm10, %v22263_v9 }
 0x454   :  { %6644 = vmatmul.mubr.f32.vlgmr.msra.gmra.mrb[46].mxu1 %v22263_v9 }
 0x455   :  { %13301 = vmatpush3.bf16.msra.mxu1 %v23815_v20  ;;  %6874 = vmatprep.mubr.f32.mxu1 %v23701_v55 }
 0x456   :  { %13973 = vmatpush3.bf16.msra.mxu0 %v13972_v63  ;;  %13303 = vmatprep.subr.bf16.mxu1 %v20282_v54  ;;  %v11288_v54 = vpop.f32.mrb[36].mxu1 }
 0x457   :  { %13974 = vmatprep.subr.bf16.mxu0 %v23543_v30  ;;  %v11289_v37 = vpop.f32.mrb[37].mxu1 }
 0x459   :  { %13305 = vmatpush3.bf16.msra.mxu1 %v20300_v36  ;;  %v11290_v36 = vadd.f32 %v11289_v37, %v11288_v54  ;;  %v23861_v54 = vld [vmem:[#allocation166_spill] sm:$0xff] }
 0x45a   :  { %13976 = vmatpush3.bf16.msra.mxu0 %v13975_v0  ;;  %13307 = vmatprep.subr.bf16.mxu1 %v20302_v53  ;;  %v23860_v0 = vld [vmem:[#allocation57_spill] sm:$0xff] }
 0x45b   :  { %13977 = vmatprep.subr.bf16.mxu0 %v23543_v30  ;;  %v5643_v53 = vadd.f32 %v11290_v36, %v5505_v31  ;;  %v23836_v31 = vpack.c.bf16 %v23674_v24, %v23673_v16  ;;  %v23842_v16 = vld [vmem:[#allocation34_spill] sm:$0xff]  ;;  %v23843_v24 = vld [vmem:[#allocation68_spill] sm:$0xff]  ;;  %v23862_v36 = vld [vmem:[#allocation139_spill] sm:$0xff] }
 0x45c   :  { %v23844_v57 = vpack.c.bf16 %v23842_v16, %v23843_v24 }
 0x45d   :  { %12891 = vmatmul.mubr.f32.vlgmr.msra.gmra.mrb[58].mxu0 %v19933_v4  ;;  %13309 = vmatpush3.bf16.msra.mxu1 %v20330_v25  ;;  %v23816_v25 = vand.u32 4294901760, %v20638_v22  ;;  %v23823_v22 = vld [vmem:[#allocation22_spill] sm:$0xff] }
 0x45e   :  { %13979 = vmatpush3.bf16.msra.mxu0 %v20642_v39  ;;  %13311 = vmatprep.subr.bf16.mxu1 %v20342_v28  ;;  %v23817_v28 = vand.u32 4294901760, %v20631_v11  ;;  %v23822_v11 = vld [vmem:[#allocation164_spill] sm:$0xff] }
 0x45f   :  { %13980 = vmatprep.subr.bf16.mxu0 %v23543_v30  ;;  %12905 = vmatprep.mubr.msk.f32.mxu0 %vm23561_vm10, %v22263_v9 }
 0x460   :  { %v13987_v8 = vpack.c.bf16 %v23817_v28, %v23816_v25  ;;  %v23864_v25 = vld [vmem:[#allocation104_spill] sm:$0xff]  ;;  %v23865_v28 = vld [vmem:[#allocation134_spill] sm:$0xff] }
 0x461   :  { %13313 = vmatpush3.bf16.msra.mxu1 %v20352_v40  ;;  %v23818_v40 = vand.u32 4294901760, %v20651_v50  ;;  %v23827_v50 = vld [vmem:[#allocation186_spill] sm:$0xff] }
 0x462   :  { %13982 = vmatpush3.bf16.msra.mxu0 %v20656_v17  ;;  %13315 = vmatprep.subr.bf16.mxu1 %v20370_v27  ;;  %v23819_v27 = vand.u32 4294901760, %v20644_v21  ;;  %v23824_v21 = vpack.c.bf16 %v23641_v43, %v23823_v22  ;;  %v23829_v43 = vld [vmem:[#allocation196_spill] sm:$0xff]  ;;  %v23870_v22 = vld [vmem:[#allocation131_spill] sm:$0xff] }
 0x463   :  { %13983 = vmatprep.subr.bf16.mxu0 %v23543_v30 }
 0x465   :  { %13317 = vmatpush3.bf16.msra.mxu1 %v20383_v26  ;;  %v13990_v26 = vpack.c.bf16 %v23819_v27, %v23818_v40  ;;  %v23867_v27 = vld [vmem:[#allocation125_spill] sm:$0xff] }
 0x466   :  { %13985 = vmatpush3.bf16.msra.mxu0 %v20676_v42  ;;  %13319 = vmatprep.subr.bf16.mxu1 %v20395_v6  ;;  %v23820_v6 = vld [vmem:[#allocation2_spill] sm:$0xff] }
 0x467   :  { %13986 = vmatprep.subr.bf16.mxu0 %v23543_v30 }
 0x469   :  { %12906 = vmatmul.mubr.f32.vlgmr.msra.gmra.mrb[58].mxu0 %v23702_v60  ;;  %13321 = vmatpush3.bf16.msra.mxu1 %v20413_v56  ;;  %v23821_v56 = vand.u32 4294901760, %v20658_v1  ;;  %v23828_v1 = vpack.c.bf16 %v23649_v58, %v23827_v50  ;;  %v23835_v58 = vpack.c.bf16 %v23669_v61, %v19966_v51  ;;  %v23841_v61 = vpack.c.bf16 %v20116_v14, %v20111_v18  ;;  %v23851_v14 = vld [vmem:[#allocation98_spill] sm:$0xff] }
 0x46a   :  { %13988 = vmatpush3.bf16.msra.mxu0 %v13987_v8  ;;  %13323 = vmatprep.subr.bf16.mxu1 %v20420_v49  ;;  %v23850_v18 = vpack.c.bf16 %v20184_v41, %v20179_v23  ;;  %v23852_v33 = vpack.c.bf16 %v20196_v48, %v23851_v14  ;;  %v23858_v23 = vld [vmem:[#allocation135_spill] sm:$0xff]  ;;  %v23859_v41 = vld [vmem:[#allocation130_spill] sm:$0xff]  ;;  %v23866_v8 = vld [vmem:[#allocation120_spill] sm:$0xff] }
 0x46b   :  { %13989 = vmatprep.subr.bf16.mxu0 %v23543_v30  ;;  %12920 = vmatprep.mubr.msk.f32.mxu0 %vm23561_vm10, %v22263_v9  ;;  %v13993_v49 = vpack.c.bf16 %v23821_v56, %v10257_v47  ;;  %v7400_v40 = vand.u32 4294901760, %v23866_v8 }
 0x46d   :  { %13325 = vmatpush3.bf16.msra.mxu1 %v20444_v35  ;;  %v23826_v35 = vpack.c.bf16 %v23647_v19, %v23645_v2  ;;  %v23832_v2 = vld [vmem:[#allocation177_spill] sm:$0xff]  ;;  %v23833_v19 = vld [vmem:[#allocation51_spill] sm:$0xff]  ;;  %v20848_v56 = vsub.f32 %v23866_v8, %v7400_v40 }
 0x46e   :  { %13991 = vmatpush3.bf16.msra.mxu0 %v13990_v26  ;;  %13327 = vmatprep.subr.bf16.mxu1 %v23820_v6  ;;  %v23834_v47 = vpack.c.bf16 %v23832_v2, %v23833_v19  ;;  %v7403_v26 = vand.u32 4294901760, %v23867_v27  ;;  %v23868_v6 = vld [vmem:[#allocation195_spill] sm:$0xff] }
 0x46f   :  { %13992 = vmatprep.subr.bf16.mxu0 %v23543_v30  ;;  %v7483_v2 = vand.u32 4294901760, %v20848_v56 }
 0x471   :  { %13329 = vmatpush3.bf16.msra.mxu1 %v23822_v11  ;;  %v23869_v11 = vld [vmem:[#allocation192_spill] sm:$0xff]  ;;  %v7484_v24 = vsub.f32 %v20848_v56, %v7483_v2 }
 0x472   :  { %13994 = vmatpush3.bf16.msra.mxu0 %v13993_v49  ;;  %13331 = vmatprep.subr.bf16.mxu1 %v23824_v21  ;;  %v20851_v49 = vsub.f32 %v23867_v27, %v7403_v26  ;;  %v7406_v21 = vand.u32 4294901760, %v23870_v22 }
 0x473   :  { %13995 = vmatprep.subr.bf16.mxu0 %v23543_v30 }
 0x474   :  { %6876 = vmatmul.mubr.f32.vlgmr.msra.gmra.mrb[48].mxu1 %v23701_v55  ;;  %v7490_v19 = vand.u32 4294901760, %v20851_v49 }
 0x475   :  { %12921 = vmatmul.mubr.msk.f32.vlgmr.msra.gmra.mrb[58].mxu0 %vm23825_vm11, %v23666_v10  ;;  %13333 = vmatpush3.bf16.msra.mxu1 %v23826_v35  ;;  %v23871_v35 = vld [vmem:[#allocation133_spill] sm:$0xff] }
 0x476   :  { %13997 = vmatpush3.bf16.msra.mxu0 %v20642_v39  ;;  %13335 = vmatprep.subr.bf16.mxu1 %v23828_v1  ;;  %v23831_v39 = vpack.c.bf16 %v23829_v43, %v23830_v38  ;;  %v7409_v50 = vand.u32 4294901760, %v23871_v35  ;;  %v20857_v1 = vsub.f32 %v23870_v22, %v7406_v21  ;;  %v23872_v38 = vld [vmem:[#allocation72_spill] sm:$0xff] }
 0x477   :  { %13998 = vmatprep.subr.bf16.mxu0 %v23543_v30  ;;  %7011 = vmatprep.mubr.f32.mxu1 %v22263_v9 }
 0x478   :  { %12935 = vmatprep.mubr.msk.f32.mxu0 %vm23561_vm10, %v22263_v9  ;;  %v20860_v43 = vsub.f32 %v23871_v35, %v7409_v50  ;;  %v23877_v35 = vld [vmem:[#allocation56_spill] sm:$0xff] }
 0x479   :  { %13337 = vmatpush3.bf16.msra.mxu1 %v23831_v39  ;;  %v20863_v39 = vpack.c.bf16 %v7403_v26, %v7400_v40  ;;  %v13495_v40 = vpack.c.bf16 %v7490_v19, %v7483_v2 }
 0x47a   :  { %14000 = vmatpush3.bf16.msra.mxu0 %v20656_v17  ;;  %13339 = vmatprep.subr.bf16.mxu1 %v23834_v47  ;;  %v11323_v17 = vpop.f32.mrb[38].mxu1  ;;  %v11575_v47 = vpop.f32.mrb[38].mxu0 }
 0x47b   :  { %14001 = vmatprep.subr.bf16.mxu0 %v23543_v30  ;;  %v11324_v59 = vpop.f32.mrb[39].mxu1 }
 0x47c   :  { %v11325_v46 = vadd.f32 %v11324_v59, %v11323_v17  ;;  %v11576_v17 = vpop.f32.mrb[39].mxu0  ;;  %v23874_v59 = vld [vmem:[#allocation145_spill] sm:$0xff] }
 0x47d   :  { %13341 = vmatpush3.bf16.msra.mxu1 %v23835_v58  ;;  %v23873_v58 = vld [vmem:[#allocation140_spill] sm:$0xff]  ;;  %v20870_v44 = vadd.f32 %v11576_v17, %v11575_v47  ;;  %v23882_v47 = vld [vmem:[#allocation59_spill] sm:$0xff]  ;;  %v23885_v17 = vld [vmem:[#allocation6_spill] sm:$0xff] }
 0x47e   :  { %14003 = vmatpush3.bf16.msra.mxu0 %v20676_v42  ;;  %13343 = vmatprep.subr.bf16.mxu1 %v23836_v31  ;;  %v23840_v42 = vpack.c.bf16 %v20009_v15, %v20004_v34  ;;  %v5751_v51 = vadd.f32 %v11325_v46, %v5643_v53  ;;  %v23848_v34 = vld [vmem:[#allocation54_spill] sm:$0xff]  ;;  %v23863_v53 = vld [vmem:[#allocation167_spill] sm:$0xff]  ;;  %v7412_v31 = vand.u32 4294901760, %v23873_v58  ;;  %v7415_v46 = vand.u32 4294901760, %v23874_v59 }
 0x47f   :  { %v23849_v15 = vpack.c.bf16 %v20167_v45, %v23848_v34  ;;  %v23857_v45 = vld [vmem:[#allocation94_spill] sm:$0xff]  ;;  %v7485_v34 = vand.u32 4294901760, %v7484_v24  ;;  %v23890_v24 = vld [vmem:[#allocation75_spill] sm:$0xff] }
 0x480   :  { %v20882_v16 = vsub.f32 %v23874_v59, %v7415_v46  ;;  %v20893_v32 = vpack.c.bf16 %v7415_v46, %v7412_v31  ;;  %v23886_v46 = vld [vmem:[#allocation7_spill] sm:$0xff] }
 0x481   :  { %12936 = vmatmul.mubr.msk.f32.vlgmr.msra.gmra.mrb[58].mxu0 %vm23837_vm5, %v23666_v10  ;;  %13345 = vmatpush3.bf16.msra.mxu1 %v23839_v13  ;;  %v20873_v13 = vpack.c.bf16 %v7409_v50, %v7406_v21  ;;  %v23878_v50 = vld [vmem:[#allocation40_spill] sm:$0xff] }
 0x482   :  { %13347 = vmatprep.subr.bf16.mxu1 %v23840_v42  ;;  %v20876_v42 = vsub.f32 %v23873_v58, %v7412_v31  ;;  %v7518_v14 = vand.u32 4294901760, %v20882_v16  ;;  %v23884_v31 = vld [vmem:[#allocation63_spill] sm:$0xff] }
 0x483   :  { %v13582_v59 = vpack.c.bf16 %v23885_v17, %v23884_v31 }
 0x485   :  { %13349 = vmatpush3.bf16.msra.mxu1 %v23841_v61  ;;  %v7504_v61 = vand.u32 4294901760, %v20860_v43 }
 0x486   :  { %13351 = vmatprep.subr.bf16.mxu1 %v23844_v57  ;;  %v7491_v57 = vsub.f32 %v20851_v49, %v7490_v19  ;;  %v23881_v19 = vld [vmem:[#allocation185_spill] sm:$0xff] }
 0x487   :  { %v11358_v48 = vpop.f32.mrb[40].mxu1  ;;  %v13580_v58 = vpack.c.bf16 %v23882_v47, %v23881_v19 }
 0x488   :  { %v11359_v63 = vpop.f32.mrb[41].mxu1 }
 0x489   :  { %13353 = vmatpush3.bf16.msra.mxu1 %v23846_v29  ;;  %v11360_v20 = vadd.f32 %v11359_v63, %v11358_v48 }
 0x48a   :  { %13355 = vmatprep.subr.bf16.mxu1 %v23847_v5  ;;  %v7505_v5 = vsub.f32 %v20860_v43, %v7504_v61 }
 0x48b   :  { %v5919_v37 = vadd.f32 %v11360_v20, %v5751_v51  ;;  %v7497_v51 = vand.u32 4294901760, %v20857_v1 }
 0x48d   :  { %13357 = vmatpush3.bf16.msra.mxu1 %v23849_v15  ;;  %v7498_v29 = vsub.f32 %v20857_v1, %v7497_v51  ;;  %v7492_v15 = vand.u32 4294901760, %v7491_v57  ;;  %v13498_v27 = vpack.c.bf16 %v7504_v61, %v7497_v51  ;;  %v23888_v51 = vld [vmem:[#allocation8_spill] sm:$0xff]  ;;  %v23889_v61 = vld [vmem:[#allocation13_spill] sm:$0xff] }
 0x48e   :  { %13359 = vmatprep.subr.bf16.mxu1 %v23850_v18  ;;  %v7511_v18 = vand.u32 4294901760, %v20876_v42  ;;  %v23891_v57 = vld [vmem:[#allocation16_spill] sm:$0xff] }
 0x490   :  { %v13501_v26 = vpack.c.bf16 %v7518_v14, %v7511_v18 }
 0x491   :  { %13361 = vmatpush3.bf16.msra.mxu1 %v23852_v33  ;;  %v7499_v33 = vand.u32 4294901760, %v7498_v29  ;;  %v23892_v29 = vld [vmem:[#allocation19_spill] sm:$0xff] }
 0x492   :  { %13395 = vmatprep.subr.bf16.mxu1 %v23853_v52  ;;  %v13468_v52 = vpack.c.bf16 %v7492_v15, %v7485_v34  ;;  %v23894_v15 = vld [vmem:[#allocation87_spill] sm:$0xff] }
 0x494   :  { %7014 = vmatmul.mubr.f32.vlgmr.msra.gmra.mrb[50].mxu1 %v22263_v9 }
 0x495   :  { %13397 = vmatpush3.bf16.msra.mxu1 %v23854_v12  ;;  %7288 = vmatprep.mubr.f32.mxu1 %v23701_v55  ;;  %v7506_v12 = vand.u32 4294901760, %v7505_v5  ;;  %v23893_v5 = vld [vmem:[#allocation82_spill] sm:$0xff] }
 0x496   :  { %13399 = vmatprep.subr.bf16.mxu1 %v23855_v3  ;;  %v7512_v3 = vsub.f32 %v20876_v42, %v7511_v18  ;;  %v13590_v34 = vpack.c.bf16 %v23893_v5, %v23892_v29  ;;  %v23895_v18 = vld [vmem:[#allocation21_spill] sm:$0xff] }
 0x497   :  { %v13471_v48 = vpack.c.bf16 %v7506_v12, %v7499_v33 }
 0x498   :  { %v7513_v63 = vand.u32 4294901760, %v7512_v3  ;;  %v23896_v3 = vld [vmem:[#allocation25_spill] sm:$0xff] }
 0x499   :  { %13401 = vmatpush3.bf16.msra.mxu1 %v23856_v7  ;;  %v7519_v7 = vsub.f32 %v20882_v16, %v7518_v14  ;;  %v13592_v14 = vpack.c.bf16 %v23895_v18, %v23894_v15 }
 0x49a   :  { %13403 = vmatprep.subr.bf16.mxu1 %v23857_v45 }
 0x49b   :  { %v7520_v20 = vand.u32 4294901760, %v7519_v7  ;;  %v23897_v7 = vld [vmem:[#allocation28_spill] sm:$0xff] }
 0x49d   :  { %13405 = vmatpush3.bf16.msra.mxu1 %v23858_v23 }
 0x49e   :  { %13407 = vmatprep.subr.bf16.mxu1 %v23859_v41 }
 0x4a1   :  { %13409 = vmatpush3.bf16.msra.mxu1 %v23860_v0 }
 0x4a2   :  { %13411 = vmatprep.subr.bf16.mxu1 %v23861_v54  ;;  %v13474_v54 = vpack.c.bf16 %v7520_v20, %v7513_v63  ;;  %v23900_v20 = vld [vmem:[#allocation12_spill] sm:$0xff] }
 0x4a5   :  { %13413 = vmatpush3.bf16.msra.mxu1 %v23862_v36  ;;  %v13477_v36 = vpack.c.bf16 %v20851_v49, %v20848_v56 }
 0x4a6   :  { %13415 = vmatprep.subr.bf16.mxu1 %v23863_v53  ;;  %v13480_v53 = vpack.c.bf16 %v20860_v43, %v20857_v1  ;;  %v13576_v1 = vpack.c.bf16 %v23878_v50, %v23877_v35 }
 0x4a9   :  { %13417 = vmatpush3.bf16.msra.mxu1 %v23864_v25  ;;  %v11645_v25 = vpop.f32.mrb[40].mxu0 }
 0x4aa   :  { %13419 = vmatprep.subr.bf16.mxu1 %v23865_v28  ;;  %v11646_v28 = vpop.f32.mrb[41].mxu0 }
 0x4ab   :  { %v11393_v45 = vpop.f32.mrb[42].mxu1  ;;  %v20929_v8 = vadd.f32 %v11646_v28, %v11645_v25  ;;  %v23904_v25 = vld [vmem:[#allocation110_spill] sm:$0xff] }
 0x4ac   :  { %v11394_v23 = vpop.f32.mrb[43].mxu1 }
 0x4ad   :  { %13421 = vmatpush3.bf16.msra.mxu1 %v23868_v6  ;;  %v11395_v41 = vadd.f32 %v11394_v23, %v11393_v45  ;;  %v11722_v6 = vpop.f32.mrb[42].mxu0  ;;  %v13594_v45 = vpack.c.bf16 %v23897_v7, %v23896_v3 }
 0x4ae   :  { %13423 = vmatprep.subr.bf16.mxu1 %v23869_v11  ;;  %v11723_v56 = vpop.f32.mrb[43].mxu0 }
 0x4af   :  { %v20913_v0 = vadd.f32 %v11395_v41, %v5919_v37  ;;  %v13483_v37 = vpack.c.bf16 %v20882_v16, %v20876_v42  ;;  %v11724_v49 = vadd.f32 %v11723_v56, %v11722_v6  ;;  %v11757_v11 = vpop.f32.mrb[44].mxu0  ;;  %v13586_v16 = vpack.c.bf16 %v23889_v61, %v23888_v51  ;;  %v23898_v41 = vld [vmem:[#allocation31_spill] sm:$0xff]  ;;  %v23907_v6 = vld [vmem:[#allocation114_spill] sm:$0xff] }
 0x4b0   :  { %v11758_v22 = vpop.f32.mrb[45].mxu0  ;;  %v23908_v56 = vld [vmem:[#allocation119_spill] sm:$0xff] }
 0x4b1   :  { %13425 = vmatpush3.bf16.msra.mxu1 %v23872_v38  ;;  %v11759_v21 = vadd.f32 %v11758_v22, %v11757_v11  ;;  %v23879_v38 = vld [vmem:[#allocation30_spill] sm:$0xff]  ;;  %v23910_v22 = vld [vmem:[#allocation55_spill] sm:$0xff] }
 0x4b2   :  { %13458 = vmatprep.subr.bf16.mxu1 %v23543_v30  ;;  %v23909_v11 = vld [vmem:[#allocation50_spill] sm:$0xff] }
 0x4b3   :  { %v20965_v43 = vadd.f32 %v11759_v21, %v11724_v49  ;;  %v13604_v49 = vpack.c.bf16 %v23908_v56, %v23907_v6  ;;  %v13606_v21 = vpack.c.bf16 %v23910_v22, %v23909_v11 }
 0x4b4   :  { %7290 = vmatmul.mubr.f32.vlgmr.msra.gmra.mrb[52].mxu1 %v23701_v55 }
 0x4b5   :  { %13460 = vmatpush3.bf16.msra.mxu1 %v20863_v39  ;;  %12680 = vmatprep.mubr.msk.f32.mxu1 %vm23561_vm10, %v22263_v9 }
 0x4b6   :  { %13461 = vmatprep.subr.bf16.mxu1 %v23543_v30 }
 0x4b9   :  { %13463 = vmatpush3.bf16.msra.mxu1 %v20873_v13 }
 0x4ba   :  { %13464 = vmatprep.subr.bf16.mxu1 %v23543_v30 }
 0x4bd   :  { %13466 = vmatpush3.bf16.msra.mxu1 %v20893_v32 }
 0x4be   :  { %13467 = vmatprep.subr.bf16.mxu1 %v23543_v30 }
 0x4c0   :  { %12681 = vmatmul.mubr.f32.vlgmr.msra.gmra.mrb[54].mxu1 %v23805_v62 }
 0x4c1   :  { %13469 = vmatpush3.bf16.msra.mxu1 %v13468_v52  ;;  %12695 = vmatprep.mubr.msk.f32.mxu1 %vm23561_vm10, %v22263_v9 }
 0x4c2   :  { %13470 = vmatprep.subr.bf16.mxu1 %v23543_v30 }
 0x4c5   :  { %13472 = vmatpush3.bf16.msra.mxu1 %v13471_v48  ;;  %v23899_v48 = vld [vmem:[#allocation99_spill] sm:$0xff] }
 0x4c6   :  { %13473 = vmatprep.subr.bf16.mxu1 %v23543_v30  ;;  %v13596_v63 = vpack.c.bf16 %v23899_v48, %v23898_v41 }
 0x4c9   :  { %13475 = vmatpush3.bf16.msra.mxu1 %v13474_v54 }
 0x4ca   :  { %13476 = vmatprep.subr.bf16.mxu1 %v23543_v30 }
 0x4cc   :  { %12696 = vmatmul.mubr.msk.f32.vlgmr.msra.gmra.mrb[54].mxu1 %vm23875_vm12, %v23666_v10 }
 0x4cd   :  { %13478 = vmatpush3.bf16.msra.mxu1 %v13477_v36  ;;  %12710 = vmatprep.mubr.msk.f32.mxu1 %vm23561_vm10, %v22263_v9  ;;  %v23901_v36 = vld [vmem:[#allocation101_spill] sm:$0xff] }
 0x4ce   :  { %13479 = vmatprep.subr.bf16.mxu1 %v23543_v30 }
 0x4d1   :  { %13481 = vmatpush3.bf16.msra.mxu1 %v13480_v53  ;;  %v23902_v53 = vld [vmem:[#allocation37_spill] sm:$0xff] }
 0x4d2   :  { %13482 = vmatprep.subr.bf16.mxu1 %v23543_v30 }
 0x4d5   :  { %13484 = vmatpush3.bf16.msra.mxu1 %v13483_v37  ;;  %v13598_v37 = vpack.c.bf16 %v23902_v53, %v23901_v36 }
 0x4d6   :  { %13485 = vmatprep.subr.bf16.mxu1 %v23543_v30 }
 0x4d8   :  { %12711 = vmatmul.mubr.f32.vlgmr.msra.gmra.mrb[54].mxu1 %v19933_v4 }
 0x4d9   :  { %13487 = vmatpush3.bf16.msra.mxu1 %v20863_v39  ;;  %12725 = vmatprep.mubr.msk.f32.mxu1 %vm23561_vm10, %v22263_v9 }
 0x4da   :  { %13488 = vmatprep.subr.bf16.mxu1 %v23543_v30 }
 0x4dd   :  { %13490 = vmatpush3.bf16.msra.mxu1 %v20873_v13 }
 0x4de   :  { %13491 = vmatprep.subr.bf16.mxu1 %v23543_v30 }
 0x4e1   :  { %13493 = vmatpush3.bf16.msra.mxu1 %v20893_v32 }
 0x4e2   :  { %13494 = vmatprep.subr.bf16.mxu1 %v23543_v30 }
 0x4e4   :  { %12726 = vmatmul.mubr.f32.vlgmr.msra.gmra.mrb[54].mxu1 %v23702_v60 }
 0x4e5   :  { %13496 = vmatpush3.bf16.msra.mxu1 %v13495_v40  ;;  %12740 = vmatprep.mubr.msk.f32.mxu1 %vm23561_vm10, %v22263_v9  ;;  %v23905_v40 = vld [vmem:[#allocation43_spill] sm:$0xff] }
 0x4e6   :  { %13497 = vmatprep.subr.bf16.mxu1 %v23543_v30 }
 0x4e9   :  { %13499 = vmatpush3.bf16.msra.mxu1 %v13498_v27  ;;  %v23906_v27 = vld [vmem:[#allocation45_spill] sm:$0xff] }
 0x4ea   :  { %13500 = vmatprep.subr.bf16.mxu1 %v23543_v30 }
 0x4ed   :  { %13502 = vmatpush3.bf16.msra.mxu1 %v13501_v26  ;;  %v13602_v26 = vpack.c.bf16 %v23906_v27, %v23905_v40 }
 0x4ee   :  { %13503 = vmatprep.subr.bf16.mxu1 %v23543_v30 }
 0x4f0   :  { %12741 = vmatmul.mubr.msk.f32.vlgmr.msra.gmra.mrb[54].mxu1 %vm23876_vm15, %v23666_v10 }
 0x4f1   :  { %13505 = vmatpush3.bf16.msra.mxu1 %v20863_v39  ;;  %12755 = vmatprep.mubr.msk.f32.mxu1 %vm23561_vm10, %v22263_v9  ;;  %v23880_v39 = vld [vmem:[#allocation32_spill] sm:$0xff] }
 0x4f2   :  { %13506 = vmatprep.subr.bf16.mxu1 %v23543_v30  ;;  %v13578_v2 = vpack.c.bf16 %v23880_v39, %v23879_v38 }
 0x4f5   :  { %13508 = vmatpush3.bf16.msra.mxu1 %v20873_v13  ;;  %v23887_v13 = vld [vmem:[#allocation65_spill] sm:$0xff] }
 0x4f6   :  { %13509 = vmatprep.subr.bf16.mxu1 %v23543_v30  ;;  %v13584_v42 = vpack.c.bf16 %v23887_v13, %v23886_v46 }
 0x4f9   :  { %13511 = vmatpush3.bf16.msra.mxu1 %v20893_v32  ;;  %v13588_v32 = vpack.c.bf16 %v23891_v57, %v23890_v24 }
 0x4fa   :  { %13577 = vmatprep.subr.bf16.mxu1 %v13576_v1  ;;  %v23911_v1 = vand.u32 4294901760, %v23877_v35  ;;  %v23917_v35 = vand.u32 4294901760, %v23884_v31  ;;  %v23923_v31 = vand.u32 4294901760, %v23890_v24  ;;  %v23929_v24 = vand.u32 4294901760, %v23896_v3 }
 0x4fb   :  { %v23936_v3 = vand.u32 4294901760, %v23904_v25 }
 0x4fc   :  { %12756 = vmatmul.mubr.msk.f32.vlgmr.msra.gmra.mrb[54].mxu1 %vm23883_vm13, %v23666_v10 }
 0x4fd   :  { %13579 = vmatpush3.bf16.msra.mxu1 %v13578_v2  ;;  %8384 = vmatprep.mubr.f32.mxu1 %v22263_v9  ;;  %v23912_v2 = vand.u32 4294901760, %v23878_v50  ;;  %v23918_v50 = vand.u32 4294901760, %v23885_v17  ;;  %v23924_v17 = vand.u32 4294901760, %v23891_v57  ;;  %v23930_v57 = vand.u32 4294901760, %v23897_v7 }
 0x4fe   :  { %13581 = vmatprep.subr.bf16.mxu1 %v13580_v58  ;;  %v23937_v7 = vand.u32 4294901760, %v23905_v40  ;;  %v23943_v40 = vand.u32 4294901760, %v23909_v11 }
 0x4ff   :  { %v13640_v58 = vpack.c.bf16 %v23912_v2, %v23911_v1 }
 0x501   :  { %13583 = vmatpush3.bf16.msra.mxu1 %v13582_v59  ;;  %v23913_v59 = vand.u32 4294901760, %v23879_v38  ;;  %v23919_v38 = vand.u32 4294901760, %v23886_v46  ;;  %v23926_v46 = vand.u32 4294901760, %v23893_v5  ;;  %v23932_v5 = vand.u32 4294901760, %v23899_v48 }
 0x502   :  { %13585 = vmatprep.subr.bf16.mxu1 %v13584_v42  ;;  %v23914_v42 = vand.u32 4294901760, %v23880_v39  ;;  %v23920_v39 = vand.u32 4294901760, %v23887_v13  ;;  %v23927_v13 = vand.u32 4294901760, %v23894_v15  ;;  %v23933_v15 = vand.u32 4294901760, %v23901_v36 }
 0x503   :  { %v23939_v48 = vand.u32 4294901760, %v23907_v6  ;;  %v23940_v36 = vand.u32 4294901760, %v23908_v56  ;;  %v23945_v56 = vld [vmem:[#allocation132_spill] sm:$0xff] }
 0x505   :  { %13587 = vmatpush3.bf16.msra.mxu1 %v13586_v16  ;;  %v13642_v16 = vpack.c.bf16 %v23914_v42, %v23913_v59  ;;  %v13668_v59 = vpack.c.bf16 %v23940_v36, %v23939_v48  ;;  %v23941_v42 = vld [vmem:[#allocation121_spill] sm:$0xff] }
 0x506   :  { %13589 = vmatprep.subr.bf16.mxu1 %v13588_v32  ;;  %v23915_v32 = vand.u32 4294901760, %v23881_v19  ;;  %v23921_v19 = vand.u32 4294901760, %v23888_v51  ;;  %v23928_v51 = vand.u32 4294901760, %v23895_v18  ;;  %v23934_v18 = vand.u32 4294901760, %v23902_v53  ;;  %v11827_v53 = vpop.f32.mrb[46].mxu0 }
 0x507   :  { %v6533_v33 = vpop.f32.mrb[44].mxu1 }
 0x508   :  { %v14030_v52 = vadd.f32 %v6533_v33, %v20913_v0  ;;  %v12667_v12 = vpop.f32.mrb[45].mxu1  ;;  %v23903_v0 = vld [vmem:[#allocation107_spill] sm:$0xff]  ;;  %v13646_v33 = vpack.c.bf16 %v23918_v50, %v23917_v35  ;;  %v8779_v50 = vand.u32 4294901760, %v23945_v56 }
 0x509   :  { %13591 = vmatpush3.bf16.msra.mxu1 %v13590_v34  ;;  %v13600_v28 = vpack.c.bf16 %v23904_v25, %v23903_v0  ;;  %v23916_v34 = vand.u32 4294901760, %v23882_v47  ;;  %v23922_v47 = vand.u32 4294901760, %v23889_v61  ;;  %v23935_v1 = vand.u32 4294901760, %v23903_v0 }
 0x50a   :  { %v10660_v23 = vrot.slane %v14030_v52, 6  ;;  %13593 = vmatprep.subr.bf16.mxu1 %v13592_v14  ;;  %v13648_v52 = vpack.c.bf16 %v23920_v39, %v23919_v38  ;;  %v21086_v39 = vsub.f32 %v23945_v56, %v8779_v50 }
 0x50b   :  { %v13644_v14 = vpack.c.bf16 %v23916_v34, %v23915_v32  ;;  %v13650_v12 = vpack.c.bf16 %v23922_v47, %v23921_v19  ;;  %v13664_v2 = vpack.c.bf16 %v23936_v3, %v23935_v1  ;;  %v23942_v32 = vld [vmem:[#allocation127_spill] sm:$0xff]  ;;  %v11828_v34 = vpop.f32.mrb[47].mxu0  ;;  %v23947_v47 = vld [vmem:[#allocation141_spill] sm:$0xff] }
 0x50c   :  { %v20993_v54 = vsel %vm10673_vm0, %v23900_v20, %v10660_v23  ;;  %v23925_v23 = vand.u32 4294901760, %v23892_v29  ;;  %v13656_v20 = vpack.c.bf16 %v23928_v51, %v23927_v13  ;;  %v23931_v29 = vand.u32 4294901760, %v23898_v41 }
 0x50d   :  { %13595 = vmatpush3.bf16.msra.mxu1 %v13594_v45  ;;  %v13652_v45 = vpack.c.bf16 %v23924_v17, %v23923_v31  ;;  %v23938_v41 = vand.u32 4294901760, %v23906_v27  ;;  %v8776_v0 = vand.u32 4294901760, %v23942_v32  ;;  %v21071_v25 = vadd.f32 %v11828_v34, %v11827_v53  ;;  %v23948_v31 = vld [vmem:[#allocation147_spill] sm:$0xff]  ;;  %v11897_v53 = vpop.f32.mrb[48].mxu0 }
 0x50e   :  { %13597 = vmatprep.subr.bf16.mxu1 %v13596_v63  ;;  %v13654_v63 = vpack.c.bf16 %v23926_v46, %v23925_v23  ;;  %v23944_v27 = vand.u32 4294901760, %v23910_v22  ;;  %v8788_v17 = vand.u32 4294901760, %v23948_v31  ;;  %v8870_v46 = vand.u32 4294901760, %v21086_v39 }
 0x50f   :  { %v21081_v6 = vsub.f32 %v23942_v32, %v8776_v0 }
 0x510   :  { %v21108_v13 = vsub.f32 %v23948_v31, %v8788_v17  ;;  %v23954_v31 = vld [vmem:[#allocation126_spill] sm:$0xff] }
 0x511   :  { %13599 = vmatpush3.bf16.msra.mxu1 %v13598_v37  ;;  %v8863_v19 = vand.u32 4294901760, %v21081_v6 }
 0x512   :  { %13601 = vmatprep.subr.bf16.mxu1 %v13600_v28 }
 0x515   :  { %13603 = vmatpush3.bf16.msra.mxu1 %v13602_v26  ;;  %v13658_v26 = vpack.c.bf16 %v23930_v57, %v23929_v24 }
 0x516   :  { %13605 = vmatprep.subr.bf16.mxu1 %v13604_v49  ;;  %v13660_v49 = vpack.c.bf16 %v23932_v5, %v23931_v29  ;;  %v8891_v5 = vand.u32 4294901760, %v21108_v13 }
 0x518   :  { %v8892_v1 = vsub.f32 %v21108_v13, %v8891_v5 }
 0x519   :  { %13607 = vmatpush3.bf16.msra.mxu1 %v13606_v21  ;;  %v13662_v21 = vpack.c.bf16 %v23934_v18, %v23933_v15 }
 0x51a   :  { %13641 = vmatprep.subr.bf16.mxu1 %v13640_v58  ;;  %v13666_v58 = vpack.c.bf16 %v23938_v41, %v23937_v7  ;;  %v8893_v48 = vand.u32 4294901760, %v8892_v1 }
 0x51c   :  { %8387 = vmatmul.mubr.f32.vlgmr.msra.gmra.mrb[56].mxu1 %v22263_v9 }
 0x51d   :  { %13643 = vmatpush3.bf16.msra.mxu1 %v13642_v16  ;;  %8661 = vmatprep.mubr.f32.mxu1 %v23701_v55  ;;  %v8773_v16 = vand.u32 4294901760, %v23941_v42 }
 0x51e   :  { %13645 = vmatprep.subr.bf16.mxu1 %v13644_v14  ;;  %v13670_v14 = vpack.c.bf16 %v23944_v27, %v23943_v40 }
 0x51f   :  { %v21078_v35 = vsub.f32 %v23941_v42, %v8773_v16  ;;  %v21091_v11 = vpack.c.bf16 %v8776_v0, %v8773_v16 }
 0x521   :  { %13647 = vmatpush3.bf16.msra.mxu1 %v13646_v33  ;;  %v23946_v33 = vld [vmem:[#allocation136_spill] sm:$0xff]  ;;  %v8856_v22 = vand.u32 4294901760, %v21078_v35 }
 0x522   :  { %13649 = vmatprep.subr.bf16.mxu1 %v13648_v52  ;;  %v8782_v38 = vand.u32 4294901760, %v23946_v33 }
 0x523   :  { %v8857_v51 = vsub.f32 %v21078_v35, %v8856_v22 }
 0x524   :  { %v21089_v52 = vsub.f32 %v23946_v33, %v8782_v38 }
 0x525   :  { %13651 = vmatpush3.bf16.msra.mxu1 %v13650_v12  ;;  %v8785_v12 = vand.u32 4294901760, %v23947_v47  ;;  %v8858_v57 = vand.u32 4294901760, %v8857_v51 }
 0x526   :  { %13653 = vmatprep.subr.bf16.mxu1 %v13652_v45  ;;  %v21099_v45 = vpack.c.bf16 %v8782_v38, %v8779_v50  ;;  %v13726_v42 = vpack.c.bf16 %v21089_v52, %v21086_v39 }
 0x527   :  { %v11470_v61 = vpop.f32.mrb[46].mxu1  ;;  %v21102_v23 = vsub.f32 %v23947_v47, %v8785_v12 }
 0x528   :  { %v11471_v37 = vpop.f32.mrb[47].mxu1 }
 0x529   :  { %v21043_v28 = vadd.f32 %v11471_v37, %v11470_v61  ;;  %13655 = vmatpush3.bf16.msra.mxu1 %v13654_v63  ;;  %v8877_v63 = vand.u32 4294901760, %v21089_v52  ;;  %v21119_v61 = vpack.c.bf16 %v8788_v17, %v8785_v12  ;;  %v8871_v37 = vsub.f32 %v21086_v39, %v8870_v46  ;;  %v23951_v12 = vld [vmem:[#allocation150_spill] sm:$0xff] }
 0x52a   :  { %13657 = vmatprep.subr.bf16.mxu1 %v13656_v20  ;;  %v8864_v20 = vsub.f32 %v21081_v6, %v8863_v19  ;;  %v8884_v29 = vand.u32 4294901760, %v21102_v23  ;;  %v13729_v32 = vpack.c.bf16 %v21108_v13, %v21102_v23  ;;  %v23957_v13 = vld [vmem:[#allocation176_spill] sm:$0xff] }
 0x52b   :  { %v8878_v24 = vsub.f32 %v21089_v52, %v8877_v63 }
 0x52d   :  { %13659 = vmatpush3.bf16.msra.mxu1 %v13658_v26  ;;  %v8865_v26 = vand.u32 4294901760, %v8864_v20  ;;  %v8879_v18 = vand.u32 4294901760, %v8878_v24  ;;  %v23958_v20 = vld [vmem:[#allocation182_spill] sm:$0xff] }
 0x52e   :  { %13661 = vmatprep.subr.bf16.mxu1 %v13660_v49  ;;  %v8872_v49 = vand.u32 4294901760, %v8871_v37 }
 0x52f   :  { %v13714_v15 = vpack.c.bf16 %v8865_v26, %v8858_v57  ;;  %v23961_v57 = vld [vmem:[#allocation204_spill] sm:$0xff] }
 0x530   :  { %v13717_v41 = vpack.c.bf16 %v8879_v18, %v8872_v49  ;;  %v23964_v49 = vld [vmem:[#allocation64_spill] sm:$0xff] }
 0x531   :  { %13663 = vmatpush3.bf16.msra.mxu1 %v13662_v21  ;;  %v8885_v21 = vsub.f32 %v21102_v23, %v8884_v29  ;;  %v23967_v18 = vld [vmem:[#allocation60_spill] sm:$0xff] }
 0x532   :  { %13665 = vmatprep.subr.bf16.mxu1 %v13664_v2 }
 0x535   :  { %13667 = vmatpush3.bf16.msra.mxu1 %v13666_v58  ;;  %v8886_v58 = vand.u32 4294901760, %v8885_v21 }
 0x536   :  { %13669 = vmatprep.subr.bf16.mxu1 %v13668_v59 }
 0x537   :  { %v13720_v59 = vpack.c.bf16 %v8893_v48, %v8886_v58 }
 0x539   :  { %13671 = vmatpush3.bf16.msra.mxu1 %v13670_v14  ;;  %v13744_v14 = vpack.c.bf16 %v8877_v63, %v8870_v46  ;;  %v23955_v63 = vld [vmem:[#allocation27_spill] sm:$0xff] }
 0x53a   :  { %13704 = vmatprep.subr.bf16.mxu1 %v23543_v30 }
 0x53c   :  { %8663 = vmatmul.mubr.f32.vlgmr.msra.gmra.mrb[58].mxu1 %v23701_v55 }
 0x53d   :  { %13706 = vmatpush3.bf16.msra.mxu1 %v21091_v11  ;;  %12770 = vmatprep.mubr.msk.f32.mxu1 %vm23561_vm10, %v22263_v9 }
 0x53e   :  { %13707 = vmatprep.subr.bf16.mxu1 %v23543_v30 }
 0x541   :  { %13709 = vmatpush3.bf16.msra.mxu1 %v21099_v45 }
 0x542   :  { %13710 = vmatprep.subr.bf16.mxu1 %v23543_v30 }
 0x545   :  { %13712 = vmatpush3.bf16.msra.mxu1 %v21119_v61 }
 0x546   :  { %13713 = vmatprep.subr.bf16.mxu1 %v23543_v30 }
 0x547   :  { %v11505_v3 = vpop.f32.mrb[48].mxu1 }
 0x548   :  { %v11506_v2 = vpop.f32.mrb[49].mxu1  ;;  %12771 = vmatmul.mubr.f32.vlgmr.msra.gmra.mrb[60].mxu1 %v23805_v62  ;;  %v13723_v62 = vpack.c.bf16 %v21081_v6, %v21078_v35  ;;  %v13747_v35 = vpack.c.bf16 %v8891_v5, %v8884_v29  ;;  %v23962_v29 = vld [vmem:[#allocation4_spill] sm:$0xff] }
 0x549   :  { %v11507_v7 = vadd.f32 %v11506_v2, %v11505_v3  ;;  %13715 = vmatpush3.bf16.msra.mxu1 %v13714_v15  ;;  %12785 = vmatprep.mubr.msk.f32.mxu1 %vm23561_vm10, %v22263_v9  ;;  %v23963_v5 = vld [vmem:[#allocation48_spill] sm:$0xff]  ;;  %v23965_v15 = vld [vmem:[#allocation79_spill] sm:$0xff] }
 0x54a   :  { %13716 = vmatprep.subr.bf16.mxu1 %v23543_v30 }
 0x54b   :  { %v6878_v36 = vadd.f32 %v11507_v7, %v21043_v28  ;;  %v11898_v28 = vpop.f32.mrb[49].mxu0 }
 0x54c   :  { %v21151_v16 = vadd.f32 %v11898_v28, %v11897_v53  ;;  %v11974_v6 = vpop.f32.mrb[50].mxu0 }
 0x54d   :  { %13718 = vmatpush3.bf16.msra.mxu1 %v13717_v41  ;;  %v11975_v50 = vpop.f32.mrb[51].mxu0 }
 0x54e   :  { %13719 = vmatprep.subr.bf16.mxu1 %v23543_v30  ;;  %v12009_v33 = vpop.f32.mrb[52].mxu0 }
 0x54f   :  { %v12010_v38 = vpop.f32.mrb[53].mxu0 }
 0x550   :  { %v12011_v39 = vadd.f32 %v12010_v38, %v12009_v33  ;;  %v12044_v52 = vpop.f32.mrb[54].mxu0 }
 0x551   :  { %13721 = vmatpush3.bf16.msra.mxu1 %v13720_v59 }
 0x552   :  { %13722 = vmatprep.subr.bf16.mxu1 %v23543_v30 }
 0x554   :  { %12786 = vmatmul.mubr.msk.f32.vlgmr.msra.gmra.mrb[60].mxu1 %vm23949_vm7, %v23666_v10 }
 0x555   :  { %13724 = vmatpush3.bf16.msra.mxu1 %v13723_v62  ;;  %12800 = vmatprep.mubr.msk.f32.mxu1 %vm23561_vm10, %v22263_v9 }
 0x556   :  { %13725 = vmatprep.subr.bf16.mxu1 %v23543_v30 }
 0x559   :  { %13727 = vmatpush3.bf16.msra.mxu1 %v13726_v42 }
 0x55a   :  { %13728 = vmatprep.subr.bf16.mxu1 %v23543_v30 }
 0x55d   :  { %13730 = vmatpush3.bf16.msra.mxu1 %v13729_v32 }
 0x55e   :  { %13731 = vmatprep.subr.bf16.mxu1 %v23543_v30 }
 0x560   :  { %12801 = vmatmul.mubr.f32.vlgmr.msra.gmra.mrb[60].mxu1 %v19933_v4  ;;  %v13741_v4 = vpack.c.bf16 %v8863_v19, %v8856_v22 }
 0x561   :  { %13733 = vmatpush3.bf16.msra.mxu1 %v21091_v11  ;;  %12815 = vmatprep.mubr.msk.f32.mxu1 %vm23561_vm10, %v22263_v9 }
 0x562   :  { %13734 = vmatprep.subr.bf16.mxu1 %v23543_v30 }
 0x565   :  { %13736 = vmatpush3.bf16.msra.mxu1 %v21099_v45 }
 0x566   :  { %13737 = vmatprep.subr.bf16.mxu1 %v23543_v30 }
 0x567   :  { %v11540_v0 = vpop.f32.mrb[50].mxu1 }
 0x568   :  { %v11541_v34 = vpop.f32.mrb[51].mxu1 }
 0x569   :  { %v11542_v40 = vadd.f32 %v11541_v34, %v11540_v0  ;;  %13739 = vmatpush3.bf16.msra.mxu1 %v21119_v61 }
 0x56a   :  { %13740 = vmatprep.subr.bf16.mxu1 %v23543_v30 }
 0x56b   :  { %v7016_v27 = vadd.f32 %v11542_v40, %v6878_v36 }
 0x56c   :  { %12816 = vmatmul.mubr.f32.vlgmr.msra.gmra.mrb[60].mxu1 %v23702_v60  ;;  %v11976_v60 = vadd.f32 %v11975_v50, %v11974_v6 }
 0x56d   :  { %13742 = vmatpush3.bf16.msra.mxu1 %v13741_v4  ;;  %12830 = vmatprep.mubr.msk.f32.mxu1 %vm23561_vm10, %v22263_v9  ;;  %v7124_v56 = vadd.f32 %v20870_v44, %v7016_v27  ;;  %v12045_v44 = vpop.f32.mrb[55].mxu0 }
 0x56e   :  { %13743 = vmatprep.subr.bf16.mxu1 %v23543_v30  ;;  %v9624_v22 = vadd.f32 %v12011_v39, %v11976_v60  ;;  %v12046_v19 = vadd.f32 %v12045_v44, %v12044_v52  ;;  %v12114_v37 = vpop.f32.mrb[56].mxu0 }
 0x56f   :  { %v12115_v24 = vpop.f32.mrb[57].mxu0 }
 0x570   :  { %v21187_v47 = vadd.f32 %v12046_v19, %v9624_v22  ;;  %v12116_v26 = vadd.f32 %v12115_v24, %v12114_v37  ;;  %v10652_v41 = vpop.f32.mrb[58].mxu0 }
 0x571   :  { %13745 = vmatpush3.bf16.msra.mxu1 %v13744_v14  ;;  %v12937_v58 = vpop.f32.mrb[59].mxu0 }
 0x572   :  { %13746 = vmatprep.subr.bf16.mxu1 %v23543_v30 }
 0x575   :  { %13748 = vmatpush3.bf16.msra.mxu1 %v13747_v35 }
 0x576   :  { %13749 = vmatprep.subr.bf16.mxu1 %v23543_v30 }
 0x578   :  { %12831 = vmatmul.mubr.msk.f32.vlgmr.msra.gmra.mrb[60].mxu1 %vm23950_vm3, %v23666_v10 }
 0x579   :  { %13751 = vmatpush3.bf16.msra.mxu1 %v21091_v11  ;;  %12845 = vmatprep.mubr.msk.f32.mxu1 %vm23561_vm10, %v22263_v9  ;;  %v23953_v11 = vld [vmem:[#allocation11_spill] sm:$0xff]  ;;  %vm10677_vm10 = vcmask 1043456  }
 0x57a   :  { %13752 = vmatprep.subr.bf16.mxu1 %v23543_v30 }
 0x57d   :  { %13754 = vmatpush3.bf16.msra.mxu1 %v21099_v45  ;;  %v23956_v45 = vld [vmem:[#allocation172_spill] sm:$0xff] }
 0x57e   :  { %13755 = vmatprep.subr.bf16.mxu1 %v23543_v30 }
 0x581   :  { %13757 = vmatpush3.bf16.msra.mxu1 %v21119_v61  ;;  %v23960_v61 = vld [vmem:[#allocation38_spill] sm:$0xff] }
 0x582   :  { %13855 = vmatprep.subr.bf16.mxu1 %v23951_v12 }
 0x584   :  { %12846 = vmatmul.mubr.msk.f32.vlgmr.msra.gmra.mrb[60].mxu1 %vm23952_vm2, %v23666_v10  ;;  %v23959_v10 = vld [vmem:[#allocation10_spill] sm:$0xff] }
 0x585   :  { %13857 = vmatpush3.bf16.msra.mxu1 %v23953_v11  ;;  %9864 = vmatprep.mubr.f32.mxu1 %v22263_v9 }
 0x586   :  { %13859 = vmatprep.subr.bf16.mxu1 %v23954_v31 }
 0x587   :  { %v11610_v17 = vpop.f32.mrb[52].mxu1 }
 0x588   :  { %v11611_v23 = vpop.f32.mrb[53].mxu1 }
 0x589   :  { %v11612_v46 = vadd.f32 %v11611_v23, %v11610_v17  ;;  %13861 = vmatpush3.bf16.msra.mxu1 %v23955_v63 }
 0x58a   :  { %13863 = vmatprep.subr.bf16.mxu1 %v23956_v45 }
 0x58b   :  { %v7292_v30 = vadd.f32 %v11612_v46, %v7124_v56 }
 0x58d   :  { %13865 = vmatpush3.bf16.msra.mxu1 %v23957_v13  ;;  %v7396_v51 = vadd.f32 %v20929_v8, %v7292_v30  ;;  %v23966_v8 = vld [vmem:[#allocation106_spill] sm:$0xff] }
 0x58e   :  { %13867 = vmatprep.subr.bf16.mxu1 %v23958_v20 }
 0x591   :  { %13869 = vmatpush3.bf16.msra.mxu1 %v23959_v10 }
 0x592   :  { %13871 = vmatprep.subr.bf16.mxu1 %v23960_v61 }
 0x595   :  { %13873 = vmatpush3.bf16.msra.mxu1 %v23961_v57 }
 0x596   :  { %13875 = vmatprep.subr.bf16.mxu1 %v23962_v29 }
 0x599   :  { %13877 = vmatpush3.bf16.msra.mxu1 %v23963_v5 }
 0x59a   :  { %13879 = vmatprep.subr.bf16.mxu1 %v23964_v49 }
 0x59d   :  { %13881 = vmatpush3.bf16.msra.mxu1 %v23965_v15 }
 0x59e   :  { %13883 = vmatprep.subr.bf16.mxu1 %v23966_v8 }
 0x5a1   :  { %13885 = vmatpush3.bf16.msra.mxu1 %v23967_v18 }
 0x5a2   :  { %13919 = vmatprep.subr.bf16.mxu1 %v23951_v12 }
 0x5a4   :  { %9868 = vmatmul.mubr.f32.vlgmr.msra.gmra.mrb[62].mxu1 %v22263_v9  ;;  %v10681_v9 = vld [vmem:[%s21250_s2] sm:$0x3f] }
 0x5a5   :  { %13921 = vmatpush3.bf16.msra.mxu1 %v23953_v11  ;;  %10138 = vmatprep.mubr.f32.mxu1 %v23701_v55 }
 0x5a6   :  { %13923 = vmatprep.subr.bf16.mxu1 %v23954_v31 }
 0x5a9   :  { %13925 = vmatpush3.bf16.msra.mxu1 %v23955_v63 }
 0x5aa   :  { %13927 = vmatprep.subr.bf16.mxu1 %v23956_v45 }
 0x5ad   :  { %13929 = vmatpush3.bf16.msra.mxu1 %v23957_v13 }
 0x5ae   :  { %13931 = vmatprep.subr.bf16.mxu1 %v23958_v20 }
 0x5b1   :  { %13933 = vmatpush3.bf16.msra.mxu1 %v23959_v10 }
 0x5b2   :  { %13935 = vmatprep.subr.bf16.mxu1 %v23960_v61 }
 0x5b5   :  { %13937 = vmatpush3.bf16.msra.mxu1 %v23961_v57 }
 0x5b6   :  { %13939 = vmatprep.subr.bf16.mxu1 %v23962_v29 }
 0x5b9   :  { %13941 = vmatpush3.bf16.msra.mxu1 %v23963_v5 }
 0x5ba   :  { %13943 = vmatprep.subr.bf16.mxu1 %v23964_v49 }
 0x5bd   :  { %13945 = vmatpush3.bf16.msra.mxu1 %v23965_v15 }
 0x5be   :  { %13947 = vmatprep.subr.bf16.mxu1 %v23966_v8 }
 0x5c1   :  { %13949 = vmatpush3.bf16.msra.mxu1 %v23967_v18 }
 0x5c4   :  { %10140 = vmatmul.mubr.f32.vlgmr.msra.gmra.mrb[64].mxu1 %v23701_v55 }
 0x5cf   :  { %v7906_v21 = vpop.f32.mrb[54].mxu1 }
 0x5d0   :  { %v14031_v1 = vadd.f32 %v7906_v21, %v7396_v51  ;;  %v12757_v3 = vpop.f32.mrb[55].mxu1 }
 0x5d2   :  { %v10663_v2 = vrot.slane %v14031_v1, 5 }
 0x5d4   :  { %v10676_v7 = vsel %vm10675_vm8, %v20993_v54, %v10663_v2 }
 0x5ef   :  { %v11792_v48 = vpop.f32.mrb[56].mxu1 }
 0x5f0   :  { %v11793_v36 = vpop.f32.mrb[57].mxu1 }
 0x5f1   :  { %v11794_v59 = vadd.f32 %v11793_v36, %v11792_v48 }
 0x5f3   :  { %v8389_v62 = vadd.f32 %v11794_v59, %v20965_v43 }
 0x5f5   :  { %v8497_v53 = vadd.f32 %v21071_v25, %v8389_v62 }
 0x60f   :  { %v11862_v42 = vpop.f32.mrb[58].mxu1 }
 0x610   :  { %v11863_v28 = vpop.f32.mrb[59].mxu1 }
 0x611   :  { %v11864_v32 = vadd.f32 %v11863_v28, %v11862_v42 }
 0x613   :  { %v8665_v55 = vadd.f32 %v11864_v32, %v8497_v53 }
 0x615   :  { %v8769_v0 = vadd.f32 %v21151_v16, %v8665_v55 }
 0x657   :  { %v9279_v54 = vpop.f32.mrb[60].mxu1 }
 0x658   :  { %v14032_v34 = vadd.f32 %v9279_v54, %v8769_v0  ;;  %v12847_v40 = vpop.f32.mrb[61].mxu1 }
 0x65a   :  { %v10666_v43 = vrot.slane %v14032_v34, 4 }
 0x65c   :  { %v10678_v4 = vsel %vm10677_vm10, %v10676_v7, %v10666_v43 }
 0x677   :  { %v12079_v25 = vpop.f32.mrb[62].mxu1 }
 0x678   :  { %v12080_v27 = vpop.f32.mrb[63].mxu1 }
 0x679   :  { %v12081_v14 = vadd.f32 %v12080_v27, %v12079_v25 }
 0x67b   :  { %v9870_v56 = vadd.f32 %v12081_v14, %v21187_v47 }
 0x67d   :  { %v10038_v35 = vadd.f32 %v12116_v26, %v9870_v56 }
 0x697   :  { %v12149_v16 = vpop.f32.mrb[64].mxu1 }
 0x698   :  { %v12150_v6 = vpop.f32.mrb[65].mxu1 }
 0x699   :  { %v12151_v50 = vadd.f32 %v12150_v6, %v12149_v16 }
 0x69b   :  { %v10142_v60 = vadd.f32 %v12151_v50, %v10038_v35 }
 0x69d   :  { %v14033_v33 = vadd.f32 %v10652_v41, %v10142_v60 }
 0x69f   :  { %v10669_v38 = vrot.slane %v14033_v33, 3 }
 0x6a1   :  { %v10680_v39 = vsel %vm10679_vm14, %v10678_v4, %v10669_v38 }
 0x6a2   :  { %v10682_v52 = vadd.f32 %v10681_v9, %v10680_v39 }
 0x6a4   :  { %10684 = vst.msk [vmem:[%s21250_s2] sm:$0x3f] %vm59_vm4, %v10682_v52 }

</bundles_post_ra>
